<compile_context>
chip_gen: v7x
topology: tpu7x:2x2x1
jax: 0.10.0
libtpu: 0.0.40
codegen_flags: <defaults>
</compile_context>

<pallas_src>
import jax
import jax.numpy as jnp
import numpy as np
from jax import lax
from jax.experimental import pallas as pl
from jax.experimental.pallas import tpu as pltpu

CIN, COUT, KH, KW = 2048, 512, 3, 3


def conv_pool_kernel(x_ref, w_ref, o_ref, acc_ref, col_ref):
    # x_ref:  (3, N, H+2, W, Tk) bf16   W-pre-shifted, H zero-padded activation tile
    # w_ref:  (3, 3, Tk, Ct)     bf16   weight tile (HWIO)
    # o_ref:  (N, Ho*Wo, Ct)     f32    pooled output tile
    # acc_ref:(N*H*W, Ct)        f32    conv accumulator (persists across Cin tiles)
    # col_ref:(N*H*W, 9*Tk)      bf16   im2col scratch (rebuilt every Cin tile)
    k = pl.program_id(1)
    _, N, Hp, W, Tk = x_ref.shape
    H = Hp - 2
    M = N * H * W
    Ct = o_ref.shape[-1]
    Ho, Wo = H // 2, W // 2

    @pl.when(k == 0)
    def _():
        acc_ref[...] = jnp.zeros_like(acc_ref)

    # Build the (M, 9*Tk) im2col block. The W shift was materialized in the wrapper,
    # so these slices touch outer dims only (no sublane relayout), and the
    # (N, H, W) -> M merge is layout-preserving because W is a multiple of 8.
    for dw in range(KW):
        slab = x_ref[dw]                                   # (N, Hp, W, Tk)
        for dh in range(KH):
            j = dh * KW + dw
            col_ref[:, j * Tk:(j + 1) * Tk] = slab[:, dh:dh + H].reshape(M, Tk)

    # One MXU matmul per Cin tile: (M, 9*Tk) @ (9*Tk, Ct), f32 accumulation.
    w_flat = w_ref[...].reshape(KH * KW * Tk, Ct)          # (dh, dw, c) K-order
    acc_ref[...] += jnp.dot(col_ref[...], w_flat,
                            preferred_element_type=jnp.float32)

    # Fused 2x2 average pool on the final Cin tile.
    @pl.when(k == pl.num_programs(1) - 1)
    def _():
        y = acc_ref[...].reshape(N, H, W, Ct)
        yh = y.reshape(N, Ho, 2, W, Ct)
        ysum = yh[:, :, 0] + yh[:, :, 1]                   # pool H pairs -> (N, Ho, W, Ct)
        yw = ysum.reshape(N, Ho, Wo, 2, Ct)
        pooled = (yw[:, :, :, 0] + yw[:, :, :, 1]) * 0.25  # pool W pairs -> (N, Ho, Wo, Ct)
        o_ref[...] = pooled.reshape(N, Ho * Wo, Ct).astype(o_ref.dtype)


def converter2_forward(x_nhwc, w_hwio, *, tk=1024, ct=256):
    N, H, W, cin = x_nhwc.shape
    kh, kw, cin2, cout = w_hwio.shape
    assert (kh, kw) == (KH, KW) and cin2 == cin
    assert cin % tk == 0 and cout % ct == 0
    assert H % 2 == 0 and W % 2 == 0 and W % 8 == 0   # sublane-aligned spatial merge
    Hp = H + 2
    Ho, Wo = H // 2, W // 2

    # bf16 at the boundary; f32 accumulation stays inside the kernel.
    xb = x_nhwc.astype(jnp.bfloat16)
    wb = w_hwio.astype(jnp.bfloat16)

    # Zero-pad the spatial border, then materialize the three W shifts once so the
    # kernel never slices the sublane (W) dimension.  Activations are tiny vs weights.
    x_pad = jnp.pad(xb, ((0, 0), (1, 1), (1, 1), (0, 0)))
    x_shift = jnp.stack([x_pad[:, :, dw:dw + W, :] for dw in range(KW)], axis=0)
    # x_shift: (3, N, H+2, W, Cin)

    out = pl.pallas_call(
        conv_pool_kernel,
        out_shape=jax.ShapeDtypeStruct((N, Ho * Wo, cout), jnp.float32),
        grid_spec=pltpu.PrefetchScalarGridSpec(
            num_scalar_prefetch=0,
            grid=(cout // ct, cin // tk),          # (Cout tile, Cin tile); reduction last
            in_specs=[
                pl.BlockSpec((KW, N, Hp, W, tk), lambda j, k: (0, 0, 0, 0, k)),
                pl.BlockSpec((KH, KW, tk, ct), lambda j, k: (0, 0, k, j)),
            ],
            out_specs=pl.BlockSpec((N, Ho * Wo, ct), lambda j, k: (0, 0, j)),
            scratch_shapes=[
                pltpu.VMEM((N * H * W, ct), jnp.float32),
                pltpu.VMEM((N * H * W, KH * KW * tk), jnp.bfloat16),
            ],
        ),
        compiler_params=pltpu.CompilerParams(
            dimension_semantics=("parallel", "arbitrary"),
            vmem_limit_bytes=32 * 1024 * 1024),
    )(x_shift, wb)
    return out.reshape(N, Ho, Wo, cout)


def reference_forward(x_nhwc, w_hwio):
    # Reference uses the same bf16-rounded inputs with exact f32 accumulation,
    # so the comparison isolates kernel correctness rather than bf16 rounding.
    xb = x_nhwc.astype(jnp.bfloat16).astype(jnp.float32)
    wb = w_hwio.astype(jnp.bfloat16).astype(jnp.float32)
    y = lax.conv_general_dilated(
        xb, wb, window_strides=(1, 1), padding=((1, 1), (1, 1)),
        dimension_numbers=("NHWC", "HWIO", "NHWC"),
        precision=lax.Precision.HIGHEST)
    N, H, W, C = y.shape
    return y.reshape(N, H // 2, 2, W // 2, 2, C).mean(axis=(2, 4))


if __name__ == "__main__":
    key = jax.random.PRNGKey(0)
    kx, kw = jax.random.split(key)

    # Small spatial / batch; channel counts fixed by the module (2048 -> 512).
    N, H, W = 2, 8, 8
    x_nchw = jax.random.normal(kx, (N, CIN, H, W), dtype=jnp.float32)
    x_nhwc = jnp.transpose(x_nchw, (0, 2, 3, 1))

    # kaiming_normal_(mode='fan_out', nonlinearity='relu'): std = sqrt(2 / (Cout*Kh*Kw))
    std = float(np.sqrt(2.0 / (COUT * KH * KW)))
    w_hwio = std * jax.random.normal(kw, (KH, KW, CIN, COUT), dtype=jnp.float32)

    out = jax.block_until_ready(converter2_forward(x_nhwc, w_hwio))
    ref = jax.block_until_ready(reference_forward(x_nhwc, w_hwio))
    np.testing.assert_allclose(np.asarray(out), np.asarray(ref), rtol=5e-3, atol=5e-3)

    print("KERNEL_OK")
</pallas_src>

<mosaic_0001>
module attributes {stable_mosaic.version = 11 : i64} {
  func.func @conv_pool_kernel(%arg0: i32, %arg1: i32, %arg2: memref<3x2x10x8x1024xbf16, #tpu.memory_space<vmem>>, %arg3: memref<3x3x1024x256xbf16, #tpu.memory_space<vmem>>, %arg4: memref<2x16x256xf32, #tpu.memory_space<vmem>>, %arg5: memref<128x256xf32, #tpu.memory_space<vmem>>, %arg6: memref<128x9216xbf16, #tpu.memory_space<vmem>>) attributes {dimension_semantics = [#tpu.dimension_semantics<parallel>, #tpu.dimension_semantics<arbitrary>], iteration_bounds = array<i64: 2, 2>, scalar_prefetch = 0 : i64, scratch_operands = 2 : i64, tpu.core_type = #tpu.core_type<tc>, window_params = [{transform_indices = @transform_0, window_bounds = array<i64: 3, 2, 10, 8, 1024>}, {transform_indices = @transform_1, window_bounds = array<i64: 3, 3, 1024, 256>}, {transform_indices = @transform_2, window_bounds = array<i64: 2, 16, 256>}]} {
    %c0_i32 = arith.constant 0 : i32
    %0 = arith.cmpi eq, %arg1, %c0_i32 : i32
    %1 = arith.extui %0 : i1 to i32
    %c0_i32_0 = arith.constant 0 : i32
    %2 = arith.cmpi ne, %1, %c0_i32_0 : i32
    scf.if %2 {
      %cst_34 = arith.constant 0.000000e+00 : f32
      %46 = vector.broadcast %cst_34 : f32 to vector<128x256xf32>
      %c0_35 = arith.constant 0 : index
      %c0_36 = arith.constant 0 : index
      %47 = vector.load %arg5[%c0_35, %c0_36] : memref<128x256xf32, #tpu.memory_space<vmem>>, vector<128x256xf32>
      tpu.vector_store %arg5[%c0_35, %c0_36], %46 {strides = array<i32>} : memref<128x256xf32, #tpu.memory_space<vmem>>, vector<128x256xf32>,
    } else {
    }
    %c0 = arith.constant 0 : index
    %c0_1 = arith.constant 0 : index
    %c0_2 = arith.constant 0 : index
    %c0_3 = arith.constant 0 : index
    %c0_4 = arith.constant 0 : index
    %3 = vector.load %arg2[%c0, %c0_1, %c0_2, %c0_3, %c0_4] : memref<3x2x10x8x1024xbf16, #tpu.memory_space<vmem>>, vector<1x2x10x8x1024xbf16>
    %4 = vector.shape_cast %3 : vector<1x2x10x8x1024xbf16> to vector<2x10x8x1024xbf16>
    %5 = vector.extract_strided_slice %4 {offsets = [0, 0, 0, 0], sizes = [2, 8, 8, 1024], strides = [1, 1, 1, 1]} : vector<2x10x8x1024xbf16> to vector<2x8x8x1024xbf16>
    %6 = vector.shape_cast %5 : vector<2x8x8x1024xbf16> to vector<128x1024xbf16>
    %c0_5 = arith.constant 0 : index
    %c0_6 = arith.constant 0 : index
    %7 = vector.load %arg6[%c0_5, %c0_6] : memref<128x9216xbf16, #tpu.memory_space<vmem>>, vector<128x1024xbf16>
    tpu.vector_store %arg6[%c0_5, %c0_6], %6 {strides = array<i32>} : memref<128x9216xbf16, #tpu.memory_space<vmem>>, vector<128x1024xbf16>,
    %8 = vector.extract_strided_slice %4 {offsets = [0, 1, 0, 0], sizes = [2, 8, 8, 1024], strides = [1, 1, 1, 1]} : vector<2x10x8x1024xbf16> to vector<2x8x8x1024xbf16>
    %9 = vector.shape_cast %8 : vector<2x8x8x1024xbf16> to vector<128x1024xbf16>
    %c0_7 = arith.constant 0 : index
    %c3072 = arith.constant 3072 : index
    %10 = vector.load %arg6[%c0_7, %c3072] : memref<128x9216xbf16, #tpu.memory_space<vmem>>, vector<128x1024xbf16>
    tpu.vector_store %arg6[%c0_7, %c3072], %9 {strides = array<i32>} : memref<128x9216xbf16, #tpu.memory_space<vmem>>, vector<128x1024xbf16>,
    %11 = vector.extract_strided_slice %4 {offsets = [0, 2, 0, 0], sizes = [2, 8, 8, 1024], strides = [1, 1, 1, 1]} : vector<2x10x8x1024xbf16> to vector<2x8x8x1024xbf16>
    %12 = vector.shape_cast %11 : vector<2x8x8x1024xbf16> to vector<128x1024xbf16>
    %c0_8 = arith.constant 0 : index
    %c6144 = arith.constant 6144 : index
    %13 = vector.load %arg6[%c0_8, %c6144] : memref<128x9216xbf16, #tpu.memory_space<vmem>>, vector<128x1024xbf16>
    tpu.vector_store %arg6[%c0_8, %c6144], %12 {strides = array<i32>} : memref<128x9216xbf16, #tpu.memory_space<vmem>>, vector<128x1024xbf16>,
    %c1 = arith.constant 1 : index
    %c0_9 = arith.constant 0 : index
    %c0_10 = arith.constant 0 : index
    %c0_11 = arith.constant 0 : index
    %c0_12 = arith.constant 0 : index
    %14 = vector.load %arg2[%c1, %c0_9, %c0_10, %c0_11, %c0_12] : memref<3x2x10x8x1024xbf16, #tpu.memory_space<vmem>>, vector<1x2x10x8x1024xbf16>
    %15 = vector.shape_cast %14 : vector<1x2x10x8x1024xbf16> to vector<2x10x8x1024xbf16>
    %16 = vector.extract_strided_slice %15 {offsets = [0, 0, 0, 0], sizes = [2, 8, 8, 1024], strides = [1, 1, 1, 1]} : vector<2x10x8x1024xbf16> to vector<2x8x8x1024xbf16>
    %17 = vector.shape_cast %16 : vector<2x8x8x1024xbf16> to vector<128x1024xbf16>
    %c0_13 = arith.constant 0 : index
    %c1024 = arith.constant 1024 : index
    %18 = vector.load %arg6[%c0_13, %c1024] : memref<128x9216xbf16, #tpu.memory_space<vmem>>, vector<128x1024xbf16>
    tpu.vector_store %arg6[%c0_13, %c1024], %17 {strides = array<i32>} : memref<128x9216xbf16, #tpu.memory_space<vmem>>, vector<128x1024xbf16>,
    %19 = vector.extract_strided_slice %15 {offsets = [0, 1, 0, 0], sizes = [2, 8, 8, 1024], strides = [1, 1, 1, 1]} : vector<2x10x8x1024xbf16> to vector<2x8x8x1024xbf16>
    %20 = vector.shape_cast %19 : vector<2x8x8x1024xbf16> to vector<128x1024xbf16>
    %c0_14 = arith.constant 0 : index
    %c4096 = arith.constant 4096 : index
    %21 = vector.load %arg6[%c0_14, %c4096] : memref<128x9216xbf16, #tpu.memory_space<vmem>>, vector<128x1024xbf16>
    tpu.vector_store %arg6[%c0_14, %c4096], %20 {strides = array<i32>} : memref<128x9216xbf16, #tpu.memory_space<vmem>>, vector<128x1024xbf16>,
    %22 = vector.extract_strided_slice %15 {offsets = [0, 2, 0, 0], sizes = [2, 8, 8, 1024], strides = [1, 1, 1, 1]} : vector<2x10x8x1024xbf16> to vector<2x8x8x1024xbf16>
    %23 = vector.shape_cast %22 : vector<2x8x8x1024xbf16> to vector<128x1024xbf16>
    %c0_15 = arith.constant 0 : index
    %c7168 = arith.constant 7168 : index
    %24 = vector.load %arg6[%c0_15, %c7168] : memref<128x9216xbf16, #tpu.memory_space<vmem>>, vector<128x1024xbf16>
    tpu.vector_store %arg6[%c0_15, %c7168], %23 {strides = array<i32>} : memref<128x9216xbf16, #tpu.memory_space<vmem>>, vector<128x1024xbf16>,
    %c2 = arith.constant 2 : index
    %c0_16 = arith.constant 0 : index
    %c0_17 = arith.constant 0 : index
    %c0_18 = arith.constant 0 : index
    %c0_19 = arith.constant 0 : index
    %25 = vector.load %arg2[%c2, %c0_16, %c0_17, %c0_18, %c0_19] : memref<3x2x10x8x1024xbf16, #tpu.memory_space<vmem>>, vector<1x2x10x8x1024xbf16>
    %26 = vector.shape_cast %25 : vector<1x2x10x8x1024xbf16> to vector<2x10x8x1024xbf16>
    %27 = vector.extract_strided_slice %26 {offsets = [0, 0, 0, 0], sizes = [2, 8, 8, 1024], strides = [1, 1, 1, 1]} : vector<2x10x8x1024xbf16> to vector<2x8x8x1024xbf16>
    %28 = vector.shape_cast %27 : vector<2x8x8x1024xbf16> to vector<128x1024xbf16>
    %c0_20 = arith.constant 0 : index
    %c2048 = arith.constant 2048 : index
    %29 = vector.load %arg6[%c0_20, %c2048] : memref<128x9216xbf16, #tpu.memory_space<vmem>>, vector<128x1024xbf16>
    tpu.vector_store %arg6[%c0_20, %c2048], %28 {strides = array<i32>} : memref<128x9216xbf16, #tpu.memory_space<vmem>>, vector<128x1024xbf16>,
    %30 = vector.extract_strided_slice %26 {offsets = [0, 1, 0, 0], sizes = [2, 8, 8, 1024], strides = [1, 1, 1, 1]} : vector<2x10x8x1024xbf16> to vector<2x8x8x1024xbf16>
    %31 = vector.shape_cast %30 : vector<2x8x8x1024xbf16> to vector<128x1024xbf16>
    %c0_21 = arith.constant 0 : index
    %c5120 = arith.constant 5120 : index
    %32 = vector.load %arg6[%c0_21, %c5120] : memref<128x9216xbf16, #tpu.memory_space<vmem>>, vector<128x1024xbf16>
    tpu.vector_store %arg6[%c0_21, %c5120], %31 {strides = array<i32>} : memref<128x9216xbf16, #tpu.memory_space<vmem>>, vector<128x1024xbf16>,
    %33 = vector.extract_strided_slice %26 {offsets = [0, 2, 0, 0], sizes = [2, 8, 8, 1024], strides = [1, 1, 1, 1]} : vector<2x10x8x1024xbf16> to vector<2x8x8x1024xbf16>
    %34 = vector.shape_cast %33 : vector<2x8x8x1024xbf16> to vector<128x1024xbf16>
    %c0_22 = arith.constant 0 : index
    %c8192 = arith.constant 8192 : index
    %35 = vector.load %arg6[%c0_22, %c8192] : memref<128x9216xbf16, #tpu.memory_space<vmem>>, vector<128x1024xbf16>
    tpu.vector_store %arg6[%c0_22, %c8192], %34 {strides = array<i32>} : memref<128x9216xbf16, #tpu.memory_space<vmem>>, vector<128x1024xbf16>,
    %c0_23 = arith.constant 0 : index
    %c0_24 = arith.constant 0 : index
    %c0_25 = arith.constant 0 : index
    %c0_26 = arith.constant 0 : index
    %36 = vector.load %arg3[%c0_23, %c0_24, %c0_25, %c0_26] : memref<3x3x1024x256xbf16, #tpu.memory_space<vmem>>, vector<3x3x1024x256xbf16>
    %37 = vector.shape_cast %36 : vector<3x3x1024x256xbf16> to vector<9216x256xbf16>
    %c0_27 = arith.constant 0 : index
    %c0_28 = arith.constant 0 : index
    %38 = vector.load %arg5[%c0_27, %c0_28] : memref<128x256xf32, #tpu.memory_space<vmem>>, vector<128x256xf32>
    %c0_29 = arith.constant 0 : index
    %c0_30 = arith.constant 0 : index
    %39 = vector.load %arg6[%c0_29, %c0_30] : memref<128x9216xbf16, #tpu.memory_space<vmem>>, vector<128x9216xbf16>
    %cst = arith.constant dense<0.000000e+00> : vector<128x256xf32>
    %40 = tpu.matmul %39, %37, %cst {dimension_numbers = #tpu.dot_dimension_numbers<[1], [0], [0], [1], [0, 0, 1, 1], [], []>} : vector<128x9216xbf16>, vector<9216x256xbf16>, vector<128x256xf32> -> vector<128x256xf32>
    %41 = arith.addf %38, %40 : vector<128x256xf32>
    %c0_31 = arith.constant 0 : index
    %c0_32 = arith.constant 0 : index
    %42 = vector.load %arg5[%c0_31, %c0_32] : memref<128x256xf32, #tpu.memory_space<vmem>>, vector<128x256xf32>
    tpu.vector_store %arg5[%c0_31, %c0_32], %41 {strides = array<i32>} : memref<128x256xf32, #tpu.memory_space<vmem>>, vector<128x256xf32>,
    %c1_i32 = arith.constant 1 : i32
    %43 = arith.cmpi eq, %arg1, %c1_i32 : i32
    %44 = arith.extui %43 : i1 to i32
    %c0_i32_33 = arith.constant 0 : i32
    %45 = arith.cmpi ne, %44, %c0_i32_33 : i32
    scf.if %45 {
      %c0_34 = arith.constant 0 : index
      %c0_35 = arith.constant 0 : index
      %46 = vector.load %arg5[%c0_34, %c0_35] : memref<128x256xf32, #tpu.memory_space<vmem>>, vector<128x256xf32>
      %47 = vector.shape_cast %46 : vector<128x256xf32> to vector<2x8x8x256xf32>
      %48 = vector.shape_cast %47 : vector<2x8x8x256xf32> to vector<2x4x2x8x256xf32>
      %49 = vector.extract_strided_slice %48 {offsets = [0, 0, 0, 0, 0], sizes = [2, 4, 1, 8, 256], strides = [1, 1, 1, 1, 1]} : vector<2x4x2x8x256xf32> to vector<2x4x1x8x256xf32>
      %50 = vector.shape_cast %49 : vector<2x4x1x8x256xf32> to vector<2x4x8x256xf32>
      %51 = vector.extract_strided_slice %48 {offsets = [0, 0, 1, 0, 0], sizes = [2, 4, 1, 8, 256], strides = [1, 1, 1, 1, 1]} : vector<2x4x2x8x256xf32> to vector<2x4x1x8x256xf32>
      %52 = vector.shape_cast %51 : vector<2x4x1x8x256xf32> to vector<2x4x8x256xf32>
      %53 = arith.addf %50, %52 : vector<2x4x8x256xf32>
      %54 = vector.shape_cast %53 : vector<2x4x8x256xf32> to vector<2x4x4x2x256xf32>
      %55 = vector.extract_strided_slice %54 {offsets = [0, 0, 0, 0, 0], sizes = [2, 4, 4, 1, 256], strides = [1, 1, 1, 1, 1]} : vector<2x4x4x2x256xf32> to vector<2x4x4x1x256xf32>
      %56 = vector.shape_cast %55 : vector<2x4x4x1x256xf32> to vector<2x4x4x256xf32>
      %57 = vector.extract_strided_slice %54 {offsets = [0, 0, 0, 1, 0], sizes = [2, 4, 4, 1, 256], strides = [1, 1, 1, 1, 1]} : vector<2x4x4x2x256xf32> to vector<2x4x4x1x256xf32>
      %58 = vector.shape_cast %57 : vector<2x4x4x1x256xf32> to vector<2x4x4x256xf32>
      %59 = arith.addf %56, %58 : vector<2x4x4x256xf32>
      %cst_36 = arith.constant 2.500000e-01 : f32
      %60 = vector.broadcast %cst_36 : f32 to vector<2x4x4x256xf32>
      %61 = arith.mulf %59, %60 : vector<2x4x4x256xf32>
      %62 = vector.shape_cast %61 : vector<2x4x4x256xf32> to vector<2x16x256xf32>
      %c0_37 = arith.constant 0 : index
      %c0_38 = arith.constant 0 : index
      %c0_39 = arith.constant 0 : index
      %63 = vector.load %arg4[%c0_37, %c0_38, %c0_39] : memref<2x16x256xf32, #tpu.memory_space<vmem>>, vector<2x16x256xf32>
      tpu.vector_store %arg4[%c0_37, %c0_38, %c0_39], %62 {strides = array<i32>} : memref<2x16x256xf32, #tpu.memory_space<vmem>>, vector<2x16x256xf32>,
    } else {
    }
    return
  }
  func.func @transform_0(%arg0: i32, %arg1: i32) -> (i32, i32, i32, i32, i32) {
    %c0_i32 = arith.constant 0 : i32
    %c0_i32_0 = arith.constant 0 : i32
    %c0_i32_1 = arith.constant 0 : i32
    %c0_i32_2 = arith.constant 0 : i32
    %c0_i32_3 = arith.constant 0 : i32
    return %c0_i32, %c0_i32_0, %c0_i32_1, %c0_i32_2, %arg1 : i32, i32, i32, i32, i32
  }
  func.func @transform_1(%arg0: i32, %arg1: i32) -> (i32, i32, i32, i32) {
    %c0_i32 = arith.constant 0 : i32
    %c0_i32_0 = arith.constant 0 : i32
    %c0_i32_1 = arith.constant 0 : i32
    return %c0_i32, %c0_i32_0, %arg1, %arg0 : i32, i32, i32, i32
  }
  func.func @transform_2(%arg0: i32, %arg1: i32) -> (i32, i32, i32) {
    %c0_i32 = arith.constant 0 : i32
    %c0_i32_0 = arith.constant 0 : i32
    %c0_i32_1 = arith.constant 0 : i32
    return %c0_i32, %c0_i32_0, %arg0 : i32, i32, i32
  }
}

</mosaic_0001>

<bundles_post_ra>
// kernel: tpu_custom_call.1
= control target key start
LH: loop header
LB: loop body
LE: loop exit
PB: predicated region body
PF: predicated region fallthrough
CT: control target
= control target key end

     0   :  { %s23094_s0 = inlined_call_operand.hbm [shape: bf16[3,2,10,8,2048], index: 0, kind: input, shape index: {}]   ;;  %s23095_s1 = inlined_call_operand.hbm [shape: bf16[3,3,2048,512], index: 1, kind: input, shape index: {}]   ;;  %s23096_s2 = inlined_call_operand.hbm [shape: f32[2,16,512], index: 2, kind: output, shape index: {}]  }
   0x1   :  { %23156 = sst [smem:[#allocation51_spill]] %s23094_s0 }
   0x2   :  { %7 = vsyncpa [#allocation5], 0 }
   0x3   :  { %9 = vsyncpa [#allocation5 + $0x1], 0 }
   0x4   :  { %10 = vsyncpa [#allocation8], 0 }
   0x5   :  { %12 = vsyncpa [#allocation8 + $0x1], 0 }
   0x6   :  { %13 = vsyncpa [#allocation6], 0 }
   0x7   :  { %15 = vsyncpa [#allocation6 + $0x1], 0  ;;  %s20432_s9 = smov 0   ;;  %s20434_s10 = smov 0  }
   0x8   :  { %s20436_s11 = smov 0   ;;  %s20438_s12 = smov 0  }
   0x9   :  { %s20440_s13 = smov 0   ;;  %s20442_s14 = smov 0  }
   0xa   :  { %s20444_s15 = smov 0   ;;  %s20446_s16 = smov 0  }
   0xb   :  { %s20448_s17 = smov 0   ;;  %s20450_s18 = smov 0  }
   0xc   :  { %s20452_s19 = smov 0   ;;  %s20454_s20 = smov 0  }
   0xd   :  { %s20456_s21 = smov 0   ;;  %s20458_s22 = smov 0  }
   0xe LB: > { %23157 = sst [smem:[#allocation16_spill]] %s20355_s11  ;;  %s15233_s23 = sadd.s32 4294967295, %s20399_s22   ;;  %s20399_s22 = sphi %s20458_s22, %s21_s22   ;;  %s20395_s21 = sphi %s20456_s21, %s23298_s21   ;;  %s20391_s20 = sphi %s20454_s20, %s23297_s20   ;;  %s20387_s19 = sphi %s20452_s19, %s23296_s19   ;;  %s20383_s18 = sphi %s20450_s18, %s23295_s18   ;;  %s20379_s17 = sphi %s20448_s17, %s23285_s17   ;;  %s20375_s16 = sphi %s20446_s16, %s23294_s16   ;;  %s20371_s15 = sphi %s20444_s15, %s23293_s15   ;;  %s20367_s14 = sphi %s20442_s14, %s23292_s14   ;;  %s20363_s13 = sphi %s20440_s13, %s23291_s13   ;;  %s20359_s12 = sphi %s20438_s12, %s23290_s12   ;;  %s20355_s11 = sphi %s20436_s11, %s23282_s11   ;;  %s20351_s10 = sphi %s20434_s10, %s23289_s10   ;;  %s20347_s9 = sphi %s20432_s9, %s23288_s9  }
   0xf   : > { %23158 = sst [smem:[#allocation17_spill]] %s20379_s17  ;;  %s30_s25 = sadd.s32 1, %s20391_s20 }
  0x10   : > { %s33_s26 = sadd.s32 1, %s20395_s21  ;;  %p31_p0 = scmp.ge.s32.totalorder %s30_s25, 2 }
  0x11   : > { %s40_s27 = sadd.s32 1, %s20379_s17  ;;  %p47_p1 = scmp.ne.s32.totalorder %s20379_s17, %s20375_s16 }
  0x12   : > { %p48_p2 = scmp.eq.s32.totalorder %s20399_s22, 0  ;;  %s23300_s25 = smov (%p31_p0, %s30_s25), 0 }
  0x13   : > { %23159 = sst [smem:[#allocation18_spill]] %s23300_s25  ;;  %s23302_s26 = smov (!%p31_p0, %s33_s26), %s20395_s21 }
  0x14   : > { %s37_s28 = ssub.s32 %s20391_s20, %s23300_s25  ;;  %p20515_p3 = por %p48_p2, %p47_p1 }
  0x15   : > { %p35_p4 = scmp.ge.s32.totalorder %s23302_s26, 2  ;;  %p38_p5 = scmp.eq.s32.totalorder %s37_s28, 0 }
  0x16   : > { %p53_p6 = scmp.ne.s32.totalorder %s20375_s16, %s20371_s15  ;;  %p20522_p7 = scmp.eq.s32.totalorder %s15233_s23, 0 }
  0x17   : > { %s23304_s26 = smov (%p35_p4, %s23302_s26), 0  ;;  %s68_s7 = sadd.s32 1, %s20367_s14 }
  0x18   : > { %23162 = sst [smem:[#allocation19_spill]] %s23304_s26  ;;  %p20533_p8 = por %p20522_p7, %p53_p6 }
  0x19   : > { %s20529_s3 = scalar_select %p38_p5, %s20379_s17, %s40_s27  }
  0x1a   : > { %s23164_s4 = scalar_select %p20533_p8, 1, 0 }
  0x1b   : > { %23163 = sst [smem:[#allocation20_spill]] %s20529_s3  ;;  %s64_s5 = ssub.s32 %s20395_s21, %s23304_s26 }
  0x1c   : > { %s65_s6 = sor.u32 %s64_s5, %s37_s28  ;;  %p75_p10 = scmp.ne.s32.totalorder %s20367_s14, %s20363_s13 }
  0x1d   : > { %p66_p9 = scmp.eq.s32.totalorder %s65_s6, 0  ;;  %p81_p11 = scmp.ne.s32.totalorder %s20363_s13, %s20359_s12 }
  0x1e   : > { %p92_p12 = scmp.eq.s32.totalorder %s64_s5, 0  ;;  %p20549_p13 = por %p75_p10, %p48_p2 }
  0x1f   : > { %s20545_s8 = scalar_select %p66_p9, %s20367_s14, %s68_s7  }
  0x20   : > { %p20555_p0 = por %p81_p11, %p20522_p7  ;;  %s94_s24 = sadd.s32 1, %s20355_s11 }
  0x21   : > { %23165 = sst [smem:[#allocation21_spill]] %s20545_s8  ;;  %p104_p1 = scmp.ne.s32.totalorder %s20355_s11, %s20351_s10 }
  0x22   : > { %s23167_s27 = scalar_select %p20555_p0, 1, 0 }
  0x23   : > { %s20563_s28 = scalar_select %p92_p12, %s20355_s11, %s94_s24  }
  0x24   : > { %p105_p4 = scmp.eq.s32.totalorder %s15233_s23, 3  ;;  %p110_p5 = scmp.ne.s32.totalorder %s20351_s10, %s20347_s9 }
  0x25   : > { %23168 = sst [smem:[#allocation22_spill]] %s20563_s28  ;;  %s23169_s12 = sadd.s32 4294967294, %s20399_s22  }
  0x26   : > { %p111_p6 = scmp.eq.s32.totalorder %s23169_s12, 3  ;;  %p20571_p9 = por %p105_p4, %p104_p1 }
  0x27   : > { %p15236_p7 = scmp.ge.s32.totalorder %s20399_s22, 4 }
  0x28   : > { %s23170_s5 = scalar_select %p20571_p9, 1, 0 }
  0x29   : > { %p20575_p2 = por %p111_p6, %p110_p5  ;;  %127 = sbr.rel (%p15236_p7) target bundleno = 90 (0x5a), region = 16 }
  0x2a   : > { %s131_s24 = sand.u32 (!%p15236_p7), 1, %s20379_s17   ;;  %s23101_s23 = sshll.u32 (!%p15236_p7), %s20391_s20, 9 }
  0x2b   : > { %s23171_s6 = scalar_select %p20575_p2, 1, 0 }
  0x2c   : > { %s18153_s30 = smul.u32 (!%p15236_p7), 1920, %s131_s24  ;;  %s23173_s0 = sld [smem:[#allocation51_spill]] (!%p15236_p7) }
  0x2d   : > { %23172 = sst [smem:[#allocation23_spill]] %s23171_s6  ;;  %s20591_s8 = scalar_lea.sflag (!%p15236_p7), [#allocation5], %s131_s24 }
  0x2e   : > { %s135_s25 = scalar_lea.vmem (!%p15236_p7), [#allocation4], %s18153_s30 }
  0x2f   : > { %s142_s3 = sshll.u32 (!%p15236_p7), %s135_s25, 4  ;;  %s20589_s3 = int_to_ptr.vmem [resolvable:$true] %s142_s3 }
  0x32   : > { %s20587_s26 = scalar_lea.hbm %s23173_s0, %s23101_s23  ;;  %s20225_s7 = scalar_lea.hbm %s23173_s0, 61440 }
  0x33   : > { %s20221_s28 = scalar_lea.hbm %s20587_s26, 30720  ;;  %p20226_p1 = scmp.lt.u32.totalorder %s20587_s26, %s23173_s0 }
  0x34   : > { %p20222_p10 = scmp.ne.s32.totalorder %s20587_s26, %s20221_s28  ;;  %p20227_p4 = scmp.lt.u32.totalorder %s20225_s7, %s20221_s28 }
  0x35   : > { %p20229_p6 = scmp.lt.u32.totalorder %s20221_s28, %s20587_s26 }
  0x36   : > { %p20223_p11 = pnand %p20222_p10, %p20515_p3  ;;  %p20228_p5 = por %p20227_p4, %p20226_p1 }
  0x38   : > { %p20224_p12 = pneg %p20223_p11  ;;  %p20230_p7 = por %p20229_p6, %p20228_p5 }
  0x3a   : > { %p20231_p2 = pnand %p20230_p7, %p20224_p12 }
  0x3c   : > { %20234 = shalt.err (!%p20231_p2)
}
  0x3d   : > { %s20235_s25 = scalar_lea.vmem %s20589_s3, 30720  ;;  %s20401_s11 = smov [#allocation4]  }
  0x3e   : > { %p20236_p10 = scmp.ne.s32.totalorder %s20589_s3, %s20235_s25  ;;  %s20239_s17 = sshll.u32 %s20401_s11, 4  ;;  %s20240_s17 = int_to_ptr.vmem [resolvable:$false] %s20239_s17 }
  0x3f   : > { %s20241_s24 = scalar_lea.vmem %s20240_s17, 61440  ;;  %p20242_p0 = scmp.lt.s32.totalorder %s20589_s3, %s20240_s17 }
  0x40   : > { %p20237_p11 = pnand %p20236_p10, %p20515_p3  ;;  %p20243_p8 = scmp.lt.s32.totalorder %s20241_s24, %s20235_s25 }
  0x42   : > { %p20238_p9 = pneg %p20237_p11  ;;  %p20244_p1 = por %p20243_p8, %p20242_p0 }
  0x44   : > { %p20245_p4 = pnand %p20244_p1, %p20238_p9 }
  0x46   : > { %20248 = shalt.err (!%p20245_p4)
}
  0x47   : > { %s20402_s28 = smov 1024   ;;  %s20403_s23 = smov 512  }
  0x48   : > { %s20404_s30 = smov 32  }
  0x49   : > { %18157 = dma.hbm_to_vmem [thread:$0]  (%p20515_p3), %s20587_s26, 30720, %s20589_s3, %s20591_s8, %s20402_s28, %s20403_s23, %s20404_s30  }
  0x4a   : > { %s152_s7 = sand.u32 1, %s20367_s14   ;;  %s15240_s12 = sshll.u32 %s20395_s21, 1 }
  0x4b   : > { %s18154_s25 = smul.u32 9216, %s152_s7  ;;  %s23174_s11 = sshll.u32 %s20391_s20, 9 }
  0x4c   : > { %s163_s17 = sadd.s32 %s23174_s11, %s15240_s12  ;;  %s20405_s28 = smov 65536  }
  0x4d   : > { %s15242_s24 = sshll.u32 %s163_s17, 6  ;;  %s156_s3 = scalar_lea.vmem [#allocation7], %s18154_s25 }
  0x4e   : > { %s165_s29 = scalar_lea.hbm %s23095_s1, %s15242_s24  ;;  %s178_s8 = sshll.u32 %s156_s3, 4  ;;  %s179_s8 = int_to_ptr.vmem [resolvable:$true] %s178_s8 }
  0x4f   : > { %s18158_s26 = scalar_select %p20549_p13, [#allocation0], [#allocation12] }
  0x50   : > { %18159 = sst [smem:[#allocation11]] (%p20549_p13), %s20405_s28  ;;  %s20406_s30 = smov 16384  }
  0x51   : > { %s170_s23 = sld [smem:[%s18158_s26]]   ;;  %s20407_s12 = smov 128  }
  0x52   : > { %18160 = sst [smem:[#allocation11 + $0x1]] (%p20549_p13), %s20406_s30  ;;  %s20408_s11 = smov 256  }
  0x53   : > { %18161 = sst [smem:[#allocation11 + $0x2]] (%p20549_p13), %s20407_s12  ;;  %s20409_s0 = smov 8  }
  0x54   : > { %18162 = sst [smem:[#allocation11 + $0x3]] (%p20549_p13), %s20408_s11  ;;  %s153_s17 = scalar_lea.sflag [#allocation8], %s152_s7 }
  0x55   : > { %18163 = sst [smem:[#allocation11 + $0x4]] (%p20549_p13), %s20407_s12  ;;  %s20410_s24 = smov [#allocation10]  }
  0x56   : > { %18164 = sst [smem:[#allocation11 + $0x5]] (%p20549_p13), %s20409_s0 }
  0x57   : > { %s15243_s6 = sshll.u32 %s170_s23, 26 }
  0x58   : > { %s15244_s25 = sadd.s32 134217728, %s15243_s6 }
  0x59   : > { %18165 = dma.general (%p20549_p13), %s165_s29, 147456, %s179_s8, %s153_s17, %s20410_s24, [#allocation11], %s15244_s25, 0  }
  0x5a PF: > { %p15245_p3 = scmp.ge.s32.totalorder %s20399_s22, 1  ;;  %p199_p8 = scmp.lt.s32.totalorder %s20399_s22, 5 }
  0x5c   : > { %p200_p0 = pnand %p15245_p3, %p199_p8 }
  0x5e   : > { %203 = sbr.rel (%p200_p0) target bundleno = 1649 (0x671), region = 28 }
  0x65   : > { %s205_s26 = sand.u32 1, %s20375_s16   ;;  %p23175_p9 = scmp.ne.s32.totalorder %s23164_s4, 0 }
  0x66   : > { %s18155_s3 = smul.u32 1920, %s205_s26  ;;  %s206_s28 = scalar_lea.sflag [#allocation5], %s205_s26 }
  0x68   : > { %s20641_s30 = scalar_lea.vmem [#allocation4], %s18155_s3 }
  0x69   : > { %20334 = dma.done.wait (%p23175_p9), %s206_s28, 30720  }
  0x6a   : > { %20336 = vsyncadd (%p23175_p9), %s206_s28, 4294936576  ;;  %s214_s15 = sand.u32 1, %s20363_s13   ;;  %p23176_p13 = scmp.ne.s32.totalorder %s23167_s27, 0 }
  0x6b   : > { %s18156_s7 = smul.u32 9216, %s214_s15  ;;  %s215_s29 = scalar_lea.sflag [#allocation8], %s214_s15 }
  0x6d   : > { %s20648_s8 = scalar_lea.vmem [#allocation7], %s18156_s7 }
  0x6e   : > { %20338 = dma.done.wait (%p23176_p13), %s215_s29, 147456  }
  0x6f   : > { %20340 = vsyncadd (%p23176_p13), %s215_s29, 4294819840  ;;  %s241_s23 = sand.u32 1, %s20351_s10   ;;  %p15247_p2 = scmp.ne.s32.totalorder %s20383_s18, 0 }
  0x70   : > { %s15246_s12 = sshll.u32 %s241_s23, 6  ;;  %v20411_v0 = vmov (!%p15247_p2), 0.0  }
  0x71   : > { %s20657_s11 = scalar_lea.vmem [#allocation9], %s15246_s12  ;;  %251 = sbr.rel (%p15247_p2) target bundleno = 129 (0x81), region = 40  ;;  %252 = vst [vmem:[#allocation2] sm:$0xff] (!%p15247_p2), %v20411_v0  ;;  %253 = vst [vmem:[#allocation2 + $0x8] sm:$0xff] (!%p15247_p2), %v20411_v0 }
  0x72   : > { %254 = vst [vmem:[#allocation2 + $0x10] sm:$0xff] (!%p15247_p2), %v20411_v0  ;;  %255 = vst [vmem:[#allocation2 + $0x18] sm:$0xff] (!%p15247_p2), %v20411_v0 }
  0x73   : > { %256 = vst [vmem:[#allocation2 + $0x20] sm:$0xff] (!%p15247_p2), %v20411_v0  ;;  %257 = vst [vmem:[#allocation2 + $0x28] sm:$0xff] (!%p15247_p2), %v20411_v0 }
  0x74   : > { %258 = vst [vmem:[#allocation2 + $0x30] sm:$0xff] (!%p15247_p2), %v20411_v0  ;;  %259 = vst [vmem:[#allocation2 + $0x38] sm:$0xff] (!%p15247_p2), %v20411_v0 }
  0x75   : > { %260 = vst [vmem:[#allocation2 + $0x40] sm:$0xff] (!%p15247_p2), %v20411_v0  ;;  %261 = vst [vmem:[#allocation2 + $0x48] sm:$0xff] (!%p15247_p2), %v20411_v0 }
  0x76   : > { %262 = vst [vmem:[#allocation2 + $0x50] sm:$0xff] (!%p15247_p2), %v20411_v0  ;;  %263 = vst [vmem:[#allocation2 + $0x58] sm:$0xff] (!%p15247_p2), %v20411_v0 }
  0x77   : > { %264 = vst [vmem:[#allocation2 + $0x60] sm:$0xff] (!%p15247_p2), %v20411_v0  ;;  %265 = vst [vmem:[#allocation2 + $0x68] sm:$0xff] (!%p15247_p2), %v20411_v0 }
  0x78   : > { %266 = vst [vmem:[#allocation2 + $0x70] sm:$0xff] %v20411_v0  ;;  %267 = vst [vmem:[#allocation2 + $0x78] sm:$0xff] %v20411_v0 }
  0x79   : > { %268 = vst [vmem:[#allocation2 + $0x80] sm:$0xff] %v20411_v0  ;;  %269 = vst [vmem:[#allocation2 + $0x88] sm:$0xff] %v20411_v0 }
  0x7a   : > { %270 = vst [vmem:[#allocation2 + $0x90] sm:$0xff] %v20411_v0  ;;  %271 = vst [vmem:[#allocation2 + $0x98] sm:$0xff] %v20411_v0 }
  0x7b   : > { %272 = vst [vmem:[#allocation2 + $0xa0] sm:$0xff] %v20411_v0  ;;  %273 = vst [vmem:[#allocation2 + $0xa8] sm:$0xff] %v20411_v0 }
  0x7c   : > { %274 = vst [vmem:[#allocation2 + $0xb0] sm:$0xff] %v20411_v0  ;;  %275 = vst [vmem:[#allocation2 + $0xb8] sm:$0xff] %v20411_v0 }
  0x7d   : > { %276 = vst [vmem:[#allocation2 + $0xc0] sm:$0xff] %v20411_v0  ;;  %277 = vst [vmem:[#allocation2 + $0xc8] sm:$0xff] %v20411_v0 }
  0x7e   : > { %278 = vst [vmem:[#allocation2 + $0xd0] sm:$0xff] %v20411_v0  ;;  %279 = vst [vmem:[#allocation2 + $0xd8] sm:$0xff] %v20411_v0 }
  0x7f   : > { %280 = vst [vmem:[#allocation2 + $0xe0] sm:$0xff] %v20411_v0  ;;  %281 = vst [vmem:[#allocation2 + $0xe8] sm:$0xff] %v20411_v0 }
  0x80   : > { %282 = vst [vmem:[#allocation2 + $0xf0] sm:$0xff] %v20411_v0  ;;  %283 = vst [vmem:[#allocation2 + $0xf8] sm:$0xff] %v20411_v0 }
  0x81 PF: > { %v18301_v1 = vld [vmem:[%s20648_s8 + $0x4] ss:$8 sps:$4 sm:$0xff]   ;;  %v18305_v3 = vld [vmem:[%s20648_s8] ss:$8 sps:$4 sm:$0xff]   ;;  %v18307_v5 = vld [vmem:[%s20648_s8 + $0x14] ss:$8 sps:$4 sm:$0xff]  }
  0x82   : > { %v18303_v2 = vld [vmem:[%s20648_s8 + $0x1204] ss:$8 sps:$4 sm:$0xff]   ;;  %10206 = vmatprep.subr.bf16.mxu1 %v18301_v1  ;;  %v18306_v4 = vld [vmem:[%s20648_s8 + $0x1200] ss:$8 sps:$4 sm:$0xff]   ;;  %v18309_v6 = vld [vmem:[%s20648_s8 + $0x1214] ss:$8 sps:$4 sm:$0xff]  }
  0x83   : > { %12240 = vmatprep.subr.bf16.mxu0 %v18303_v2  ;;  %10207 = vmatpush1.bf16.msra.mxu1 %v18305_v3  ;;  %v18311_v7 = vld [vmem:[%s20648_s8 + $0x10] ss:$8 sps:$4 sm:$0xff]   ;;  %v18313_v9 = vld [vmem:[%s20648_s8 + $0x24] ss:$8 sps:$4 sm:$0xff]   ;;  %v18317_v11 = vld [vmem:[%s20648_s8 + $0x20] ss:$8 sps:$4 sm:$0xff]  }
  0x84   : > { %12241 = vmatpush1.bf16.msra.mxu0 %v18306_v4  ;;  %10208 = vmatprep.subr.bf16.mxu1 %v18307_v5  ;;  %v18312_v8 = vld [vmem:[%s20648_s8 + $0x1210] ss:$8 sps:$4 sm:$0xff]   ;;  %v18315_v10 = vld [vmem:[%s20648_s8 + $0x1224] ss:$8 sps:$4 sm:$0xff]   ;;  %v18318_v12 = vld [vmem:[%s20648_s8 + $0x1220] ss:$8 sps:$4 sm:$0xff]  }
  0x85   : > { %12242 = vmatprep.subr.bf16.mxu0 %v18309_v6  ;;  %v18319_v13 = vld [vmem:[%s20648_s8 + $0x34] ss:$8 sps:$4 sm:$0xff]   ;;  %v18323_v15 = vld [vmem:[%s20648_s8 + $0x30] ss:$8 sps:$4 sm:$0xff]   ;;  %v18325_v17 = vld [vmem:[%s20648_s8 + $0x44] ss:$8 sps:$4 sm:$0xff]  }
  0x86   : > { %v18321_v14 = vld [vmem:[%s20648_s8 + $0x1234] ss:$8 sps:$4 sm:$0xff]   ;;  %v18324_v16 = vld [vmem:[%s20648_s8 + $0x1230] ss:$8 sps:$4 sm:$0xff]   ;;  %v18327_v18 = vld [vmem:[%s20648_s8 + $0x1244] ss:$8 sps:$4 sm:$0xff]  }
  0x87   : > { %10209 = vmatpush1.bf16.msra.mxu1 %v18311_v7  ;;  %v18329_v19 = vld [vmem:[%s20648_s8 + $0x40] ss:$8 sps:$4 sm:$0xff]   ;;  %v18331_v21 = vld [vmem:[%s20648_s8 + $0x54] ss:$8 sps:$4 sm:$0xff]   ;;  %v18335_v23 = vld [vmem:[%s20648_s8 + $0x50] ss:$8 sps:$4 sm:$0xff]  }
  0x88   : > { %12243 = vmatpush1.bf16.msra.mxu0 %v18312_v8  ;;  %10210 = vmatprep.subr.bf16.mxu1 %v18313_v9  ;;  %v18330_v20 = vld [vmem:[%s20648_s8 + $0x1240] ss:$8 sps:$4 sm:$0xff]   ;;  %v18333_v22 = vld [vmem:[%s20648_s8 + $0x1254] ss:$8 sps:$4 sm:$0xff]   ;;  %v18336_v24 = vld [vmem:[%s20648_s8 + $0x1250] ss:$8 sps:$4 sm:$0xff]  }
  0x89   : > { %12244 = vmatprep.subr.bf16.mxu0 %v18315_v10  ;;  %v18337_v25 = vld [vmem:[%s20648_s8 + $0x64] ss:$8 sps:$4 sm:$0xff]   ;;  %v18341_v27 = vld [vmem:[%s20648_s8 + $0x60] ss:$8 sps:$4 sm:$0xff]   ;;  %v18343_v29 = vld [vmem:[%s20648_s8 + $0x74] ss:$8 sps:$4 sm:$0xff]  }
  0x8a   : > { %v18339_v26 = vld [vmem:[%s20648_s8 + $0x1264] ss:$8 sps:$4 sm:$0xff]   ;;  %v18342_v28 = vld [vmem:[%s20648_s8 + $0x1260] ss:$8 sps:$4 sm:$0xff]   ;;  %v18345_v30 = vld [vmem:[%s20648_s8 + $0x1274] ss:$8 sps:$4 sm:$0xff]  }
  0x8b   : > { %10211 = vmatpush1.bf16.msra.mxu1 %v18317_v11  ;;  %v18347_v31 = vld [vmem:[%s20648_s8 + $0x70] ss:$8 sps:$4 sm:$0xff]   ;;  %v18349_v33 = vld [vmem:[%s20648_s8 + $0x84] ss:$8 sps:$4 sm:$0xff]   ;;  %v18353_v35 = vld [vmem:[%s20648_s8 + $0x80] ss:$8 sps:$4 sm:$0xff]  }
  0x8c   : > { %12245 = vmatpush1.bf16.msra.mxu0 %v18318_v12  ;;  %10212 = vmatprep.subr.bf16.mxu1 %v18319_v13  ;;  %v18348_v32 = vld [vmem:[%s20648_s8 + $0x1270] ss:$8 sps:$4 sm:$0xff]   ;;  %v18351_v34 = vld [vmem:[%s20648_s8 + $0x1284] ss:$8 sps:$4 sm:$0xff]   ;;  %v18354_v36 = vld [vmem:[%s20648_s8 + $0x1280] ss:$8 sps:$4 sm:$0xff]  }
  0x8d   : > { %12246 = vmatprep.subr.bf16.mxu0 %v18321_v14  ;;  %v18355_v37 = vld [vmem:[%s20648_s8 + $0x94] ss:$8 sps:$4 sm:$0xff]   ;;  %v18359_v39 = vld [vmem:[%s20648_s8 + $0x90] ss:$8 sps:$4 sm:$0xff]   ;;  %v18361_v41 = vld [vmem:[%s20648_s8 + $0xa4] ss:$8 sps:$4 sm:$0xff]  }
  0x8e   : > { %v18357_v38 = vld [vmem:[%s20648_s8 + $0x1294] ss:$8 sps:$4 sm:$0xff]   ;;  %v18360_v40 = vld [vmem:[%s20648_s8 + $0x1290] ss:$8 sps:$4 sm:$0xff]   ;;  %v18363_v42 = vld [vmem:[%s20648_s8 + $0x12a4] ss:$8 sps:$4 sm:$0xff]  }
  0x8f   : > { %10213 = vmatpush1.bf16.msra.mxu1 %v18323_v15  ;;  %v18365_v43 = vld [vmem:[%s20648_s8 + $0xa0] ss:$8 sps:$4 sm:$0xff]   ;;  %v18367_v45 = vld [vmem:[%s20648_s8 + $0xb4] ss:$8 sps:$4 sm:$0xff]   ;;  %v18371_v47 = vld [vmem:[%s20648_s8 + $0xb0] ss:$8 sps:$4 sm:$0xff]  }
  0x90   : > { %12247 = vmatpush1.bf16.msra.mxu0 %v18324_v16  ;;  %10214 = vmatprep.subr.bf16.mxu1 %v18325_v17  ;;  %v18366_v44 = vld [vmem:[%s20648_s8 + $0x12a0] ss:$8 sps:$4 sm:$0xff]   ;;  %v18369_v46 = vld [vmem:[%s20648_s8 + $0x12b4] ss:$8 sps:$4 sm:$0xff]   ;;  %v18372_v49 = vld [vmem:[%s20648_s8 + $0x12b0] ss:$8 sps:$4 sm:$0xff]  }
  0x91   : > { %12248 = vmatprep.subr.bf16.mxu0 %v18327_v18  ;;  %v20708_v48 = vld [vmem:[%s20641_s30] sm:$0xff]  ;;  %v15398_v51 = vld [vmem:[%s20641_s30 + $0x2b0] sm:$0xff]  ;;  %p16992_p12 = scmp.ne.s32.totalorder %s20383_s18, 1 }
  0x92   : > { %v288_v50 = vld [vmem:[%s20641_s30 + $0x20] sm:$0xff]  ;;  %v15402_v53 = vld [vmem:[%s20641_s30 + $0x2d0] sm:$0xff]  ;;  %vm15030_vm0 = vcmask (!%p16992_p12), 1041409   ;;  %vm15032_vm1 = vcmask (!%p16992_p12), 1042434   ;;  %vm15034_vm2 = vcmask (!%p16992_p12), 1043459   ;;  %vm15036_vm3 = vcmask (!%p16992_p12), 1044484  }
  0x93   : > { %10215 = vmatpush1.bf16.msra.mxu1 %v18329_v19  ;;  %v15249_v52 = vcombine.high %v20708_v48, %v288_v50  ;;  %v18373_v54 = vld [vmem:[%s20648_s8 + $0xc4] ss:$8 sps:$4 sm:$0xff]   ;;  %v15541_v56 = vcombine.high %v15398_v51, %v15402_v53  ;;  %v18377_v57 = vld [vmem:[%s20648_s8 + $0xc0] ss:$8 sps:$4 sm:$0xff]   ;;  %v18379_v59 = vld [vmem:[%s20648_s8 + $0xd4] ss:$8 sps:$4 sm:$0xff]   ;;  %v15248_v12 = vcombine.low %v20708_v48, %v288_v50  ;;  %v15540_v13 = vcombine.low %v15398_v51, %v15402_v53 }
  0x94   : > { %12249 = vmatpush1.bf16.msra.mxu0 %v18330_v20  ;;  %10216 = vmatprep.subr.bf16.mxu1 %v18331_v21  ;;  %v18375_v55 = vld [vmem:[%s20648_s8 + $0x12c4] ss:$8 sps:$4 sm:$0xff]   ;;  %v18378_v58 = vld [vmem:[%s20648_s8 + $0x12c0] ss:$8 sps:$4 sm:$0xff]   ;;  %v18381_v60 = vld [vmem:[%s20648_s8 + $0x12d4] ss:$8 sps:$4 sm:$0xff]  }
  0x95   : > { %12250 = vmatprep.subr.bf16.mxu0 %v18333_v22  ;;  %10238 = vmatprep.mubr.bf16.mxu1 %v15249_v52  ;;  %v18383_v61 = vld [vmem:[%s20648_s8 + $0xd0] ss:$8 sps:$4 sm:$0xff]   ;;  %v18385_v63 = vld [vmem:[%s20648_s8 + $0xe4] ss:$8 sps:$4 sm:$0xff]   ;;  %v18389_v1 = vld [vmem:[%s20648_s8 + $0xe0] ss:$8 sps:$4 sm:$0xff]  }
  0x96   : > { %12272 = vmatprep.mubr.bf16.mxu0 %v15541_v56  ;;  %v18384_v62 = vld [vmem:[%s20648_s8 + $0x12d0] ss:$8 sps:$4 sm:$0xff]   ;;  %v18387_v0 = vld [vmem:[%s20648_s8 + $0x12e4] ss:$8 sps:$4 sm:$0xff]   ;;  %v18390_v2 = vld [vmem:[%s20648_s8 + $0x12e0] ss:$8 sps:$4 sm:$0xff]  }
  0x97   : > { %10217 = vmatpush1.bf16.msra.mxu1 %v18335_v23  ;;  %v18391_v3 = vld [vmem:[%s20648_s8 + $0xf4] ss:$8 sps:$4 sm:$0xff]   ;;  %v18395_v5 = vld [vmem:[%s20648_s8 + $0xf0] ss:$8 sps:$4 sm:$0xff]   ;;  %v18399_v7 = vld [vmem:[%s20648_s8 + $0x104] ss:$8 sps:$4 sm:$0xff]  }
  0x98   : > { %12251 = vmatpush1.bf16.msra.mxu0 %v18336_v24  ;;  %10218 = vmatprep.subr.bf16.mxu1 %v18337_v25  ;;  %v18393_v4 = vld [vmem:[%s20648_s8 + $0x12f4] ss:$8 sps:$4 sm:$0xff]   ;;  %v18396_v6 = vld [vmem:[%s20648_s8 + $0x12f0] ss:$8 sps:$4 sm:$0xff]   ;;  %v18402_v8 = vld [vmem:[%s20648_s8 + $0x1304] ss:$8 sps:$4 sm:$0xff]  }
  0x99   : > { %12252 = vmatprep.subr.bf16.mxu0 %v18339_v26  ;;  %v292_v9 = vld [vmem:[%s20641_s30 + $0x40] sm:$0xff]  ;;  %v15406_v15 = vld [vmem:[%s20641_s30 + $0x2f0] sm:$0xff]  ;;  %vm15038_vm4 = vcmask (!%p16992_p12), 1045509   ;;  %vm15040_vm5 = vcmask (!%p16992_p12), 1046534   ;;  %vm15042_vm6 = vcmask (!%p16992_p12), 1047559  }
  0x9a   : > { %v18397_v10 = vld [vmem:[%s20648_s8 + $0x100] ss:$8 sps:$4 sm:$0xff]   ;;  %v15410_v16 = vld [vmem:[%s20641_s30 + $0x310] sm:$0xff]  ;;  %v18411_v23 = vld [vmem:[%s20648_s8 + $0x124] ss:$8 sps:$4 sm:$0xff]  }
  0x9b   : > { %10219 = vmatpush1.bf16.msra.mxu1 %v18341_v27  ;;  %v18400_v11 = vld [vmem:[%s20648_s8 + $0x1300] ss:$8 sps:$4 sm:$0xff]   ;;  %v18405_v17 = vld [vmem:[%s20648_s8 + $0x114] ss:$8 sps:$4 sm:$0xff]   ;;  %v15549_v20 = vcombine.high %v15406_v15, %v15410_v16  ;;  %v18403_v21 = vld [vmem:[%s20648_s8 + $0x110] ss:$8 sps:$4 sm:$0xff]  }
  0x9c   : > { %12253 = vmatpush1.bf16.msra.mxu0 %v18342_v28  ;;  %10220 = vmatprep.subr.bf16.mxu1 %v18343_v29  ;;  %v296_v14 = vld [vmem:[%s20641_s30 + $0x60] sm:$0xff]  ;;  %v18408_v18 = vld [vmem:[%s20648_s8 + $0x1314] ss:$8 sps:$4 sm:$0xff]   ;;  %v18406_v22 = vld [vmem:[%s20648_s8 + $0x1310] ss:$8 sps:$4 sm:$0xff]  }
  0x9d   : > { %12254 = vmatprep.subr.bf16.mxu0 %v18345_v30  ;;  %v20742_v19 = vcombine.high %v292_v9, %v296_v14  ;;  %v18414_v24 = vld [vmem:[%s20648_s8 + $0x1324] ss:$8 sps:$4 sm:$0xff]   ;;  %v18409_v25 = vld [vmem:[%s20648_s8 + $0x120] ss:$8 sps:$4 sm:$0xff]   ;;  %v20753_v29 = vcombine.low %v292_v9, %v296_v14  ;;  %v15548_v30 = vcombine.low %v15406_v15, %v15410_v16  ;;  %v15426_v48 = vld [vmem:[%s20641_s30 + $0x390] sm:$0xff] }
  0x9e   : > { %v18412_v26 = vld [vmem:[%s20648_s8 + $0x1320] ss:$8 sps:$4 sm:$0xff]   ;;  %v18432_v50 = vld [vmem:[%s20648_s8 + $0x1354] ss:$8 sps:$4 sm:$0xff]   ;;  %v18427_v53 = vld [vmem:[%s20648_s8 + $0x150] ss:$8 sps:$4 sm:$0xff]  }
  0x9f   : > { %10221 = vmatpush1.bf16.msra.mxu1 %v18347_v31  ;;  %v300_v27 = vld [vmem:[%s20641_s30 + $0x80] sm:$0xff]  ;;  %v15414_v31 = vld [vmem:[%s20641_s30 + $0x330] sm:$0xff] }
  0xa0   : > { %12255 = vmatpush1.bf16.msra.mxu0 %v18348_v32  ;;  %10222 = vmatprep.subr.bf16.mxu1 %v18349_v33  ;;  %v304_v28 = vld [vmem:[%s20641_s30 + $0xa0] sm:$0xff]  ;;  %v15418_v32 = vld [vmem:[%s20641_s30 + $0x350] sm:$0xff] }
  0xa1   : > { %12256 = vmatprep.subr.bf16.mxu0 %v18351_v34  ;;  %v18417_v33 = vld [vmem:[%s20648_s8 + $0x134] ss:$8 sps:$4 sm:$0xff]   ;;  %v18438_v56 = vld [vmem:[%s20648_s8 + $0x1364] ss:$8 sps:$4 sm:$0xff]   ;;  %v18445_v15 = vld [vmem:[%s20648_s8 + $0x180] ss:$8 sps:$4 sm:$0xff]  }
  0xa2   : > { %v18420_v34 = vld [vmem:[%s20648_s8 + $0x1334] ss:$8 sps:$4 sm:$0xff]   ;;  %v332_v9 = vld [vmem:[%s20641_s30 + $0x180] sm:$0xff] }
  0xa3   : > { %10223 = vmatpush1.bf16.msra.mxu1 %v18353_v35  ;;  %v20759_v35 = vcombine.high %v300_v27, %v304_v28  ;;  %v15450_v14 = vld [vmem:[%s20641_s30 + $0x450] sm:$0xff]  ;;  %v18448_v16 = vld [vmem:[%s20648_s8 + $0x1380] ss:$8 sps:$4 sm:$0xff]  }
  0xa4   : > { %12257 = vmatpush1.bf16.msra.mxu0 %v18354_v36  ;;  %10224 = vmatprep.subr.bf16.mxu1 %v18355_v37  ;;  %v15557_v36 = vcombine.high %v15414_v31, %v15418_v32  ;;  %v18415_v37 = vld [vmem:[%s20648_s8 + $0x130] ss:$8 sps:$4 sm:$0xff]  }
  0xa5   : > { %12258 = vmatprep.subr.bf16.mxu0 %v18357_v38  ;;  %v18418_v38 = vld [vmem:[%s20648_s8 + $0x1330] ss:$8 sps:$4 sm:$0xff]  }
  0xa7   : > { %10225 = vmatpush1.bf16.msra.mxu1 %v18359_v39  ;;  %v18423_v39 = vld [vmem:[%s20648_s8 + $0x144] ss:$8 sps:$4 sm:$0xff]  }
  0xa8   : > { %12259 = vmatpush1.bf16.msra.mxu0 %v18360_v40  ;;  %10226 = vmatprep.subr.bf16.mxu1 %v18361_v41  ;;  %v18426_v40 = vld [vmem:[%s20648_s8 + $0x1344] ss:$8 sps:$4 sm:$0xff]   ;;  %v18421_v41 = vld [vmem:[%s20648_s8 + $0x140] ss:$8 sps:$4 sm:$0xff]  }
  0xa9   : > { %12260 = vmatprep.subr.bf16.mxu0 %v18363_v42  ;;  %v18424_v42 = vld [vmem:[%s20648_s8 + $0x1340] ss:$8 sps:$4 sm:$0xff]  }
  0xab   : > { %10227 = vmatpush1.bf16.msra.mxu1 %v18365_v43  ;;  %v308_v43 = vld [vmem:[%s20641_s30 + $0xc0] sm:$0xff] }
  0xac   : > { %12261 = vmatpush1.bf16.msra.mxu0 %v18366_v44  ;;  %10228 = vmatprep.subr.bf16.mxu1 %v18367_v45  ;;  %v312_v44 = vld [vmem:[%s20641_s30 + $0xe0] sm:$0xff]  ;;  %v20771_v45 = vcombine.low %v300_v27, %v304_v28 }
  0xad   : > { %12262 = vmatprep.subr.bf16.mxu0 %v18369_v46  ;;  %v15556_v46 = vcombine.low %v15414_v31, %v15418_v32  ;;  %v20777_v51 = vcombine.high %v308_v43, %v312_v44  ;;  %v18460_v27 = vld [vmem:[%s20648_s8 + $0x13a0] ss:$8 sps:$4 sm:$0xff]  }
  0xae   : > { %v340_v28 = vld [vmem:[%s20641_s30 + $0x1c0] sm:$0xff] }
  0xaf   : > { %10229 = vmatpush1.bf16.msra.mxu1 %v18371_v47  ;;  %v15422_v47 = vld [vmem:[%s20641_s30 + $0x370] sm:$0xff]  ;;  %v344_v32 = vld [vmem:[%s20641_s30 + $0x1e0] sm:$0xff] }
  0xb0   : > { %12263 = vmatpush1.bf16.msra.mxu0 %v18372_v49  ;;  %10230 = vmatprep.subr.bf16.mxu1 %v18373_v54  ;;  %v18429_v49 = vld [vmem:[%s20648_s8 + $0x154] ss:$8 sps:$4 sm:$0xff]   ;;  %v15565_v52 = vcombine.high %v15422_v47, %v15426_v48  ;;  %v18430_v54 = vld [vmem:[%s20648_s8 + $0x1350] ss:$8 sps:$4 sm:$0xff]  }
  0xb1   : > { %12264 = vmatprep.subr.bf16.mxu0 %v18375_v55  ;;  %v18435_v55 = vld [vmem:[%s20648_s8 + $0x164] ss:$8 sps:$4 sm:$0xff]  }
  0xb3   : > { %10231 = vmatpush1.bf16.msra.mxu1 %v18377_v57  ;;  %v18433_v57 = vld [vmem:[%s20648_s8 + $0x160] ss:$8 sps:$4 sm:$0xff]  }
  0xb4   : > { %12265 = vmatpush1.bf16.msra.mxu0 %v18378_v58  ;;  %10232 = vmatprep.subr.bf16.mxu1 %v18379_v59  ;;  %v324_v58 = vld [vmem:[%s20641_s30 + $0x140] sm:$0xff] }
  0xb5   : > { %12266 = vmatprep.subr.bf16.mxu0 %v18381_v60  ;;  %v328_v59 = vld [vmem:[%s20641_s30 + $0x160] sm:$0xff]  ;;  %v20788_v60 = vcombine.low %v308_v43, %v312_v44 }
  0xb6   : > { %v18474_v43 = vld [vmem:[%s20648_s8 + $0x13c4] ss:$8 sps:$4 sm:$0xff]   ;;  %v18469_v44 = vld [vmem:[%s20648_s8 + $0x1c0] ss:$8 sps:$4 sm:$0xff]  }
  0xb7   : > { %10233 = vmatpush1.bf16.msra.mxu1 %v18383_v61  ;;  %v15564_v61 = vcombine.low %v15422_v47, %v15426_v48  ;;  %v348_v47 = vld [vmem:[%s20641_s30 + $0x200] sm:$0xff] }
  0xb8   : > { %12267 = vmatpush1.bf16.msra.mxu0 %v18384_v62  ;;  %10234 = vmatprep.subr.bf16.mxu1 %v18385_v63  ;;  %v15438_v62 = vld [vmem:[%s20641_s30 + $0x3f0] sm:$0xff]  ;;  %v352_v48 = vld [vmem:[%s20641_s30 + $0x220] sm:$0xff] }
  0xb9   : > { %12268 = vmatprep.subr.bf16.mxu0 %v18387_v0  ;;  %v15442_v63 = vld [vmem:[%s20641_s30 + $0x410] sm:$0xff]  ;;  %v18436_v0 = vld [vmem:[%s20648_s8 + $0x1360] ss:$8 sps:$4 sm:$0xff]  }
  0xbb   : > { %10235 = vmatpush1.bf16.msra.mxu1 %v18389_v1  ;;  %v18441_v1 = vld [vmem:[%s20648_s8 + $0x174] ss:$8 sps:$4 sm:$0xff]  }
  0xbc   : > { %12269 = vmatpush1.bf16.msra.mxu0 %v18390_v2  ;;  %10236 = vmatprep.subr.bf16.mxu1 %v18391_v3  ;;  %v18444_v2 = vld [vmem:[%s20648_s8 + $0x1374] ss:$8 sps:$4 sm:$0xff]   ;;  %v15281_v3 = vcombine.high %v324_v58, %v328_v59 }
  0xbd   : > { %12270 = vmatprep.subr.bf16.mxu0 %v18393_v4  ;;  %v15573_v4 = vcombine.high %v15438_v62, %v15442_v63 }
  0xbf   : > { %10237 = vmatpush1.bf16.msra.mxu1 %v18395_v5  ;;  %v18439_v5 = vld [vmem:[%s20648_s8 + $0x170] ss:$8 sps:$4 sm:$0xff]  }
  0xc0   : > { %12271 = vmatpush1.bf16.msra.mxu0 %v18396_v6  ;;  %10319 = vmatprep.subr.bf16.mxu1 %v18399_v7  ;;  %v18442_v6 = vld [vmem:[%s20648_s8 + $0x1370] ss:$8 sps:$4 sm:$0xff]   ;;  %v18447_v7 = vld [vmem:[%s20648_s8 + $0x184] ss:$8 sps:$4 sm:$0xff]  }
  0xc1   : > { %12353 = vmatprep.subr.bf16.mxu0 %v18402_v8  ;;  %v18450_v8 = vld [vmem:[%s20648_s8 + $0x1384] ss:$8 sps:$4 sm:$0xff]  }
  0xc2   : > { %10239 = vmatmul.mubr.bf16.vlgmr.msra.gmra.mrb[0].mxu1 %v15248_v12  ;;  %v15572_v12 = vcombine.low %v15438_v62, %v15442_v63  ;;  %v18486_v62 = vld [vmem:[%s20648_s8 + $0x13e4] ss:$8 sps:$4 sm:$0xff]   ;;  %v18481_v63 = vld [vmem:[%s20648_s8 + $0x1e0] ss:$8 sps:$4 sm:$0xff]  }
  0xc3   : > { %12273 = vmatmul.mubr.bf16.vlgmr.msra.gmra.mrb[0].mxu0 %v15540_v13  ;;  %10320 = vmatpush1.bf16.msra.mxu1 %v18397_v10  ;;  %v336_v10 = vld [vmem:[%s20641_s30 + $0x1a0] sm:$0xff]  ;;  %v15446_v13 = vld [vmem:[%s20641_s30 + $0x430] sm:$0xff] }
  0xc4   : > { %12354 = vmatpush1.bf16.msra.mxu0 %v18400_v11  ;;  %10321 = vmatprep.subr.bf16.mxu1 %v18405_v17  ;;  %v15280_v11 = vcombine.low %v324_v58, %v328_v59  ;;  %v18453_v17 = vld [vmem:[%s20648_s8 + $0x194] ss:$8 sps:$4 sm:$0xff]   ;;  %v15580_v31 = vcombine.low %v15446_v13, %v15450_v14  ;;  %v18475_v58 = vld [vmem:[%s20648_s8 + $0x1d0] ss:$8 sps:$4 sm:$0xff]  }
  0xc5   : > { %12355 = vmatprep.subr.bf16.mxu0 %v18408_v18  ;;  %10248 = vmatprep.mubr.bf16.mxu1 %v20742_v19  ;;  %v18456_v18 = vld [vmem:[%s20648_s8 + $0x1394] ss:$8 sps:$4 sm:$0xff]   ;;  %v18478_v59 = vld [vmem:[%s20648_s8 + $0x13d0] ss:$8 sps:$4 sm:$0xff]  }
  0xc6   : > { %12282 = vmatprep.mubr.bf16.mxu0 %v15549_v20  ;;  %v20808_v20 = vcombine.high %v332_v9, %v336_v10 }
  0xc7   : > { %10322 = vmatpush1.bf16.msra.mxu1 %v18403_v21  ;;  %v15581_v21 = vcombine.high %v15446_v13, %v15450_v14  ;;  %v18495_v13 = vld [vmem:[%s20648_s8 + $0x204] ss:$8 sps:$4 sm:$0xff]  }
  0xc8   : > { %12356 = vmatpush1.bf16.msra.mxu0 %v18406_v22  ;;  %10323 = vmatprep.subr.bf16.mxu1 %v18411_v23  ;;  %v18451_v22 = vld [vmem:[%s20648_s8 + $0x190] ss:$8 sps:$4 sm:$0xff]   ;;  %v18498_v14 = vld [vmem:[%s20648_s8 + $0x1404] ss:$8 sps:$4 sm:$0xff]  }
  0xc9   : > { %12357 = vmatprep.subr.bf16.mxu0 %v18414_v24  ;;  %v18454_v23 = vld [vmem:[%s20648_s8 + $0x1390] ss:$8 sps:$4 sm:$0xff]   ;;  %v18459_v24 = vld [vmem:[%s20648_s8 + $0x1a4] ss:$8 sps:$4 sm:$0xff]  }
  0xca   : > { %10249 = vmatmul.mubr.bf16.gmra.mrb[4].mxu1 %v20753_v29 }
  0xcb   : > { %12283 = vmatmul.mubr.bf16.gmra.mrb[4].mxu0 %v15548_v30  ;;  %10324 = vmatpush1.bf16.msra.mxu1 %v18409_v25  ;;  %v18462_v25 = vld [vmem:[%s20648_s8 + $0x13a4] ss:$8 sps:$4 sm:$0xff]   ;;  %v20818_v30 = vcombine.low %v332_v9, %v336_v10 }
  0xcc   : > { %12358 = vmatpush1.bf16.msra.mxu0 %v18412_v26  ;;  %10325 = vmatprep.subr.bf16.mxu1 %v18417_v33  ;;  %v18457_v26 = vld [vmem:[%s20648_s8 + $0x1a0] ss:$8 sps:$4 sm:$0xff]   ;;  %v15454_v33 = vld [vmem:[%s20641_s30 + $0x470] sm:$0xff] }
  0xcd   : > { %12359 = vmatprep.subr.bf16.mxu0 %v18420_v34  ;;  %10258 = vmatprep.mubr.bf16.mxu1 %v20759_v35  ;;  %v15458_v34 = vld [vmem:[%s20641_s30 + $0x490] sm:$0xff] }
  0xce   : > { %12292 = vmatprep.mubr.bf16.mxu0 %v15557_v36  ;;  %v18465_v36 = vld [vmem:[%s20648_s8 + $0x1b4] ss:$8 sps:$4 sm:$0xff]  }
  0xcf   : > { %10326 = vmatpush1.bf16.msra.mxu1 %v18415_v37  ;;  %v18468_v37 = vld [vmem:[%s20648_s8 + $0x13b4] ss:$8 sps:$4 sm:$0xff]  }
  0xd0   : > { %12360 = vmatpush1.bf16.msra.mxu0 %v18418_v38  ;;  %10327 = vmatprep.subr.bf16.mxu1 %v18423_v39  ;;  %v20825_v38 = vcombine.high %v340_v28, %v344_v32  ;;  %v15589_v39 = vcombine.high %v15454_v33, %v15458_v34 }
  0xd1   : > { %12361 = vmatprep.subr.bf16.mxu0 %v18426_v40  ;;  %v18463_v40 = vld [vmem:[%s20648_s8 + $0x1b0] ss:$8 sps:$4 sm:$0xff]  }
  0xd2   : > { %10259 = vmatmul.mubr.bf16.gmra.mrb[8].mxu1 %v20771_v45 }
  0xd3   : > { %12293 = vmatmul.mubr.bf16.gmra.mrb[8].mxu0 %v15556_v46  ;;  %10328 = vmatpush1.bf16.msra.mxu1 %v18421_v41  ;;  %v18466_v41 = vld [vmem:[%s20648_s8 + $0x13b0] ss:$8 sps:$4 sm:$0xff]   ;;  %v18472_v46 = vld [vmem:[%s20648_s8 + $0x13c0] ss:$8 sps:$4 sm:$0xff]  }
  0xd4   : > { %12362 = vmatpush1.bf16.msra.mxu0 %v18424_v42  ;;  %10329 = vmatprep.subr.bf16.mxu1 %v18429_v49  ;;  %v18471_v42 = vld [vmem:[%s20648_s8 + $0x1c4] ss:$8 sps:$4 sm:$0xff]   ;;  %v20837_v49 = vcombine.low %v340_v28, %v344_v32  ;;  %v18502_v32 = vld [vmem:[%s20648_s8 + $0x1410] ss:$8 sps:$4 sm:$0xff]  }
  0xd5   : > { %12363 = vmatprep.subr.bf16.mxu0 %v18432_v50  ;;  %10268 = vmatprep.mubr.bf16.mxu1 %v20777_v51  ;;  %v15588_v50 = vcombine.low %v15454_v33, %v15458_v34  ;;  %v18507_v33 = vld [vmem:[%s20648_s8 + $0x224] ss:$8 sps:$4 sm:$0xff]  }
  0xd6   : > { %12302 = vmatprep.mubr.bf16.mxu0 %v15565_v52  ;;  %v15462_v52 = vld [vmem:[%s20641_s30 + $0x4b0] sm:$0xff]  ;;  %v18510_v34 = vld [vmem:[%s20648_s8 + $0x1424] ss:$8 sps:$4 sm:$0xff]  }
  0xd7   : > { %10330 = vmatpush1.bf16.msra.mxu1 %v18427_v53  ;;  %v15466_v53 = vld [vmem:[%s20641_s30 + $0x4d0] sm:$0xff] }
  0xd8   : > { %12364 = vmatpush1.bf16.msra.mxu0 %v18430_v54  ;;  %10331 = vmatprep.subr.bf16.mxu1 %v18435_v55  ;;  %v18477_v54 = vld [vmem:[%s20648_s8 + $0x1d4] ss:$8 sps:$4 sm:$0xff]  }
  0xd9   : > { %12365 = vmatprep.subr.bf16.mxu0 %v18438_v56  ;;  %v18480_v55 = vld [vmem:[%s20648_s8 + $0x13d4] ss:$8 sps:$4 sm:$0xff]   ;;  %v20843_v56 = vcombine.high %v348_v47, %v352_v48 }
  0xda   : > { %10269 = vmatmul.mubr.bf16.gmra.mrb[12].mxu1 %v20788_v60 }
  0xdb   : > { %12303 = vmatmul.mubr.bf16.gmra.mrb[12].mxu0 %v15564_v61  ;;  %10332 = vmatpush1.bf16.msra.mxu1 %v18433_v57  ;;  %v15597_v57 = vcombine.high %v15462_v52, %v15466_v53  ;;  %v18483_v61 = vld [vmem:[%s20648_s8 + $0x1e4] ss:$8 sps:$4 sm:$0xff]  }
  0xdc   : > { %12366 = vmatpush1.bf16.msra.mxu0 %v18436_v0  ;;  %10333 = vmatprep.subr.bf16.mxu1 %v18441_v1  ;;  %v18484_v0 = vld [vmem:[%s20648_s8 + $0x13e0] ss:$8 sps:$4 sm:$0xff]  }
  0xdd   : > { %12367 = vmatprep.subr.bf16.mxu0 %v18444_v2  ;;  %10278 = vmatprep.mubr.bf16.mxu1 %v15281_v3  ;;  %v285_v1 = vld [vmem:[%s20641_s30 + $0x8] sm:$0xff]  ;;  %v20855_v3 = vcombine.low %v348_v47, %v352_v48  ;;  %v18516_v47 = vld [vmem:[%s20648_s8 + $0x1434] ss:$8 sps:$4 sm:$0xff]  }
  0xde   : > { %12312 = vmatprep.mubr.bf16.mxu0 %v15573_v4  ;;  %v289_v2 = vld [vmem:[%s20641_s30 + $0x28] sm:$0xff]  ;;  %v15596_v4 = vcombine.low %v15462_v52, %v15466_v53  ;;  %v18511_v52 = vld [vmem:[%s20648_s8 + $0x230] ss:$8 sps:$4 sm:$0xff]  }
  0xdf   : > { %10334 = vmatpush1.bf16.msra.mxu1 %v18439_v5  ;;  %v15399_v5 = vld [vmem:[%s20641_s30 + $0x2b8] sm:$0xff]  ;;  %v15251_v9 = vcombine.high %v285_v1, %v289_v2 }
  0xe0   : > { %12368 = vmatpush1.bf16.msra.mxu0 %v18442_v6  ;;  %10335 = vmatprep.subr.bf16.mxu1 %v18447_v7  ;;  %v15403_v6 = vld [vmem:[%s20641_s30 + $0x2d8] sm:$0xff] }
  0xe1   : > { %12369 = vmatprep.subr.bf16.mxu0 %v18450_v8  ;;  %v18489_v7 = vld [vmem:[%s20648_s8 + $0x1f4] ss:$8 sps:$4 sm:$0xff]   ;;  %v15543_v10 = vcombine.high %v15399_v5, %v15403_v6  ;;  %v18514_v53 = vld [vmem:[%s20648_s8 + $0x1430] ss:$8 sps:$4 sm:$0xff]  }
  0xe2   : > { %10279 = vmatmul.mubr.bf16.gmra.mrb[16].mxu1 %v15280_v11  ;;  %v18492_v8 = vld [vmem:[%s20648_s8 + $0x13f4] ss:$8 sps:$4 sm:$0xff]   ;;  %v18487_v11 = vld [vmem:[%s20648_s8 + $0x1f0] ss:$8 sps:$4 sm:$0xff]  }
  0xe3   : > { %12313 = vmatmul.mubr.bf16.gmra.mrb[16].mxu0 %v15572_v12  ;;  %10336 = vmatpush1.bf16.msra.mxu1 %v18445_v15  ;;  %v18490_v12 = vld [vmem:[%s20648_s8 + $0x13f0] ss:$8 sps:$4 sm:$0xff]   ;;  %v18493_v15 = vld [vmem:[%s20648_s8 + $0x200] ss:$8 sps:$4 sm:$0xff]  }
  0xe4   : > { %12370 = vmatpush1.bf16.msra.mxu0 %v18448_v16  ;;  %10337 = vmatprep.subr.bf16.mxu1 %v18453_v17  ;;  %v293_v16 = vld [vmem:[%s20641_s30 + $0x48] sm:$0xff] }
  0xe5   : > { %12371 = vmatprep.subr.bf16.mxu0 %v18456_v18  ;;  %10288 = vmatprep.mubr.bf16.mxu1 %v20808_v20  ;;  %v297_v17 = vld [vmem:[%s20641_s30 + $0x68] sm:$0xff]  ;;  %v15250_v18 = vcombine.low %v285_v1, %v289_v2  ;;  %v15427_v1 = vld [vmem:[%s20641_s30 + $0x398] sm:$0xff] }
  0xe6   : > { %12322 = vmatprep.mubr.bf16.mxu0 %v15581_v21  ;;  %v15542_v21 = vcombine.low %v15399_v5, %v15403_v6  ;;  %v18525_v2 = vld [vmem:[%s20648_s8 + $0x254] ss:$8 sps:$4 sm:$0xff]  }
  0xe7   : > { %10338 = vmatpush1.bf16.msra.mxu1 %v18451_v22  ;;  %v15407_v22 = vld [vmem:[%s20641_s30 + $0x2f8] sm:$0xff] }
  0xe8   : > { %12372 = vmatpush1.bf16.msra.mxu0 %v18454_v23  ;;  %10339 = vmatprep.subr.bf16.mxu1 %v18459_v24  ;;  %v15411_v23 = vld [vmem:[%s20641_s30 + $0x318] sm:$0xff]  ;;  %v18496_v24 = vld [vmem:[%s20648_s8 + $0x1400] ss:$8 sps:$4 sm:$0xff]  }
  0xe9   : > { %12373 = vmatprep.subr.bf16.mxu0 %v18462_v25  ;;  %v18501_v25 = vld [vmem:[%s20648_s8 + $0x214] ss:$8 sps:$4 sm:$0xff]   ;;  %v15551_v28 = vcombine.high %v15407_v22, %v15411_v23 }
  0xea   : > { %10289 = vmatmul.mubr.bf16.gmra.mrb[20].mxu1 %v20818_v30 }
  0xeb   : > { %12323 = vmatmul.mubr.bf16.gmra.mrb[20].mxu0 %v15580_v31  ;;  %10340 = vmatpush1.bf16.msra.mxu1 %v18457_v26  ;;  %v18504_v26 = vld [vmem:[%s20648_s8 + $0x1414] ss:$8 sps:$4 sm:$0xff]   ;;  %v18499_v31 = vld [vmem:[%s20648_s8 + $0x210] ss:$8 sps:$4 sm:$0xff]  }
  0xec   : > { %12374 = vmatpush1.bf16.msra.mxu0 %v18460_v27  ;;  %10341 = vmatprep.subr.bf16.mxu1 %v18465_v36  ;;  %v20874_v27 = vcombine.high %v293_v16, %v297_v17  ;;  %v301_v36 = vld [vmem:[%s20641_s30 + $0x88] sm:$0xff] }
  0xed   : > { %12375 = vmatprep.subr.bf16.mxu0 %v18468_v37  ;;  %10298 = vmatprep.mubr.bf16.mxu1 %v20825_v38  ;;  %v305_v37 = vld [vmem:[%s20641_s30 + $0xa8] sm:$0xff] }
  0xee   : > { %12332 = vmatprep.mubr.bf16.mxu0 %v15589_v39  ;;  %v20883_v39 = vcombine.low %v293_v16, %v297_v17  ;;  %v20891_v48 = vcombine.high %v301_v36, %v305_v37  ;;  %v15439_v17 = vld [vmem:[%s20641_s30 + $0x3f8] sm:$0xff] }
  0xef   : > { %10342 = vmatpush1.bf16.msra.mxu1 %v18463_v40  ;;  %v15550_v40 = vcombine.low %v15407_v22, %v15411_v23  ;;  %v18540_v22 = vld [vmem:[%s20648_s8 + $0x1474] ss:$8 sps:$4 sm:$0xff]  }
  0xf0   : > { %12376 = vmatpush1.bf16.msra.mxu0 %v18466_v41  ;;  %10343 = vmatprep.subr.bf16.mxu1 %v18471_v42  ;;  %v15415_v41 = vld [vmem:[%s20641_s30 + $0x338] sm:$0xff] }
  0xf1   : > { %12377 = vmatprep.subr.bf16.mxu0 %v18474_v43  ;;  %v15419_v42 = vld [vmem:[%s20641_s30 + $0x358] sm:$0xff]  ;;  %v18505_v43 = vld [vmem:[%s20648_s8 + $0x220] ss:$8 sps:$4 sm:$0xff]  }
  0xf2   : > { %10299 = vmatmul.mubr.bf16.gmra.mrb[24].mxu1 %v20837_v49 }
  0xf3   : > { %12333 = vmatmul.mubr.bf16.gmra.mrb[24].mxu0 %v15588_v50  ;;  %10344 = vmatpush1.bf16.msra.mxu1 %v18469_v44  ;;  %v18508_v44 = vld [vmem:[%s20648_s8 + $0x1420] ss:$8 sps:$4 sm:$0xff]   ;;  %v15559_v50 = vcombine.high %v15415_v41, %v15419_v42 }
  0xf4   : > { %12378 = vmatpush1.bf16.msra.mxu0 %v18472_v46  ;;  %10345 = vmatprep.subr.bf16.mxu1 %v18477_v54  ;;  %v18513_v46 = vld [vmem:[%s20648_s8 + $0x234] ss:$8 sps:$4 sm:$0xff]   ;;  %v18519_v54 = vld [vmem:[%s20648_s8 + $0x244] ss:$8 sps:$4 sm:$0xff]  }
  0xf5   : > { %12379 = vmatprep.subr.bf16.mxu0 %v18480_v55  ;;  %10308 = vmatprep.mubr.bf16.mxu1 %v20843_v56  ;;  %v18522_v55 = vld [vmem:[%s20648_s8 + $0x1444] ss:$8 sps:$4 sm:$0xff]  }
  0xf6   : > { %12342 = vmatprep.mubr.bf16.mxu0 %v15597_v57  ;;  %v18517_v57 = vld [vmem:[%s20648_s8 + $0x240] ss:$8 sps:$4 sm:$0xff]  }
  0xf7   : > { %10346 = vmatpush1.bf16.msra.mxu1 %v18475_v58  ;;  %v18520_v58 = vld [vmem:[%s20648_s8 + $0x1440] ss:$8 sps:$4 sm:$0xff]  }
  0xf8   : > { %12380 = vmatpush1.bf16.msra.mxu0 %v18478_v59  ;;  %10347 = vmatprep.subr.bf16.mxu1 %v18483_v61  ;;  %v309_v59 = vld [vmem:[%s20641_s30 + $0xc8] sm:$0xff]  ;;  %v20902_v61 = vcombine.low %v301_v36, %v305_v37 }
  0xf9   : > { %12381 = vmatprep.subr.bf16.mxu0 %v18486_v62  ;;  %v15558_v62 = vcombine.low %v15415_v41, %v15419_v42  ;;  %v337_v36 = vld [vmem:[%s20641_s30 + $0x1a8] sm:$0xff]  ;;  %v15447_v41 = vld [vmem:[%s20641_s30 + $0x438] sm:$0xff] }
  0xfa   : > { %10309 = vmatmul.mubr.bf16.gmra.mrb[28].mxu1 %v20855_v3  ;;  %v15451_v42 = vld [vmem:[%s20641_s30 + $0x458] sm:$0xff] }
  0xfb   : > { %12343 = vmatmul.mubr.bf16.gmra.mrb[28].mxu0 %v15596_v4  ;;  %10348 = vmatpush1.bf16.msra.mxu1 %v18481_v63  ;;  %v313_v63 = vld [vmem:[%s20641_s30 + $0xe8] sm:$0xff]  ;;  %v18528_v4 = vld [vmem:[%s20648_s8 + $0x1454] ss:$8 sps:$4 sm:$0xff]  }
  0xfc   : > { %12382 = vmatpush1.bf16.msra.mxu0 %v18484_v0  ;;  %10349 = vmatprep.subr.bf16.mxu1 %v18489_v7  ;;  %v15423_v0 = vld [vmem:[%s20641_s30 + $0x378] sm:$0xff]  ;;  %v20909_v5 = vcombine.high %v309_v59, %v313_v63 }
  0xfd   : > { %12383 = vmatprep.subr.bf16.mxu0 %v18492_v8  ;;  %10351 = vmatprep.mubr.bf16.mxu1 %v15251_v9  ;;  %v15567_v6 = vcombine.high %v15423_v0, %v15427_v1  ;;  %v18523_v7 = vld [vmem:[%s20648_s8 + $0x250] ss:$8 sps:$4 sm:$0xff]   ;;  %v18531_v9 = vld [vmem:[%s20648_s8 + $0x264] ss:$8 sps:$4 sm:$0xff]   ;;  %v15566_v16 = vcombine.low %v15423_v0, %v15427_v1  ;;  %v18556_v1 = vld [vmem:[%s20648_s8 + $0x14a0] ss:$8 sps:$4 sm:$0xff]  }
  0xfe   : > { %12385 = vmatprep.mubr.bf16.mxu0 %v15543_v10  ;;  %v18526_v8 = vld [vmem:[%s20648_s8 + $0x1450] ss:$8 sps:$4 sm:$0xff]   ;;  %v18534_v10 = vld [vmem:[%s20648_s8 + $0x1464] ss:$8 sps:$4 sm:$0xff]  }
  0xff   : > { %10350 = vmatpush1.bf16.msra.mxu1 %v18487_v11  ;;  %v18529_v11 = vld [vmem:[%s20648_s8 + $0x260] ss:$8 sps:$4 sm:$0xff]   ;;  %v15459_v0 = vld [vmem:[%s20641_s30 + $0x498] sm:$0xff] }
 0x100   : > { %12384 = vmatpush1.bf16.msra.mxu0 %v18490_v12  ;;  %10432 = vmatprep.subr.bf16.mxu1 %v18495_v13  ;;  %v18532_v12 = vld [vmem:[%s20648_s8 + $0x1460] ss:$8 sps:$4 sm:$0xff]  }
 0x101   : > { %12466 = vmatprep.subr.bf16.mxu0 %v18498_v14  ;;  %v325_v13 = vld [vmem:[%s20641_s30 + $0x148] sm:$0xff] }
 0x102   : > { %10352 = vmatmul.mubr.bf16.vlgmr.msra.gmra.mrb[0].mxu1 %v15250_v18  ;;  %v329_v14 = vld [vmem:[%s20641_s30 + $0x168] sm:$0xff]  ;;  %v15443_v18 = vld [vmem:[%s20641_s30 + $0x418] sm:$0xff] }
 0x103   : > { %12386 = vmatmul.mubr.bf16.vlgmr.msra.gmra.mrb[0].mxu0 %v15542_v21  ;;  %10433 = vmatpush1.bf16.msra.mxu1 %v18493_v15  ;;  %v20921_v15 = vcombine.low %v309_v59, %v313_v63  ;;  %v18537_v21 = vld [vmem:[%s20648_s8 + $0x274] ss:$8 sps:$4 sm:$0xff]   ;;  %v15283_v23 = vcombine.high %v325_v13, %v329_v14  ;;  %v15282_v37 = vcombine.low %v325_v13, %v329_v14  ;;  %v353_v13 = vld [vmem:[%s20641_s30 + $0x228] sm:$0xff] }
 0x104   : > { %12467 = vmatpush1.bf16.msra.mxu0 %v18496_v24  ;;  %10434 = vmatprep.subr.bf16.mxu1 %v18501_v25  ;;  %v15575_v24 = vcombine.high %v15439_v17, %v15443_v18  ;;  %v18535_v25 = vld [vmem:[%s20648_s8 + $0x270] ss:$8 sps:$4 sm:$0xff]  }
 0x105   : > { %12468 = vmatprep.subr.bf16.mxu0 %v18504_v26  ;;  %10361 = vmatprep.mubr.bf16.mxu1 %v20874_v27  ;;  %v18538_v26 = vld [vmem:[%s20648_s8 + $0x1470] ss:$8 sps:$4 sm:$0xff]  }
 0x106   : > { %12395 = vmatprep.mubr.bf16.mxu0 %v15551_v28  ;;  %v18543_v28 = vld [vmem:[%s20648_s8 + $0x284] ss:$8 sps:$4 sm:$0xff]   ;;  %v15455_v63 = vld [vmem:[%s20641_s30 + $0x478] sm:$0xff] }
 0x107   : > { %10435 = vmatpush1.bf16.msra.mxu1 %v18499_v31  ;;  %v18546_v31 = vld [vmem:[%s20648_s8 + $0x1484] ss:$8 sps:$4 sm:$0xff]  }
 0x108   : > { %12469 = vmatpush1.bf16.msra.mxu0 %v18502_v32  ;;  %10436 = vmatprep.subr.bf16.mxu1 %v18507_v33  ;;  %v18541_v32 = vld [vmem:[%s20648_s8 + $0x280] ss:$8 sps:$4 sm:$0xff]  }
 0x109   : > { %12470 = vmatprep.subr.bf16.mxu0 %v18510_v34  ;;  %v18544_v33 = vld [vmem:[%s20648_s8 + $0x1480] ss:$8 sps:$4 sm:$0xff]  }
 0x10a   : > { %10362 = vmatmul.mubr.bf16.gmra.mrb[4].mxu1 %v20883_v39  ;;  %v333_v34 = vld [vmem:[%s20641_s30 + $0x188] sm:$0xff] }
 0x10b   : > { %12396 = vmatmul.mubr.bf16.gmra.mrb[4].mxu0 %v15550_v40  ;;  %10437 = vmatpush1.bf16.msra.mxu1 %v18505_v43  ;;  %v15574_v40 = vcombine.low %v15439_v17, %v15443_v18  ;;  %v18549_v43 = vld [vmem:[%s20648_s8 + $0x294] ss:$8 sps:$4 sm:$0xff]   ;;  %v20950_v59 = vcombine.low %v333_v34, %v337_v36 }
 0x10c   : > { %12471 = vmatpush1.bf16.msra.mxu0 %v18508_v44  ;;  %10438 = vmatprep.subr.bf16.mxu1 %v18513_v46  ;;  %v18552_v44 = vld [vmem:[%s20648_s8 + $0x1494] ss:$8 sps:$4 sm:$0xff]   ;;  %v20940_v46 = vcombine.high %v333_v34, %v337_v36  ;;  %v18577_v34 = vld [vmem:[%s20648_s8 + $0x2e0] ss:$8 sps:$4 sm:$0xff]  }
 0x10d   : > { %12472 = vmatprep.subr.bf16.mxu0 %v18516_v47  ;;  %10371 = vmatprep.mubr.bf16.mxu1 %v20891_v48  ;;  %v15583_v47 = vcombine.high %v15447_v41, %v15451_v42  ;;  %v15463_v17 = vld [vmem:[%s20641_s30 + $0x4b8] sm:$0xff]  ;;  %v18580_v36 = vld [vmem:[%s20648_s8 + $0x14e0] ss:$8 sps:$4 sm:$0xff]  }
 0x10e   : > { %12405 = vmatprep.mubr.bf16.mxu0 %v15559_v50  ;;  %v18547_v50 = vld [vmem:[%s20648_s8 + $0x290] ss:$8 sps:$4 sm:$0xff]  }
 0x10f   : > { %10439 = vmatpush1.bf16.msra.mxu1 %v18511_v52  ;;  %v18550_v52 = vld [vmem:[%s20648_s8 + $0x1490] ss:$8 sps:$4 sm:$0xff]  }
 0x110   : > { %12473 = vmatpush1.bf16.msra.mxu0 %v18514_v53  ;;  %10440 = vmatprep.subr.bf16.mxu1 %v18519_v54  ;;  %v18555_v53 = vld [vmem:[%s20648_s8 + $0x2a4] ss:$8 sps:$4 sm:$0xff]   ;;  %v15467_v18 = vld [vmem:[%s20641_s30 + $0x4d8] sm:$0xff] }
 0x111   : > { %12474 = vmatprep.subr.bf16.mxu0 %v18522_v55  ;;  %v18558_v54 = vld [vmem:[%s20648_s8 + $0x14a4] ss:$8 sps:$4 sm:$0xff]   ;;  %v18553_v55 = vld [vmem:[%s20648_s8 + $0x2a0] ss:$8 sps:$4 sm:$0xff]  }
 0x112   : > { %10372 = vmatmul.mubr.bf16.gmra.mrb[8].mxu1 %v20902_v61 }
 0x113   : > { %12406 = vmatmul.mubr.bf16.gmra.mrb[8].mxu0 %v15558_v62  ;;  %10441 = vmatpush1.bf16.msra.mxu1 %v18517_v57  ;;  %v341_v57 = vld [vmem:[%s20641_s30 + $0x1c8] sm:$0xff]  ;;  %v15582_v62 = vcombine.low %v15447_v41, %v15451_v42  ;;  %v15598_v41 = vcombine.low %v15463_v17, %v15467_v18  ;;  %v290_v42 = vld [vmem:[%s20641_s30 + $0x30] sm:$0xff] }
 0x114   : > { %12475 = vmatpush1.bf16.msra.mxu0 %v18520_v58  ;;  %10442 = vmatprep.subr.bf16.mxu1 %v18525_v2  ;;  %v345_v58 = vld [vmem:[%s20641_s30 + $0x1e8] sm:$0xff]  ;;  %v18561_v2 = vld [vmem:[%s20648_s8 + $0x2b4] ss:$8 sps:$4 sm:$0xff]  }
 0x115   : > { %12476 = vmatprep.subr.bf16.mxu0 %v18528_v4  ;;  %10381 = vmatprep.mubr.bf16.mxu1 %v20909_v5  ;;  %v18564_v4 = vld [vmem:[%s20648_s8 + $0x14b4] ss:$8 sps:$4 sm:$0xff]   ;;  %v20967_v14 = vcombine.low %v341_v57, %v345_v58 }
 0x116   : > { %12415 = vmatprep.mubr.bf16.mxu0 %v15567_v6  ;;  %v20957_v6 = vcombine.high %v341_v57, %v345_v58  ;;  %v18591_v57 = vld [vmem:[%s20648_s8 + $0x304] ss:$8 sps:$4 sm:$0xff]  }
 0x117   : > { %10443 = vmatpush1.bf16.msra.mxu1 %v18523_v7  ;;  %v15591_v7 = vcombine.high %v15455_v63, %v15459_v0  ;;  %v18594_v58 = vld [vmem:[%s20648_s8 + $0x1504] ss:$8 sps:$4 sm:$0xff]  }
 0x118   : > { %12477 = vmatpush1.bf16.msra.mxu0 %v18526_v8  ;;  %10444 = vmatprep.subr.bf16.mxu1 %v18531_v9  ;;  %v18559_v8 = vld [vmem:[%s20648_s8 + $0x2b0] ss:$8 sps:$4 sm:$0xff]  }
 0x119   : > { %12478 = vmatprep.subr.bf16.mxu0 %v18534_v10  ;;  %v18562_v9 = vld [vmem:[%s20648_s8 + $0x14b0] ss:$8 sps:$4 sm:$0xff]   ;;  %v18567_v10 = vld [vmem:[%s20648_s8 + $0x2c4] ss:$8 sps:$4 sm:$0xff]  }
 0x11a   : > { %10382 = vmatmul.mubr.bf16.gmra.mrb[12].mxu1 %v20921_v15 }
 0x11b   : > { %12416 = vmatmul.mubr.bf16.gmra.mrb[12].mxu0 %v15566_v16  ;;  %10445 = vmatpush1.bf16.msra.mxu1 %v18529_v11  ;;  %v18570_v11 = vld [vmem:[%s20648_s8 + $0x14c4] ss:$8 sps:$4 sm:$0xff]   ;;  %v15590_v16 = vcombine.low %v15455_v63, %v15459_v0  ;;  %v18592_v63 = vld [vmem:[%s20648_s8 + $0x1500] ss:$8 sps:$4 sm:$0xff]   ;;  %v294_v0 = vld [vmem:[%s20641_s30 + $0x50] sm:$0xff] }
 0x11c   : > { %12479 = vmatpush1.bf16.msra.mxu0 %v18532_v12  ;;  %10446 = vmatprep.subr.bf16.mxu1 %v18537_v21  ;;  %v349_v12 = vld [vmem:[%s20641_s30 + $0x208] sm:$0xff] }
 0x11d   : > { %12480 = vmatprep.subr.bf16.mxu0 %v18540_v22  ;;  %10391 = vmatprep.mubr.bf16.mxu1 %v15283_v23  ;;  %v18565_v21 = vld [vmem:[%s20648_s8 + $0x2c0] ss:$8 sps:$4 sm:$0xff]   ;;  %v18573_v23 = vld [vmem:[%s20648_s8 + $0x2d4] ss:$8 sps:$4 sm:$0xff]  }
 0x11e   : > { %12425 = vmatprep.mubr.bf16.mxu0 %v15575_v24  ;;  %v18568_v22 = vld [vmem:[%s20648_s8 + $0x14c0] ss:$8 sps:$4 sm:$0xff]   ;;  %v18576_v24 = vld [vmem:[%s20648_s8 + $0x14d4] ss:$8 sps:$4 sm:$0xff]  }
 0x11f   : > { %10447 = vmatpush1.bf16.msra.mxu1 %v18535_v25  ;;  %v20975_v25 = vcombine.high %v349_v12, %v353_v13 }
 0x120   : > { %12481 = vmatpush1.bf16.msra.mxu0 %v18538_v26  ;;  %10448 = vmatprep.subr.bf16.mxu1 %v18543_v28  ;;  %v15599_v26 = vcombine.high %v15463_v17, %v15467_v18  ;;  %v18571_v28 = vld [vmem:[%s20648_s8 + $0x2d0] ss:$8 sps:$4 sm:$0xff]   ;;  %v18603_v17 = vld [vmem:[%s20648_s8 + $0x324] ss:$8 sps:$4 sm:$0xff]  }
 0x121   : > { %12482 = vmatprep.subr.bf16.mxu0 %v18546_v31  ;;  %v18574_v31 = vld [vmem:[%s20648_s8 + $0x14d0] ss:$8 sps:$4 sm:$0xff]   ;;  %v18606_v18 = vld [vmem:[%s20648_s8 + $0x1524] ss:$8 sps:$4 sm:$0xff]  }
 0x122   : > { %10392 = vmatmul.mubr.bf16.gmra.mrb[16].mxu1 %v15282_v37  ;;  %v286_v37 = vld [vmem:[%s20641_s30 + $0x10] sm:$0xff] }
 0x123   : > { %12426 = vmatmul.mubr.bf16.gmra.mrb[16].mxu0 %v15574_v40  ;;  %10449 = vmatpush1.bf16.msra.mxu1 %v18541_v32  ;;  %v18579_v32 = vld [vmem:[%s20648_s8 + $0x2e4] ss:$8 sps:$4 sm:$0xff]   ;;  %v20986_v40 = vcombine.low %v349_v12, %v353_v13  ;;  %v18595_v13 = vld [vmem:[%s20648_s8 + $0x310] ss:$8 sps:$4 sm:$0xff]  }
 0x124   : > { %12483 = vmatpush1.bf16.msra.mxu0 %v18544_v33  ;;  %10450 = vmatprep.subr.bf16.mxu1 %v18549_v43  ;;  %v18582_v33 = vld [vmem:[%s20648_s8 + $0x14e4] ss:$8 sps:$4 sm:$0xff]  }
 0x125   : > { %12484 = vmatprep.subr.bf16.mxu0 %v18552_v44  ;;  %10401 = vmatprep.mubr.bf16.mxu1 %v20940_v46  ;;  %v15620_v43 = vld [vmem:[%s20641_s30 + $0x520] sm:$0xff] }
 0x126   : > { %12435 = vmatprep.mubr.bf16.mxu0 %v15583_v47  ;;  %v15624_v44 = vld [vmem:[%s20641_s30 + $0x540] sm:$0xff]  ;;  %v18585_v47 = vld [vmem:[%s20648_s8 + $0x2f4] ss:$8 sps:$4 sm:$0xff]  }
 0x127   : > { %10451 = vmatpush1.bf16.msra.mxu1 %v18547_v50  ;;  %v18588_v50 = vld [vmem:[%s20648_s8 + $0x14f4] ss:$8 sps:$4 sm:$0xff]  }
 0x128   : > { %12485 = vmatpush1.bf16.msra.mxu0 %v18550_v52  ;;  %10452 = vmatprep.subr.bf16.mxu1 %v18555_v53  ;;  %v15253_v52 = vcombine.high %v286_v37, %v290_v42  ;;  %v15761_v53 = vcombine.high %v15620_v43, %v15624_v44 }
 0x129   : > { %12486 = vmatprep.subr.bf16.mxu0 %v18558_v54  ;;  %v18583_v54 = vld [vmem:[%s20648_s8 + $0x2f0] ss:$8 sps:$4 sm:$0xff]  }
 0x12a   : > { %10402 = vmatmul.mubr.bf16.gmra.mrb[20].mxu1 %v20950_v59 }
 0x12b   : > { %12436 = vmatmul.mubr.bf16.gmra.mrb[20].mxu0 %v15582_v62  ;;  %10453 = vmatpush1.bf16.msra.mxu1 %v18553_v55  ;;  %v18586_v55 = vld [vmem:[%s20648_s8 + $0x14f0] ss:$8 sps:$4 sm:$0xff]   ;;  %v18589_v62 = vld [vmem:[%s20648_s8 + $0x300] ss:$8 sps:$4 sm:$0xff]  }
 0x12c   : > { %12487 = vmatpush1.bf16.msra.mxu0 %v18556_v1  ;;  %10454 = vmatprep.subr.bf16.mxu1 %v18561_v2  ;;  %v298_v1 = vld [vmem:[%s20641_s30 + $0x70] sm:$0xff]  ;;  %v15252_v2 = vcombine.low %v286_v37, %v290_v42 }
 0x12d   : > { %12488 = vmatprep.subr.bf16.mxu0 %v18564_v4  ;;  %10411 = vmatprep.mubr.bf16.mxu1 %v20957_v6  ;;  %v15760_v4 = vcombine.low %v15620_v43, %v15624_v44  ;;  %v18610_v42 = vld [vmem:[%s20648_s8 + $0x1530] ss:$8 sps:$4 sm:$0xff]   ;;  %v18615_v43 = vld [vmem:[%s20648_s8 + $0x344] ss:$8 sps:$4 sm:$0xff]  }
 0x12e   : > { %12445 = vmatprep.mubr.bf16.mxu0 %v15591_v7  ;;  %v15628_v7 = vld [vmem:[%s20641_s30 + $0x560] sm:$0xff] }
 0x12f   : > { %10455 = vmatpush1.bf16.msra.mxu1 %v18559_v8  ;;  %v15632_v8 = vld [vmem:[%s20641_s30 + $0x580] sm:$0xff] }
 0x130   : > { %12489 = vmatpush1.bf16.msra.mxu0 %v18562_v9  ;;  %10456 = vmatprep.subr.bf16.mxu1 %v18567_v10  ;;  %v18597_v9 = vld [vmem:[%s20648_s8 + $0x314] ss:$8 sps:$4 sm:$0xff]   ;;  %v15769_v12 = vcombine.high %v15628_v7, %v15632_v8  ;;  %v18618_v44 = vld [vmem:[%s20648_s8 + $0x1544] ss:$8 sps:$4 sm:$0xff]  }
 0x131   : > { %12490 = vmatprep.subr.bf16.mxu0 %v18570_v11  ;;  %v18600_v10 = vld [vmem:[%s20648_s8 + $0x1514] ss:$8 sps:$4 sm:$0xff]   ;;  %v21006_v11 = vcombine.high %v294_v0, %v298_v1 }
 0x132   : > { %10412 = vmatmul.mubr.bf16.gmra.mrb[24].mxu1 %v20967_v14 }
 0x133   : > { %12446 = vmatmul.mubr.bf16.gmra.mrb[24].mxu0 %v15590_v16  ;;  %10457 = vmatpush1.bf16.msra.mxu1 %v18565_v21  ;;  %v18598_v16 = vld [vmem:[%s20648_s8 + $0x1510] ss:$8 sps:$4 sm:$0xff]   ;;  %v18601_v21 = vld [vmem:[%s20648_s8 + $0x320] ss:$8 sps:$4 sm:$0xff]  }
 0x134   : > { %12491 = vmatpush1.bf16.msra.mxu0 %v18568_v22  ;;  %10458 = vmatprep.subr.bf16.mxu1 %v18573_v23  ;;  %v18604_v22 = vld [vmem:[%s20648_s8 + $0x1520] ss:$8 sps:$4 sm:$0xff]   ;;  %v302_v23 = vld [vmem:[%s20641_s30 + $0x90] sm:$0xff] }
 0x135   : > { %12492 = vmatprep.subr.bf16.mxu0 %v18576_v24  ;;  %10421 = vmatprep.mubr.bf16.mxu1 %v20975_v25  ;;  %v306_v24 = vld [vmem:[%s20641_s30 + $0xb0] sm:$0xff] }
 0x136   : > { %12455 = vmatprep.mubr.bf16.mxu0 %v15599_v26  ;;  %v21017_v26 = vcombine.low %v294_v0, %v298_v1 }
 0x137   : > { %10459 = vmatpush1.bf16.msra.mxu1 %v18571_v28  ;;  %v15768_v28 = vcombine.low %v15628_v7, %v15632_v8  ;;  %v18627_v7 = vld [vmem:[%s20648_s8 + $0x364] ss:$8 sps:$4 sm:$0xff]  }
 0x138   : > { %12493 = vmatpush1.bf16.msra.mxu0 %v18574_v31  ;;  %10460 = vmatprep.subr.bf16.mxu1 %v18579_v32  ;;  %v15636_v31 = vld [vmem:[%s20641_s30 + $0x5a0] sm:$0xff] }
 0x139   : > { %12494 = vmatprep.subr.bf16.mxu0 %v18582_v33  ;;  %v15640_v32 = vld [vmem:[%s20641_s30 + $0x5c0] sm:$0xff]  ;;  %v18609_v33 = vld [vmem:[%s20648_s8 + $0x334] ss:$8 sps:$4 sm:$0xff]  }
 0x13a   : > { %10422 = vmatmul.mubr.bf16.gmra.mrb[28].mxu1 %v20986_v40  ;;  %v15777_v37 = vcombine.high %v15636_v31, %v15640_v32  ;;  %v18630_v8 = vld [vmem:[%s20648_s8 + $0x1564] ss:$8 sps:$4 sm:$0xff]  }
 0x13b   : > { %12456 = vmatmul.mubr.bf16.gmra.mrb[28].mxu0 %v15598_v41  ;;  %10461 = vmatpush1.bf16.msra.mxu1 %v18577_v34  ;;  %v18612_v34 = vld [vmem:[%s20648_s8 + $0x1534] ss:$8 sps:$4 sm:$0xff]   ;;  %v18607_v41 = vld [vmem:[%s20648_s8 + $0x330] ss:$8 sps:$4 sm:$0xff]  }
 0x13c   : > { %12495 = vmatpush1.bf16.msra.mxu0 %v18580_v36  ;;  %10462 = vmatprep.subr.bf16.mxu1 %v18585_v47  ;;  %v21023_v36 = vcombine.high %v302_v23, %v306_v24  ;;  %v18613_v47 = vld [vmem:[%s20648_s8 + $0x340] ss:$8 sps:$4 sm:$0xff]  }
 0x13d   : > { %12496 = vmatprep.subr.bf16.mxu0 %v18588_v50  ;;  %10464 = vmatprep.mubr.bf16.mxu1 %v15253_v52  ;;  %v310_v50 = vld [vmem:[%s20641_s30 + $0xd0] sm:$0xff] }
 0x13e   : > { %12498 = vmatprep.mubr.bf16.mxu0 %v15761_v53  ;;  %v314_v52 = vld [vmem:[%s20641_s30 + $0xf0] sm:$0xff]  ;;  %v21034_v53 = vcombine.low %v302_v23, %v306_v24 }
 0x13f   : > { %10463 = vmatpush1.bf16.msra.mxu1 %v18583_v54  ;;  %v15776_v54 = vcombine.low %v15636_v31, %v15640_v32  ;;  %v21041_v0 = vcombine.high %v310_v50, %v314_v52  ;;  %v18636_v23 = vld [vmem:[%s20648_s8 + $0x1574] ss:$8 sps:$4 sm:$0xff]   ;;  %v18631_v31 = vld [vmem:[%s20648_s8 + $0x370] ss:$8 sps:$4 sm:$0xff]  }
 0x140   : > { %12497 = vmatpush1.bf16.msra.mxu0 %v18586_v55  ;;  %10545 = vmatprep.subr.bf16.mxu1 %v18591_v57  ;;  %v15644_v55 = vld [vmem:[%s20641_s30 + $0x5e0] sm:$0xff]  ;;  %v18634_v32 = vld [vmem:[%s20648_s8 + $0x1570] ss:$8 sps:$4 sm:$0xff]  }
 0x141   : > { %12579 = vmatprep.subr.bf16.mxu0 %v18594_v58  ;;  %v15648_v57 = vld [vmem:[%s20641_s30 + $0x600] sm:$0xff] }
 0x142   : > { %10465 = vmatmul.mubr.bf16.vlgmr.msra.gmra.mrb[0].mxu1 %v15252_v2  ;;  %v18616_v58 = vld [vmem:[%s20648_s8 + $0x1540] ss:$8 sps:$4 sm:$0xff]   ;;  %v15785_v1 = vcombine.high %v15644_v55, %v15648_v57  ;;  %v18619_v2 = vld [vmem:[%s20648_s8 + $0x350] ss:$8 sps:$4 sm:$0xff]  }
 0x143   : > { %12499 = vmatmul.mubr.bf16.vlgmr.msra.gmra.mrb[0].mxu0 %v15760_v4  ;;  %10546 = vmatpush1.bf16.msra.mxu1 %v18589_v62  ;;  %v18621_v62 = vld [vmem:[%s20648_s8 + $0x354] ss:$8 sps:$4 sm:$0xff]   ;;  %v18622_v4 = vld [vmem:[%s20648_s8 + $0x1550] ss:$8 sps:$4 sm:$0xff]  }
 0x144   : > { %12580 = vmatpush1.bf16.msra.mxu0 %v18592_v63  ;;  %10547 = vmatprep.subr.bf16.mxu1 %v18597_v9  ;;  %v18624_v63 = vld [vmem:[%s20648_s8 + $0x1554] ss:$8 sps:$4 sm:$0xff]  }
 0x145   : > { %12581 = vmatprep.subr.bf16.mxu0 %v18600_v10  ;;  %10474 = vmatprep.mubr.bf16.mxu1 %v21006_v11  ;;  %v326_v9 = vld [vmem:[%s20641_s30 + $0x150] sm:$0xff] }
 0x146   : > { %12508 = vmatprep.mubr.bf16.mxu0 %v15769_v12  ;;  %v330_v10 = vld [vmem:[%s20641_s30 + $0x170] sm:$0xff]  ;;  %v21051_v12 = vcombine.low %v310_v50, %v314_v52  ;;  %v15668_v50 = vld [vmem:[%s20641_s30 + $0x6a0] sm:$0xff] }
 0x147   : > { %10548 = vmatpush1.bf16.msra.mxu1 %v18595_v13  ;;  %v15784_v13 = vcombine.low %v15644_v55, %v15648_v57  ;;  %v15285_v24 = vcombine.high %v326_v9, %v330_v10  ;;  %v15672_v52 = vld [vmem:[%s20641_s30 + $0x6c0] sm:$0xff]  ;;  %v18648_v55 = vld [vmem:[%s20648_s8 + $0x1594] ss:$8 sps:$4 sm:$0xff]  }
 0x148   : > { %12582 = vmatpush1.bf16.msra.mxu0 %v18598_v16  ;;  %10549 = vmatprep.subr.bf16.mxu1 %v18603_v17  ;;  %v15660_v16 = vld [vmem:[%s20641_s30 + $0x660] sm:$0xff] }
 0x149   : > { %12583 = vmatprep.subr.bf16.mxu0 %v18606_v18  ;;  %v15664_v17 = vld [vmem:[%s20641_s30 + $0x680] sm:$0xff] }
 0x14a   : > { %10475 = vmatmul.mubr.bf16.gmra.mrb[4].mxu1 %v21017_v26  ;;  %v18625_v18 = vld [vmem:[%s20648_s8 + $0x360] ss:$8 sps:$4 sm:$0xff]  }
 0x14b   : > { %12509 = vmatmul.mubr.bf16.gmra.mrb[4].mxu0 %v15768_v28  ;;  %10550 = vmatpush1.bf16.msra.mxu1 %v18601_v21  ;;  %v18628_v21 = vld [vmem:[%s20648_s8 + $0x1560] ss:$8 sps:$4 sm:$0xff]   ;;  %v15793_v28 = vcombine.high %v15660_v16, %v15664_v17 }
 0x14c   : > { %12584 = vmatpush1.bf16.msra.mxu0 %v18604_v22  ;;  %10551 = vmatprep.subr.bf16.mxu1 %v18609_v33  ;;  %v18633_v22 = vld [vmem:[%s20648_s8 + $0x374] ss:$8 sps:$4 sm:$0xff]   ;;  %v18639_v33 = vld [vmem:[%s20648_s8 + $0x384] ss:$8 sps:$4 sm:$0xff]  }
 0x14d   : > { %12585 = vmatprep.subr.bf16.mxu0 %v18612_v34  ;;  %10484 = vmatprep.mubr.bf16.mxu1 %v21023_v36  ;;  %v18642_v34 = vld [vmem:[%s20648_s8 + $0x1584] ss:$8 sps:$4 sm:$0xff]  }
 0x14e   : > { %12518 = vmatprep.mubr.bf16.mxu0 %v15777_v37  ;;  %v18637_v37 = vld [vmem:[%s20648_s8 + $0x380] ss:$8 sps:$4 sm:$0xff]  }
 0x14f   : > { %10552 = vmatpush1.bf16.msra.mxu1 %v18607_v41  ;;  %v18640_v41 = vld [vmem:[%s20648_s8 + $0x1580] ss:$8 sps:$4 sm:$0xff]  }
 0x150   : > { %12586 = vmatpush1.bf16.msra.mxu0 %v18610_v42  ;;  %10553 = vmatprep.subr.bf16.mxu1 %v18615_v43  ;;  %v334_v42 = vld [vmem:[%s20641_s30 + $0x190] sm:$0xff]  ;;  %v15284_v43 = vcombine.low %v326_v9, %v330_v10 }
 0x151   : > { %12587 = vmatprep.subr.bf16.mxu0 %v18618_v44  ;;  %v15792_v44 = vcombine.low %v15660_v16, %v15664_v17  ;;  %v346_v9 = vld [vmem:[%s20641_s30 + $0x1f0] sm:$0xff]  ;;  %v15676_v16 = vld [vmem:[%s20641_s30 + $0x6e0] sm:$0xff] }
 0x152   : > { %10485 = vmatmul.mubr.bf16.gmra.mrb[8].mxu1 %v21034_v53  ;;  %v15680_v17 = vld [vmem:[%s20641_s30 + $0x700] sm:$0xff] }
 0x153   : > { %12519 = vmatmul.mubr.bf16.gmra.mrb[8].mxu0 %v15776_v54  ;;  %10554 = vmatpush1.bf16.msra.mxu1 %v18613_v47  ;;  %v338_v47 = vld [vmem:[%s20641_s30 + $0x1b0] sm:$0xff] }
 0x154   : > { %12588 = vmatpush1.bf16.msra.mxu0 %v18616_v58  ;;  %10555 = vmatprep.subr.bf16.mxu1 %v18621_v62  ;;  %v18645_v54 = vld [vmem:[%s20648_s8 + $0x394] ss:$8 sps:$4 sm:$0xff]   ;;  %v21072_v57 = vcombine.high %v334_v42, %v338_v47  ;;  %v15801_v58 = vcombine.high %v15668_v50, %v15672_v52  ;;  %v18643_v62 = vld [vmem:[%s20648_s8 + $0x390] ss:$8 sps:$4 sm:$0xff]   ;;  %v21083_v10 = vcombine.low %v334_v42, %v338_v47  ;;  %v15688_v47 = vld [vmem:[%s20641_s30 + $0x740] sm:$0xff] }
 0x155   : > { %12589 = vmatprep.subr.bf16.mxu0 %v18624_v63  ;;  %10494 = vmatprep.mubr.bf16.mxu1 %v21041_v0  ;;  %v18646_v63 = vld [vmem:[%s20648_s8 + $0x1590] ss:$8 sps:$4 sm:$0xff]  }
 0x156   : > { %12528 = vmatprep.mubr.bf16.mxu0 %v15785_v1  ;;  %v18651_v1 = vld [vmem:[%s20648_s8 + $0x3a4] ss:$8 sps:$4 sm:$0xff]  }
 0x157   : > { %10556 = vmatpush1.bf16.msra.mxu1 %v18619_v2  ;;  %v18654_v2 = vld [vmem:[%s20648_s8 + $0x15a4] ss:$8 sps:$4 sm:$0xff]  }
 0x158   : > { %12590 = vmatpush1.bf16.msra.mxu0 %v18622_v4  ;;  %10557 = vmatprep.subr.bf16.mxu1 %v18627_v7  ;;  %v18649_v4 = vld [vmem:[%s20648_s8 + $0x3a0] ss:$8 sps:$4 sm:$0xff]  }
 0x159   : > { %12591 = vmatprep.subr.bf16.mxu0 %v18630_v8  ;;  %v18652_v7 = vld [vmem:[%s20648_s8 + $0x15a0] ss:$8 sps:$4 sm:$0xff]   ;;  %v342_v8 = vld [vmem:[%s20641_s30 + $0x1d0] sm:$0xff] }
 0x15a   : > { %10495 = vmatmul.mubr.bf16.gmra.mrb[12].mxu1 %v21051_v12  ;;  %v21101_v42 = vcombine.low %v342_v8, %v346_v9 }
 0x15b   : > { %12529 = vmatmul.mubr.bf16.gmra.mrb[12].mxu0 %v15784_v13  ;;  %10558 = vmatpush1.bf16.msra.mxu1 %v18625_v18  ;;  %v15800_v13 = vcombine.low %v15668_v50, %v15672_v52  ;;  %v18657_v18 = vld [vmem:[%s20648_s8 + $0x3b4] ss:$8 sps:$4 sm:$0xff]  }
 0x15c   : > { %12592 = vmatpush1.bf16.msra.mxu0 %v18628_v21  ;;  %10559 = vmatprep.subr.bf16.mxu1 %v18633_v22  ;;  %v18660_v21 = vld [vmem:[%s20648_s8 + $0x15b4] ss:$8 sps:$4 sm:$0xff]   ;;  %v21089_v22 = vcombine.high %v342_v8, %v346_v9 }
 0x15d   : > { %12593 = vmatprep.subr.bf16.mxu0 %v18636_v23  ;;  %10504 = vmatprep.mubr.bf16.mxu1 %v15285_v24  ;;  %v15809_v23 = vcombine.high %v15676_v16, %v15680_v17  ;;  %v18655_v24 = vld [vmem:[%s20648_s8 + $0x3b0] ss:$8 sps:$4 sm:$0xff]   ;;  %v18669_v50 = vld [vmem:[%s20648_s8 + $0x3d4] ss:$8 sps:$4 sm:$0xff]  }
 0x15e   : > { %12538 = vmatprep.mubr.bf16.mxu0 %v15793_v28  ;;  %v18658_v28 = vld [vmem:[%s20648_s8 + $0x15b0] ss:$8 sps:$4 sm:$0xff]   ;;  %v18672_v52 = vld [vmem:[%s20648_s8 + $0x15d4] ss:$8 sps:$4 sm:$0xff]  }
 0x15f   : > { %10560 = vmatpush1.bf16.msra.mxu1 %v18631_v31  ;;  %v18663_v31 = vld [vmem:[%s20648_s8 + $0x3c4] ss:$8 sps:$4 sm:$0xff]  }
 0x160   : > { %12594 = vmatpush1.bf16.msra.mxu0 %v18634_v32  ;;  %10561 = vmatprep.subr.bf16.mxu1 %v18639_v33  ;;  %v18666_v32 = vld [vmem:[%s20648_s8 + $0x15c4] ss:$8 sps:$4 sm:$0xff]   ;;  %v18661_v33 = vld [vmem:[%s20648_s8 + $0x3c0] ss:$8 sps:$4 sm:$0xff]  }
 0x161   : > { %12595 = vmatprep.subr.bf16.mxu0 %v18642_v34  ;;  %v18664_v34 = vld [vmem:[%s20648_s8 + $0x15c0] ss:$8 sps:$4 sm:$0xff]  }
 0x162   : > { %10505 = vmatmul.mubr.bf16.gmra.mrb[16].mxu1 %v15284_v43  ;;  %v15808_v43 = vcombine.low %v15676_v16, %v15680_v17  ;;  %v15625_v16 = vld [vmem:[%s20641_s30 + $0x548] sm:$0xff] }
 0x163   : > { %12539 = vmatmul.mubr.bf16.gmra.mrb[16].mxu0 %v15792_v44  ;;  %10562 = vmatpush1.bf16.msra.mxu1 %v18637_v37  ;;  %v350_v37 = vld [vmem:[%s20641_s30 + $0x210] sm:$0xff]  ;;  %v15684_v44 = vld [vmem:[%s20641_s30 + $0x720] sm:$0xff] }
 0x164   : > { %12596 = vmatpush1.bf16.msra.mxu0 %v18640_v41  ;;  %10563 = vmatprep.subr.bf16.mxu1 %v18645_v54  ;;  %v354_v41 = vld [vmem:[%s20641_s30 + $0x230] sm:$0xff]  ;;  %v15816_v9 = vcombine.low %v15684_v44, %v15688_v47  ;;  %v18676_v17 = vld [vmem:[%s20648_s8 + $0x15e0] ss:$8 sps:$4 sm:$0xff]  }
 0x165   : > { %12597 = vmatprep.subr.bf16.mxu0 %v18648_v55  ;;  %10514 = vmatprep.mubr.bf16.mxu1 %v21072_v57  ;;  %v21107_v54 = vcombine.high %v350_v37, %v354_v41  ;;  %v15817_v55 = vcombine.high %v15684_v44, %v15688_v47  ;;  %v21118_v8 = vcombine.low %v350_v37, %v354_v41  ;;  %v299_v37 = vld [vmem:[%s20641_s30 + $0x78] sm:$0xff]  ;;  %v15629_v44 = vld [vmem:[%s20641_s30 + $0x568] sm:$0xff] }
 0x166   : > { %12548 = vmatprep.mubr.bf16.mxu0 %v15801_v58  ;;  %v18667_v58 = vld [vmem:[%s20648_s8 + $0x3d0] ss:$8 sps:$4 sm:$0xff]   ;;  %v15633_v47 = vld [vmem:[%s20641_s30 + $0x588] sm:$0xff] }
 0x167   : > { %10564 = vmatpush1.bf16.msra.mxu1 %v18643_v62  ;;  %v18670_v62 = vld [vmem:[%s20648_s8 + $0x15d0] ss:$8 sps:$4 sm:$0xff]  }
 0x168   : > { %12598 = vmatpush1.bf16.msra.mxu0 %v18646_v63  ;;  %10565 = vmatprep.subr.bf16.mxu1 %v18651_v1  ;;  %v18675_v63 = vld [vmem:[%s20648_s8 + $0x3e4] ss:$8 sps:$4 sm:$0xff]  }
 0x169   : > { %12599 = vmatprep.subr.bf16.mxu0 %v18654_v2  ;;  %v18678_v1 = vld [vmem:[%s20648_s8 + $0x15e4] ss:$8 sps:$4 sm:$0xff]   ;;  %v18673_v2 = vld [vmem:[%s20648_s8 + $0x3e0] ss:$8 sps:$4 sm:$0xff]  }
 0x16a   : > { %10515 = vmatmul.mubr.bf16.gmra.mrb[20].mxu1 %v21083_v10 }
 0x16b   : > { %12549 = vmatmul.mubr.bf16.gmra.mrb[20].mxu0 %v15800_v13  ;;  %10566 = vmatpush1.bf16.msra.mxu1 %v18649_v4  ;;  %v287_v4 = vld [vmem:[%s20641_s30 + $0x18] sm:$0xff]  ;;  %v15621_v13 = vld [vmem:[%s20641_s30 + $0x528] sm:$0xff] }
 0x16c   : > { %12600 = vmatpush1.bf16.msra.mxu0 %v18652_v7  ;;  %10567 = vmatprep.subr.bf16.mxu1 %v18657_v18  ;;  %v291_v7 = vld [vmem:[%s20641_s30 + $0x38] sm:$0xff] }
 0x16d   : > { %12601 = vmatprep.subr.bf16.mxu0 %v18660_v21  ;;  %10524 = vmatprep.mubr.bf16.mxu1 %v21089_v22  ;;  %v18681_v18 = vld [vmem:[%s20648_s8 + $0x3f4] ss:$8 sps:$4 sm:$0xff]   ;;  %v15254_v41 = vcombine.low %v287_v4, %v291_v7 }
 0x16e   : > { %12558 = vmatprep.mubr.bf16.mxu0 %v15809_v23  ;;  %v18684_v21 = vld [vmem:[%s20648_s8 + $0x15f4] ss:$8 sps:$4 sm:$0xff]   ;;  %v15255_v23 = vcombine.high %v287_v4, %v291_v7  ;;  %v18699_v4 = vld [vmem:[%s20648_s8 + $0x424] ss:$8 sps:$4 sm:$0xff]  }
 0x16f   : > { %10568 = vmatpush1.bf16.msra.mxu1 %v18655_v24  ;;  %v15763_v24 = vcombine.high %v15621_v13, %v15625_v16  ;;  %v18702_v7 = vld [vmem:[%s20648_s8 + $0x1624] ss:$8 sps:$4 sm:$0xff]  }
 0x170   : > { %12602 = vmatpush1.bf16.msra.mxu0 %v18658_v28  ;;  %10569 = vmatprep.subr.bf16.mxu1 %v18663_v31  ;;  %v18679_v28 = vld [vmem:[%s20648_s8 + $0x3f0] ss:$8 sps:$4 sm:$0xff]  }
 0x171   : > { %12603 = vmatprep.subr.bf16.mxu0 %v18666_v32  ;;  %v18682_v31 = vld [vmem:[%s20648_s8 + $0x15f0] ss:$8 sps:$4 sm:$0xff]   ;;  %v18687_v32 = vld [vmem:[%s20648_s8 + $0x404] ss:$8 sps:$4 sm:$0xff]  }
 0x172   : > { %10525 = vmatmul.mubr.bf16.gmra.mrb[24].mxu1 %v21101_v42 }
 0x173   : > { %12559 = vmatmul.mubr.bf16.gmra.mrb[24].mxu0 %v15808_v43  ;;  %10570 = vmatpush1.bf16.msra.mxu1 %v18661_v33  ;;  %v18690_v33 = vld [vmem:[%s20648_s8 + $0x1604] ss:$8 sps:$4 sm:$0xff]   ;;  %v15762_v43 = vcombine.low %v15621_v13, %v15625_v16  ;;  %v18700_v13 = vld [vmem:[%s20648_s8 + $0x1620] ss:$8 sps:$4 sm:$0xff]   ;;  %v303_v16 = vld [vmem:[%s20641_s30 + $0x98] sm:$0xff] }
 0x174   : > { %12604 = vmatpush1.bf16.msra.mxu0 %v18664_v34  ;;  %10571 = vmatprep.subr.bf16.mxu1 %v18669_v50  ;;  %v295_v34 = vld [vmem:[%s20641_s30 + $0x58] sm:$0xff]  ;;  %v18685_v50 = vld [vmem:[%s20648_s8 + $0x400] ss:$8 sps:$4 sm:$0xff]  }
 0x175   : > { %12605 = vmatprep.subr.bf16.mxu0 %v18672_v52  ;;  %10534 = vmatprep.mubr.bf16.mxu1 %v21107_v54  ;;  %v18688_v52 = vld [vmem:[%s20648_s8 + $0x1600] ss:$8 sps:$4 sm:$0xff]  }
 0x176   : > { %12568 = vmatprep.mubr.bf16.mxu0 %v15817_v55  ;;  %v18693_v55 = vld [vmem:[%s20648_s8 + $0x414] ss:$8 sps:$4 sm:$0xff]  }
 0x177   : > { %10572 = vmatpush1.bf16.msra.mxu1 %v18667_v58  ;;  %v18696_v58 = vld [vmem:[%s20648_s8 + $0x1614] ss:$8 sps:$4 sm:$0xff]  }
 0x178   : > { %12606 = vmatpush1.bf16.msra.mxu0 %v18670_v62  ;;  %10573 = vmatprep.subr.bf16.mxu1 %v18675_v63  ;;  %v21138_v62 = vcombine.high %v295_v34, %v299_v37  ;;  %v15771_v63 = vcombine.high %v15629_v44, %v15633_v47 }
 0x179   : > { %12607 = vmatprep.subr.bf16.mxu0 %v18678_v1  ;;  %v18691_v1 = vld [vmem:[%s20648_s8 + $0x410] ss:$8 sps:$4 sm:$0xff]  }
 0x17a   : > { %10535 = vmatmul.mubr.bf16.gmra.mrb[28].mxu1 %v21118_v8 }
 0x17b   : > { %12569 = vmatmul.mubr.bf16.gmra.mrb[28].mxu0 %v15816_v9  ;;  %10574 = vmatpush1.bf16.msra.mxu1 %v18673_v2  ;;  %v18694_v2 = vld [vmem:[%s20648_s8 + $0x1610] ss:$8 sps:$4 sm:$0xff]   ;;  %v18697_v9 = vld [vmem:[%s20648_s8 + $0x420] ss:$8 sps:$4 sm:$0xff]  }
 0x17c   : > { %12608 = vmatpush1.bf16.msra.mxu0 %v18676_v17  ;;  %10575 = vmatprep.subr.bf16.mxu1 %v18681_v18  ;;  %v21148_v17 = vcombine.low %v295_v34, %v299_v37  ;;  %v15770_v18 = vcombine.low %v15629_v44, %v15633_v47  ;;  %v18703_v34 = vld [vmem:[%s20648_s8 + $0x430] ss:$8 sps:$4 sm:$0xff]   ;;  %v18709_v44 = vld [vmem:[%s20648_s8 + $0x440] ss:$8 sps:$4 sm:$0xff]  }
 0x17d   : > { %12609 = vmatprep.subr.bf16.mxu0 %v18684_v21  ;;  %10577 = vmatprep.mubr.bf16.mxu1 %v15255_v23  ;;  %v307_v21 = vld [vmem:[%s20641_s30 + $0xb8] sm:$0xff]  ;;  %v15637_v23 = vld [vmem:[%s20641_s30 + $0x5a8] sm:$0xff] }
 0x17e   : > { %12611 = vmatprep.mubr.bf16.mxu0 %v15763_v24  ;;  %v15641_v24 = vld [vmem:[%s20641_s30 + $0x5c8] sm:$0xff]  ;;  %v18706_v37 = vld [vmem:[%s20648_s8 + $0x1630] ss:$8 sps:$4 sm:$0xff]  }
 0x17f   : > { %10576 = vmatpush1.bf16.msra.mxu1 %v18679_v28  ;;  %v18705_v28 = vld [vmem:[%s20648_s8 + $0x434] ss:$8 sps:$4 sm:$0xff]   ;;  %v18712_v47 = vld [vmem:[%s20648_s8 + $0x1640] ss:$8 sps:$4 sm:$0xff]  }
 0x180   : > { %12610 = vmatpush1.bf16.msra.mxu0 %v18682_v31  ;;  %10658 = vmatprep.subr.bf16.mxu1 %v18687_v32  ;;  %v18708_v31 = vld [vmem:[%s20648_s8 + $0x1634] ss:$8 sps:$4 sm:$0xff]   ;;  %v21155_v32 = vcombine.high %v303_v16, %v307_v21 }
 0x181   : > { %12692 = vmatprep.subr.bf16.mxu0 %v18690_v33  ;;  %v15779_v33 = vcombine.high %v15637_v23, %v15641_v24 }
 0x182   : > { %10578 = vmatmul.mubr.bf16.vlgmr.msra.gmra.mrb[0].mxu1 %v15254_v41  ;;  %v18711_v41 = vld [vmem:[%s20648_s8 + $0x444] ss:$8 sps:$4 sm:$0xff]  }
 0x183   : > { %12612 = vmatmul.mubr.bf16.vlgmr.msra.gmra.mrb[0].mxu0 %v15762_v43  ;;  %10659 = vmatpush1.bf16.msra.mxu1 %v18685_v50  ;;  %v18714_v43 = vld [vmem:[%s20648_s8 + $0x1644] ss:$8 sps:$4 sm:$0xff]   ;;  %v311_v50 = vld [vmem:[%s20641_s30 + $0xd8] sm:$0xff] }
 0x184   : > { %12693 = vmatpush1.bf16.msra.mxu0 %v18688_v52  ;;  %10660 = vmatprep.subr.bf16.mxu1 %v18693_v55  ;;  %v315_v52 = vld [vmem:[%s20641_s30 + $0xf8] sm:$0xff]  ;;  %v21167_v55 = vcombine.low %v303_v16, %v307_v21  ;;  %v18726_v21 = vld [vmem:[%s20648_s8 + $0x1664] ss:$8 sps:$4 sm:$0xff]  }
 0x185   : > { %12694 = vmatprep.subr.bf16.mxu0 %v18696_v58  ;;  %10587 = vmatprep.mubr.bf16.mxu1 %v21138_v62  ;;  %v15778_v58 = vcombine.low %v15637_v23, %v15641_v24  ;;  %v18718_v16 = vld [vmem:[%s20648_s8 + $0x1650] ss:$8 sps:$4 sm:$0xff]   ;;  %v18721_v23 = vld [vmem:[%s20648_s8 + $0x460] ss:$8 sps:$4 sm:$0xff]  }
 0x186   : > { %12621 = vmatprep.mubr.bf16.mxu0 %v15771_v63  ;;  %v15645_v63 = vld [vmem:[%s20641_s30 + $0x5e8] sm:$0xff] }
 0x187   : > { %10661 = vmatpush1.bf16.msra.mxu1 %v18691_v1  ;;  %v15649_v1 = vld [vmem:[%s20641_s30 + $0x608] sm:$0xff] }
 0x188   : > { %12695 = vmatpush1.bf16.msra.mxu0 %v18694_v2  ;;  %10662 = vmatprep.subr.bf16.mxu1 %v18699_v4  ;;  %v18717_v2 = vld [vmem:[%s20648_s8 + $0x454] ss:$8 sps:$4 sm:$0xff]   ;;  %v18724_v24 = vld [vmem:[%s20648_s8 + $0x1660] ss:$8 sps:$4 sm:$0xff]  }
 0x189   : > { %12696 = vmatprep.subr.bf16.mxu0 %v18702_v7  ;;  %v18720_v4 = vld [vmem:[%s20648_s8 + $0x1654] ss:$8 sps:$4 sm:$0xff]   ;;  %v21173_v7 = vcombine.high %v311_v50, %v315_v52 }
 0x18a   : > { %10588 = vmatmul.mubr.bf16.gmra.mrb[4].mxu1 %v21148_v17 }
 0x18b   : > { %12622 = vmatmul.mubr.bf16.gmra.mrb[4].mxu0 %v15770_v18  ;;  %10663 = vmatpush1.bf16.msra.mxu1 %v18697_v9  ;;  %v15787_v9 = vcombine.high %v15645_v63, %v15649_v1  ;;  %v18723_v18 = vld [vmem:[%s20648_s8 + $0x464] ss:$8 sps:$4 sm:$0xff]  }
 0x18c   : > { %12697 = vmatpush1.bf16.msra.mxu0 %v18700_v13  ;;  %10664 = vmatprep.subr.bf16.mxu1 %v18705_v28  ;;  %v18715_v13 = vld [vmem:[%s20648_s8 + $0x450] ss:$8 sps:$4 sm:$0xff]  }
 0x18d   : > { %12698 = vmatprep.subr.bf16.mxu0 %v18708_v31  ;;  %10597 = vmatprep.mubr.bf16.mxu1 %v21155_v32  ;;  %v327_v28 = vld [vmem:[%s20641_s30 + $0x158] sm:$0xff] }
 0x18e   : > { %12631 = vmatprep.mubr.bf16.mxu0 %v15779_v33  ;;  %v331_v31 = vld [vmem:[%s20641_s30 + $0x178] sm:$0xff]  ;;  %v21185_v33 = vcombine.low %v311_v50, %v315_v52 }
 0x18f   : > { %10665 = vmatpush1.bf16.msra.mxu1 %v18703_v34  ;;  %v15786_v34 = vcombine.low %v15645_v63, %v15649_v1  ;;  %v18727_v50 = vld [vmem:[%s20648_s8 + $0x470] ss:$8 sps:$4 sm:$0xff]   ;;  %v18735_v63 = vld [vmem:[%s20648_s8 + $0x484] ss:$8 sps:$4 sm:$0xff]  }
 0x190   : > { %12699 = vmatpush1.bf16.msra.mxu0 %v18706_v37  ;;  %10666 = vmatprep.subr.bf16.mxu1 %v18711_v41  ;;  %v15661_v37 = vld [vmem:[%s20641_s30 + $0x668] sm:$0xff]  ;;  %v18730_v52 = vld [vmem:[%s20648_s8 + $0x1670] ss:$8 sps:$4 sm:$0xff]  }
 0x191   : > { %12700 = vmatprep.subr.bf16.mxu0 %v18714_v43  ;;  %v15665_v41 = vld [vmem:[%s20641_s30 + $0x688] sm:$0xff]  ;;  %v18729_v43 = vld [vmem:[%s20648_s8 + $0x474] ss:$8 sps:$4 sm:$0xff]  }
 0x192   : > { %10598 = vmatmul.mubr.bf16.gmra.mrb[8].mxu1 %v21167_v55  ;;  %v18738_v1 = vld [vmem:[%s20648_s8 + $0x1684] ss:$8 sps:$4 sm:$0xff]  }
 0x193   : > { %12632 = vmatmul.mubr.bf16.gmra.mrb[8].mxu0 %v15778_v58  ;;  %10667 = vmatpush1.bf16.msra.mxu1 %v18709_v44  ;;  %v18732_v44 = vld [vmem:[%s20648_s8 + $0x1674] ss:$8 sps:$4 sm:$0xff]   ;;  %v15795_v58 = vcombine.high %v15661_v37, %v15665_v41 }
 0x194   : > { %12701 = vmatpush1.bf16.msra.mxu0 %v18712_v47  ;;  %10668 = vmatprep.subr.bf16.mxu1 %v18717_v2  ;;  %v15287_v47 = vcombine.high %v327_v28, %v331_v31  ;;  %v18733_v2 = vld [vmem:[%s20648_s8 + $0x480] ss:$8 sps:$4 sm:$0xff]  }
 0x195   : > { %12702 = vmatprep.subr.bf16.mxu0 %v18720_v4  ;;  %10607 = vmatprep.mubr.bf16.mxu1 %v21173_v7  ;;  %v335_v4 = vld [vmem:[%s20641_s30 + $0x198] sm:$0xff] }
 0x196   : > { %12641 = vmatprep.mubr.bf16.mxu0 %v15787_v9  ;;  %v339_v9 = vld [vmem:[%s20641_s30 + $0x1b8] sm:$0xff] }
 0x197   : > { %10669 = vmatpush1.bf16.msra.mxu1 %v18715_v13  ;;  %v15286_v13 = vcombine.low %v327_v28, %v331_v31  ;;  %v18739_v28 = vld [vmem:[%s20648_s8 + $0x490] ss:$8 sps:$4 sm:$0xff]  }
 0x198   : > { %12703 = vmatpush1.bf16.msra.mxu0 %v18718_v16  ;;  %10670 = vmatprep.subr.bf16.mxu1 %v18723_v18  ;;  %v15794_v16 = vcombine.low %v15661_v37, %v15665_v41  ;;  %v15669_v18 = vld [vmem:[%s20641_s30 + $0x6a8] sm:$0xff]  ;;  %v18742_v31 = vld [vmem:[%s20648_s8 + $0x1690] ss:$8 sps:$4 sm:$0xff]  }
 0x199   : > { %12704 = vmatprep.subr.bf16.mxu0 %v18726_v21  ;;  %v15673_v21 = vld [vmem:[%s20641_s30 + $0x6c8] sm:$0xff] }
 0x19a   : > { %10608 = vmatmul.mubr.bf16.gmra.mrb[12].mxu1 %v21185_v33  ;;  %v18747_v37 = vld [vmem:[%s20648_s8 + $0x4a4] ss:$8 sps:$4 sm:$0xff]  }
 0x19b   : > { %12642 = vmatmul.mubr.bf16.gmra.mrb[12].mxu0 %v15786_v34  ;;  %10671 = vmatpush1.bf16.msra.mxu1 %v18721_v23  ;;  %v18736_v23 = vld [vmem:[%s20648_s8 + $0x1680] ss:$8 sps:$4 sm:$0xff]   ;;  %v18744_v34 = vld [vmem:[%s20648_s8 + $0x1694] ss:$8 sps:$4 sm:$0xff]   ;;  %v18750_v41 = vld [vmem:[%s20648_s8 + $0x16a4] ss:$8 sps:$4 sm:$0xff]  }
 0x19c   : > { %12705 = vmatpush1.bf16.msra.mxu0 %v18724_v24  ;;  %10672 = vmatprep.subr.bf16.mxu1 %v18729_v43  ;;  %v18741_v24 = vld [vmem:[%s20648_s8 + $0x494] ss:$8 sps:$4 sm:$0xff]   ;;  %v21204_v43 = vcombine.high %v335_v4, %v339_v9 }
 0x19d   : > { %12706 = vmatprep.subr.bf16.mxu0 %v18732_v44  ;;  %10617 = vmatprep.mubr.bf16.mxu1 %v15287_v47  ;;  %v15803_v44 = vcombine.high %v15669_v18, %v15673_v21  ;;  %v343_v47 = vld [vmem:[%s20641_s30 + $0x1d8] sm:$0xff] }
 0x19e   : > { %12651 = vmatprep.mubr.bf16.mxu0 %v15795_v58  ;;  %v347_v58 = vld [vmem:[%s20641_s30 + $0x1f8] sm:$0xff] }
 0x19f   : > { %10673 = vmatpush1.bf16.msra.mxu1 %v18727_v50  ;;  %v21213_v50 = vcombine.low %v335_v4, %v339_v9  ;;  %v18751_v9 = vld [vmem:[%s20648_s8 + $0x4b0] ss:$8 sps:$4 sm:$0xff]  }
 0x1a0   : > { %12707 = vmatpush1.bf16.msra.mxu0 %v18730_v52  ;;  %10674 = vmatprep.subr.bf16.mxu1 %v18735_v63  ;;  %v15802_v52 = vcombine.low %v15669_v18, %v15673_v21  ;;  %v15677_v63 = vld [vmem:[%s20641_s30 + $0x6e8] sm:$0xff]  ;;  %v18754_v18 = vld [vmem:[%s20648_s8 + $0x16b0] ss:$8 sps:$4 sm:$0xff]  }
 0x1a1   : > { %12708 = vmatprep.subr.bf16.mxu0 %v18738_v1  ;;  %23177 = vst [vmem:[#allocation24_spill] sm:$0xff] %v21213_v50  ;;  %v15681_v1 = vld [vmem:[%s20641_s30 + $0x708] sm:$0xff] }
 0x1a2   : > { %10618 = vmatmul.mubr.bf16.gmra.mrb[16].mxu1 %v15286_v13  ;;  %v18748_v13 = vld [vmem:[%s20648_s8 + $0x16a0] ss:$8 sps:$4 sm:$0xff]   ;;  %v15811_v4 = vcombine.high %v15677_v63, %v15681_v1  ;;  %v18759_v21 = vld [vmem:[%s20648_s8 + $0x4c4] ss:$8 sps:$4 sm:$0xff]  }
 0x1a3   : > { %12652 = vmatmul.mubr.bf16.gmra.mrb[16].mxu0 %v15794_v16  ;;  %10675 = vmatpush1.bf16.msra.mxu1 %v18733_v2  ;;  %v18745_v2 = vld [vmem:[%s20648_s8 + $0x4a0] ss:$8 sps:$4 sm:$0xff]   ;;  %v18753_v16 = vld [vmem:[%s20648_s8 + $0x4b4] ss:$8 sps:$4 sm:$0xff]  }
 0x1a4   : > { %12709 = vmatpush1.bf16.msra.mxu0 %v18736_v23  ;;  %10676 = vmatprep.subr.bf16.mxu1 %v18741_v24  ;;  %v18756_v23 = vld [vmem:[%s20648_s8 + $0x16b4] ss:$8 sps:$4 sm:$0xff]   ;;  %v21221_v24 = vcombine.high %v343_v47, %v347_v58 }
 0x1a5   : > { %12710 = vmatprep.subr.bf16.mxu0 %v18744_v34  ;;  %10627 = vmatprep.mubr.bf16.mxu1 %v21204_v43  ;;  %v18762_v34 = vld [vmem:[%s20648_s8 + $0x16c4] ss:$8 sps:$4 sm:$0xff]  }
 0x1a6   : > { %12661 = vmatprep.mubr.bf16.mxu0 %v15803_v44  ;;  %23178 = vst [vmem:[#allocation25_spill] sm:$0xff] %v21221_v24  ;;  %v18757_v44 = vld [vmem:[%s20648_s8 + $0x4c0] ss:$8 sps:$4 sm:$0xff]  }
 0x1a7   : > { %10677 = vmatpush1.bf16.msra.mxu1 %v18739_v28  ;;  %v18760_v28 = vld [vmem:[%s20648_s8 + $0x16c0] ss:$8 sps:$4 sm:$0xff]  }
 0x1a8   : > { %12711 = vmatpush1.bf16.msra.mxu0 %v18742_v31  ;;  %10678 = vmatprep.subr.bf16.mxu1 %v18747_v37  ;;  %v351_v31 = vld [vmem:[%s20641_s30 + $0x218] sm:$0xff]  ;;  %v21232_v37 = vcombine.low %v343_v47, %v347_v58 }
 0x1a9   : > { %12712 = vmatprep.subr.bf16.mxu0 %v18750_v41  ;;  %v15810_v41 = vcombine.low %v15677_v63, %v15681_v1  ;;  %v18763_v58 = vld [vmem:[%s20648_s8 + $0x4d0] ss:$8 sps:$4 sm:$0xff]   ;;  %v18771_v1 = vld [vmem:[%s20648_s8 + $0x4e4] ss:$8 sps:$4 sm:$0xff]  }
 0x1aa   : > { %10628 = vmatmul.mubr.bf16.gmra.mrb[20].mxu1 %v21213_v50  ;;  %23179 = vst [vmem:[#allocation26_spill] sm:$0xff] %v21232_v37  ;;  %v18766_v63 = vld [vmem:[%s20648_s8 + $0x16d0] ss:$8 sps:$4 sm:$0xff]  }
 0x1ab   : > { %12662 = vmatmul.mubr.bf16.gmra.mrb[20].mxu0 %v15802_v52  ;;  %10679 = vmatpush1.bf16.msra.mxu1 %v18745_v2  ;;  %v355_v52 = vld [vmem:[%s20641_s30 + $0x238] sm:$0xff]  ;;  %v15685_v2 = vld [vmem:[%s20641_s30 + $0x728] sm:$0xff] }
 0x1ac   : > { %12713 = vmatpush1.bf16.msra.mxu0 %v18748_v13  ;;  %10680 = vmatprep.subr.bf16.mxu1 %v18753_v16  ;;  %v15689_v13 = vld [vmem:[%s20641_s30 + $0x748] sm:$0xff]  ;;  %v18765_v16 = vld [vmem:[%s20648_s8 + $0x4d4] ss:$8 sps:$4 sm:$0xff]  }
 0x1ad   : > { %12714 = vmatprep.subr.bf16.mxu0 %v18756_v23  ;;  %10637 = vmatprep.mubr.bf16.mxu1 %v21221_v24  ;;  %v18768_v23 = vld [vmem:[%s20648_s8 + $0x16d4] ss:$8 sps:$4 sm:$0xff]   ;;  %v15819_v47 = vcombine.high %v15685_v2, %v15689_v13 }
 0x1ae   : > { %12671 = vmatprep.mubr.bf16.mxu0 %v15811_v4  ;;  %v21239_v4 = vcombine.high %v351_v31, %v355_v52  ;;  %v15635_v50 = vld [vmem:[%s20641_s30 + $0x598] sm:$0xff] }
 0x1af   : > { %10681 = vmatpush1.bf16.msra.mxu1 %v18751_v9  ;;  %v18774_v9 = vld [vmem:[%s20648_s8 + $0x16e4] ss:$8 sps:$4 sm:$0xff]  }
 0x1b0   : > { %12715 = vmatpush1.bf16.msra.mxu0 %v18754_v18  ;;  %10682 = vmatprep.subr.bf16.mxu1 %v18759_v21  ;;  %23180 = vst [vmem:[#allocation27_spill] sm:$0xff] %v21239_v4  ;;  %v18769_v18 = vld [vmem:[%s20648_s8 + $0x4e0] ss:$8 sps:$4 sm:$0xff]  }
 0x1b1   : > { %12716 = vmatprep.subr.bf16.mxu0 %v18762_v34  ;;  %v18772_v21 = vld [vmem:[%s20648_s8 + $0x16e0] ss:$8 sps:$4 sm:$0xff]  }
 0x1b2   : > { %10638 = vmatmul.mubr.bf16.gmra.mrb[24].mxu1 %v21232_v37  ;;  %v15392_v34 = vld [vmem:[%s20641_s30 + $0x280] sm:$0xff] }
 0x1b3   : > { %12672 = vmatmul.mubr.bf16.gmra.mrb[24].mxu0 %v15810_v41  ;;  %10683 = vmatpush1.bf16.msra.mxu1 %v18757_v44  ;;  %v15396_v37 = vld [vmem:[%s20641_s30 + $0x2a0] sm:$0xff]  ;;  %v21251_v41 = vcombine.low %v351_v31, %v355_v52  ;;  %v15818_v44 = vcombine.low %v15685_v2, %v15689_v13  ;;  %v18775_v31 = vld [vmem:[%s20648_s8 + $0x4f0] ss:$8 sps:$4 sm:$0xff]  }
 0x1b4   : > { %12717 = vmatpush1.bf16.msra.mxu0 %v18760_v28  ;;  %10684 = vmatprep.subr.bf16.mxu1 %v18765_v16  ;;  %v15622_v28 = vld [vmem:[%s20641_s30 + $0x530] sm:$0xff]  ;;  %v18783_v2 = vld [vmem:[%s20648_s8 + $0x504] ss:$8 sps:$4 sm:$0xff]  }
 0x1b5   : > { %12718 = vmatprep.subr.bf16.mxu0 %v18768_v23  ;;  %10647 = vmatprep.mubr.bf16.mxu1 %v21239_v4  ;;  %23181 = vst [vmem:[#allocation28_spill] sm:$0xff] %v21251_v41  ;;  %v15626_v16 = vld [vmem:[%s20641_s30 + $0x550] sm:$0xff]  ;;  %v15473_v4 = vcombine.high %v15392_v34, %v15396_v37  ;;  %v18786_v13 = vld [vmem:[%s20648_s8 + $0x1704] ss:$8 sps:$4 sm:$0xff]  }
 0x1b6   : > { %12681 = vmatprep.mubr.bf16.mxu0 %v15819_v47  ;;  %v18777_v23 = vld [vmem:[%s20648_s8 + $0x4f4] ss:$8 sps:$4 sm:$0xff]   ;;  %v15765_v24 = vcombine.high %v15622_v28, %v15626_v16  ;;  %v18778_v52 = vld [vmem:[%s20648_s8 + $0x16f0] ss:$8 sps:$4 sm:$0xff]  }
 0x1b7   : > { %10685 = vmatpush1.bf16.msra.mxu1 %v18763_v58  ;;  %v18780_v47 = vld [vmem:[%s20648_s8 + $0x16f4] ss:$8 sps:$4 sm:$0xff]   ;;  %v18781_v58 = vld [vmem:[%s20648_s8 + $0x500] ss:$8 sps:$4 sm:$0xff]  }
 0x1b8   : > { %12719 = vmatpush1.bf16.msra.mxu0 %v18766_v63  ;;  %10686 = vmatprep.subr.bf16.mxu1 %v18771_v1  ;;  %v18784_v63 = vld [vmem:[%s20648_s8 + $0x1700] ss:$8 sps:$4 sm:$0xff]  }
 0x1b9   : > { %12720 = vmatprep.subr.bf16.mxu0 %v18774_v9  ;;  %v15400_v1 = vld [vmem:[%s20641_s30 + $0x2c0] sm:$0xff] }
 0x1ba   : > { %10648 = vmatmul.mubr.bf16.gmra.mrb[28].mxu1 %v21251_v41  ;;  %v15404_v9 = vld [vmem:[%s20641_s30 + $0x2e0] sm:$0xff]  ;;  %v15634_v41 = vld [vmem:[%s20641_s30 + $0x590] sm:$0xff] }
 0x1bb   : > { %12682 = vmatmul.mubr.bf16.gmra.mrb[28].mxu0 %v15818_v44  ;;  %10687 = vmatpush1.bf16.msra.mxu1 %v18769_v18  ;;  %v15472_v18 = vcombine.low %v15392_v34, %v15396_v37  ;;  %v15764_v44 = vcombine.low %v15622_v28, %v15626_v16  ;;  %v18787_v37 = vld [vmem:[%s20648_s8 + $0x510] ss:$8 sps:$4 sm:$0xff]   ;;  %v18795_v28 = vld [vmem:[%s20648_s8 + $0x524] ss:$8 sps:$4 sm:$0xff]  }
 0x1bc   : > { %12721 = vmatpush1.bf16.msra.mxu0 %v18772_v21  ;;  %10688 = vmatprep.subr.bf16.mxu1 %v18777_v23  ;;  %v15630_v21 = vld [vmem:[%s20641_s30 + $0x570] sm:$0xff]  ;;  %v18798_v16 = vld [vmem:[%s20648_s8 + $0x1724] ss:$8 sps:$4 sm:$0xff]  }
 0x1bd   : > { %12722 = vmatprep.subr.bf16.mxu0 %v18780_v47  ;;  %10690 = vmatprep.mubr.bf16.mxu1 %v15473_v4  ;;  %v18789_v23 = vld [vmem:[%s20648_s8 + $0x514] ss:$8 sps:$4 sm:$0xff]   ;;  %v15773_v47 = vcombine.high %v15630_v21, %v15634_v41  ;;  %v18790_v34 = vld [vmem:[%s20648_s8 + $0x1710] ss:$8 sps:$4 sm:$0xff]  }
 0x1be   : > { %12724 = vmatprep.mubr.bf16.mxu0 %v15765_v24  ;;  %v18792_v4 = vld [vmem:[%s20648_s8 + $0x1714] ss:$8 sps:$4 sm:$0xff]   ;;  %v21270_v24 = vcombine.high %v15400_v1, %v15404_v9 }
 0x1bf   : > { %10689 = vmatpush1.bf16.msra.mxu1 %v18775_v31  ;;  %v18793_v31 = vld [vmem:[%s20648_s8 + $0x520] ss:$8 sps:$4 sm:$0xff]  }
 0x1c0   : > { %12723 = vmatpush1.bf16.msra.mxu0 %v18778_v52  ;;  %10771 = vmatprep.subr.bf16.mxu1 %v18783_v2  ;;  %23182 = vst [vmem:[#allocation29_spill] sm:$0xff] %v21270_v24  ;;  %v15408_v52 = vld [vmem:[%s20641_s30 + $0x300] sm:$0xff] }
 0x1c1   : > { %12805 = vmatprep.subr.bf16.mxu0 %v18786_v13  ;;  %v15412_v2 = vld [vmem:[%s20641_s30 + $0x320] sm:$0xff]  ;;  %v21280_v13 = vcombine.low %v15400_v1, %v15404_v9  ;;  %v18802_v1 = vld [vmem:[%s20648_s8 + $0x1730] ss:$8 sps:$4 sm:$0xff]  }
 0x1c2   : > { %10691 = vmatmul.mubr.bf16.vlgmr.msra.gmra.mrb[0].mxu1 %v15472_v18  ;;  %v15772_v18 = vcombine.low %v15630_v21, %v15634_v41  ;;  %v18799_v41 = vld [vmem:[%s20648_s8 + $0x530] ss:$8 sps:$4 sm:$0xff]   ;;  %v18807_v9 = vld [vmem:[%s20648_s8 + $0x544] ss:$8 sps:$4 sm:$0xff]  }
 0x1c3   : > { %12725 = vmatmul.mubr.bf16.vlgmr.msra.gmra.mrb[0].mxu0 %v15764_v44  ;;  %10772 = vmatpush1.bf16.msra.mxu1 %v18781_v58  ;;  %23183 = vst [vmem:[#allocation30_spill] sm:$0xff] %v21280_v13  ;;  %v15638_v58 = vld [vmem:[%s20641_s30 + $0x5b0] sm:$0xff]  ;;  %v18796_v44 = vld [vmem:[%s20648_s8 + $0x1720] ss:$8 sps:$4 sm:$0xff]   ;;  %v18810_v21 = vld [vmem:[%s20648_s8 + $0x1744] ss:$8 sps:$4 sm:$0xff]  }
 0x1c4   : > { %12806 = vmatpush1.bf16.msra.mxu0 %v18784_v63  ;;  %10773 = vmatprep.subr.bf16.mxu1 %v18789_v23  ;;  %v15642_v63 = vld [vmem:[%s20641_s30 + $0x5d0] sm:$0xff] }
 0x1c5   : > { %12807 = vmatprep.subr.bf16.mxu0 %v18792_v4  ;;  %10700 = vmatprep.mubr.bf16.mxu1 %v21270_v24  ;;  %v18801_v23 = vld [vmem:[%s20648_s8 + $0x534] ss:$8 sps:$4 sm:$0xff]   ;;  %v15781_v24 = vcombine.high %v15638_v58, %v15642_v63 }
 0x1c6   : > { %12734 = vmatprep.mubr.bf16.mxu0 %v15773_v47  ;;  %v18804_v4 = vld [vmem:[%s20648_s8 + $0x1734] ss:$8 sps:$4 sm:$0xff]   ;;  %v21287_v47 = vcombine.high %v15408_v52, %v15412_v2 }
 0x1c7   : > { %10774 = vmatpush1.bf16.msra.mxu1 %v18787_v37  ;;  %v15416_v37 = vld [vmem:[%s20641_s30 + $0x340] sm:$0xff] }
 0x1c8   : > { %12808 = vmatpush1.bf16.msra.mxu0 %v18790_v34  ;;  %10775 = vmatprep.subr.bf16.mxu1 %v18795_v28  ;;  %23184 = vst [vmem:[#allocation31_spill] sm:$0xff] %v21287_v47  ;;  %v15420_v34 = vld [vmem:[%s20641_s30 + $0x360] sm:$0xff]  ;;  %v21297_v28 = vcombine.low %v15408_v52, %v15412_v2  ;;  %v18811_v2 = vld [vmem:[%s20648_s8 + $0x550] ss:$8 sps:$4 sm:$0xff]  }
 0x1c9   : > { %12809 = vmatprep.subr.bf16.mxu0 %v18798_v16  ;;  %v15780_v16 = vcombine.low %v15638_v58, %v15642_v63  ;;  %v18814_v58 = vld [vmem:[%s20648_s8 + $0x1750] ss:$8 sps:$4 sm:$0xff]   ;;  %v18819_v63 = vld [vmem:[%s20648_s8 + $0x564] ss:$8 sps:$4 sm:$0xff]  }
 0x1ca   : > { %10701 = vmatmul.mubr.bf16.gmra.mrb[4].mxu1 %v21280_v13  ;;  %23185 = vst [vmem:[#allocation32_spill] sm:$0xff] %v21297_v28  ;;  %v15436_v13 = vld [vmem:[%s20641_s30 + $0x3e0] sm:$0xff] }
 0x1cb   : > { %12735 = vmatmul.mubr.bf16.gmra.mrb[4].mxu0 %v15772_v18  ;;  %10776 = vmatpush1.bf16.msra.mxu1 %v18793_v31  ;;  %v15646_v31 = vld [vmem:[%s20641_s30 + $0x5f0] sm:$0xff] }
 0x1cc   : > { %12810 = vmatpush1.bf16.msra.mxu0 %v18796_v44  ;;  %10777 = vmatprep.subr.bf16.mxu1 %v18801_v23  ;;  %v15650_v18 = vld [vmem:[%s20641_s30 + $0x610] sm:$0xff]  ;;  %v18805_v44 = vld [vmem:[%s20648_s8 + $0x540] ss:$8 sps:$4 sm:$0xff]  }
 0x1cd   : > { %12811 = vmatprep.subr.bf16.mxu0 %v18804_v4  ;;  %10710 = vmatprep.mubr.bf16.mxu1 %v21287_v47  ;;  %v18808_v23 = vld [vmem:[%s20648_s8 + $0x1740] ss:$8 sps:$4 sm:$0xff]   ;;  %v18813_v4 = vld [vmem:[%s20648_s8 + $0x554] ss:$8 sps:$4 sm:$0xff]   ;;  %v21305_v47 = vcombine.high %v15416_v37, %v15420_v34  ;;  %v15789_v52 = vcombine.high %v15646_v31, %v15650_v18 }
 0x1ce   : > { %12744 = vmatprep.mubr.bf16.mxu0 %v15781_v24  ;;  %v18816_v24 = vld [vmem:[%s20648_s8 + $0x1754] ss:$8 sps:$4 sm:$0xff]  }
 0x1cf   : > { %10778 = vmatpush1.bf16.msra.mxu1 %v18799_v41  ;;  %23186 = vst [vmem:[#allocation33_spill] sm:$0xff] %v21305_v47  ;;  %v18822_v41 = vld [vmem:[%s20648_s8 + $0x1764] ss:$8 sps:$4 sm:$0xff]  }
 0x1d0   : > { %12812 = vmatpush1.bf16.msra.mxu0 %v18802_v1  ;;  %10779 = vmatprep.subr.bf16.mxu1 %v18807_v9  ;;  %v18817_v1 = vld [vmem:[%s20648_s8 + $0x560] ss:$8 sps:$4 sm:$0xff]  }
 0x1d1   : > { %12813 = vmatprep.subr.bf16.mxu0 %v18810_v21  ;;  %v18820_v9 = vld [vmem:[%s20648_s8 + $0x1760] ss:$8 sps:$4 sm:$0xff]  }
 0x1d2   : > { %10711 = vmatmul.mubr.bf16.gmra.mrb[8].mxu1 %v21297_v28  ;;  %v15432_v21 = vld [vmem:[%s20641_s30 + $0x3c0] sm:$0xff]  ;;  %v15788_v28 = vcombine.low %v15646_v31, %v15650_v18 }
 0x1d3   : > { %12745 = vmatmul.mubr.bf16.gmra.mrb[8].mxu0 %v15780_v16  ;;  %10780 = vmatpush1.bf16.msra.mxu1 %v18805_v44  ;;  %v21316_v16 = vcombine.low %v15416_v37, %v15420_v34  ;;  %v15662_v44 = vld [vmem:[%s20641_s30 + $0x670] sm:$0xff]  ;;  %v18831_v31 = vld [vmem:[%s20648_s8 + $0x584] ss:$8 sps:$4 sm:$0xff]  }
 0x1d4   : > { %12814 = vmatpush1.bf16.msra.mxu0 %v18808_v23  ;;  %10781 = vmatprep.subr.bf16.mxu1 %v18813_v4  ;;  %v15666_v23 = vld [vmem:[%s20641_s30 + $0x690] sm:$0xff]  ;;  %v18834_v18 = vld [vmem:[%s20648_s8 + $0x1784] ss:$8 sps:$4 sm:$0xff]  }
 0x1d5   : > { %12815 = vmatprep.subr.bf16.mxu0 %v18816_v24  ;;  %10720 = vmatprep.mubr.bf16.mxu1 %v21305_v47  ;;  %23187 = vst [vmem:[#allocation34_spill] sm:$0xff] %v21316_v16  ;;  %v18825_v4 = vld [vmem:[%s20648_s8 + $0x574] ss:$8 sps:$4 sm:$0xff]   ;;  %v15797_v47 = vcombine.high %v15662_v44, %v15666_v23  ;;  %v18823_v37 = vld [vmem:[%s20648_s8 + $0x570] ss:$8 sps:$4 sm:$0xff]  }
 0x1d6   : > { %12754 = vmatprep.mubr.bf16.mxu0 %v15789_v52  ;;  %v18828_v24 = vld [vmem:[%s20648_s8 + $0x1774] ss:$8 sps:$4 sm:$0xff]   ;;  %v15505_v52 = vcombine.high %v15432_v21, %v15436_v13  ;;  %v18826_v34 = vld [vmem:[%s20648_s8 + $0x1770] ss:$8 sps:$4 sm:$0xff]  }
 0x1d7   : > { %10782 = vmatpush1.bf16.msra.mxu1 %v18811_v2  ;;  %v18829_v2 = vld [vmem:[%s20648_s8 + $0x580] ss:$8 sps:$4 sm:$0xff]  }
 0x1d8   : > { %12816 = vmatpush1.bf16.msra.mxu0 %v18814_v58  ;;  %10783 = vmatprep.subr.bf16.mxu1 %v18819_v63  ;;  %v18832_v58 = vld [vmem:[%s20648_s8 + $0x1780] ss:$8 sps:$4 sm:$0xff]  }
 0x1d9   : > { %12817 = vmatprep.subr.bf16.mxu0 %v18822_v41  ;;  %v15440_v63 = vld [vmem:[%s20641_s30 + $0x400] sm:$0xff] }
 0x1da   : > { %10721 = vmatmul.mubr.bf16.gmra.mrb[12].mxu1 %v21316_v16  ;;  %v15444_v41 = vld [vmem:[%s20641_s30 + $0x420] sm:$0xff]  ;;  %v15504_v16 = vcombine.low %v15432_v21, %v15436_v13  ;;  %v18835_v13 = vld [vmem:[%s20648_s8 + $0x590] ss:$8 sps:$4 sm:$0xff]  }
 0x1db   : > { %12755 = vmatmul.mubr.bf16.gmra.mrb[12].mxu0 %v15788_v28  ;;  %10784 = vmatpush1.bf16.msra.mxu1 %v18817_v1  ;;  %v15796_v28 = vcombine.low %v15662_v44, %v15666_v23  ;;  %v15670_v1 = vld [vmem:[%s20641_s30 + $0x6b0] sm:$0xff]  ;;  %v18843_v44 = vld [vmem:[%s20648_s8 + $0x5a4] ss:$8 sps:$4 sm:$0xff]  }
 0x1dc   : > { %12818 = vmatpush1.bf16.msra.mxu0 %v18820_v9  ;;  %10785 = vmatprep.subr.bf16.mxu1 %v18825_v4  ;;  %v15674_v9 = vld [vmem:[%s20641_s30 + $0x6d0] sm:$0xff]  ;;  %v18846_v23 = vld [vmem:[%s20648_s8 + $0x17a4] ss:$8 sps:$4 sm:$0xff]  }
 0x1dd   : > { %12819 = vmatprep.subr.bf16.mxu0 %v18828_v24  ;;  %10730 = vmatprep.mubr.bf16.mxu1 %v15505_v52  ;;  %v18837_v4 = vld [vmem:[%s20648_s8 + $0x594] ss:$8 sps:$4 sm:$0xff]   ;;  %v15805_v52 = vcombine.high %v15670_v1, %v15674_v9  ;;  %v18838_v21 = vld [vmem:[%s20648_s8 + $0x1790] ss:$8 sps:$4 sm:$0xff]  }
 0x1de   : > { %12764 = vmatprep.mubr.bf16.mxu0 %v15797_v47  ;;  %v18840_v24 = vld [vmem:[%s20648_s8 + $0x1794] ss:$8 sps:$4 sm:$0xff]   ;;  %v21336_v47 = vcombine.high %v15440_v63, %v15444_v41 }
 0x1df   : > { %10786 = vmatpush1.bf16.msra.mxu1 %v18823_v37  ;;  %v18841_v37 = vld [vmem:[%s20648_s8 + $0x5a0] ss:$8 sps:$4 sm:$0xff]  }
 0x1e0   : > { %12820 = vmatpush1.bf16.msra.mxu0 %v18826_v34  ;;  %10787 = vmatprep.subr.bf16.mxu1 %v18831_v31  ;;  %23188 = vst [vmem:[#allocation35_spill] sm:$0xff] %v21336_v47  ;;  %v18844_v34 = vld [vmem:[%s20648_s8 + $0x17a0] ss:$8 sps:$4 sm:$0xff]  }
 0x1e1   : > { %12821 = vmatprep.subr.bf16.mxu0 %v18834_v18  ;;  %v15452_v31 = vld [vmem:[%s20641_s30 + $0x460] sm:$0xff]  ;;  %v21347_v18 = vcombine.low %v15440_v63, %v15444_v41  ;;  %v18850_v41 = vld [vmem:[%s20648_s8 + $0x17b0] ss:$8 sps:$4 sm:$0xff]  }
 0x1e2   : > { %10731 = vmatmul.mubr.bf16.gmra.mrb[16].mxu1 %v15504_v16  ;;  %v15448_v16 = vld [vmem:[%s20641_s30 + $0x440] sm:$0xff] }
 0x1e3   : > { %12765 = vmatmul.mubr.bf16.gmra.mrb[16].mxu0 %v15796_v28  ;;  %10788 = vmatpush1.bf16.msra.mxu1 %v18829_v2  ;;  %23189 = vst [vmem:[#allocation36_spill] sm:$0xff] %v21347_v18  ;;  %v15804_v2 = vcombine.low %v15670_v1, %v15674_v9  ;;  %v15682_v28 = vld [vmem:[%s20641_s30 + $0x710] sm:$0xff]  ;;  %v18855_v1 = vld [vmem:[%s20648_s8 + $0x5c4] ss:$8 sps:$4 sm:$0xff]  }
 0x1e4   : > { %12822 = vmatpush1.bf16.msra.mxu0 %v18832_v58  ;;  %10789 = vmatprep.subr.bf16.mxu1 %v18837_v4  ;;  %v15678_v58 = vld [vmem:[%s20641_s30 + $0x6f0] sm:$0xff]  ;;  %v18858_v9 = vld [vmem:[%s20648_s8 + $0x17c4] ss:$8 sps:$4 sm:$0xff]  }
 0x1e5   : > { %12823 = vmatprep.subr.bf16.mxu0 %v18840_v24  ;;  %10740 = vmatprep.mubr.bf16.mxu1 %v21336_v47  ;;  %v18849_v4 = vld [vmem:[%s20648_s8 + $0x5b4] ss:$8 sps:$4 sm:$0xff]   ;;  %v21354_v47 = vcombine.high %v15448_v16, %v15452_v31  ;;  %v15813_v63 = vcombine.high %v15678_v58, %v15682_v28 }
 0x1e6   : > { %12774 = vmatprep.mubr.bf16.mxu0 %v15805_v52  ;;  %v18852_v24 = vld [vmem:[%s20648_s8 + $0x17b4] ss:$8 sps:$4 sm:$0xff]   ;;  %v18847_v52 = vld [vmem:[%s20648_s8 + $0x5b0] ss:$8 sps:$4 sm:$0xff]  }
 0x1e7   : > { %10790 = vmatpush1.bf16.msra.mxu1 %v18835_v13  ;;  %23190 = vst [vmem:[#allocation37_spill] sm:$0xff] %v21354_v47  ;;  %v15456_v13 = vld [vmem:[%s20641_s30 + $0x480] sm:$0xff] }
 0x1e8   : > { %12824 = vmatpush1.bf16.msra.mxu0 %v18838_v21  ;;  %10791 = vmatprep.subr.bf16.mxu1 %v18843_v44  ;;  %v18853_v21 = vld [vmem:[%s20648_s8 + $0x5c0] ss:$8 sps:$4 sm:$0xff]  }
 0x1e9   : > { %12825 = vmatprep.subr.bf16.mxu0 %v18846_v23  ;;  %v15460_v44 = vld [vmem:[%s20641_s30 + $0x4a0] sm:$0xff]  ;;  %v15686_v23 = vld [vmem:[%s20641_s30 + $0x730] sm:$0xff] }
 0x1ea   : > { %10741 = vmatmul.mubr.bf16.gmra.mrb[20].mxu1 %v21347_v18  ;;  %v18864_v18 = vld [vmem:[%s20648_s8 + $0x17d4] ss:$8 sps:$4 sm:$0xff]  }
 0x1eb   : > { %12775 = vmatmul.mubr.bf16.gmra.mrb[20].mxu0 %v15804_v2  ;;  %10792 = vmatpush1.bf16.msra.mxu1 %v18841_v37  ;;  %v21365_v2 = vcombine.low %v15448_v16, %v15452_v31  ;;  %v15812_v37 = vcombine.low %v15678_v58, %v15682_v28  ;;  %v18862_v31 = vld [vmem:[%s20648_s8 + $0x17d0] ss:$8 sps:$4 sm:$0xff]   ;;  %v18867_v58 = vld [vmem:[%s20648_s8 + $0x5e4] ss:$8 sps:$4 sm:$0xff]  }
 0x1ec   : > { %12826 = vmatpush1.bf16.msra.mxu0 %v18844_v34  ;;  %10793 = vmatprep.subr.bf16.mxu1 %v18849_v4  ;;  %v15690_v34 = vld [vmem:[%s20641_s30 + $0x750] sm:$0xff]  ;;  %v18856_v4 = vld [vmem:[%s20648_s8 + $0x17c0] ss:$8 sps:$4 sm:$0xff]   ;;  %v18870_v28 = vld [vmem:[%s20648_s8 + $0x17e4] ss:$8 sps:$4 sm:$0xff]  }
 0x1ed   : > { %12827 = vmatprep.subr.bf16.mxu0 %v18852_v24  ;;  %10750 = vmatprep.mubr.bf16.mxu1 %v21354_v47  ;;  %23191 = vst [vmem:[#allocation38_spill] sm:$0xff] %v21365_v2  ;;  %v18861_v24 = vld [vmem:[%s20648_s8 + $0x5d4] ss:$8 sps:$4 sm:$0xff]   ;;  %v21372_v47 = vcombine.high %v15456_v13, %v15460_v44  ;;  %v15821_v16 = vcombine.high %v15686_v23, %v15690_v34 }
 0x1ee   : > { %12784 = vmatprep.mubr.bf16.mxu0 %v15813_v63  ;;  %v18859_v63 = vld [vmem:[%s20648_s8 + $0x5d0] ss:$8 sps:$4 sm:$0xff]  }
 0x1ef   : > { %10794 = vmatpush1.bf16.msra.mxu1 %v18847_v52  ;;  %23192 = vst [vmem:[#allocation39_spill] sm:$0xff] %v21372_v47  ;;  %v15393_v52 = vld [vmem:[%s20641_s30 + $0x288] sm:$0xff] }
 0x1f0   : > { %12828 = vmatpush1.bf16.msra.mxu0 %v18850_v41  ;;  %10795 = vmatprep.subr.bf16.mxu1 %v18855_v1  ;;  %v18865_v41 = vld [vmem:[%s20648_s8 + $0x5e0] ss:$8 sps:$4 sm:$0xff]  }
 0x1f1   : > { %12829 = vmatprep.subr.bf16.mxu0 %v18858_v9  ;;  %v15397_v1 = vld [vmem:[%s20641_s30 + $0x2a8] sm:$0xff]  ;;  %v15623_v9 = vld [vmem:[%s20641_s30 + $0x538] sm:$0xff] }
 0x1f2   : > { %10751 = vmatmul.mubr.bf16.gmra.mrb[24].mxu1 %v21365_v2 }
 0x1f3   : > { %12785 = vmatmul.mubr.bf16.gmra.mrb[24].mxu0 %v15812_v37  ;;  %10796 = vmatpush1.bf16.msra.mxu1 %v18853_v21  ;;  %v21383_v37 = vcombine.low %v15456_v13, %v15460_v44  ;;  %v15820_v21 = vcombine.low %v15686_v23, %v15690_v34  ;;  %v18871_v13 = vld [vmem:[%s20648_s8 + $0x5f0] ss:$8 sps:$4 sm:$0xff]   ;;  %v18879_v23 = vld [vmem:[%s20648_s8 + $0x604] ss:$8 sps:$4 sm:$0xff]  }
 0x1f4   : > { %12830 = vmatpush1.bf16.msra.mxu0 %v18856_v4  ;;  %10797 = vmatprep.subr.bf16.mxu1 %v18861_v24  ;;  %v15627_v4 = vld [vmem:[%s20641_s30 + $0x558] sm:$0xff]  ;;  %v18882_v34 = vld [vmem:[%s20648_s8 + $0x1804] ss:$8 sps:$4 sm:$0xff]  }
 0x1f5   : > { %12831 = vmatprep.subr.bf16.mxu0 %v18864_v18  ;;  %10760 = vmatprep.mubr.bf16.mxu1 %v21372_v47  ;;  %23193 = vst [vmem:[#allocation40_spill] sm:$0xff] %v21383_v37  ;;  %v18868_v18 = vld [vmem:[%s20648_s8 + $0x17e0] ss:$8 sps:$4 sm:$0xff]   ;;  %v18873_v24 = vld [vmem:[%s20648_s8 + $0x5f4] ss:$8 sps:$4 sm:$0xff]   ;;  %v15767_v2 = vcombine.high %v15623_v9, %v15627_v4 }
 0x1f6   : > { %12794 = vmatprep.mubr.bf16.mxu0 %v15821_v16  ;;  %v18876_v47 = vld [vmem:[%s20648_s8 + $0x17f4] ss:$8 sps:$4 sm:$0xff]   ;;  %v15475_v16 = vcombine.high %v15393_v52, %v15397_v1  ;;  %v18874_v44 = vld [vmem:[%s20648_s8 + $0x17f0] ss:$8 sps:$4 sm:$0xff]  }
 0x1f7   : > { %10798 = vmatpush1.bf16.msra.mxu1 %v18859_v63  ;;  %v15401_v63 = vld [vmem:[%s20641_s30 + $0x2c8] sm:$0xff] }
 0x1f8   : > { %12832 = vmatpush1.bf16.msra.mxu0 %v18862_v31  ;;  %10799 = vmatprep.subr.bf16.mxu1 %v18867_v58  ;;  %v18877_v31 = vld [vmem:[%s20648_s8 + $0x600] ss:$8 sps:$4 sm:$0xff]  }
 0x1f9   : > { %12833 = vmatprep.subr.bf16.mxu0 %v18870_v28  ;;  %v15405_v58 = vld [vmem:[%s20641_s30 + $0x2e8] sm:$0xff]  ;;  %v15474_v28 = vcombine.low %v15393_v52, %v15397_v1  ;;  %v18883_v52 = vld [vmem:[%s20648_s8 + $0x610] ss:$8 sps:$4 sm:$0xff]  }
 0x1fa   : > { %10761 = vmatmul.mubr.bf16.gmra.mrb[28].mxu1 %v21383_v37  ;;  %v15631_v37 = vld [vmem:[%s20641_s30 + $0x578] sm:$0xff] }
 0x1fb   : > { %12795 = vmatmul.mubr.bf16.gmra.mrb[28].mxu0 %v15820_v21  ;;  %10800 = vmatpush1.bf16.msra.mxu1 %v18865_v41  ;;  %v15766_v21 = vcombine.low %v15623_v9, %v15627_v4  ;;  %v18880_v41 = vld [vmem:[%s20648_s8 + $0x1800] ss:$8 sps:$4 sm:$0xff]   ;;  %v18886_v1 = vld [vmem:[%s20648_s8 + $0x1810] ss:$8 sps:$4 sm:$0xff]   ;;  %v18891_v9 = vld [vmem:[%s20648_s8 + $0x624] ss:$8 sps:$4 sm:$0xff]  }
 0x1fc   : > { %12834 = vmatpush1.bf16.msra.mxu0 %v18868_v18  ;;  %10801 = vmatprep.subr.bf16.mxu1 %v18873_v24  ;;  %v18885_v18 = vld [vmem:[%s20648_s8 + $0x614] ss:$8 sps:$4 sm:$0xff]   ;;  %v15775_v24 = vcombine.high %v15631_v37, %v15635_v50  ;;  %v18894_v4 = vld [vmem:[%s20648_s8 + $0x1824] ss:$8 sps:$4 sm:$0xff]  }
 0x1fd   : > { %12835 = vmatprep.subr.bf16.mxu0 %v18876_v47  ;;  %10803 = vmatprep.mubr.bf16.mxu1 %v15475_v16  ;;  %v18888_v47 = vld [vmem:[%s20648_s8 + $0x1814] ss:$8 sps:$4 sm:$0xff]   ;;  %v18889_v16 = vld [vmem:[%s20648_s8 + $0x620] ss:$8 sps:$4 sm:$0xff]  }
 0x1fe   : > { %12837 = vmatprep.mubr.bf16.mxu0 %v15767_v2  ;;  %v21402_v2 = vcombine.high %v15401_v63, %v15405_v58 }
 0x1ff   : > { %10802 = vmatpush1.bf16.msra.mxu1 %v18871_v13  ;;  %v18892_v13 = vld [vmem:[%s20648_s8 + $0x1820] ss:$8 sps:$4 sm:$0xff]  }
 0x200   : > { %12836 = vmatpush1.bf16.msra.mxu0 %v18874_v44  ;;  %10884 = vmatprep.subr.bf16.mxu1 %v18879_v23  ;;  %23194 = vst [vmem:[#allocation41_spill] sm:$0xff] %v21402_v2  ;;  %v15409_v44 = vld [vmem:[%s20641_s30 + $0x308] sm:$0xff] }
 0x201   : > { %12918 = vmatprep.subr.bf16.mxu0 %v18882_v34  ;;  %v15413_v23 = vld [vmem:[%s20641_s30 + $0x328] sm:$0xff]  ;;  %v21413_v34 = vcombine.low %v15401_v63, %v15405_v58 }
 0x202   : > { %10804 = vmatmul.mubr.bf16.vlgmr.msra.gmra.mrb[0].mxu1 %v15474_v28  ;;  %v15774_v28 = vcombine.low %v15631_v37, %v15635_v50  ;;  %v18895_v50 = vld [vmem:[%s20648_s8 + $0x630] ss:$8 sps:$4 sm:$0xff]   ;;  %v18903_v63 = vld [vmem:[%s20648_s8 + $0x644] ss:$8 sps:$4 sm:$0xff]  }
 0x203   : > { %12838 = vmatmul.mubr.bf16.vlgmr.msra.gmra.mrb[0].mxu0 %v15766_v21  ;;  %10885 = vmatpush1.bf16.msra.mxu1 %v18877_v31  ;;  %23195 = vst [vmem:[#allocation42_spill] sm:$0xff] %v21413_v34  ;;  %v15639_v31 = vld [vmem:[%s20641_s30 + $0x5b8] sm:$0xff]  ;;  %v18906_v58 = vld [vmem:[%s20648_s8 + $0x1844] ss:$8 sps:$4 sm:$0xff]  }
 0x204   : > { %12919 = vmatpush1.bf16.msra.mxu0 %v18880_v41  ;;  %10886 = vmatprep.subr.bf16.mxu1 %v18885_v18  ;;  %v15643_v21 = vld [vmem:[%s20641_s30 + $0x5d8] sm:$0xff] }
 0x205   : > { %12920 = vmatprep.subr.bf16.mxu0 %v18888_v47  ;;  %10813 = vmatprep.mubr.bf16.mxu1 %v21402_v2  ;;  %v18897_v41 = vld [vmem:[%s20648_s8 + $0x634] ss:$8 sps:$4 sm:$0xff]   ;;  %v21419_v47 = vcombine.high %v15409_v44, %v15413_v23  ;;  %v18898_v37 = vld [vmem:[%s20648_s8 + $0x1830] ss:$8 sps:$4 sm:$0xff]  }
 0x206   : > { %12847 = vmatprep.mubr.bf16.mxu0 %v15775_v24  ;;  %v18900_v18 = vld [vmem:[%s20648_s8 + $0x1834] ss:$8 sps:$4 sm:$0xff]   ;;  %v15783_v24 = vcombine.high %v15639_v31, %v15643_v21 }
 0x207   : > { %10887 = vmatpush1.bf16.msra.mxu1 %v18883_v52  ;;  %23196 = vst [vmem:[#allocation43_spill] sm:$0xff] %v21419_v47  ;;  %v18901_v52 = vld [vmem:[%s20648_s8 + $0x640] ss:$8 sps:$4 sm:$0xff]   ;;  %v15675_v2 = vld [vmem:[%s20641_s30 + $0x6d8] sm:$0xff] }
 0x208   : > { %12921 = vmatpush1.bf16.msra.mxu0 %v18886_v1  ;;  %10888 = vmatprep.subr.bf16.mxu1 %v18891_v9  ;;  %v15417_v1 = vld [vmem:[%s20641_s30 + $0x348] sm:$0xff] }
 0x209   : > { %12922 = vmatprep.subr.bf16.mxu0 %v18894_v4  ;;  %v15421_v9 = vld [vmem:[%s20641_s30 + $0x368] sm:$0xff]  ;;  %v21430_v4 = vcombine.low %v15409_v44, %v15413_v23  ;;  %v18907_v23 = vld [vmem:[%s20648_s8 + $0x650] ss:$8 sps:$4 sm:$0xff]  }
 0x20a   : > { %10814 = vmatmul.mubr.bf16.gmra.mrb[4].mxu1 %v21413_v34  ;;  %v15647_v34 = vld [vmem:[%s20641_s30 + $0x5f8] sm:$0xff] }
 0x20b   : > { %12848 = vmatmul.mubr.bf16.gmra.mrb[4].mxu0 %v15774_v28  ;;  %10889 = vmatpush1.bf16.msra.mxu1 %v18889_v16  ;;  %23197 = vst [vmem:[#allocation44_spill] sm:$0xff] %v21430_v4  ;;  %v15782_v28 = vcombine.low %v15639_v31, %v15643_v21  ;;  %v15651_v16 = vld [vmem:[%s20641_s30 + $0x618] sm:$0xff]  ;;  %v18915_v21 = vld [vmem:[%s20648_s8 + $0x664] ss:$8 sps:$4 sm:$0xff]  }
 0x20c   : > { %12923 = vmatpush1.bf16.msra.mxu0 %v18892_v13  ;;  %10890 = vmatprep.subr.bf16.mxu1 %v18897_v41  ;;  %v18904_v13 = vld [vmem:[%s20648_s8 + $0x1840] ss:$8 sps:$4 sm:$0xff]   ;;  %v18909_v41 = vld [vmem:[%s20648_s8 + $0x654] ss:$8 sps:$4 sm:$0xff]   ;;  %v15791_v44 = vcombine.high %v15647_v34, %v15651_v16  ;;  %v18910_v31 = vld [vmem:[%s20648_s8 + $0x1850] ss:$8 sps:$4 sm:$0xff]  }
 0x20d   : > { %12924 = vmatprep.subr.bf16.mxu0 %v18900_v18  ;;  %10823 = vmatprep.mubr.bf16.mxu1 %v21419_v47  ;;  %v18912_v18 = vld [vmem:[%s20648_s8 + $0x1854] ss:$8 sps:$4 sm:$0xff]  }
 0x20e   : > { %12857 = vmatprep.mubr.bf16.mxu0 %v15783_v24  ;;  %v21437_v24 = vcombine.high %v15417_v1, %v15421_v9 }
 0x20f   : > { %10891 = vmatpush1.bf16.msra.mxu1 %v18895_v50  ;;  %v18918_v50 = vld [vmem:[%s20648_s8 + $0x1864] ss:$8 sps:$4 sm:$0xff]  }
 0x210   : > { %12925 = vmatpush1.bf16.msra.mxu0 %v18898_v37  ;;  %10892 = vmatprep.subr.bf16.mxu1 %v18903_v63  ;;  %23198 = vst [vmem:[#allocation45_spill] sm:$0xff] %v21437_v24  ;;  %v15433_v37 = vld [vmem:[%s20641_s30 + $0x3c8] sm:$0xff] }
 0x211   : > { %12926 = vmatprep.subr.bf16.mxu0 %v18906_v58  ;;  %v18913_v63 = vld [vmem:[%s20648_s8 + $0x660] ss:$8 sps:$4 sm:$0xff]  }
 0x212   : > { %10824 = vmatmul.mubr.bf16.gmra.mrb[8].mxu1 %v21430_v4  ;;  %v15437_v58 = vld [vmem:[%s20641_s30 + $0x3e8] sm:$0xff]  ;;  %v15667_v4 = vld [vmem:[%s20641_s30 + $0x698] sm:$0xff] }
 0x213   : > { %12858 = vmatmul.mubr.bf16.gmra.mrb[8].mxu0 %v15782_v28  ;;  %10893 = vmatpush1.bf16.msra.mxu1 %v18901_v52  ;;  %v21448_v28 = vcombine.low %v15417_v1, %v15421_v9  ;;  %v15790_v52 = vcombine.low %v15647_v34, %v15651_v16  ;;  %v18919_v34 = vld [vmem:[%s20648_s8 + $0x670] ss:$8 sps:$4 sm:$0xff]   ;;  %v18927_v9 = vld [vmem:[%s20648_s8 + $0x684] ss:$8 sps:$4 sm:$0xff]  }
 0x214   : > { %12927 = vmatpush1.bf16.msra.mxu0 %v18904_v13  ;;  %10894 = vmatprep.subr.bf16.mxu1 %v18909_v41  ;;  %v15663_v13 = vld [vmem:[%s20641_s30 + $0x678] sm:$0xff]  ;;  %v18916_v41 = vld [vmem:[%s20648_s8 + $0x1860] ss:$8 sps:$4 sm:$0xff]   ;;  %v18930_v16 = vld [vmem:[%s20648_s8 + $0x1884] ss:$8 sps:$4 sm:$0xff]  }
 0x215   : > { %12928 = vmatprep.subr.bf16.mxu0 %v18912_v18  ;;  %10833 = vmatprep.mubr.bf16.mxu1 %v21437_v24  ;;  %23199 = vst [vmem:[#allocation46_spill] sm:$0xff] %v21448_v28  ;;  %v18921_v18 = vld [vmem:[%s20648_s8 + $0x674] ss:$8 sps:$4 sm:$0xff]   ;;  %v15799_v47 = vcombine.high %v15663_v13, %v15667_v4  ;;  %v18922_v1 = vld [vmem:[%s20648_s8 + $0x1870] ss:$8 sps:$4 sm:$0xff]  }
 0x216   : > { %12867 = vmatprep.mubr.bf16.mxu0 %v15791_v44  ;;  %v18924_v24 = vld [vmem:[%s20648_s8 + $0x1874] ss:$8 sps:$4 sm:$0xff]   ;;  %v15507_v44 = vcombine.high %v15433_v37, %v15437_v58 }
 0x217   : > { %10895 = vmatpush1.bf16.msra.mxu1 %v18907_v23  ;;  %v15441_v23 = vld [vmem:[%s20641_s30 + $0x408] sm:$0xff] }
 0x218   : > { %12929 = vmatpush1.bf16.msra.mxu0 %v18910_v31  ;;  %10896 = vmatprep.subr.bf16.mxu1 %v18915_v21  ;;  %v18925_v31 = vld [vmem:[%s20648_s8 + $0x680] ss:$8 sps:$4 sm:$0xff]  }
 0x219   : > { %12930 = vmatprep.subr.bf16.mxu0 %v18918_v50  ;;  %v15445_v21 = vld [vmem:[%s20641_s30 + $0x428] sm:$0xff]  ;;  %v15506_v50 = vcombine.low %v15433_v37, %v15437_v58  ;;  %v18934_v37 = vld [vmem:[%s20648_s8 + $0x1890] ss:$8 sps:$4 sm:$0xff]  }
 0x21a   : > { %10834 = vmatmul.mubr.bf16.gmra.mrb[12].mxu1 %v21448_v28  ;;  %v15671_v28 = vld [vmem:[%s20641_s30 + $0x6b8] sm:$0xff]  ;;  %v18939_v58 = vld [vmem:[%s20648_s8 + $0x6a4] ss:$8 sps:$4 sm:$0xff]  }
 0x21b   : > { %12868 = vmatmul.mubr.bf16.gmra.mrb[12].mxu0 %v15790_v52  ;;  %10897 = vmatpush1.bf16.msra.mxu1 %v18913_v63  ;;  %v15798_v52 = vcombine.low %v15663_v13, %v15667_v4  ;;  %v18928_v63 = vld [vmem:[%s20648_s8 + $0x1880] ss:$8 sps:$4 sm:$0xff]   ;;  %v18931_v4 = vld [vmem:[%s20648_s8 + $0x690] ss:$8 sps:$4 sm:$0xff]   ;;  %v18942_v13 = vld [vmem:[%s20648_s8 + $0x18a4] ss:$8 sps:$4 sm:$0xff]  }
 0x21c   : > { %12931 = vmatpush1.bf16.msra.mxu0 %v18916_v41  ;;  %10898 = vmatprep.subr.bf16.mxu1 %v18921_v18  ;;  %v18933_v41 = vld [vmem:[%s20648_s8 + $0x694] ss:$8 sps:$4 sm:$0xff]   ;;  %v15807_v18 = vcombine.high %v15671_v28, %v15675_v2 }
 0x21d   : > { %12932 = vmatprep.subr.bf16.mxu0 %v18924_v24  ;;  %10843 = vmatprep.mubr.bf16.mxu1 %v15507_v44  ;;  %v18936_v24 = vld [vmem:[%s20648_s8 + $0x1894] ss:$8 sps:$4 sm:$0xff]   ;;  %v18937_v44 = vld [vmem:[%s20648_s8 + $0x6a0] ss:$8 sps:$4 sm:$0xff]  }
 0x21e   : > { %12877 = vmatprep.mubr.bf16.mxu0 %v15799_v47  ;;  %v21468_v47 = vcombine.high %v15441_v23, %v15445_v21 }
 0x21f   : > { %10899 = vmatpush1.bf16.msra.mxu1 %v18919_v34  ;;  %v15449_v34 = vld [vmem:[%s20641_s30 + $0x448] sm:$0xff] }
 0x220   : > { %12933 = vmatpush1.bf16.msra.mxu0 %v18922_v1  ;;  %10900 = vmatprep.subr.bf16.mxu1 %v18927_v9  ;;  %23200 = vst [vmem:[#allocation47_spill] sm:$0xff] %v21468_v47  ;;  %v21477_v1 = vcombine.low %v15441_v23, %v15445_v21  ;;  %v15806_v9 = vcombine.low %v15671_v28, %v15675_v2  ;;  %v18946_v28 = vld [vmem:[%s20648_s8 + $0x18b0] ss:$8 sps:$4 sm:$0xff]   ;;  %v18951_v21 = vld [vmem:[%s20648_s8 + $0x6c4] ss:$8 sps:$4 sm:$0xff]  }
 0x221   : > { %12934 = vmatprep.subr.bf16.mxu0 %v18930_v16  ;;  %v15453_v16 = vld [vmem:[%s20641_s30 + $0x468] sm:$0xff] }
 0x222   : > { %10844 = vmatmul.mubr.bf16.gmra.mrb[16].mxu1 %v15506_v50  ;;  %23201 = vst [vmem:[#allocation48_spill] sm:$0xff] %v21477_v1  ;;  %v15683_v50 = vld [vmem:[%s20641_s30 + $0x718] sm:$0xff]  ;;  %v21486_v23 = vcombine.high %v15449_v34, %v15453_v16 }
 0x223   : > { %12878 = vmatmul.mubr.bf16.gmra.mrb[16].mxu0 %v15798_v52  ;;  %10901 = vmatpush1.bf16.msra.mxu1 %v18925_v31  ;;  %v15679_v31 = vld [vmem:[%s20641_s30 + $0x6f8] sm:$0xff]  ;;  %v18940_v52 = vld [vmem:[%s20648_s8 + $0x18a0] ss:$8 sps:$4 sm:$0xff]  }
 0x224   : > { %12935 = vmatpush1.bf16.msra.mxu0 %v18928_v63  ;;  %10902 = vmatprep.subr.bf16.mxu1 %v18933_v41  ;;  %v18945_v63 = vld [vmem:[%s20648_s8 + $0x6b4] ss:$8 sps:$4 sm:$0xff]   ;;  %v15815_v2 = vcombine.high %v15679_v31, %v15683_v50 }
 0x225   : > { %12936 = vmatprep.subr.bf16.mxu0 %v18936_v24  ;;  %10853 = vmatprep.mubr.bf16.mxu1 %v21468_v47  ;;  %v18948_v41 = vld [vmem:[%s20648_s8 + $0x18b4] ss:$8 sps:$4 sm:$0xff]   ;;  %v18943_v24 = vld [vmem:[%s20648_s8 + $0x6b0] ss:$8 sps:$4 sm:$0xff]  }
 0x226   : > { %12887 = vmatprep.mubr.bf16.mxu0 %v15807_v18  ;;  %v18954_v18 = vld [vmem:[%s20648_s8 + $0x18c4] ss:$8 sps:$4 sm:$0xff]  }
 0x227   : > { %10903 = vmatpush1.bf16.msra.mxu1 %v18931_v4  ;;  %v15457_v4 = vld [vmem:[%s20641_s30 + $0x488] sm:$0xff] }
 0x228   : > { %12937 = vmatpush1.bf16.msra.mxu0 %v18934_v37  ;;  %10904 = vmatprep.subr.bf16.mxu1 %v18939_v58  ;;  %v15461_v37 = vld [vmem:[%s20641_s30 + $0x4a8] sm:$0xff]  ;;  %v15687_v58 = vld [vmem:[%s20641_s30 + $0x738] sm:$0xff] }
 0x229   : > { %12938 = vmatprep.subr.bf16.mxu0 %v18942_v13  ;;  %v21496_v13 = vcombine.low %v15449_v34, %v15453_v16  ;;  %v21503_v47 = vcombine.high %v15457_v4, %v15461_v37  ;;  %v18955_v34 = vld [vmem:[%s20648_s8 + $0x6d0] ss:$8 sps:$4 sm:$0xff]  }
 0x22a   : > { %10854 = vmatmul.mubr.bf16.gmra.mrb[20].mxu1 %v21477_v1  ;;  %v18960_v1 = vld [vmem:[%s20648_s8 + $0x18d4] ss:$8 sps:$4 sm:$0xff]   ;;  %v18958_v16 = vld [vmem:[%s20648_s8 + $0x18d0] ss:$8 sps:$4 sm:$0xff]  }
 0x22b   : > { %12888 = vmatmul.mubr.bf16.gmra.mrb[20].mxu0 %v15806_v9  ;;  %10905 = vmatpush1.bf16.msra.mxu1 %v18937_v44  ;;  %v15814_v9 = vcombine.low %v15679_v31, %v15683_v50  ;;  %v15691_v44 = vld [vmem:[%s20641_s30 + $0x758] sm:$0xff]  ;;  %v18963_v31 = vld [vmem:[%s20648_s8 + $0x6e4] ss:$8 sps:$4 sm:$0xff]  }
 0x22c   : > { %12939 = vmatpush1.bf16.msra.mxu0 %v18940_v52  ;;  %10906 = vmatprep.subr.bf16.mxu1 %v18945_v63  ;;  %v18949_v52 = vld [vmem:[%s20648_s8 + $0x6c0] ss:$8 sps:$4 sm:$0xff]   ;;  %v18966_v50 = vld [vmem:[%s20648_s8 + $0x18e4] ss:$8 sps:$4 sm:$0xff]  }
 0x22d   : > { %12940 = vmatprep.subr.bf16.mxu0 %v18948_v41  ;;  %10863 = vmatprep.mubr.bf16.mxu1 %v21486_v23  ;;  %v18952_v63 = vld [vmem:[%s20648_s8 + $0x18c0] ss:$8 sps:$4 sm:$0xff]   ;;  %v18957_v41 = vld [vmem:[%s20648_s8 + $0x6d4] ss:$8 sps:$4 sm:$0xff]  }
 0x22e   : > { %12897 = vmatprep.mubr.bf16.mxu0 %v15815_v2  ;;  %v15823_v2 = vcombine.high %v15687_v58, %v15691_v44 }
 0x22f   : > { %10907 = vmatpush1.bf16.msra.mxu1 %v18943_v24  ;;  %v21511_v24 = vcombine.low %v15457_v4, %v15461_v37  ;;  %v18967_v4 = vld [vmem:[%s20648_s8 + $0x6f0] ss:$8 sps:$4 sm:$0xff]  }
 0x230   : > { %12941 = vmatpush1.bf16.msra.mxu0 %v18946_v28  ;;  %10908 = vmatprep.subr.bf16.mxu1 %v18951_v21  ;;  %v15822_v28 = vcombine.low %v15687_v58, %v15691_v44  ;;  %v15394_v21 = vld [vmem:[%s20641_s30 + $0x290] sm:$0xff]  ;;  %v18975_v58 = vld [vmem:[%s20648_s8 + $0x704] ss:$8 sps:$4 sm:$0xff]  }
 0x231   : > { %12942 = vmatprep.subr.bf16.mxu0 %v18954_v18  ;;  %v18961_v18 = vld [vmem:[%s20648_s8 + $0x6e0] ss:$8 sps:$4 sm:$0xff]   ;;  %v18970_v37 = vld [vmem:[%s20648_s8 + $0x18f0] ss:$8 sps:$4 sm:$0xff]   ;;  %v18978_v44 = vld [vmem:[%s20648_s8 + $0x1904] ss:$8 sps:$4 sm:$0xff]  }
 0x232   : > { %10864 = vmatmul.mubr.bf16.gmra.mrb[24].mxu1 %v21496_v13 }
 0x233   : > { %12898 = vmatmul.mubr.bf16.gmra.mrb[24].mxu0 %v15814_v9  ;;  %10909 = vmatpush1.bf16.msra.mxu1 %v18949_v52  ;;  %v18964_v9 = vld [vmem:[%s20648_s8 + $0x18e0] ss:$8 sps:$4 sm:$0xff]   ;;  %v18972_v52 = vld [vmem:[%s20648_s8 + $0x18f4] ss:$8 sps:$4 sm:$0xff]  }
 0x234   : > { %12943 = vmatpush1.bf16.msra.mxu0 %v18952_v63  ;;  %10910 = vmatprep.subr.bf16.mxu1 %v18957_v41  ;;  %v20029_v63 = vld [vmem:[%s20641_s30 + $0x2b0] sm:$0xff] }
 0x235   : > { %12944 = vmatprep.subr.bf16.mxu0 %v18960_v1  ;;  %10873 = vmatprep.mubr.bf16.mxu1 %v21503_v47  ;;  %v18969_v1 = vld [vmem:[%s20648_s8 + $0x6f4] ss:$8 sps:$4 sm:$0xff]   ;;  %v15477_v41 = vcombine.high %v15394_v21, %v20029_v63 }
 0x236   : > { %12907 = vmatprep.mubr.bf16.mxu0 %v15823_v2  ;;  %v15476_v2 = vcombine.low %v15394_v21, %v20029_v63  ;;  %v18982_v21 = vld [vmem:[%s20648_s8 + $0x1910] ss:$8 sps:$4 sm:$0xff]  }
 0x237   : > { %10911 = vmatpush1.bf16.msra.mxu1 %v18955_v34  ;;  %v18973_v34 = vld [vmem:[%s20648_s8 + $0x700] ss:$8 sps:$4 sm:$0xff]  }
 0x238   : > { %12945 = vmatpush1.bf16.msra.mxu0 %v18958_v16  ;;  %10912 = vmatprep.subr.bf16.mxu1 %v18963_v31  ;;  %v18976_v16 = vld [vmem:[%s20648_s8 + $0x1900] ss:$8 sps:$4 sm:$0xff]   ;;  %v18981_v31 = vld [vmem:[%s20648_s8 + $0x714] ss:$8 sps:$4 sm:$0xff]  }
 0x239   : > { %12946 = vmatprep.subr.bf16.mxu0 %v18966_v50  ;;  %v18984_v50 = vld [vmem:[%s20648_s8 + $0x1914] ss:$8 sps:$4 sm:$0xff]  }
 0x23a   : > { %10874 = vmatmul.mubr.bf16.gmra.mrb[28].mxu1 %v21511_v24 }
 0x23b   : > { %12908 = vmatmul.mubr.bf16.gmra.mrb[28].mxu0 %v15822_v28  ;;  %10913 = vmatpush1.bf16.msra.mxu1 %v18961_v18  ;;  %v20030_v28 = vld [vmem:[%s20641_s30 + $0x2d0] sm:$0xff] }
 0x23c   : > { %12947 = vmatpush1.bf16.msra.mxu0 %v18964_v9  ;;  %10914 = vmatprep.subr.bf16.mxu1 %v18969_v1  ;;  %v20031_v18 = vld [vmem:[%s20641_s30 + $0x2f0] sm:$0xff]  ;;  %v18987_v1 = vld [vmem:[%s20648_s8 + $0x724] ss:$8 sps:$4 sm:$0xff]  }
 0x23d   : > { %12948 = vmatprep.subr.bf16.mxu0 %v18972_v52  ;;  %10916 = vmatprep.mubr.bf16.mxu1 %v15477_v41  ;;  %v21531_v9 = vcombine.high %v20030_v28, %v20031_v18  ;;  %v18990_v52 = vld [vmem:[%s20648_s8 + $0x1924] ss:$8 sps:$4 sm:$0xff]   ;;  %v21540_v63 = vcombine.low %v20030_v28, %v20031_v18  ;;  %v18988_v41 = vld [vmem:[%s20648_s8 + $0x1920] ss:$8 sps:$4 sm:$0xff]  }
 0x23e   : > { %12950 = vmatprep.mubr.bf16.mxu0 %v20742_v19  ;;  %v18979_v19 = vld [vmem:[%s20648_s8 + $0x710] ss:$8 sps:$4 sm:$0xff]   ;;  %v19000_v28 = vld [vmem:[%s20648_s8 + $0x1940] ss:$8 sps:$4 sm:$0xff]  }
 0x23f   : > { %10915 = vmatpush1.bf16.msra.mxu1 %v18967_v4  ;;  %v18993_v4 = vld [vmem:[%s20648_s8 + $0x734] ss:$8 sps:$4 sm:$0xff]   ;;  %v316_v18 = vld [vmem:[%s20641_s30 + $0x100] sm:$0xff] }
 0x240   : > { %12949 = vmatpush1.bf16.msra.mxu0 %v18970_v37  ;;  %10997 = vmatprep.subr.bf16.mxu1 %v18975_v58  ;;  %v18996_v37 = vld [vmem:[%s20648_s8 + $0x1934] ss:$8 sps:$4 sm:$0xff]  }
 0x241   : > { %13031 = vmatprep.subr.bf16.mxu0 %v18978_v44  ;;  %v20032_v58 = vld [vmem:[%s20641_s30 + $0x310] sm:$0xff] }
 0x242   : > { %10917 = vmatmul.mubr.bf16.vlgmr.msra.gmra.mrb[0].mxu1 %v15476_v2  ;;  %v20033_v44 = vld [vmem:[%s20641_s30 + $0x330] sm:$0xff] }
 0x243   : > { %12951 = vmatmul.mubr.bf16.vlgmr.msra.gmra.mrb[0].mxu0 %v20753_v29  ;;  %10998 = vmatpush1.bf16.msra.mxu1 %v18973_v34  ;;  %v18985_v29 = vld [vmem:[%s20648_s8 + $0x720] ss:$8 sps:$4 sm:$0xff]   ;;  %v21548_v2 = vcombine.high %v20032_v58, %v20033_v44  ;;  %v18994_v34 = vld [vmem:[%s20648_s8 + $0x1930] ss:$8 sps:$4 sm:$0xff]  }
 0x244   : > { %13032 = vmatpush1.bf16.msra.mxu0 %v18976_v16  ;;  %10999 = vmatprep.subr.bf16.mxu1 %v18981_v31  ;;  %v18999_v16 = vld [vmem:[%s20648_s8 + $0x744] ss:$8 sps:$4 sm:$0xff]  }
 0x245   : > { %13033 = vmatprep.subr.bf16.mxu0 %v18984_v50  ;;  %10926 = vmatprep.mubr.bf16.mxu1 %v21531_v9  ;;  %v19002_v31 = vld [vmem:[%s20648_s8 + $0x1944] ss:$8 sps:$4 sm:$0xff]   ;;  %v18997_v50 = vld [vmem:[%s20648_s8 + $0x740] ss:$8 sps:$4 sm:$0xff]  }
 0x246   : > { %12960 = vmatprep.mubr.bf16.mxu0 %v20759_v35  ;;  %v18991_v35 = vld [vmem:[%s20648_s8 + $0x730] ss:$8 sps:$4 sm:$0xff]  }
 0x247   : > { %11000 = vmatpush1.bf16.msra.mxu1 %v18979_v19  ;;  %v21562_v19 = vcombine.low %v20032_v58, %v20033_v44  ;;  %v19011_v58 = vld [vmem:[%s20648_s8 + $0x764] ss:$8 sps:$4 sm:$0xff]  }
 0x248   : > { %13034 = vmatpush1.bf16.msra.mxu0 %v18982_v21  ;;  %11001 = vmatprep.subr.bf16.mxu1 %v18987_v1  ;;  %v19005_v21 = vld [vmem:[%s20648_s8 + $0x754] ss:$8 sps:$4 sm:$0xff]   ;;  %v19014_v44 = vld [vmem:[%s20648_s8 + $0x1964] ss:$8 sps:$4 sm:$0xff]  }
 0x249   : > { %13035 = vmatprep.subr.bf16.mxu0 %v18990_v52  ;;  %v19008_v1 = vld [vmem:[%s20648_s8 + $0x1954] ss:$8 sps:$4 sm:$0xff]  }
 0x24a   : > { %10927 = vmatmul.mubr.bf16.gmra.mrb[4].mxu1 %v21540_v63  ;;  %v20034_v52 = vld [vmem:[%s20641_s30 + $0x350] sm:$0xff] }
 0x24b   : > { %12961 = vmatmul.mubr.bf16.gmra.mrb[4].mxu0 %v20771_v45  ;;  %11002 = vmatpush1.bf16.msra.mxu1 %v18985_v29  ;;  %v320_v45 = vld [vmem:[%s20641_s30 + $0x120] sm:$0xff]  ;;  %v20035_v29 = vld [vmem:[%s20641_s30 + $0x370] sm:$0xff] }
 0x24c   : > { %13036 = vmatpush1.bf16.msra.mxu0 %v18988_v41  ;;  %11003 = vmatprep.subr.bf16.mxu1 %v18993_v4  ;;  %v15377_v41 = vcombine.high %v316_v18, %v320_v45  ;;  %v19003_v4 = vld [vmem:[%s20648_s8 + $0x750] ss:$8 sps:$4 sm:$0xff]  }
 0x24d   : > { %13037 = vmatprep.subr.bf16.mxu0 %v18996_v37  ;;  %10936 = vmatprep.mubr.bf16.mxu1 %v21548_v2  ;;  %v19006_v37 = vld [vmem:[%s20648_s8 + $0x1950] ss:$8 sps:$4 sm:$0xff]  }
 0x24e   : > { %12970 = vmatprep.mubr.bf16.mxu0 %v20777_v51  ;;  %v21568_v51 = vcombine.high %v20034_v52, %v20035_v29 }
 0x24f   : > { %11004 = vmatpush1.bf16.msra.mxu1 %v18991_v35  ;;  %v19009_v35 = vld [vmem:[%s20648_s8 + $0x760] ss:$8 sps:$4 sm:$0xff]  }
 0x250   : > { %13038 = vmatpush1.bf16.msra.mxu0 %v18994_v34  ;;  %11005 = vmatprep.subr.bf16.mxu1 %v18999_v16  ;;  %v21578_v34 = vcombine.low %v20034_v52, %v20035_v29  ;;  %v15376_v16 = vcombine.low %v316_v18, %v320_v45  ;;  %v19015_v18 = vld [vmem:[%s20648_s8 + $0x770] ss:$8 sps:$4 sm:$0xff]   ;;  %v19023_v52 = vld [vmem:[%s20648_s8 + $0x784] ss:$8 sps:$4 sm:$0xff]  }
 0x251   : > { %13039 = vmatprep.subr.bf16.mxu0 %v19002_v31  ;;  %v15434_v31 = vld [vmem:[%s20641_s30 + $0x3d0] sm:$0xff]  ;;  %v19026_v29 = vld [vmem:[%s20648_s8 + $0x1984] ss:$8 sps:$4 sm:$0xff]  }
 0x252   : > { %10937 = vmatmul.mubr.bf16.gmra.mrb[8].mxu1 %v21562_v19  ;;  %v19018_v45 = vld [vmem:[%s20648_s8 + $0x1970] ss:$8 sps:$4 sm:$0xff]  }
 0x253   : > { %12971 = vmatmul.mubr.bf16.gmra.mrb[8].mxu0 %v20788_v60  ;;  %11006 = vmatpush1.bf16.msra.mxu1 %v18997_v50  ;;  %v19012_v60 = vld [vmem:[%s20648_s8 + $0x1960] ss:$8 sps:$4 sm:$0xff]   ;;  %v19017_v50 = vld [vmem:[%s20648_s8 + $0x774] ss:$8 sps:$4 sm:$0xff]  }
 0x254   : > { %13040 = vmatpush1.bf16.msra.mxu0 %v19000_v28  ;;  %11007 = vmatprep.subr.bf16.mxu1 %v19005_v21  ;;  %v19020_v28 = vld [vmem:[%s20648_s8 + $0x1974] ss:$8 sps:$4 sm:$0xff]  }
 0x255   : > { %13041 = vmatprep.subr.bf16.mxu0 %v19008_v1  ;;  %10946 = vmatprep.mubr.bf16.mxu1 %v21568_v51  ;;  %v20036_v21 = vld [vmem:[%s20641_s30 + $0x3f0] sm:$0xff] }
 0x256   : > { %12980 = vmatprep.mubr.bf16.mxu0 %v15377_v41  ;;  %v15509_v1 = vcombine.high %v15434_v31, %v20036_v21  ;;  %v19021_v41 = vld [vmem:[%s20648_s8 + $0x780] ss:$8 sps:$4 sm:$0xff]  }
 0x257   : > { %11008 = vmatpush1.bf16.msra.mxu1 %v19003_v4  ;;  %v15508_v4 = vcombine.low %v15434_v31, %v20036_v21  ;;  %v19030_v31 = vld [vmem:[%s20648_s8 + $0x1990] ss:$8 sps:$4 sm:$0xff]   ;;  %v19033_v21 = vld [vmem:[%s20648_s8 + $0x7a0] ss:$8 sps:$4 sm:$0xff]  }
 0x258   : > { %13042 = vmatpush1.bf16.msra.mxu0 %v19006_v37  ;;  %11009 = vmatprep.subr.bf16.mxu1 %v19011_v58  ;;  %v19024_v37 = vld [vmem:[%s20648_s8 + $0x1980] ss:$8 sps:$4 sm:$0xff]   ;;  %v19029_v58 = vld [vmem:[%s20648_s8 + $0x794] ss:$8 sps:$4 sm:$0xff]  }
 0x259   : > { %13043 = vmatprep.subr.bf16.mxu0 %v19014_v44  ;;  %v19032_v44 = vld [vmem:[%s20648_s8 + $0x1994] ss:$8 sps:$4 sm:$0xff]  }
 0x25a   : > { %10947 = vmatmul.mubr.bf16.gmra.mrb[12].mxu1 %v21578_v34 }
 0x25b   : > { %12981 = vmatmul.mubr.bf16.gmra.mrb[12].mxu0 %v15376_v16  ;;  %11010 = vmatpush1.bf16.msra.mxu1 %v19009_v35  ;;  %v20037_v35 = vld [vmem:[%s20641_s30 + $0x410] sm:$0xff] }
 0x25c   : > { %13044 = vmatpush1.bf16.msra.mxu0 %v19012_v60  ;;  %11011 = vmatprep.subr.bf16.mxu1 %v19017_v50  ;;  %v20038_v16 = vld [vmem:[%s20641_s30 + $0x430] sm:$0xff]  ;;  %v19035_v50 = vld [vmem:[%s20648_s8 + $0x7a4] ss:$8 sps:$4 sm:$0xff]  }
 0x25d   : > { %13045 = vmatprep.subr.bf16.mxu0 %v19020_v28  ;;  %10956 = vmatprep.mubr.bf16.mxu1 %v15509_v1  ;;  %v21597_v60 = vcombine.high %v20037_v35, %v20038_v16  ;;  %v19038_v28 = vld [vmem:[%s20648_s8 + $0x19a4] ss:$8 sps:$4 sm:$0xff]   ;;  %v21608_v1 = vcombine.low %v20037_v35, %v20038_v16  ;;  %v19045_v16 = vld [vmem:[%s20648_s8 + $0x7c0] ss:$8 sps:$4 sm:$0xff]  }
 0x25e   : > { %12990 = vmatprep.mubr.bf16.mxu0 %v20808_v20  ;;  %v19027_v20 = vld [vmem:[%s20648_s8 + $0x790] ss:$8 sps:$4 sm:$0xff]   ;;  %v360_v35 = vld [vmem:[%s20641_s30 + $0x260] sm:$0xff] }
 0x25f   : > { %11012 = vmatpush1.bf16.msra.mxu1 %v19015_v18  ;;  %v19041_v18 = vld [vmem:[%s20648_s8 + $0x7b4] ss:$8 sps:$4 sm:$0xff]  }
 0x260   : > { %13046 = vmatpush1.bf16.msra.mxu0 %v19018_v45  ;;  %11013 = vmatprep.subr.bf16.mxu1 %v19023_v52  ;;  %v19044_v45 = vld [vmem:[%s20648_s8 + $0x19b4] ss:$8 sps:$4 sm:$0xff]   ;;  %v19039_v52 = vld [vmem:[%s20648_s8 + $0x7b0] ss:$8 sps:$4 sm:$0xff]  }
 0x261   : > { %13047 = vmatprep.subr.bf16.mxu0 %v19026_v29  ;;  %v19042_v29 = vld [vmem:[%s20648_s8 + $0x19b0] ss:$8 sps:$4 sm:$0xff]  }
 0x262   : > { %10957 = vmatmul.mubr.bf16.gmra.mrb[16].mxu1 %v15508_v4 }
 0x263   : > { %12991 = vmatmul.mubr.bf16.gmra.mrb[16].mxu0 %v20818_v30  ;;  %11014 = vmatpush1.bf16.msra.mxu1 %v19021_v41  ;;  %v19036_v30 = vld [vmem:[%s20648_s8 + $0x19a0] ss:$8 sps:$4 sm:$0xff]   ;;  %v20039_v41 = vld [vmem:[%s20641_s30 + $0x450] sm:$0xff] }
 0x264   : > { %13048 = vmatpush1.bf16.msra.mxu0 %v19024_v37  ;;  %11015 = vmatprep.subr.bf16.mxu1 %v19029_v58  ;;  %v19047_v37 = vld [vmem:[%s20648_s8 + $0x7c4] ss:$8 sps:$4 sm:$0xff]  }
 0x265   : > { %13049 = vmatprep.subr.bf16.mxu0 %v19032_v44  ;;  %10966 = vmatprep.mubr.bf16.mxu1 %v21597_v60  ;;  %v19050_v58 = vld [vmem:[%s20648_s8 + $0x19c4] ss:$8 sps:$4 sm:$0xff]  }
 0x266   : > { %13000 = vmatprep.mubr.bf16.mxu0 %v20825_v38  ;;  %v20040_v38 = vld [vmem:[%s20641_s30 + $0x470] sm:$0xff]  ;;  %v356_v44 = vld [vmem:[%s20641_s30 + $0x240] sm:$0xff] }
 0x267   : > { %11016 = vmatpush1.bf16.msra.mxu1 %v19027_v20  ;;  %v21616_v4 = vcombine.high %v20039_v41, %v20040_v38  ;;  %v19048_v20 = vld [vmem:[%s20648_s8 + $0x19c0] ss:$8 sps:$4 sm:$0xff]  }
 0x268   : > { %13050 = vmatpush1.bf16.msra.mxu0 %v19030_v31  ;;  %11017 = vmatprep.subr.bf16.mxu1 %v19035_v50  ;;  %v19053_v31 = vld [vmem:[%s20648_s8 + $0x7d4] ss:$8 sps:$4 sm:$0xff]  }
 0x269   : > { %13051 = vmatprep.subr.bf16.mxu0 %v19038_v28  ;;  %v19056_v50 = vld [vmem:[%s20648_s8 + $0x19d4] ss:$8 sps:$4 sm:$0xff]  }
 0x26a   : > { %10967 = vmatmul.mubr.bf16.gmra.mrb[20].mxu1 %v21608_v1  ;;  %v20041_v28 = vld [vmem:[%s20641_s30 + $0x490] sm:$0xff] }
 0x26b   : > { %13001 = vmatmul.mubr.bf16.gmra.mrb[20].mxu0 %v20837_v49  ;;  %11018 = vmatpush1.bf16.msra.mxu1 %v19033_v21  ;;  %v21628_v49 = vcombine.low %v20039_v41, %v20040_v38  ;;  %v20042_v21 = vld [vmem:[%s20641_s30 + $0x4b0] sm:$0xff]  ;;  %v19057_v41 = vld [vmem:[%s20648_s8 + $0x7e0] ss:$8 sps:$4 sm:$0xff]  }
 0x26c   : > { %13052 = vmatpush1.bf16.msra.mxu0 %v19036_v30  ;;  %11019 = vmatprep.subr.bf16.mxu1 %v19041_v18  ;;  %v21634_v30 = vcombine.high %v20041_v28, %v20042_v21  ;;  %v19051_v18 = vld [vmem:[%s20648_s8 + $0x7d0] ss:$8 sps:$4 sm:$0xff]   ;;  %v21644_v38 = vcombine.low %v20041_v28, %v20042_v21  ;;  %v19071_v28 = vld [vmem:[%s20648_s8 + $0x804] ss:$8 sps:$4 sm:$0xff]  }
 0x26d   : > { %13053 = vmatprep.subr.bf16.mxu0 %v19044_v45  ;;  %10976 = vmatprep.mubr.bf16.mxu1 %v21616_v4  ;;  %v19054_v45 = vld [vmem:[%s20648_s8 + $0x19d0] ss:$8 sps:$4 sm:$0xff]   ;;  %v19074_v21 = vld [vmem:[%s20648_s8 + $0x1a04] ss:$8 sps:$4 sm:$0xff]  }
 0x26e   : > { %13010 = vmatprep.mubr.bf16.mxu0 %v20843_v56  ;;  %v15385_v56 = vcombine.high %v356_v44, %v360_v35 }
 0x26f   : > { %11020 = vmatpush1.bf16.msra.mxu1 %v19039_v52  ;;  %v19059_v52 = vld [vmem:[%s20648_s8 + $0x7e4] ss:$8 sps:$4 sm:$0xff]  }
 0x270   : > { %13054 = vmatpush1.bf16.msra.mxu0 %v19042_v29  ;;  %11021 = vmatprep.subr.bf16.mxu1 %v19047_v37  ;;  %v19062_v29 = vld [vmem:[%s20648_s8 + $0x19e4] ss:$8 sps:$4 sm:$0xff]   ;;  %v15384_v37 = vcombine.low %v356_v44, %v360_v35  ;;  %v19063_v44 = vld [vmem:[%s20648_s8 + $0x7f0] ss:$8 sps:$4 sm:$0xff]  }
 0x271   : > { %13055 = vmatprep.subr.bf16.mxu0 %v19050_v58  ;;  %v15395_v58 = vld [vmem:[%s20641_s30 + $0x298] sm:$0xff] }
 0x272   : > { %10977 = vmatmul.mubr.bf16.gmra.mrb[24].mxu1 %v21628_v49  ;;  %v19066_v35 = vld [vmem:[%s20648_s8 + $0x19f0] ss:$8 sps:$4 sm:$0xff]  }
 0x273   : > { %13011 = vmatmul.mubr.bf16.gmra.mrb[24].mxu0 %v20855_v3  ;;  %11022 = vmatpush1.bf16.msra.mxu1 %v19045_v16  ;;  %v19060_v3 = vld [vmem:[%s20648_s8 + $0x19e0] ss:$8 sps:$4 sm:$0xff]   ;;  %v19065_v16 = vld [vmem:[%s20648_s8 + $0x7f4] ss:$8 sps:$4 sm:$0xff]  }
 0x274   : > { %13056 = vmatpush1.bf16.msra.mxu0 %v19048_v20  ;;  %11023 = vmatprep.subr.bf16.mxu1 %v19053_v31  ;;  %v19068_v20 = vld [vmem:[%s20648_s8 + $0x19f4] ss:$8 sps:$4 sm:$0xff]  }
 0x275   : > { %13057 = vmatprep.subr.bf16.mxu0 %v19056_v50  ;;  %10986 = vmatprep.mubr.bf16.mxu1 %v21634_v30  ;;  %v20043_v31 = vld [vmem:[%s20641_s30 + $0x2b8] sm:$0xff] }
 0x276   : > { %13020 = vmatprep.mubr.bf16.mxu0 %v15385_v56  ;;  %v15479_v50 = vcombine.high %v15395_v58, %v20043_v31  ;;  %v19069_v56 = vld [vmem:[%s20648_s8 + $0x800] ss:$8 sps:$4 sm:$0xff]  }
 0x277   : > { %11024 = vmatpush1.bf16.msra.mxu1 %v19051_v18  ;;  %v15478_v18 = vcombine.low %v15395_v58, %v20043_v31  ;;  %v19078_v58 = vld [vmem:[%s20648_s8 + $0x1a10] ss:$8 sps:$4 sm:$0xff]   ;;  %v19081_v31 = vld [vmem:[%s20648_s8 + $0x820] ss:$8 sps:$4 sm:$0xff]  }
 0x278   : > { %13058 = vmatpush1.bf16.msra.mxu0 %v19054_v45  ;;  %11025 = vmatprep.subr.bf16.mxu1 %v19059_v52  ;;  %v19072_v45 = vld [vmem:[%s20648_s8 + $0x1a00] ss:$8 sps:$4 sm:$0xff]   ;;  %v19077_v52 = vld [vmem:[%s20648_s8 + $0x814] ss:$8 sps:$4 sm:$0xff]  }
 0x279   : > { %13059 = vmatprep.subr.bf16.mxu0 %v19062_v29  ;;  %v19080_v29 = vld [vmem:[%s20648_s8 + $0x1a14] ss:$8 sps:$4 sm:$0xff]  }
 0x27a   : > { %10987 = vmatmul.mubr.bf16.gmra.mrb[28].mxu1 %v21644_v38 }
 0x27b   : > { %13021 = vmatmul.mubr.bf16.gmra.mrb[28].mxu0 %v15384_v37  ;;  %11026 = vmatpush1.bf16.msra.mxu1 %v19057_v41  ;;  %v20044_v41 = vld [vmem:[%s20641_s30 + $0x2d8] sm:$0xff] }
 0x27c   : > { %13060 = vmatpush1.bf16.msra.mxu0 %v19060_v3  ;;  %11027 = vmatprep.subr.bf16.mxu1 %v19065_v16  ;;  %v20045_v37 = vld [vmem:[%s20641_s30 + $0x2f8] sm:$0xff]  ;;  %v19083_v16 = vld [vmem:[%s20648_s8 + $0x824] ss:$8 sps:$4 sm:$0xff]  }
 0x27d   : > { %13061 = vmatprep.subr.bf16.mxu0 %v19068_v20  ;;  %11029 = vmatprep.mubr.bf16.mxu1 %v15479_v50  ;;  %v21663_v3 = vcombine.high %v20044_v41, %v20045_v37  ;;  %v19086_v20 = vld [vmem:[%s20648_s8 + $0x1a24] ss:$8 sps:$4 sm:$0xff]   ;;  %v21674_v50 = vcombine.low %v20044_v41, %v20045_v37  ;;  %v19093_v37 = vld [vmem:[%s20648_s8 + $0x840] ss:$8 sps:$4 sm:$0xff]  }
 0x27e   : > { %13063 = vmatprep.mubr.bf16.mxu0 %v20874_v27  ;;  %v19075_v27 = vld [vmem:[%s20648_s8 + $0x810] ss:$8 sps:$4 sm:$0xff]   ;;  %v321_v41 = vld [vmem:[%s20641_s30 + $0x128] sm:$0xff] }
 0x27f   : > { %11028 = vmatpush1.bf16.msra.mxu1 %v19063_v44  ;;  %v19089_v44 = vld [vmem:[%s20648_s8 + $0x834] ss:$8 sps:$4 sm:$0xff]  }
 0x280   : > { %13062 = vmatpush1.bf16.msra.mxu0 %v19066_v35  ;;  %11110 = vmatprep.subr.bf16.mxu1 %v19071_v28  ;;  %v19092_v35 = vld [vmem:[%s20648_s8 + $0x1a34] ss:$8 sps:$4 sm:$0xff]   ;;  %v19087_v28 = vld [vmem:[%s20648_s8 + $0x830] ss:$8 sps:$4 sm:$0xff]  }
 0x281   : > { %13144 = vmatprep.subr.bf16.mxu0 %v19074_v21  ;;  %v19090_v21 = vld [vmem:[%s20648_s8 + $0x1a30] ss:$8 sps:$4 sm:$0xff]  }
 0x282   : > { %11030 = vmatmul.mubr.bf16.vlgmr.msra.gmra.mrb[0].mxu1 %v15478_v18 }
 0x283   : > { %13064 = vmatmul.mubr.bf16.vlgmr.msra.gmra.mrb[0].mxu0 %v20883_v39  ;;  %11111 = vmatpush1.bf16.msra.mxu1 %v19069_v56  ;;  %v19084_v39 = vld [vmem:[%s20648_s8 + $0x1a20] ss:$8 sps:$4 sm:$0xff]   ;;  %v20046_v56 = vld [vmem:[%s20641_s30 + $0x318] sm:$0xff] }
 0x284   : > { %13145 = vmatpush1.bf16.msra.mxu0 %v19072_v45  ;;  %11112 = vmatprep.subr.bf16.mxu1 %v19077_v52  ;;  %v19095_v45 = vld [vmem:[%s20648_s8 + $0x844] ss:$8 sps:$4 sm:$0xff]  }
 0x285   : > { %13146 = vmatprep.subr.bf16.mxu0 %v19080_v29  ;;  %11039 = vmatprep.mubr.bf16.mxu1 %v21663_v3  ;;  %v19098_v52 = vld [vmem:[%s20648_s8 + $0x1a44] ss:$8 sps:$4 sm:$0xff]  }
 0x286   : > { %13073 = vmatprep.mubr.bf16.mxu0 %v20891_v48  ;;  %v20047_v48 = vld [vmem:[%s20641_s30 + $0x338] sm:$0xff]  ;;  %v317_v29 = vld [vmem:[%s20641_s30 + $0x108] sm:$0xff] }
 0x287   : > { %11113 = vmatpush1.bf16.msra.mxu1 %v19075_v27  ;;  %v21682_v18 = vcombine.high %v20046_v56, %v20047_v48  ;;  %v19096_v27 = vld [vmem:[%s20648_s8 + $0x1a40] ss:$8 sps:$4 sm:$0xff]  }
 0x288   : > { %13147 = vmatpush1.bf16.msra.mxu0 %v19078_v58  ;;  %11114 = vmatprep.subr.bf16.mxu1 %v19083_v16  ;;  %v19101_v58 = vld [vmem:[%s20648_s8 + $0x854] ss:$8 sps:$4 sm:$0xff]  }
 0x289   : > { %13148 = vmatprep.subr.bf16.mxu0 %v19086_v20  ;;  %v19104_v16 = vld [vmem:[%s20648_s8 + $0x1a54] ss:$8 sps:$4 sm:$0xff]  }
 0x28a   : > { %11040 = vmatmul.mubr.bf16.gmra.mrb[4].mxu1 %v21674_v50  ;;  %v20048_v20 = vld [vmem:[%s20641_s30 + $0x358] sm:$0xff] }
 0x28b   : > { %13074 = vmatmul.mubr.bf16.gmra.mrb[4].mxu0 %v20902_v61  ;;  %11115 = vmatpush1.bf16.msra.mxu1 %v19081_v31  ;;  %v21694_v61 = vcombine.low %v20046_v56, %v20047_v48  ;;  %v20049_v31 = vld [vmem:[%s20641_s30 + $0x378] sm:$0xff]  ;;  %v19105_v56 = vld [vmem:[%s20648_s8 + $0x860] ss:$8 sps:$4 sm:$0xff]  }
 0x28c   : > { %13149 = vmatpush1.bf16.msra.mxu0 %v19084_v39  ;;  %11116 = vmatprep.subr.bf16.mxu1 %v19089_v44  ;;  %v21700_v39 = vcombine.high %v20048_v20, %v20049_v31  ;;  %v19099_v44 = vld [vmem:[%s20648_s8 + $0x850] ss:$8 sps:$4 sm:$0xff]   ;;  %v21710_v48 = vcombine.low %v20048_v20, %v20049_v31  ;;  %v19119_v20 = vld [vmem:[%s20648_s8 + $0x884] ss:$8 sps:$4 sm:$0xff]  }
 0x28d   : > { %13150 = vmatprep.subr.bf16.mxu0 %v19092_v35  ;;  %11049 = vmatprep.mubr.bf16.mxu1 %v21682_v18  ;;  %v19102_v35 = vld [vmem:[%s20648_s8 + $0x1a50] ss:$8 sps:$4 sm:$0xff]   ;;  %v19122_v31 = vld [vmem:[%s20648_s8 + $0x1a84] ss:$8 sps:$4 sm:$0xff]  }
 0x28e   : > { %13083 = vmatprep.mubr.bf16.mxu0 %v20909_v5  ;;  %v15379_v5 = vcombine.high %v317_v29, %v321_v41 }
 0x28f   : > { %11117 = vmatpush1.bf16.msra.mxu1 %v19087_v28  ;;  %v19107_v28 = vld [vmem:[%s20648_s8 + $0x864] ss:$8 sps:$4 sm:$0xff]  }
 0x290   : > { %13151 = vmatpush1.bf16.msra.mxu0 %v19090_v21  ;;  %11118 = vmatprep.subr.bf16.mxu1 %v19095_v45  ;;  %v19110_v21 = vld [vmem:[%s20648_s8 + $0x1a64] ss:$8 sps:$4 sm:$0xff]   ;;  %v15378_v45 = vcombine.low %v317_v29, %v321_v41  ;;  %v19111_v29 = vld [vmem:[%s20648_s8 + $0x870] ss:$8 sps:$4 sm:$0xff]  }
 0x291   : > { %13152 = vmatprep.subr.bf16.mxu0 %v19098_v52  ;;  %v15435_v52 = vld [vmem:[%s20641_s30 + $0x3d8] sm:$0xff] }
 0x292   : > { %11050 = vmatmul.mubr.bf16.gmra.mrb[8].mxu1 %v21694_v61  ;;  %v19114_v41 = vld [vmem:[%s20648_s8 + $0x1a70] ss:$8 sps:$4 sm:$0xff]  }
 0x293   : > { %13084 = vmatmul.mubr.bf16.gmra.mrb[8].mxu0 %v20921_v15  ;;  %11119 = vmatpush1.bf16.msra.mxu1 %v19093_v37  ;;  %v19108_v15 = vld [vmem:[%s20648_s8 + $0x1a60] ss:$8 sps:$4 sm:$0xff]   ;;  %v19113_v37 = vld [vmem:[%s20648_s8 + $0x874] ss:$8 sps:$4 sm:$0xff]  }
 0x294   : > { %13153 = vmatpush1.bf16.msra.mxu0 %v19096_v27  ;;  %11120 = vmatprep.subr.bf16.mxu1 %v19101_v58  ;;  %v19116_v27 = vld [vmem:[%s20648_s8 + $0x1a74] ss:$8 sps:$4 sm:$0xff]  }
 0x295   : > { %13154 = vmatprep.subr.bf16.mxu0 %v19104_v16  ;;  %11059 = vmatprep.mubr.bf16.mxu1 %v21700_v39  ;;  %v20050_v58 = vld [vmem:[%s20641_s30 + $0x3f8] sm:$0xff] }
 0x296   : > { %13093 = vmatprep.mubr.bf16.mxu0 %v15379_v5  ;;  %v15511_v16 = vcombine.high %v15435_v52, %v20050_v58  ;;  %v19117_v5 = vld [vmem:[%s20648_s8 + $0x880] ss:$8 sps:$4 sm:$0xff]  }
 0x297   : > { %11121 = vmatpush1.bf16.msra.mxu1 %v19099_v44  ;;  %v15510_v44 = vcombine.low %v15435_v52, %v20050_v58  ;;  %v19126_v52 = vld [vmem:[%s20648_s8 + $0x1a90] ss:$8 sps:$4 sm:$0xff]   ;;  %v19129_v58 = vld [vmem:[%s20648_s8 + $0x8a0] ss:$8 sps:$4 sm:$0xff]  }
 0x298   : > { %13155 = vmatpush1.bf16.msra.mxu0 %v19102_v35  ;;  %11122 = vmatprep.subr.bf16.mxu1 %v19107_v28  ;;  %v19120_v35 = vld [vmem:[%s20648_s8 + $0x1a80] ss:$8 sps:$4 sm:$0xff]   ;;  %v19125_v28 = vld [vmem:[%s20648_s8 + $0x894] ss:$8 sps:$4 sm:$0xff]  }
 0x299   : > { %13156 = vmatprep.subr.bf16.mxu0 %v19110_v21  ;;  %v19128_v21 = vld [vmem:[%s20648_s8 + $0x1a94] ss:$8 sps:$4 sm:$0xff]  }
 0x29a   : > { %11060 = vmatmul.mubr.bf16.gmra.mrb[12].mxu1 %v21710_v48 }
 0x29b   : > { %13094 = vmatmul.mubr.bf16.gmra.mrb[12].mxu0 %v15378_v45  ;;  %11123 = vmatpush1.bf16.msra.mxu1 %v19105_v56  ;;  %v20051_v56 = vld [vmem:[%s20641_s30 + $0x418] sm:$0xff] }
 0x29c   : > { %13157 = vmatpush1.bf16.msra.mxu0 %v19108_v15  ;;  %11124 = vmatprep.subr.bf16.mxu1 %v19113_v37  ;;  %v20052_v45 = vld [vmem:[%s20641_s30 + $0x438] sm:$0xff]  ;;  %v19131_v37 = vld [vmem:[%s20648_s8 + $0x8a4] ss:$8 sps:$4 sm:$0xff]  }
 0x29d   : > { %13158 = vmatprep.subr.bf16.mxu0 %v19116_v27  ;;  %11069 = vmatprep.mubr.bf16.mxu1 %v15511_v16  ;;  %v21729_v15 = vcombine.high %v20051_v56, %v20052_v45  ;;  %v19134_v27 = vld [vmem:[%s20648_s8 + $0x1aa4] ss:$8 sps:$4 sm:$0xff]   ;;  %v21740_v16 = vcombine.low %v20051_v56, %v20052_v45  ;;  %v19141_v45 = vld [vmem:[%s20648_s8 + $0x8c0] ss:$8 sps:$4 sm:$0xff]  }
 0x29e   : > { %13103 = vmatprep.mubr.bf16.mxu0 %v20940_v46  ;;  %v19123_v46 = vld [vmem:[%s20648_s8 + $0x890] ss:$8 sps:$4 sm:$0xff]   ;;  %v361_v56 = vld [vmem:[%s20641_s30 + $0x268] sm:$0xff] }
 0x29f   : > { %11125 = vmatpush1.bf16.msra.mxu1 %v19111_v29  ;;  %v19137_v29 = vld [vmem:[%s20648_s8 + $0x8b4] ss:$8 sps:$4 sm:$0xff]  }
 0x2a0   : > { %13159 = vmatpush1.bf16.msra.mxu0 %v19114_v41  ;;  %11126 = vmatprep.subr.bf16.mxu1 %v19119_v20  ;;  %v19140_v41 = vld [vmem:[%s20648_s8 + $0x1ab4] ss:$8 sps:$4 sm:$0xff]   ;;  %v19135_v20 = vld [vmem:[%s20648_s8 + $0x8b0] ss:$8 sps:$4 sm:$0xff]  }
 0x2a1   : > { %13160 = vmatprep.subr.bf16.mxu0 %v19122_v31  ;;  %v19138_v31 = vld [vmem:[%s20648_s8 + $0x1ab0] ss:$8 sps:$4 sm:$0xff]  }
 0x2a2   : > { %11070 = vmatmul.mubr.bf16.gmra.mrb[16].mxu1 %v15510_v44 }
 0x2a3   : > { %13104 = vmatmul.mubr.bf16.gmra.mrb[16].mxu0 %v20950_v59  ;;  %11127 = vmatpush1.bf16.msra.mxu1 %v19117_v5  ;;  %v19132_v59 = vld [vmem:[%s20648_s8 + $0x1aa0] ss:$8 sps:$4 sm:$0xff]   ;;  %v20053_v5 = vld [vmem:[%s20641_s30 + $0x458] sm:$0xff] }
 0x2a4   : > { %13161 = vmatpush1.bf16.msra.mxu0 %v19120_v35  ;;  %11128 = vmatprep.subr.bf16.mxu1 %v19125_v28  ;;  %v19143_v35 = vld [vmem:[%s20648_s8 + $0x8c4] ss:$8 sps:$4 sm:$0xff]  }
 0x2a5   : > { %13162 = vmatprep.subr.bf16.mxu0 %v19128_v21  ;;  %11079 = vmatprep.mubr.bf16.mxu1 %v21729_v15  ;;  %v19146_v28 = vld [vmem:[%s20648_s8 + $0x1ac4] ss:$8 sps:$4 sm:$0xff]  }
 0x2a6   : > { %13113 = vmatprep.mubr.bf16.mxu0 %v20957_v6  ;;  %v20054_v6 = vld [vmem:[%s20641_s30 + $0x478] sm:$0xff]  ;;  %v357_v21 = vld [vmem:[%s20641_s30 + $0x248] sm:$0xff] }
 0x2a7   : > { %11129 = vmatpush1.bf16.msra.mxu1 %v19123_v46  ;;  %v21748_v44 = vcombine.high %v20053_v5, %v20054_v6  ;;  %v19144_v46 = vld [vmem:[%s20648_s8 + $0x1ac0] ss:$8 sps:$4 sm:$0xff]  }
 0x2a8   : > { %13163 = vmatpush1.bf16.msra.mxu0 %v19126_v52  ;;  %11130 = vmatprep.subr.bf16.mxu1 %v19131_v37  ;;  %v19149_v52 = vld [vmem:[%s20648_s8 + $0x8d4] ss:$8 sps:$4 sm:$0xff]  }
 0x2a9   : > { %13164 = vmatprep.subr.bf16.mxu0 %v19134_v27  ;;  %v19152_v37 = vld [vmem:[%s20648_s8 + $0x1ad4] ss:$8 sps:$4 sm:$0xff]  }
 0x2aa   : > { %11080 = vmatmul.mubr.bf16.gmra.mrb[20].mxu1 %v21740_v16  ;;  %v20055_v27 = vld [vmem:[%s20641_s30 + $0x498] sm:$0xff] }
 0x2ab   : > { %13114 = vmatmul.mubr.bf16.gmra.mrb[20].mxu0 %v20967_v14  ;;  %11131 = vmatpush1.bf16.msra.mxu1 %v19129_v58  ;;  %v21760_v14 = vcombine.low %v20053_v5, %v20054_v6  ;;  %v20056_v58 = vld [vmem:[%s20641_s30 + $0x4b8] sm:$0xff]  ;;  %v19153_v5 = vld [vmem:[%s20648_s8 + $0x8e0] ss:$8 sps:$4 sm:$0xff]  }
 0x2ac   : > { %13165 = vmatpush1.bf16.msra.mxu0 %v19132_v59  ;;  %11132 = vmatprep.subr.bf16.mxu1 %v19137_v29  ;;  %v21766_v59 = vcombine.high %v20055_v27, %v20056_v58  ;;  %v19147_v29 = vld [vmem:[%s20648_s8 + $0x8d0] ss:$8 sps:$4 sm:$0xff]   ;;  %v21776_v6 = vcombine.low %v20055_v27, %v20056_v58  ;;  %v19167_v27 = vld [vmem:[%s20648_s8 + $0x904] ss:$8 sps:$4 sm:$0xff]  }
 0x2ad   : > { %13166 = vmatprep.subr.bf16.mxu0 %v19140_v41  ;;  %11089 = vmatprep.mubr.bf16.mxu1 %v21748_v44  ;;  %v19150_v41 = vld [vmem:[%s20648_s8 + $0x1ad0] ss:$8 sps:$4 sm:$0xff]   ;;  %v19170_v58 = vld [vmem:[%s20648_s8 + $0x1b04] ss:$8 sps:$4 sm:$0xff]  }
 0x2ae   : > { %13123 = vmatprep.mubr.bf16.mxu0 %v20975_v25  ;;  %v15387_v25 = vcombine.high %v357_v21, %v361_v56 }
 0x2af   : > { %11133 = vmatpush1.bf16.msra.mxu1 %v19135_v20  ;;  %v19155_v20 = vld [vmem:[%s20648_s8 + $0x8e4] ss:$8 sps:$4 sm:$0xff]  }
 0x2b0   : > { %13167 = vmatpush1.bf16.msra.mxu0 %v19138_v31  ;;  %11134 = vmatprep.subr.bf16.mxu1 %v19143_v35  ;;  %v19158_v31 = vld [vmem:[%s20648_s8 + $0x1ae4] ss:$8 sps:$4 sm:$0xff]   ;;  %v15386_v35 = vcombine.low %v357_v21, %v361_v56  ;;  %v19159_v21 = vld [vmem:[%s20648_s8 + $0x8f0] ss:$8 sps:$4 sm:$0xff]  }
 0x2b1   : > { %13168 = vmatprep.subr.bf16.mxu0 %v19146_v28  ;;  %v15616_v28 = vld [vmem:[%s20641_s30 + $0x500] sm:$0xff]  ;;  %v19162_v56 = vld [vmem:[%s20648_s8 + $0x1af0] ss:$8 sps:$4 sm:$0xff]  }
 0x2b2   : > { %11090 = vmatmul.mubr.bf16.gmra.mrb[24].mxu1 %v21760_v14 }
 0x2b3   : > { %13124 = vmatmul.mubr.bf16.gmra.mrb[24].mxu0 %v20986_v40  ;;  %11135 = vmatpush1.bf16.msra.mxu1 %v19141_v45  ;;  %v19156_v40 = vld [vmem:[%s20648_s8 + $0x1ae0] ss:$8 sps:$4 sm:$0xff]   ;;  %v19161_v45 = vld [vmem:[%s20648_s8 + $0x8f4] ss:$8 sps:$4 sm:$0xff]  }
 0x2b4   : > { %13169 = vmatpush1.bf16.msra.mxu0 %v19144_v46  ;;  %11136 = vmatprep.subr.bf16.mxu1 %v19149_v52  ;;  %v19164_v46 = vld [vmem:[%s20648_s8 + $0x1af4] ss:$8 sps:$4 sm:$0xff]   ;;  %v20057_v52 = vld [vmem:[%s20641_s30 + $0x520] sm:$0xff] }
 0x2b5   : > { %13170 = vmatprep.subr.bf16.mxu0 %v19152_v37  ;;  %11099 = vmatprep.mubr.bf16.mxu1 %v21766_v59  ;;  %v15697_v37 = vcombine.high %v15616_v28, %v20057_v52 }
 0x2b6   : > { %13133 = vmatprep.mubr.bf16.mxu0 %v15387_v25  ;;  %v19165_v25 = vld [vmem:[%s20648_s8 + $0x900] ss:$8 sps:$4 sm:$0xff]  }
 0x2b7   : > { %11137 = vmatpush1.bf16.msra.mxu1 %v19147_v29  ;;  %v15696_v29 = vcombine.low %v15616_v28, %v20057_v52  ;;  %v19174_v28 = vld [vmem:[%s20648_s8 + $0x1b10] ss:$8 sps:$4 sm:$0xff]   ;;  %v19177_v52 = vld [vmem:[%s20648_s8 + $0x920] ss:$8 sps:$4 sm:$0xff]  }
 0x2b8   : > { %13171 = vmatpush1.bf16.msra.mxu0 %v19150_v41  ;;  %11138 = vmatprep.subr.bf16.mxu1 %v19155_v20  ;;  %v19168_v41 = vld [vmem:[%s20648_s8 + $0x1b00] ss:$8 sps:$4 sm:$0xff]   ;;  %v19173_v20 = vld [vmem:[%s20648_s8 + $0x914] ss:$8 sps:$4 sm:$0xff]  }
 0x2b9   : > { %13172 = vmatprep.subr.bf16.mxu0 %v19158_v31  ;;  %v19176_v31 = vld [vmem:[%s20648_s8 + $0x1b14] ss:$8 sps:$4 sm:$0xff]  }
 0x2ba   : > { %11100 = vmatmul.mubr.bf16.gmra.mrb[28].mxu1 %v21776_v6 }
 0x2bb   : > { %13134 = vmatmul.mubr.bf16.gmra.mrb[28].mxu0 %v15386_v35  ;;  %11139 = vmatpush1.bf16.msra.mxu1 %v19153_v5  ;;  %v20058_v5 = vld [vmem:[%s20641_s30 + $0x540] sm:$0xff] }
 0x2bc   : > { %13173 = vmatpush1.bf16.msra.mxu0 %v19156_v40  ;;  %11140 = vmatprep.subr.bf16.mxu1 %v19161_v45  ;;  %v20059_v35 = vld [vmem:[%s20641_s30 + $0x560] sm:$0xff] }
 0x2bd   : > { %13174 = vmatprep.subr.bf16.mxu0 %v19164_v46  ;;  %11142 = vmatprep.mubr.bf16.mxu1 %v15697_v37  ;;  %v21795_v40 = vcombine.high %v20058_v5, %v20059_v35  ;;  %v19179_v45 = vld [vmem:[%s20648_s8 + $0x924] ss:$8 sps:$4 sm:$0xff]   ;;  %v21806_v37 = vcombine.low %v20058_v5, %v20059_v35  ;;  %v322_v5 = vld [vmem:[%s20641_s30 + $0x130] sm:$0xff]  ;;  %v19189_v35 = vld [vmem:[%s20648_s8 + $0x940] ss:$8 sps:$4 sm:$0xff]  }
 0x2be   : > { %13176 = vmatprep.mubr.bf16.mxu0 %v21006_v11  ;;  %v19171_v11 = vld [vmem:[%s20648_s8 + $0x910] ss:$8 sps:$4 sm:$0xff]   ;;  %v19182_v46 = vld [vmem:[%s20648_s8 + $0x1b24] ss:$8 sps:$4 sm:$0xff]  }
 0x2bf   : > { %11141 = vmatpush1.bf16.msra.mxu1 %v19159_v21  ;;  %v19185_v21 = vld [vmem:[%s20648_s8 + $0x934] ss:$8 sps:$4 sm:$0xff]  }
 0x2c0   : > { %13175 = vmatpush1.bf16.msra.mxu0 %v19162_v56  ;;  %11223 = vmatprep.subr.bf16.mxu1 %v19167_v27  ;;  %v19188_v56 = vld [vmem:[%s20648_s8 + $0x1b34] ss:$8 sps:$4 sm:$0xff]   ;;  %v19183_v27 = vld [vmem:[%s20648_s8 + $0x930] ss:$8 sps:$4 sm:$0xff]  }
 0x2c1   : > { %13257 = vmatprep.subr.bf16.mxu0 %v19170_v58  ;;  %v19186_v58 = vld [vmem:[%s20648_s8 + $0x1b30] ss:$8 sps:$4 sm:$0xff]  }
 0x2c2   : > { %11143 = vmatmul.mubr.bf16.vlgmr.msra.gmra.mrb[0].mxu1 %v15696_v29 }
 0x2c3   : > { %13177 = vmatmul.mubr.bf16.vlgmr.msra.gmra.mrb[0].mxu0 %v21017_v26  ;;  %11224 = vmatpush1.bf16.msra.mxu1 %v19165_v25  ;;  %v19180_v26 = vld [vmem:[%s20648_s8 + $0x1b20] ss:$8 sps:$4 sm:$0xff]  }
 0x2c4   : > { %13258 = vmatpush1.bf16.msra.mxu0 %v19168_v41  ;;  %11225 = vmatprep.subr.bf16.mxu1 %v19173_v20  ;;  %v20060_v25 = vld [vmem:[%s20641_s30 + $0x580] sm:$0xff] }
 0x2c5   : > { %13259 = vmatprep.subr.bf16.mxu0 %v19176_v31  ;;  %11152 = vmatprep.mubr.bf16.mxu1 %v21795_v40  ;;  %v19191_v41 = vld [vmem:[%s20648_s8 + $0x944] ss:$8 sps:$4 sm:$0xff]   ;;  %v318_v31 = vld [vmem:[%s20641_s30 + $0x110] sm:$0xff] }
 0x2c6   : > { %13186 = vmatprep.mubr.bf16.mxu0 %v21023_v36  ;;  %v20061_v36 = vld [vmem:[%s20641_s30 + $0x5a0] sm:$0xff] }
 0x2c7   : > { %11226 = vmatpush1.bf16.msra.mxu1 %v19171_v11  ;;  %v21814_v29 = vcombine.high %v20060_v25, %v20061_v36  ;;  %v19194_v20 = vld [vmem:[%s20648_s8 + $0x1b44] ss:$8 sps:$4 sm:$0xff]   ;;  %v19192_v11 = vld [vmem:[%s20648_s8 + $0x1b40] ss:$8 sps:$4 sm:$0xff]  }
 0x2c8   : > { %13260 = vmatpush1.bf16.msra.mxu0 %v19174_v28  ;;  %11227 = vmatprep.subr.bf16.mxu1 %v19179_v45  ;;  %v19197_v28 = vld [vmem:[%s20648_s8 + $0x954] ss:$8 sps:$4 sm:$0xff]  }
 0x2c9   : > { %13261 = vmatprep.subr.bf16.mxu0 %v19182_v46  ;;  %v19200_v45 = vld [vmem:[%s20648_s8 + $0x1b54] ss:$8 sps:$4 sm:$0xff]   ;;  %v20062_v46 = vld [vmem:[%s20641_s30 + $0x5c0] sm:$0xff] }
 0x2ca   : > { %11153 = vmatmul.mubr.bf16.gmra.mrb[4].mxu1 %v21806_v37 }
 0x2cb   : > { %13187 = vmatmul.mubr.bf16.gmra.mrb[4].mxu0 %v21034_v53  ;;  %11228 = vmatpush1.bf16.msra.mxu1 %v19177_v52  ;;  %v21826_v53 = vcombine.low %v20060_v25, %v20061_v36  ;;  %v20063_v52 = vld [vmem:[%s20641_s30 + $0x5e0] sm:$0xff] }
 0x2cc   : > { %13262 = vmatpush1.bf16.msra.mxu0 %v19180_v26  ;;  %11229 = vmatprep.subr.bf16.mxu1 %v19185_v21  ;;  %v21832_v26 = vcombine.high %v20062_v46, %v20063_v52  ;;  %v19195_v21 = vld [vmem:[%s20648_s8 + $0x950] ss:$8 sps:$4 sm:$0xff]   ;;  %v19201_v25 = vld [vmem:[%s20648_s8 + $0x960] ss:$8 sps:$4 sm:$0xff]   ;;  %v21842_v36 = vcombine.low %v20062_v46, %v20063_v52  ;;  %v19215_v46 = vld [vmem:[%s20648_s8 + $0x984] ss:$8 sps:$4 sm:$0xff]  }
 0x2cd   : > { %13263 = vmatprep.subr.bf16.mxu0 %v19188_v56  ;;  %11162 = vmatprep.mubr.bf16.mxu1 %v21814_v29  ;;  %v19198_v56 = vld [vmem:[%s20648_s8 + $0x1b50] ss:$8 sps:$4 sm:$0xff]   ;;  %v19218_v52 = vld [vmem:[%s20648_s8 + $0x1b84] ss:$8 sps:$4 sm:$0xff]  }
 0x2ce   : > { %13196 = vmatprep.mubr.bf16.mxu0 %v21041_v0  ;;  %v15381_v0 = vcombine.high %v318_v31, %v322_v5 }
 0x2cf   : > { %11230 = vmatpush1.bf16.msra.mxu1 %v19183_v27  ;;  %v19203_v27 = vld [vmem:[%s20648_s8 + $0x964] ss:$8 sps:$4 sm:$0xff]  }
 0x2d0   : > { %13264 = vmatpush1.bf16.msra.mxu0 %v19186_v58  ;;  %11231 = vmatprep.subr.bf16.mxu1 %v19191_v41  ;;  %v19206_v58 = vld [vmem:[%s20648_s8 + $0x1b64] ss:$8 sps:$4 sm:$0xff]   ;;  %v15380_v41 = vcombine.low %v318_v31, %v322_v5  ;;  %v19207_v31 = vld [vmem:[%s20648_s8 + $0x970] ss:$8 sps:$4 sm:$0xff]  }
 0x2d1   : > { %13265 = vmatprep.subr.bf16.mxu0 %v19194_v20  ;;  %v15656_v20 = vld [vmem:[%s20641_s30 + $0x640] sm:$0xff]  ;;  %v19210_v5 = vld [vmem:[%s20648_s8 + $0x1b70] ss:$8 sps:$4 sm:$0xff]  }
 0x2d2   : > { %11163 = vmatmul.mubr.bf16.gmra.mrb[8].mxu1 %v21826_v53 }
 0x2d3   : > { %13197 = vmatmul.mubr.bf16.gmra.mrb[8].mxu0 %v21051_v12  ;;  %11232 = vmatpush1.bf16.msra.mxu1 %v19189_v35  ;;  %v19204_v12 = vld [vmem:[%s20648_s8 + $0x1b60] ss:$8 sps:$4 sm:$0xff]   ;;  %v19209_v35 = vld [vmem:[%s20648_s8 + $0x974] ss:$8 sps:$4 sm:$0xff]  }
 0x2d4   : > { %13266 = vmatpush1.bf16.msra.mxu0 %v19192_v11  ;;  %11233 = vmatprep.subr.bf16.mxu1 %v19197_v28  ;;  %v19212_v11 = vld [vmem:[%s20648_s8 + $0x1b74] ss:$8 sps:$4 sm:$0xff]   ;;  %v20064_v28 = vld [vmem:[%s20641_s30 + $0x660] sm:$0xff] }
 0x2d5   : > { %13267 = vmatprep.subr.bf16.mxu0 %v19200_v45  ;;  %11172 = vmatprep.mubr.bf16.mxu1 %v21832_v26  ;;  %v15729_v45 = vcombine.high %v15656_v20, %v20064_v28 }
 0x2d6   : > { %13206 = vmatprep.mubr.bf16.mxu0 %v15381_v0  ;;  %v19213_v0 = vld [vmem:[%s20648_s8 + $0x980] ss:$8 sps:$4 sm:$0xff]  }
 0x2d7   : > { %11234 = vmatpush1.bf16.msra.mxu1 %v19195_v21  ;;  %v15728_v21 = vcombine.low %v15656_v20, %v20064_v28  ;;  %v19222_v20 = vld [vmem:[%s20648_s8 + $0x1b90] ss:$8 sps:$4 sm:$0xff]   ;;  %v19225_v28 = vld [vmem:[%s20648_s8 + $0x9a0] ss:$8 sps:$4 sm:$0xff]  }
 0x2d8   : > { %13268 = vmatpush1.bf16.msra.mxu0 %v19198_v56  ;;  %11235 = vmatprep.subr.bf16.mxu1 %v19203_v27  ;;  %v19216_v56 = vld [vmem:[%s20648_s8 + $0x1b80] ss:$8 sps:$4 sm:$0xff]   ;;  %v19221_v27 = vld [vmem:[%s20648_s8 + $0x994] ss:$8 sps:$4 sm:$0xff]  }
 0x2d9   : > { %13269 = vmatprep.subr.bf16.mxu0 %v19206_v58  ;;  %v19224_v58 = vld [vmem:[%s20648_s8 + $0x1b94] ss:$8 sps:$4 sm:$0xff]  }
 0x2da   : > { %11173 = vmatmul.mubr.bf16.gmra.mrb[12].mxu1 %v21842_v36 }
 0x2db   : > { %13207 = vmatmul.mubr.bf16.gmra.mrb[12].mxu0 %v15380_v41  ;;  %11236 = vmatpush1.bf16.msra.mxu1 %v19201_v25  ;;  %v20065_v25 = vld [vmem:[%s20641_s30 + $0x680] sm:$0xff] }
 0x2dc   : > { %13270 = vmatpush1.bf16.msra.mxu0 %v19204_v12  ;;  %11237 = vmatprep.subr.bf16.mxu1 %v19209_v35  ;;  %v20066_v41 = vld [vmem:[%s20641_s30 + $0x6a0] sm:$0xff] }
 0x2dd   : > { %13271 = vmatprep.subr.bf16.mxu0 %v19212_v11  ;;  %11182 = vmatprep.mubr.bf16.mxu1 %v15729_v45  ;;  %v21861_v12 = vcombine.high %v20065_v25, %v20066_v41  ;;  %v19227_v35 = vld [vmem:[%s20648_s8 + $0x9a4] ss:$8 sps:$4 sm:$0xff]   ;;  %v21872_v45 = vcombine.low %v20065_v25, %v20066_v41  ;;  %v362_v25 = vld [vmem:[%s20641_s30 + $0x270] sm:$0xff]  ;;  %v19237_v41 = vld [vmem:[%s20648_s8 + $0x9c0] ss:$8 sps:$4 sm:$0xff]  }
 0x2de   : > { %13216 = vmatprep.mubr.bf16.mxu0 %v21072_v57  ;;  %v19219_v57 = vld [vmem:[%s20648_s8 + $0x990] ss:$8 sps:$4 sm:$0xff]   ;;  %v19230_v11 = vld [vmem:[%s20648_s8 + $0x1ba4] ss:$8 sps:$4 sm:$0xff]  }
 0x2df   : > { %11238 = vmatpush1.bf16.msra.mxu1 %v19207_v31  ;;  %v19233_v31 = vld [vmem:[%s20648_s8 + $0x9b4] ss:$8 sps:$4 sm:$0xff]  }
 0x2e0   : > { %13272 = vmatpush1.bf16.msra.mxu0 %v19210_v5  ;;  %11239 = vmatprep.subr.bf16.mxu1 %v19215_v46  ;;  %v19236_v5 = vld [vmem:[%s20648_s8 + $0x1bb4] ss:$8 sps:$4 sm:$0xff]   ;;  %v19231_v46 = vld [vmem:[%s20648_s8 + $0x9b0] ss:$8 sps:$4 sm:$0xff]  }
 0x2e1   : > { %13273 = vmatprep.subr.bf16.mxu0 %v19218_v52  ;;  %v19234_v52 = vld [vmem:[%s20648_s8 + $0x1bb0] ss:$8 sps:$4 sm:$0xff]  }
 0x2e2   : > { %11183 = vmatmul.mubr.bf16.gmra.mrb[16].mxu1 %v15728_v21 }
 0x2e3   : > { %13217 = vmatmul.mubr.bf16.gmra.mrb[16].mxu0 %v21083_v10  ;;  %11240 = vmatpush1.bf16.msra.mxu1 %v19213_v0  ;;  %v19228_v10 = vld [vmem:[%s20648_s8 + $0x1ba0] ss:$8 sps:$4 sm:$0xff]  }
 0x2e4   : > { %13274 = vmatpush1.bf16.msra.mxu0 %v19216_v56  ;;  %11241 = vmatprep.subr.bf16.mxu1 %v19221_v27  ;;  %v20067_v0 = vld [vmem:[%s20641_s30 + $0x6c0] sm:$0xff] }
 0x2e5   : > { %13275 = vmatprep.subr.bf16.mxu0 %v19224_v58  ;;  %11192 = vmatprep.mubr.bf16.mxu1 %v21861_v12  ;;  %v19239_v56 = vld [vmem:[%s20648_s8 + $0x9c4] ss:$8 sps:$4 sm:$0xff]   ;;  %v358_v58 = vld [vmem:[%s20641_s30 + $0x250] sm:$0xff] }
 0x2e6   : > { %13226 = vmatprep.mubr.bf16.mxu0 %v21089_v22  ;;  %v20068_v22 = vld [vmem:[%s20641_s30 + $0x6e0] sm:$0xff] }
 0x2e7   : > { %11242 = vmatpush1.bf16.msra.mxu1 %v19219_v57  ;;  %v21880_v21 = vcombine.high %v20067_v0, %v20068_v22  ;;  %v19242_v27 = vld [vmem:[%s20648_s8 + $0x1bc4] ss:$8 sps:$4 sm:$0xff]   ;;  %v19240_v57 = vld [vmem:[%s20648_s8 + $0x1bc0] ss:$8 sps:$4 sm:$0xff]  }
 0x2e8   : > { %13276 = vmatpush1.bf16.msra.mxu0 %v19222_v20  ;;  %11243 = vmatprep.subr.bf16.mxu1 %v19227_v35  ;;  %v19245_v20 = vld [vmem:[%s20648_s8 + $0x9d4] ss:$8 sps:$4 sm:$0xff]  }
 0x2e9   : > { %13277 = vmatprep.subr.bf16.mxu0 %v19230_v11  ;;  %v19248_v35 = vld [vmem:[%s20648_s8 + $0x1bd4] ss:$8 sps:$4 sm:$0xff]   ;;  %v20069_v11 = vld [vmem:[%s20641_s30 + $0x700] sm:$0xff] }
 0x2ea   : > { %11193 = vmatmul.mubr.bf16.gmra.mrb[20].mxu1 %v21872_v45 }
 0x2eb   : > { %13227 = vmatmul.mubr.bf16.gmra.mrb[20].mxu0 %v21101_v42  ;;  %11244 = vmatpush1.bf16.msra.mxu1 %v19225_v28  ;;  %v21892_v42 = vcombine.low %v20067_v0, %v20068_v22  ;;  %v20070_v28 = vld [vmem:[%s20641_s30 + $0x720] sm:$0xff] }
 0x2ec   : > { %13278 = vmatpush1.bf16.msra.mxu0 %v19228_v10  ;;  %11245 = vmatprep.subr.bf16.mxu1 %v19233_v31  ;;  %v21898_v10 = vcombine.high %v20069_v11, %v20070_v28  ;;  %v19243_v31 = vld [vmem:[%s20648_s8 + $0x9d0] ss:$8 sps:$4 sm:$0xff]   ;;  %v19249_v0 = vld [vmem:[%s20648_s8 + $0x9e0] ss:$8 sps:$4 sm:$0xff]   ;;  %v21908_v22 = vcombine.low %v20069_v11, %v20070_v28  ;;  %v19263_v11 = vld [vmem:[%s20648_s8 + $0xa04] ss:$8 sps:$4 sm:$0xff]  }
 0x2ed   : > { %13279 = vmatprep.subr.bf16.mxu0 %v19236_v5  ;;  %11202 = vmatprep.mubr.bf16.mxu1 %v21880_v21  ;;  %v19246_v5 = vld [vmem:[%s20648_s8 + $0x1bd0] ss:$8 sps:$4 sm:$0xff]   ;;  %v19266_v28 = vld [vmem:[%s20648_s8 + $0x1c04] ss:$8 sps:$4 sm:$0xff]  }
 0x2ee   : > { %13236 = vmatprep.mubr.bf16.mxu0 %v21107_v54  ;;  %v15389_v54 = vcombine.high %v358_v58, %v362_v25 }
 0x2ef   : > { %11246 = vmatpush1.bf16.msra.mxu1 %v19231_v46  ;;  %v19251_v46 = vld [vmem:[%s20648_s8 + $0x9e4] ss:$8 sps:$4 sm:$0xff]  }
 0x2f0   : > { %13280 = vmatpush1.bf16.msra.mxu0 %v19234_v52  ;;  %11247 = vmatprep.subr.bf16.mxu1 %v19239_v56  ;;  %v19254_v52 = vld [vmem:[%s20648_s8 + $0x1be4] ss:$8 sps:$4 sm:$0xff]   ;;  %v15388_v56 = vcombine.low %v358_v58, %v362_v25  ;;  %v19255_v58 = vld [vmem:[%s20648_s8 + $0x9f0] ss:$8 sps:$4 sm:$0xff]  }
 0x2f1   : > { %13281 = vmatprep.subr.bf16.mxu0 %v19242_v27  ;;  %v15617_v27 = vld [vmem:[%s20641_s30 + $0x508] sm:$0xff]  ;;  %v19258_v25 = vld [vmem:[%s20648_s8 + $0x1bf0] ss:$8 sps:$4 sm:$0xff]  }
 0x2f2   : > { %11203 = vmatmul.mubr.bf16.gmra.mrb[24].mxu1 %v21892_v42 }
 0x2f3   : > { %13237 = vmatmul.mubr.bf16.gmra.mrb[24].mxu0 %v21118_v8  ;;  %11248 = vmatpush1.bf16.msra.mxu1 %v19237_v41  ;;  %v19252_v8 = vld [vmem:[%s20648_s8 + $0x1be0] ss:$8 sps:$4 sm:$0xff]   ;;  %v19257_v41 = vld [vmem:[%s20648_s8 + $0x9f4] ss:$8 sps:$4 sm:$0xff]  }
 0x2f4   : > { %13282 = vmatpush1.bf16.msra.mxu0 %v19240_v57  ;;  %11249 = vmatprep.subr.bf16.mxu1 %v19245_v20  ;;  %v19260_v57 = vld [vmem:[%s20648_s8 + $0x1bf4] ss:$8 sps:$4 sm:$0xff]   ;;  %v20071_v20 = vld [vmem:[%s20641_s30 + $0x528] sm:$0xff] }
 0x2f5   : > { %13283 = vmatprep.subr.bf16.mxu0 %v19248_v35  ;;  %11212 = vmatprep.mubr.bf16.mxu1 %v21898_v10  ;;  %v15699_v35 = vcombine.high %v15617_v27, %v20071_v20 }
 0x2f6   : > { %13246 = vmatprep.mubr.bf16.mxu0 %v15389_v54  ;;  %v19261_v54 = vld [vmem:[%s20648_s8 + $0xa00] ss:$8 sps:$4 sm:$0xff]  }
 0x2f7   : > { %11250 = vmatpush1.bf16.msra.mxu1 %v19243_v31  ;;  %v15698_v31 = vcombine.low %v15617_v27, %v20071_v20  ;;  %v19270_v27 = vld [vmem:[%s20648_s8 + $0x1c10] ss:$8 sps:$4 sm:$0xff]   ;;  %v19273_v20 = vld [vmem:[%s20648_s8 + $0xa20] ss:$8 sps:$4 sm:$0xff]  }
 0x2f8   : > { %13284 = vmatpush1.bf16.msra.mxu0 %v19246_v5  ;;  %11251 = vmatprep.subr.bf16.mxu1 %v19251_v46  ;;  %v19264_v5 = vld [vmem:[%s20648_s8 + $0x1c00] ss:$8 sps:$4 sm:$0xff]   ;;  %v19269_v46 = vld [vmem:[%s20648_s8 + $0xa14] ss:$8 sps:$4 sm:$0xff]  }
 0x2f9   : > { %13285 = vmatprep.subr.bf16.mxu0 %v19254_v52  ;;  %v19272_v52 = vld [vmem:[%s20648_s8 + $0x1c14] ss:$8 sps:$4 sm:$0xff]  }
 0x2fa   : > { %11213 = vmatmul.mubr.bf16.gmra.mrb[28].mxu1 %v21908_v22 }
 0x2fb   : > { %13247 = vmatmul.mubr.bf16.gmra.mrb[28].mxu0 %v15388_v56  ;;  %11252 = vmatpush1.bf16.msra.mxu1 %v19249_v0  ;;  %v20072_v0 = vld [vmem:[%s20641_s30 + $0x548] sm:$0xff] }
 0x2fc   : > { %13286 = vmatpush1.bf16.msra.mxu0 %v19252_v8  ;;  %11253 = vmatprep.subr.bf16.mxu1 %v19257_v41  ;;  %v20073_v56 = vld [vmem:[%s20641_s30 + $0x568] sm:$0xff] }
 0x2fd   : > { %13287 = vmatprep.subr.bf16.mxu0 %v19260_v57  ;;  %11255 = vmatprep.mubr.bf16.mxu1 %v15699_v35  ;;  %v21927_v8 = vcombine.high %v20072_v0, %v20073_v56  ;;  %v19275_v41 = vld [vmem:[%s20648_s8 + $0xa24] ss:$8 sps:$4 sm:$0xff]   ;;  %v21938_v35 = vcombine.low %v20072_v0, %v20073_v56  ;;  %v323_v0 = vld [vmem:[%s20641_s30 + $0x138] sm:$0xff]  ;;  %v19285_v56 = vld [vmem:[%s20648_s8 + $0xa40] ss:$8 sps:$4 sm:$0xff]  }
 0x2fe   : > { %13289 = vmatprep.mubr.bf16.mxu0 %v21138_v62  ;;  %v19267_v62 = vld [vmem:[%s20648_s8 + $0xa10] ss:$8 sps:$4 sm:$0xff]   ;;  %v19278_v57 = vld [vmem:[%s20648_s8 + $0x1c24] ss:$8 sps:$4 sm:$0xff]  }
 0x2ff   : > { %11254 = vmatpush1.bf16.msra.mxu1 %v19255_v58  ;;  %v19281_v58 = vld [vmem:[%s20648_s8 + $0xa34] ss:$8 sps:$4 sm:$0xff]  }
 0x300   : > { %13288 = vmatpush1.bf16.msra.mxu0 %v19258_v25  ;;  %11336 = vmatprep.subr.bf16.mxu1 %v19263_v11  ;;  %v19284_v25 = vld [vmem:[%s20648_s8 + $0x1c34] ss:$8 sps:$4 sm:$0xff]   ;;  %v19279_v11 = vld [vmem:[%s20648_s8 + $0xa30] ss:$8 sps:$4 sm:$0xff]  }
 0x301   : > { %13370 = vmatprep.subr.bf16.mxu0 %v19266_v28  ;;  %v19282_v28 = vld [vmem:[%s20648_s8 + $0x1c30] ss:$8 sps:$4 sm:$0xff]  }
 0x302   : > { %11256 = vmatmul.mubr.bf16.vlgmr.msra.gmra.mrb[0].mxu1 %v15698_v31 }
 0x303   : > { %13290 = vmatmul.mubr.bf16.vlgmr.msra.gmra.mrb[0].mxu0 %v21148_v17  ;;  %11337 = vmatpush1.bf16.msra.mxu1 %v19261_v54  ;;  %v19276_v17 = vld [vmem:[%s20648_s8 + $0x1c20] ss:$8 sps:$4 sm:$0xff]  }
 0x304   : > { %13371 = vmatpush1.bf16.msra.mxu0 %v19264_v5  ;;  %11338 = vmatprep.subr.bf16.mxu1 %v19269_v46  ;;  %v20074_v54 = vld [vmem:[%s20641_s30 + $0x588] sm:$0xff] }
 0x305   : > { %13372 = vmatprep.subr.bf16.mxu0 %v19272_v52  ;;  %11265 = vmatprep.mubr.bf16.mxu1 %v21927_v8  ;;  %v19287_v5 = vld [vmem:[%s20648_s8 + $0xa44] ss:$8 sps:$4 sm:$0xff]   ;;  %v319_v52 = vld [vmem:[%s20641_s30 + $0x118] sm:$0xff] }
 0x306   : > { %13299 = vmatprep.mubr.bf16.mxu0 %v21155_v32  ;;  %v20075_v32 = vld [vmem:[%s20641_s30 + $0x5a8] sm:$0xff] }
 0x307   : > { %11339 = vmatpush1.bf16.msra.mxu1 %v19267_v62  ;;  %v21946_v31 = vcombine.high %v20074_v54, %v20075_v32  ;;  %v19290_v46 = vld [vmem:[%s20648_s8 + $0x1c44] ss:$8 sps:$4 sm:$0xff]   ;;  %v19288_v62 = vld [vmem:[%s20648_s8 + $0x1c40] ss:$8 sps:$4 sm:$0xff]  }
 0x308   : > { %13373 = vmatpush1.bf16.msra.mxu0 %v19270_v27  ;;  %11340 = vmatprep.subr.bf16.mxu1 %v19275_v41  ;;  %v19293_v27 = vld [vmem:[%s20648_s8 + $0xa54] ss:$8 sps:$4 sm:$0xff]  }
 0x309   : > { %13374 = vmatprep.subr.bf16.mxu0 %v19278_v57  ;;  %v19296_v41 = vld [vmem:[%s20648_s8 + $0x1c54] ss:$8 sps:$4 sm:$0xff]   ;;  %v20076_v57 = vld [vmem:[%s20641_s30 + $0x5c8] sm:$0xff] }
 0x30a   : > { %11266 = vmatmul.mubr.bf16.gmra.mrb[4].mxu1 %v21938_v35 }
 0x30b   : > { %13300 = vmatmul.mubr.bf16.gmra.mrb[4].mxu0 %v21167_v55  ;;  %11341 = vmatpush1.bf16.msra.mxu1 %v19273_v20  ;;  %v21958_v55 = vcombine.low %v20074_v54, %v20075_v32  ;;  %v20077_v20 = vld [vmem:[%s20641_s30 + $0x5e8] sm:$0xff] }
 0x30c   : > { %13375 = vmatpush1.bf16.msra.mxu0 %v19276_v17  ;;  %11342 = vmatprep.subr.bf16.mxu1 %v19281_v58  ;;  %v21964_v17 = vcombine.high %v20076_v57, %v20077_v20  ;;  %v19291_v58 = vld [vmem:[%s20648_s8 + $0xa50] ss:$8 sps:$4 sm:$0xff]   ;;  %v19297_v54 = vld [vmem:[%s20648_s8 + $0xa60] ss:$8 sps:$4 sm:$0xff]   ;;  %v21974_v32 = vcombine.low %v20076_v57, %v20077_v20  ;;  %v19311_v57 = vld [vmem:[%s20648_s8 + $0xa84] ss:$8 sps:$4 sm:$0xff]  }
 0x30d   : > { %13376 = vmatprep.subr.bf16.mxu0 %v19284_v25  ;;  %11275 = vmatprep.mubr.bf16.mxu1 %v21946_v31  ;;  %v19294_v25 = vld [vmem:[%s20648_s8 + $0x1c50] ss:$8 sps:$4 sm:$0xff]   ;;  %v19314_v20 = vld [vmem:[%s20648_s8 + $0x1c84] ss:$8 sps:$4 sm:$0xff]  }
 0x30e   : > { %13309 = vmatprep.mubr.bf16.mxu0 %v21173_v7  ;;  %v15383_v7 = vcombine.high %v319_v52, %v323_v0  ;;  %23202 = vst [vmem:[#allocation49_spill] sm:$0xff] %v21974_v32 }
 0x30f   : > { %11343 = vmatpush1.bf16.msra.mxu1 %v19279_v11  ;;  %v19299_v11 = vld [vmem:[%s20648_s8 + $0xa64] ss:$8 sps:$4 sm:$0xff]  }
 0x310   : > { %13377 = vmatpush1.bf16.msra.mxu0 %v19282_v28  ;;  %11344 = vmatprep.subr.bf16.mxu1 %v19287_v5  ;;  %v19302_v28 = vld [vmem:[%s20648_s8 + $0x1c64] ss:$8 sps:$4 sm:$0xff]   ;;  %v15382_v5 = vcombine.low %v319_v52, %v323_v0  ;;  %v19303_v52 = vld [vmem:[%s20648_s8 + $0xa70] ss:$8 sps:$4 sm:$0xff]  }
 0x311   : > { %13378 = vmatprep.subr.bf16.mxu0 %v19290_v46  ;;  %v15657_v46 = vld [vmem:[%s20641_s30 + $0x648] sm:$0xff]  ;;  %v19306_v0 = vld [vmem:[%s20648_s8 + $0x1c70] ss:$8 sps:$4 sm:$0xff]  }
 0x312   : > { %11276 = vmatmul.mubr.bf16.gmra.mrb[8].mxu1 %v21958_v55 }
 0x313   : > { %13310 = vmatmul.mubr.bf16.gmra.mrb[8].mxu0 %v21185_v33  ;;  %11345 = vmatpush1.bf16.msra.mxu1 %v19285_v56  ;;  %v19300_v33 = vld [vmem:[%s20648_s8 + $0x1c60] ss:$8 sps:$4 sm:$0xff]   ;;  %v19305_v56 = vld [vmem:[%s20648_s8 + $0xa74] ss:$8 sps:$4 sm:$0xff]  }
 0x314   : > { %13379 = vmatpush1.bf16.msra.mxu0 %v19288_v62  ;;  %11346 = vmatprep.subr.bf16.mxu1 %v19293_v27  ;;  %v19308_v62 = vld [vmem:[%s20648_s8 + $0x1c74] ss:$8 sps:$4 sm:$0xff]   ;;  %v20078_v27 = vld [vmem:[%s20641_s30 + $0x668] sm:$0xff] }
 0x315   : > { %13380 = vmatprep.subr.bf16.mxu0 %v19296_v41  ;;  %11285 = vmatprep.mubr.bf16.mxu1 %v21964_v17  ;;  %v15731_v41 = vcombine.high %v15657_v46, %v20078_v27 }
 0x316   : > { %13319 = vmatprep.mubr.bf16.mxu0 %v15383_v7  ;;  %v19309_v7 = vld [vmem:[%s20648_s8 + $0xa80] ss:$8 sps:$4 sm:$0xff]  }
 0x317   : > { %11347 = vmatpush1.bf16.msra.mxu1 %v19291_v58  ;;  %v15730_v58 = vcombine.low %v15657_v46, %v20078_v27  ;;  %v19315_v46 = vld [vmem:[%s20648_s8 + $0xa90] ss:$8 sps:$4 sm:$0xff]   ;;  %v19326_v27 = vld [vmem:[%s20648_s8 + $0x1ca4] ss:$8 sps:$4 sm:$0xff]  }
 0x318   : > { %13381 = vmatpush1.bf16.msra.mxu0 %v19294_v25  ;;  %11348 = vmatprep.subr.bf16.mxu1 %v19299_v11  ;;  %v19312_v25 = vld [vmem:[%s20648_s8 + $0x1c80] ss:$8 sps:$4 sm:$0xff]   ;;  %v19317_v11 = vld [vmem:[%s20648_s8 + $0xa94] ss:$8 sps:$4 sm:$0xff]  }
 0x319   : > { %13382 = vmatprep.subr.bf16.mxu0 %v19302_v28  ;;  %v19320_v28 = vld [vmem:[%s20648_s8 + $0x1c94] ss:$8 sps:$4 sm:$0xff]  }
 0x31a   : > { %11286 = vmatmul.mubr.bf16.gmra.mrb[12].mxu1 %v21974_v32 }
 0x31b   : > { %13320 = vmatmul.mubr.bf16.gmra.mrb[12].mxu0 %v15382_v5  ;;  %11349 = vmatpush1.bf16.msra.mxu1 %v19297_v54  ;;  %v20079_v54 = vld [vmem:[%s20641_s30 + $0x688] sm:$0xff] }
 0x31c   : > { %13383 = vmatpush1.bf16.msra.mxu0 %v19300_v33  ;;  %11350 = vmatprep.subr.bf16.mxu1 %v19305_v56  ;;  %v20080_v5 = vld [vmem:[%s20641_s30 + $0x6a8] sm:$0xff]  ;;  %v19318_v56 = vld [vmem:[%s20648_s8 + $0x1c90] ss:$8 sps:$4 sm:$0xff]  }
 0x31d   : > { %13384 = vmatprep.subr.bf16.mxu0 %v19308_v62  ;;  %11295 = vmatprep.mubr.bf16.mxu1 %v15731_v41  ;;  %v21993_v33 = vcombine.high %v20079_v54, %v20080_v5  ;;  %v19323_v62 = vld [vmem:[%s20648_s8 + $0xaa4] ss:$8 sps:$4 sm:$0xff]  }
 0x31e   : > { %13329 = vmatprep.mubr.bf16.mxu0 %v21204_v43  ;;  %v23204_v43 = vld [vmem:[#allocation24_spill] sm:$0xff]  ;;  %v23205_v41 = vld [vmem:[#allocation25_spill] sm:$0xff] }
 0x31f   : > { %11351 = vmatpush1.bf16.msra.mxu1 %v19303_v52  ;;  %23203 = vst [vmem:[#allocation50_spill] sm:$0xff] %v21993_v33  ;;  %v19321_v52 = vld [vmem:[%s20648_s8 + $0xaa0] ss:$8 sps:$4 sm:$0xff]  }
 0x320   : > { %13385 = vmatpush1.bf16.msra.mxu0 %v19306_v0  ;;  %11352 = vmatprep.subr.bf16.mxu1 %v19311_v57  ;;  %v19324_v0 = vld [vmem:[%s20648_s8 + $0x1ca0] ss:$8 sps:$4 sm:$0xff]   ;;  %v22004_v57 = vcombine.low %v20079_v54, %v20080_v5  ;;  %v23208_v54 = vld [vmem:[#allocation26_spill] sm:$0xff]  ;;  %v19335_v5 = vld [vmem:[%s20648_s8 + $0xac4] ss:$8 sps:$4 sm:$0xff]  }
 0x321   : > { %13386 = vmatprep.subr.bf16.mxu0 %v19314_v20  ;;  %v19329_v20 = vld [vmem:[%s20648_s8 + $0xab4] ss:$8 sps:$4 sm:$0xff]  }
 0x322   : > { %11296 = vmatmul.mubr.bf16.gmra.mrb[16].mxu1 %v15730_v58  ;;  %23206 = vst [vmem:[#allocation24_spill] sm:$0xff] %v22004_v57  ;;  %v19327_v58 = vld [vmem:[%s20648_s8 + $0xab0] ss:$8 sps:$4 sm:$0xff]  }
 0x323   : > { %13330 = vmatmul.mubr.bf16.gmra.mrb[16].mxu0 %v23204_v43  ;;  %11353 = vmatpush1.bf16.msra.mxu1 %v19309_v7  ;;  %v19332_v7 = vld [vmem:[%s20648_s8 + $0x1cb4] ss:$8 sps:$4 sm:$0xff]  }
 0x324   : > { %13387 = vmatpush1.bf16.msra.mxu0 %v19312_v25  ;;  %11354 = vmatprep.subr.bf16.mxu1 %v19317_v11  ;;  %v19330_v25 = vld [vmem:[%s20648_s8 + $0x1cb0] ss:$8 sps:$4 sm:$0xff]   ;;  %v20081_v11 = vld [vmem:[%s20641_s30 + $0x6c8] sm:$0xff] }
 0x325   : > { %13388 = vmatprep.subr.bf16.mxu0 %v19320_v28  ;;  %11305 = vmatprep.mubr.bf16.mxu1 %v21993_v33  ;;  %v20082_v28 = vld [vmem:[%s20641_s30 + $0x6e8] sm:$0xff] }
 0x326   : > { %13339 = vmatprep.mubr.bf16.mxu0 %v23205_v41  ;;  %v22012_v43 = vcombine.high %v20081_v11, %v20082_v28  ;;  %v19333_v41 = vld [vmem:[%s20648_s8 + $0xac0] ss:$8 sps:$4 sm:$0xff]  }
 0x327   : > { %11355 = vmatpush1.bf16.msra.mxu1 %v19315_v46  ;;  %v19338_v46 = vld [vmem:[%s20648_s8 + $0x1cc4] ss:$8 sps:$4 sm:$0xff]  }
 0x328   : > { %13389 = vmatpush1.bf16.msra.mxu0 %v19318_v56  ;;  %11356 = vmatprep.subr.bf16.mxu1 %v19323_v62  ;;  %23207 = vst [vmem:[#allocation25_spill] sm:$0xff] %v22012_v43  ;;  %v359_v56 = vld [vmem:[%s20641_s30 + $0x258] sm:$0xff] }
 0x329   : > { %13390 = vmatprep.subr.bf16.mxu0 %v19326_v27  ;;  %v363_v62 = vld [vmem:[%s20641_s30 + $0x278] sm:$0xff] }
 0x32a   : > { %11306 = vmatmul.mubr.bf16.gmra.mrb[20].mxu1 %v22004_v57  ;;  %v23209_v27 = vld [vmem:[#allocation27_spill] sm:$0xff]  ;;  %v19336_v57 = vld [vmem:[%s20648_s8 + $0x1cc0] ss:$8 sps:$4 sm:$0xff]  }
 0x32b   : > { %13340 = vmatmul.mubr.bf16.gmra.mrb[20].mxu0 %v23208_v54  ;;  %11357 = vmatpush1.bf16.msra.mxu1 %v19321_v52  ;;  %v22024_v54 = vcombine.low %v20081_v11, %v20082_v28  ;;  %v19341_v52 = vld [vmem:[%s20648_s8 + $0xad4] ss:$8 sps:$4 sm:$0xff]   ;;  %v23212_v11 = vld [vmem:[#allocation28_spill] sm:$0xff] }
 0x32c   : > { %13391 = vmatpush1.bf16.msra.mxu0 %v19324_v0  ;;  %11358 = vmatprep.subr.bf16.mxu1 %v19329_v20  ;;  %v19344_v0 = vld [vmem:[%s20648_s8 + $0x1cd4] ss:$8 sps:$4 sm:$0xff]   ;;  %v20083_v20 = vld [vmem:[%s20641_s30 + $0x708] sm:$0xff] }
 0x32d   : > { %13392 = vmatprep.subr.bf16.mxu0 %v19332_v7  ;;  %11315 = vmatprep.mubr.bf16.mxu1 %v22012_v43  ;;  %23210 = vst [vmem:[#allocation26_spill] sm:$0xff] %v22024_v54  ;;  %v20084_v7 = vld [vmem:[%s20641_s30 + $0x728] sm:$0xff] }
 0x32e   : > { %13349 = vmatprep.mubr.bf16.mxu0 %v23209_v27  ;;  %v22030_v43 = vcombine.high %v20083_v20, %v20084_v7  ;;  %v15391_v27 = vcombine.high %v359_v56, %v363_v62  ;;  %v19347_v28 = vld [vmem:[%s20648_s8 + $0xae4] ss:$8 sps:$4 sm:$0xff]   ;;  %v22040_v33 = vcombine.low %v20083_v20, %v20084_v7 }
 0x32f   : > { %11359 = vmatpush1.bf16.msra.mxu1 %v19327_v58  ;;  %v19339_v58 = vld [vmem:[%s20648_s8 + $0xad0] ss:$8 sps:$4 sm:$0xff]   ;;  %v19359_v20 = vld [vmem:[%s20648_s8 + $0xb04] ss:$8 sps:$4 sm:$0xff]  }
 0x330   : > { %13393 = vmatpush1.bf16.msra.mxu0 %v19330_v25  ;;  %11360 = vmatprep.subr.bf16.mxu1 %v19335_v5  ;;  %23211 = vst [vmem:[#allocation27_spill] sm:$0xff] %v22030_v43  ;;  %v19342_v25 = vld [vmem:[%s20648_s8 + $0x1cd0] ss:$8 sps:$4 sm:$0xff]   ;;  %v19350_v5 = vld [vmem:[%s20648_s8 + $0x1ce4] ss:$8 sps:$4 sm:$0xff]   ;;  %23213 = vst [vmem:[#allocation28_spill] sm:$0xff] %v22040_v33 }
 0x331   : > { %13394 = vmatprep.subr.bf16.mxu0 %v19338_v46  ;;  %v19345_v46 = vld [vmem:[%s20648_s8 + $0xae0] ss:$8 sps:$4 sm:$0xff]   ;;  %v19362_v7 = vld [vmem:[%s20648_s8 + $0x1d04] ss:$8 sps:$4 sm:$0xff]  }
 0x332   : > { %11316 = vmatmul.mubr.bf16.gmra.mrb[24].mxu1 %v22024_v54  ;;  %v15390_v54 = vcombine.low %v359_v56, %v363_v62  ;;  %v19351_v56 = vld [vmem:[%s20648_s8 + $0xaf0] ss:$8 sps:$4 sm:$0xff]  }
 0x333   : > { %13350 = vmatmul.mubr.bf16.gmra.mrb[24].mxu0 %v23212_v11  ;;  %11361 = vmatpush1.bf16.msra.mxu1 %v19333_v41  ;;  %v19348_v41 = vld [vmem:[%s20648_s8 + $0x1ce0] ss:$8 sps:$4 sm:$0xff]   ;;  %v20085_v11 = vld [vmem:[%s20641_s30 + $0x530] sm:$0xff] }
 0x334   : > { %13395 = vmatpush1.bf16.msra.mxu0 %v19336_v57  ;;  %11362 = vmatprep.subr.bf16.mxu1 %v19341_v52  ;;  %v15618_v57 = vld [vmem:[%s20641_s30 + $0x510] sm:$0xff] }
 0x335   : > { %13396 = vmatprep.subr.bf16.mxu0 %v19344_v0  ;;  %11325 = vmatprep.mubr.bf16.mxu1 %v22030_v43  ;;  %v19353_v52 = vld [vmem:[%s20648_s8 + $0xaf4] ss:$8 sps:$4 sm:$0xff]   ;;  %v19354_v62 = vld [vmem:[%s20648_s8 + $0x1cf0] ss:$8 sps:$4 sm:$0xff]   ;;  %v19396_v43 = vld [vmem:[%s20648_s8 + $0x1d60] ss:$8 sps:$4 sm:$0xff]  }
 0x336   : > { %13359 = vmatprep.mubr.bf16.mxu0 %v15391_v27  ;;  %v19356_v0 = vld [vmem:[%s20648_s8 + $0x1cf4] ss:$8 sps:$4 sm:$0xff]   ;;  %v15701_v27 = vcombine.high %v15618_v57, %v20085_v11 }
 0x337   : > { %11363 = vmatpush1.bf16.msra.mxu1 %v19339_v58  ;;  %v23214_v58 = vld [vmem:[#allocation29_spill] sm:$0xff] }
 0x338   : > { %13397 = vmatpush1.bf16.msra.mxu0 %v19342_v25  ;;  %11364 = vmatprep.subr.bf16.mxu1 %v19347_v28  ;;  %v19357_v25 = vld [vmem:[%s20648_s8 + $0xb00] ss:$8 sps:$4 sm:$0xff]  }
 0x339   : > { %13398 = vmatprep.subr.bf16.mxu0 %v19350_v5  ;;  %v19360_v28 = vld [vmem:[%s20648_s8 + $0x1d00] ss:$8 sps:$4 sm:$0xff]   ;;  %v19365_v5 = vld [vmem:[%s20648_s8 + $0xb14] ss:$8 sps:$4 sm:$0xff]  }
 0x33a   : > { %11326 = vmatmul.mubr.bf16.gmra.mrb[28].mxu1 %v22040_v33  ;;  %v19381_v33 = vld [vmem:[%s20648_s8 + $0xb40] ss:$8 sps:$4 sm:$0xff]  }
 0x33b   : > { %13360 = vmatmul.mubr.bf16.gmra.mrb[28].mxu0 %v15390_v54  ;;  %11365 = vmatpush1.bf16.msra.mxu1 %v19345_v46  ;;  %v15700_v54 = vcombine.low %v15618_v57, %v20085_v11  ;;  %v19368_v46 = vld [vmem:[%s20648_s8 + $0x1d14] ss:$8 sps:$4 sm:$0xff]   ;;  %v19363_v57 = vld [vmem:[%s20648_s8 + $0xb10] ss:$8 sps:$4 sm:$0xff]  }
 0x33c   : > { %13399 = vmatpush1.bf16.msra.mxu0 %v19348_v41  ;;  %11366 = vmatprep.subr.bf16.mxu1 %v19353_v52  ;;  %v20086_v41 = vld [vmem:[%s20641_s30 + $0x550] sm:$0xff] }
 0x33d   : > { %13400 = vmatprep.subr.bf16.mxu0 %v19356_v0  ;;  %11368 = vmatprep.mubr.bf16.mxu1 %v15701_v27  ;;  %v20087_v52 = vld [vmem:[%s20641_s30 + $0x570] sm:$0xff] }
 0x33e   : > { %13402 = vmatprep.mubr.bf16.mxu0 %v23214_v58  ;;  %v22059_v0 = vcombine.high %v20086_v41, %v20087_v52  ;;  %v23216_v27 = vld [vmem:[#allocation30_spill] sm:$0xff]  ;;  %v19372_v58 = vld [vmem:[%s20648_s8 + $0x1d20] ss:$8 sps:$4 sm:$0xff]  }
 0x33f   : > { %11367 = vmatpush1.bf16.msra.mxu1 %v19351_v56  ;;  %v19366_v11 = vld [vmem:[%s20648_s8 + $0x1d10] ss:$8 sps:$4 sm:$0xff]   ;;  %v19371_v56 = vld [vmem:[%s20648_s8 + $0xb24] ss:$8 sps:$4 sm:$0xff]  }
 0x340   : > { %13401 = vmatpush1.bf16.msra.mxu0 %v19354_v62  ;;  %11449 = vmatprep.subr.bf16.mxu1 %v19359_v20  ;;  %23215 = vst [vmem:[#allocation29_spill] sm:$0xff] %v22059_v0  ;;  %v19374_v62 = vld [vmem:[%s20648_s8 + $0x1d24] ss:$8 sps:$4 sm:$0xff]   ;;  %v23217_v20 = vld [vmem:[#allocation31_spill] sm:$0xff] }
 0x341   : > { %13483 = vmatprep.subr.bf16.mxu0 %v19362_v7  ;;  %v19369_v7 = vld [vmem:[%s20648_s8 + $0xb20] ss:$8 sps:$4 sm:$0xff]  }
 0x342   : > { %11369 = vmatmul.mubr.bf16.vlgmr.msra.gmra.mrb[0].mxu1 %v15700_v54  ;;  %v19380_v54 = vld [vmem:[%s20648_s8 + $0x1d34] ss:$8 sps:$4 sm:$0xff]  }
 0x343   : > { %13403 = vmatmul.mubr.bf16.vlgmr.msra.gmra.mrb[0].mxu0 %v23216_v27  ;;  %11450 = vmatpush1.bf16.msra.mxu1 %v19357_v25  ;;  %v22070_v25 = vcombine.low %v20086_v41, %v20087_v52  ;;  %v20088_v27 = vld [vmem:[%s20641_s30 + $0x590] sm:$0xff]  ;;  %v23220_v41 = vld [vmem:[#allocation32_spill] sm:$0xff] }
 0x344   : > { %13484 = vmatpush1.bf16.msra.mxu0 %v19360_v28  ;;  %11451 = vmatprep.subr.bf16.mxu1 %v19365_v5  ;;  %v19377_v28 = vld [vmem:[%s20648_s8 + $0xb34] ss:$8 sps:$4 sm:$0xff]   ;;  %v19375_v5 = vld [vmem:[%s20648_s8 + $0xb30] ss:$8 sps:$4 sm:$0xff]   ;;  %v19383_v52 = vld [vmem:[%s20648_s8 + $0xb44] ss:$8 sps:$4 sm:$0xff]  }
 0x345   : > { %13485 = vmatprep.subr.bf16.mxu0 %v19368_v46  ;;  %11378 = vmatprep.mubr.bf16.mxu1 %v22059_v0  ;;  %23218 = vst [vmem:[#allocation30_spill] sm:$0xff] %v22070_v25  ;;  %v19378_v46 = vld [vmem:[%s20648_s8 + $0x1d30] ss:$8 sps:$4 sm:$0xff]  }
 0x346   : > { %13412 = vmatprep.mubr.bf16.mxu0 %v23217_v20  ;;  %v20089_v20 = vld [vmem:[%s20641_s30 + $0x5b0] sm:$0xff] }
 0x347   : > { %11452 = vmatpush1.bf16.msra.mxu1 %v19363_v57  ;;  %v22078_v0 = vcombine.high %v20088_v27, %v20089_v20  ;;  %v19386_v57 = vld [vmem:[%s20648_s8 + $0x1d44] ss:$8 sps:$4 sm:$0xff]  }
 0x348   : > { %13486 = vmatpush1.bf16.msra.mxu0 %v19366_v11  ;;  %11453 = vmatprep.subr.bf16.mxu1 %v19371_v56  ;;  %v15424_v11 = vld [vmem:[%s20641_s30 + $0x380] sm:$0xff] }
 0x349   : > { %13487 = vmatprep.subr.bf16.mxu0 %v19374_v62  ;;  %23219 = vst [vmem:[#allocation31_spill] sm:$0xff] %v22078_v0  ;;  %v15428_v56 = vld [vmem:[%s20641_s30 + $0x3a0] sm:$0xff]  ;;  %v23221_v62 = vld [vmem:[#allocation33_spill] sm:$0xff] }
 0x34a   : > { %11379 = vmatmul.mubr.bf16.gmra.mrb[4].mxu1 %v22070_v25  ;;  %v19384_v25 = vld [vmem:[%s20648_s8 + $0x1d40] ss:$8 sps:$4 sm:$0xff]  }
 0x34b   : > { %13413 = vmatmul.mubr.bf16.gmra.mrb[4].mxu0 %v23220_v41  ;;  %11454 = vmatpush1.bf16.msra.mxu1 %v19369_v7  ;;  %v22090_v41 = vcombine.low %v20088_v27, %v20089_v20  ;;  %v19389_v7 = vld [vmem:[%s20648_s8 + $0xb54] ss:$8 sps:$4 sm:$0xff]   ;;  %v19395_v20 = vld [vmem:[%s20648_s8 + $0xb64] ss:$8 sps:$4 sm:$0xff]  }
 0x34c   : > { %13488 = vmatpush1.bf16.msra.mxu0 %v19372_v58  ;;  %11455 = vmatprep.subr.bf16.mxu1 %v19377_v28  ;;  %v19392_v58 = vld [vmem:[%s20648_s8 + $0x1d54] ss:$8 sps:$4 sm:$0xff]  }
 0x34d   : > { %13489 = vmatprep.subr.bf16.mxu0 %v19380_v54  ;;  %11388 = vmatprep.mubr.bf16.mxu1 %v22078_v0  ;;  %23222 = vst [vmem:[#allocation32_spill] sm:$0xff] %v22090_v41  ;;  %v20090_v28 = vld [vmem:[%s20641_s30 + $0x5d0] sm:$0xff] }
 0x34e   : > { %13422 = vmatprep.mubr.bf16.mxu0 %v23221_v62  ;;  %v20091_v54 = vld [vmem:[%s20641_s30 + $0x5f0] sm:$0xff]  ;;  %v15601_v62 = vcombine.high %v15424_v11, %v15428_v56 }
 0x34f   : > { %11456 = vmatpush1.bf16.msra.mxu1 %v19375_v5  ;;  %v22096_v0 = vcombine.high %v20090_v28, %v20091_v54  ;;  %v23224_v27 = vld [vmem:[#allocation34_spill] sm:$0xff] }
 0x350   : > { %13490 = vmatpush1.bf16.msra.mxu0 %v19378_v46  ;;  %11457 = vmatprep.subr.bf16.mxu1 %v19383_v52  ;;  %v19387_v5 = vld [vmem:[%s20648_s8 + $0xb50] ss:$8 sps:$4 sm:$0xff]   ;;  %v19398_v52 = vld [vmem:[%s20648_s8 + $0x1d64] ss:$8 sps:$4 sm:$0xff]  }
 0x351   : > { %13491 = vmatprep.subr.bf16.mxu0 %v19386_v57  ;;  %23223 = vst [vmem:[#allocation33_spill] sm:$0xff] %v22096_v0  ;;  %v19390_v46 = vld [vmem:[%s20648_s8 + $0x1d50] ss:$8 sps:$4 sm:$0xff]   ;;  %v19393_v57 = vld [vmem:[%s20648_s8 + $0xb60] ss:$8 sps:$4 sm:$0xff]  }
 0x352   : > { %11389 = vmatmul.mubr.bf16.gmra.mrb[8].mxu1 %v22090_v41  ;;  %v22107_v41 = vcombine.low %v20090_v28, %v20091_v54  ;;  %v19407_v28 = vld [vmem:[%s20648_s8 + $0xb84] ss:$8 sps:$4 sm:$0xff]  }
 0x353   : > { %13423 = vmatmul.mubr.bf16.gmra.mrb[8].mxu0 %v23224_v27  ;;  %11458 = vmatpush1.bf16.msra.mxu1 %v19381_v33  ;;  %v15600_v33 = vcombine.low %v15424_v11, %v15428_v56  ;;  %v20092_v27 = vld [vmem:[%s20641_s30 + $0x670] sm:$0xff]  ;;  %v19410_v54 = vld [vmem:[%s20648_s8 + $0x1d84] ss:$8 sps:$4 sm:$0xff]  }
 0x354   : > { %13492 = vmatpush1.bf16.msra.mxu0 %v19384_v25  ;;  %11459 = vmatprep.subr.bf16.mxu1 %v19389_v7  ;;  %23225 = vst [vmem:[#allocation34_spill] sm:$0xff] %v22107_v41  ;;  %v15658_v25 = vld [vmem:[%s20641_s30 + $0x650] sm:$0xff] }
 0x355   : > { %13493 = vmatprep.subr.bf16.mxu0 %v19392_v58  ;;  %11398 = vmatprep.mubr.bf16.mxu1 %v22096_v0  ;;  %v19401_v7 = vld [vmem:[%s20648_s8 + $0xb74] ss:$8 sps:$4 sm:$0xff]   ;;  %v19399_v11 = vld [vmem:[%s20648_s8 + $0xb70] ss:$8 sps:$4 sm:$0xff]  }
 0x356   : > { %13432 = vmatprep.mubr.bf16.mxu0 %v15601_v62  ;;  %v19404_v58 = vld [vmem:[%s20648_s8 + $0x1d74] ss:$8 sps:$4 sm:$0xff]   ;;  %v15733_v62 = vcombine.high %v15658_v25, %v20092_v27  ;;  %v19402_v56 = vld [vmem:[%s20648_s8 + $0x1d70] ss:$8 sps:$4 sm:$0xff]  }
 0x357   : > { %11460 = vmatpush1.bf16.msra.mxu1 %v19387_v5  ;;  %v23226_v5 = vld [vmem:[#allocation35_spill] sm:$0xff] }
 0x358   : > { %13494 = vmatpush1.bf16.msra.mxu0 %v19390_v46  ;;  %11461 = vmatprep.subr.bf16.mxu1 %v19395_v20  ;;  %v19405_v46 = vld [vmem:[%s20648_s8 + $0xb80] ss:$8 sps:$4 sm:$0xff]  }
 0x359   : > { %13495 = vmatprep.subr.bf16.mxu0 %v19398_v52  ;;  %v19408_v20 = vld [vmem:[%s20648_s8 + $0x1d80] ss:$8 sps:$4 sm:$0xff]   ;;  %v15732_v52 = vcombine.low %v15658_v25, %v20092_v27  ;;  %v19411_v25 = vld [vmem:[%s20648_s8 + $0xb90] ss:$8 sps:$4 sm:$0xff]  }
 0x35a   : > { %11399 = vmatmul.mubr.bf16.gmra.mrb[12].mxu1 %v22107_v41  ;;  %v19414_v27 = vld [vmem:[%s20648_s8 + $0x1d90] ss:$8 sps:$4 sm:$0xff]   ;;  %v19429_v41 = vld [vmem:[%s20648_s8 + $0xbc0] ss:$8 sps:$4 sm:$0xff]  }
 0x35b   : > { %13433 = vmatmul.mubr.bf16.gmra.mrb[12].mxu0 %v15600_v33  ;;  %11462 = vmatpush1.bf16.msra.mxu1 %v19393_v57  ;;  %v19416_v57 = vld [vmem:[%s20648_s8 + $0x1d94] ss:$8 sps:$4 sm:$0xff]  }
 0x35c   : > { %13496 = vmatpush1.bf16.msra.mxu0 %v19396_v43  ;;  %11463 = vmatprep.subr.bf16.mxu1 %v19401_v7  ;;  %v19413_v43 = vld [vmem:[%s20648_s8 + $0xb94] ss:$8 sps:$4 sm:$0xff]  }
 0x35d   : > { %13497 = vmatprep.subr.bf16.mxu0 %v19404_v58  ;;  %11408 = vmatprep.mubr.bf16.mxu1 %v15733_v62  ;;  %v20093_v33 = vld [vmem:[%s20641_s30 + $0x690] sm:$0xff]  ;;  %v23228_v62 = vld [vmem:[#allocation36_spill] sm:$0xff] }
 0x35e   : > { %13442 = vmatprep.mubr.bf16.mxu0 %v23226_v5  ;;  %v20094_v7 = vld [vmem:[%s20641_s30 + $0x6b0] sm:$0xff]  ;;  %v19420_v5 = vld [vmem:[%s20648_s8 + $0x1da0] ss:$8 sps:$4 sm:$0xff]  }
 0x35f   : > { %11464 = vmatpush1.bf16.msra.mxu1 %v19399_v11  ;;  %v22125_v58 = vcombine.high %v20093_v33, %v20094_v7  ;;  %v19419_v11 = vld [vmem:[%s20648_s8 + $0xba4] ss:$8 sps:$4 sm:$0xff]  }
 0x360   : > { %13498 = vmatpush1.bf16.msra.mxu0 %v19402_v56  ;;  %11465 = vmatprep.subr.bf16.mxu1 %v19407_v28  ;;  %v19422_v56 = vld [vmem:[%s20648_s8 + $0x1da4] ss:$8 sps:$4 sm:$0xff]  }
 0x361   : > { %13499 = vmatprep.subr.bf16.mxu0 %v19410_v54  ;;  %23227 = vst [vmem:[#allocation35_spill] sm:$0xff] %v22125_v58  ;;  %v23229_v28 = vld [vmem:[#allocation37_spill] sm:$0xff] }
 0x362   : > { %11409 = vmatmul.mubr.bf16.gmra.mrb[16].mxu1 %v15732_v52  ;;  %v19417_v54 = vld [vmem:[%s20648_s8 + $0xba0] ss:$8 sps:$4 sm:$0xff]   ;;  %v19428_v52 = vld [vmem:[%s20648_s8 + $0x1db4] ss:$8 sps:$4 sm:$0xff]  }
 0x363   : > { %13443 = vmatmul.mubr.bf16.gmra.mrb[16].mxu0 %v23228_v62  ;;  %11466 = vmatpush1.bf16.msra.mxu1 %v19405_v46  ;;  %v22136_v46 = vcombine.low %v20093_v33, %v20094_v7  ;;  %v20095_v62 = vld [vmem:[%s20641_s30 + $0x6d0] sm:$0xff]  ;;  %v19431_v7 = vld [vmem:[%s20648_s8 + $0xbc4] ss:$8 sps:$4 sm:$0xff]  }
 0x364   : > { %13500 = vmatpush1.bf16.msra.mxu0 %v19408_v20  ;;  %11467 = vmatprep.subr.bf16.mxu1 %v19413_v43  ;;  %v19425_v20 = vld [vmem:[%s20648_s8 + $0xbb4] ss:$8 sps:$4 sm:$0xff]   ;;  %v19423_v43 = vld [vmem:[%s20648_s8 + $0xbb0] ss:$8 sps:$4 sm:$0xff]  }
 0x365   : > { %13501 = vmatprep.subr.bf16.mxu0 %v19416_v57  ;;  %11418 = vmatprep.mubr.bf16.mxu1 %v22125_v58  ;;  %23230 = vst [vmem:[#allocation36_spill] sm:$0xff] %v22136_v46  ;;  %v19426_v57 = vld [vmem:[%s20648_s8 + $0x1db0] ss:$8 sps:$4 sm:$0xff]  }
 0x366   : > { %13452 = vmatprep.mubr.bf16.mxu0 %v23229_v28  ;;  %v20096_v28 = vld [vmem:[%s20641_s30 + $0x6f0] sm:$0xff] }
 0x367   : > { %11468 = vmatpush1.bf16.msra.mxu1 %v19411_v25  ;;  %v22144_v58 = vcombine.high %v20095_v62, %v20096_v28  ;;  %v23232_v33 = vld [vmem:[#allocation38_spill] sm:$0xff]  ;;  %v19434_v25 = vld [vmem:[%s20648_s8 + $0x1dc4] ss:$8 sps:$4 sm:$0xff]  }
 0x368   : > { %13502 = vmatpush1.bf16.msra.mxu0 %v19414_v27  ;;  %11469 = vmatprep.subr.bf16.mxu1 %v19419_v11  ;;  %v15464_v27 = vld [vmem:[%s20641_s30 + $0x4c0] sm:$0xff] }
 0x369   : > { %13503 = vmatprep.subr.bf16.mxu0 %v19422_v56  ;;  %23231 = vst [vmem:[#allocation37_spill] sm:$0xff] %v22144_v58  ;;  %v15468_v11 = vld [vmem:[%s20641_s30 + $0x4e0] sm:$0xff]  ;;  %v23233_v56 = vld [vmem:[#allocation39_spill] sm:$0xff] }
 0x36a   : > { %11419 = vmatmul.mubr.bf16.gmra.mrb[20].mxu1 %v22136_v46  ;;  %v19432_v46 = vld [vmem:[%s20648_s8 + $0x1dc0] ss:$8 sps:$4 sm:$0xff]  }
 0x36b   : > { %13453 = vmatmul.mubr.bf16.gmra.mrb[20].mxu0 %v23232_v33  ;;  %11470 = vmatpush1.bf16.msra.mxu1 %v19417_v54  ;;  %v22156_v33 = vcombine.low %v20095_v62, %v20096_v28  ;;  %v19437_v54 = vld [vmem:[%s20648_s8 + $0xbd4] ss:$8 sps:$4 sm:$0xff]   ;;  %v19443_v62 = vld [vmem:[%s20648_s8 + $0xbe4] ss:$8 sps:$4 sm:$0xff]  }
 0x36c   : > { %13504 = vmatpush1.bf16.msra.mxu0 %v19420_v5  ;;  %11471 = vmatprep.subr.bf16.mxu1 %v19425_v20  ;;  %v19440_v5 = vld [vmem:[%s20648_s8 + $0x1dd4] ss:$8 sps:$4 sm:$0xff]   ;;  %v19446_v28 = vld [vmem:[%s20648_s8 + $0x1de4] ss:$8 sps:$4 sm:$0xff]  }
 0x36d   : > { %13505 = vmatprep.subr.bf16.mxu0 %v19428_v52  ;;  %11428 = vmatprep.mubr.bf16.mxu1 %v22144_v58  ;;  %23234 = vst [vmem:[#allocation38_spill] sm:$0xff] %v22156_v33  ;;  %v20097_v20 = vld [vmem:[%s20641_s30 + $0x710] sm:$0xff]  ;;  %v23236_v58 = vld [vmem:[#allocation40_spill] sm:$0xff] }
 0x36e   : > { %13462 = vmatprep.mubr.bf16.mxu0 %v23233_v56  ;;  %v20098_v52 = vld [vmem:[%s20641_s30 + $0x730] sm:$0xff]  ;;  %v15609_v56 = vcombine.high %v15464_v27, %v15468_v11 }
 0x36f   : > { %11472 = vmatpush1.bf16.msra.mxu1 %v19423_v43  ;;  %v22162_v0 = vcombine.high %v20097_v20, %v20098_v52  ;;  %v19435_v43 = vld [vmem:[%s20648_s8 + $0xbd0] ss:$8 sps:$4 sm:$0xff]  }
 0x370   : > { %13506 = vmatpush1.bf16.msra.mxu0 %v19426_v57  ;;  %11473 = vmatprep.subr.bf16.mxu1 %v19431_v7  ;;  %v19438_v57 = vld [vmem:[%s20648_s8 + $0x1dd0] ss:$8 sps:$4 sm:$0xff]   ;;  %v22171_v7 = vcombine.low %v20097_v20, %v20098_v52  ;;  %v19455_v20 = vld [vmem:[%s20648_s8 + $0xc04] ss:$8 sps:$4 sm:$0xff]  }
 0x371   : > { %13507 = vmatprep.subr.bf16.mxu0 %v19434_v25  ;;  %23235 = vst [vmem:[#allocation39_spill] sm:$0xff] %v22162_v0  ;;  %v15608_v25 = vcombine.low %v15464_v27, %v15468_v11  ;;  %v19447_v27 = vld [vmem:[%s20648_s8 + $0xbf0] ss:$8 sps:$4 sm:$0xff]   ;;  %v19458_v52 = vld [vmem:[%s20648_s8 + $0x1e04] ss:$8 sps:$4 sm:$0xff]  }
 0x372   : > { %11429 = vmatmul.mubr.bf16.gmra.mrb[24].mxu1 %v22156_v33  ;;  %23237 = vst [vmem:[#allocation40_spill] sm:$0xff] %v22171_v7  ;;  %v20099_v33 = vld [vmem:[%s20641_s30 + $0x538] sm:$0xff] }
 0x373   : > { %13463 = vmatmul.mubr.bf16.gmra.mrb[24].mxu0 %v23236_v58  ;;  %11474 = vmatpush1.bf16.msra.mxu1 %v19429_v41  ;;  %v15619_v58 = vld [vmem:[%s20641_s30 + $0x518] sm:$0xff]  ;;  %v19441_v41 = vld [vmem:[%s20648_s8 + $0xbe0] ss:$8 sps:$4 sm:$0xff]  }
 0x374   : > { %13508 = vmatpush1.bf16.msra.mxu0 %v19432_v46  ;;  %11475 = vmatprep.subr.bf16.mxu1 %v19437_v54  ;;  %v19444_v46 = vld [vmem:[%s20648_s8 + $0x1de0] ss:$8 sps:$4 sm:$0xff]   ;;  %v19449_v54 = vld [vmem:[%s20648_s8 + $0xbf4] ss:$8 sps:$4 sm:$0xff]   ;;  %v15703_v32 = vcombine.high %v15619_v58, %v20099_v33  ;;  %v19450_v11 = vld [vmem:[%s20648_s8 + $0x1df0] ss:$8 sps:$4 sm:$0xff]  }
 0x375   : > { %13509 = vmatprep.subr.bf16.mxu0 %v19440_v5  ;;  %11438 = vmatprep.mubr.bf16.mxu1 %v22162_v0  ;;  %v19452_v5 = vld [vmem:[%s20648_s8 + $0x1df4] ss:$8 sps:$4 sm:$0xff]  }
 0x376   : > { %13472 = vmatprep.mubr.bf16.mxu0 %v15609_v56  ;;  %v23238_v56 = vld [vmem:[#allocation41_spill] sm:$0xff] }
 0x377   : > { %11476 = vmatpush1.bf16.msra.mxu1 %v19435_v43  ;;  %v15702_v43 = vcombine.low %v15619_v58, %v20099_v33  ;;  %v19459_v33 = vld [vmem:[%s20648_s8 + $0xc10] ss:$8 sps:$4 sm:$0xff]  }
 0x378   : > { %13510 = vmatpush1.bf16.msra.mxu0 %v19438_v57  ;;  %11477 = vmatprep.subr.bf16.mxu1 %v19443_v62  ;;  %v19453_v57 = vld [vmem:[%s20648_s8 + $0xc00] ss:$8 sps:$4 sm:$0xff]   ;;  %v19462_v58 = vld [vmem:[%s20648_s8 + $0x1e10] ss:$8 sps:$4 sm:$0xff]  }
 0x379   : > { %13511 = vmatprep.subr.bf16.mxu0 %v19446_v28  ;;  %v19456_v62 = vld [vmem:[%s20648_s8 + $0x1e00] ss:$8 sps:$4 sm:$0xff]   ;;  %v19461_v28 = vld [vmem:[%s20648_s8 + $0xc14] ss:$8 sps:$4 sm:$0xff]  }
 0x37a   : > { %11439 = vmatmul.mubr.bf16.gmra.mrb[28].mxu1 %v22171_v7  ;;  %v20106_v7 = vld [vmem:[%s20641_s30 + $0x678] sm:$0xff] }
 0x37b   : > { %13473 = vmatmul.mubr.bf16.gmra.mrb[28].mxu0 %v15608_v25  ;;  %11478 = vmatpush1.bf16.msra.mxu1 %v19441_v41  ;;  %v19464_v25 = vld [vmem:[%s20648_s8 + $0x1e14] ss:$8 sps:$4 sm:$0xff]  }
 0x37c   : > { %13512 = vmatpush1.bf16.msra.mxu0 %v19444_v46  ;;  %11479 = vmatprep.subr.bf16.mxu1 %v19449_v54  ;;  %v20100_v41 = vld [vmem:[%s20641_s30 + $0x558] sm:$0xff] }
 0x37d   : > { %13513 = vmatprep.subr.bf16.mxu0 %v19452_v5  ;;  %11481 = vmatprep.mubr.bf16.mxu1 %v15703_v32  ;;  %v20101_v46 = vld [vmem:[%s20641_s30 + $0x578] sm:$0xff]  ;;  %v23240_v32 = vld [vmem:[#allocation42_spill] sm:$0xff]  ;;  %v19467_v5 = vld [vmem:[%s20648_s8 + $0xc24] ss:$8 sps:$4 sm:$0xff]  }
 0x37e   : > { %13515 = vmatprep.mubr.bf16.mxu0 %v23238_v56  ;;  %v22191_v54 = vcombine.high %v20100_v41, %v20101_v46  ;;  %v19468_v56 = vld [vmem:[%s20648_s8 + $0x1e20] ss:$8 sps:$4 sm:$0xff]  }
 0x37f   : > { %11480 = vmatpush1.bf16.msra.mxu1 %v19447_v27  ;;  %v19470_v27 = vld [vmem:[%s20648_s8 + $0x1e24] ss:$8 sps:$4 sm:$0xff]  }
 0x380   : > { %13514 = vmatpush1.bf16.msra.mxu0 %v19450_v11  ;;  %11562 = vmatprep.subr.bf16.mxu1 %v19455_v20  ;;  %23239 = vst [vmem:[#allocation41_spill] sm:$0xff] %v22191_v54  ;;  %v23241_v11 = vld [vmem:[#allocation43_spill] sm:$0xff]  ;;  %v22200_v20 = vcombine.low %v20100_v41, %v20101_v46  ;;  %v23244_v41 = vld [vmem:[#allocation44_spill] sm:$0xff] }
 0x381   : > { %13596 = vmatprep.subr.bf16.mxu0 %v19458_v52  ;;  %v19465_v52 = vld [vmem:[%s20648_s8 + $0xc20] ss:$8 sps:$4 sm:$0xff]   ;;  %v19471_v46 = vld [vmem:[%s20648_s8 + $0xc30] ss:$8 sps:$4 sm:$0xff]  }
 0x382   : > { %11482 = vmatmul.mubr.bf16.vlgmr.msra.gmra.mrb[0].mxu1 %v15702_v43  ;;  %23242 = vst [vmem:[#allocation42_spill] sm:$0xff] %v22200_v20  ;;  %v19473_v43 = vld [vmem:[%s20648_s8 + $0xc34] ss:$8 sps:$4 sm:$0xff]  }
 0x383   : > { %13516 = vmatmul.mubr.bf16.vlgmr.msra.gmra.mrb[0].mxu0 %v23240_v32  ;;  %11563 = vmatpush1.bf16.msra.mxu1 %v19453_v57  ;;  %v19476_v57 = vld [vmem:[%s20648_s8 + $0x1e34] ss:$8 sps:$4 sm:$0xff]   ;;  %v19474_v32 = vld [vmem:[%s20648_s8 + $0x1e30] ss:$8 sps:$4 sm:$0xff]  }
 0x384   : > { %13597 = vmatpush1.bf16.msra.mxu0 %v19456_v62  ;;  %11564 = vmatprep.subr.bf16.mxu1 %v19461_v28  ;;  %v20102_v62 = vld [vmem:[%s20641_s30 + $0x598] sm:$0xff] }
 0x385   : > { %13598 = vmatprep.subr.bf16.mxu0 %v19464_v25  ;;  %11491 = vmatprep.mubr.bf16.mxu1 %v22191_v54  ;;  %v20103_v28 = vld [vmem:[%s20641_s30 + $0x5b8] sm:$0xff] }
 0x386   : > { %13525 = vmatprep.mubr.bf16.mxu0 %v23241_v11  ;;  %v22208_v25 = vcombine.high %v20102_v62, %v20103_v28  ;;  %v15425_v11 = vld [vmem:[%s20641_s30 + $0x388] sm:$0xff] }
 0x387   : > { %11565 = vmatpush1.bf16.msra.mxu1 %v19459_v33  ;;  %v19479_v33 = vld [vmem:[%s20648_s8 + $0xc44] ss:$8 sps:$4 sm:$0xff]  }
 0x388   : > { %13599 = vmatpush1.bf16.msra.mxu0 %v19462_v58  ;;  %11566 = vmatprep.subr.bf16.mxu1 %v19467_v5  ;;  %23243 = vst [vmem:[#allocation43_spill] sm:$0xff] %v22208_v25  ;;  %v19482_v58 = vld [vmem:[%s20648_s8 + $0x1e44] ss:$8 sps:$4 sm:$0xff]  }
 0x389   : > { %13600 = vmatprep.subr.bf16.mxu0 %v19470_v27  ;;  %v23245_v5 = vld [vmem:[#allocation45_spill] sm:$0xff]  ;;  %v22218_v27 = vcombine.low %v20102_v62, %v20103_v28  ;;  %v23247_v28 = vld [vmem:[#allocation46_spill] sm:$0xff] }
 0x38a   : > { %11492 = vmatmul.mubr.bf16.gmra.mrb[4].mxu1 %v22200_v20  ;;  %v20104_v20 = vld [vmem:[%s20641_s30 + $0x5d8] sm:$0xff] }
 0x38b   : > { %13526 = vmatmul.mubr.bf16.gmra.mrb[4].mxu0 %v23244_v41  ;;  %11567 = vmatpush1.bf16.msra.mxu1 %v19465_v52  ;;  %23246 = vst [vmem:[#allocation44_spill] sm:$0xff] %v22218_v27  ;;  %v15429_v52 = vld [vmem:[%s20641_s30 + $0x3a8] sm:$0xff]  ;;  %v19488_v41 = vld [vmem:[%s20648_s8 + $0x1e54] ss:$8 sps:$4 sm:$0xff]  }
 0x38c   : > { %13601 = vmatpush1.bf16.msra.mxu0 %v19468_v56  ;;  %11568 = vmatprep.subr.bf16.mxu1 %v19473_v43  ;;  %v19477_v56 = vld [vmem:[%s20648_s8 + $0xc40] ss:$8 sps:$4 sm:$0xff]   ;;  %v15603_v62 = vcombine.high %v15425_v11, %v15429_v52 }
 0x38d   : > { %13602 = vmatprep.subr.bf16.mxu0 %v19476_v57  ;;  %11501 = vmatprep.mubr.bf16.mxu1 %v22208_v25  ;;  %v19480_v43 = vld [vmem:[%s20648_s8 + $0x1e40] ss:$8 sps:$4 sm:$0xff]   ;;  %v19485_v57 = vld [vmem:[%s20648_s8 + $0xc54] ss:$8 sps:$4 sm:$0xff]  }
 0x38e   : > { %13535 = vmatprep.mubr.bf16.mxu0 %v23245_v5  ;;  %v20105_v25 = vld [vmem:[%s20641_s30 + $0x5f8] sm:$0xff] }
 0x38f   : > { %11569 = vmatpush1.bf16.msra.mxu1 %v19471_v46  ;;  %v22228_v54 = vcombine.high %v20104_v20, %v20105_v25  ;;  %v19483_v46 = vld [vmem:[%s20648_s8 + $0xc50] ss:$8 sps:$4 sm:$0xff]   ;;  %v22237_v5 = vcombine.low %v20104_v20, %v20105_v25 }
 0x390   : > { %13603 = vmatpush1.bf16.msra.mxu0 %v19474_v32  ;;  %11570 = vmatprep.subr.bf16.mxu1 %v19479_v33  ;;  %v19486_v32 = vld [vmem:[%s20648_s8 + $0x1e50] ss:$8 sps:$4 sm:$0xff]   ;;  %v19491_v33 = vld [vmem:[%s20648_s8 + $0xc64] ss:$8 sps:$4 sm:$0xff]  }
 0x391   : > { %13604 = vmatprep.subr.bf16.mxu0 %v19482_v58  ;;  %v19494_v58 = vld [vmem:[%s20648_s8 + $0x1e64] ss:$8 sps:$4 sm:$0xff]   ;;  %v19495_v20 = vld [vmem:[%s20648_s8 + $0xc70] ss:$8 sps:$4 sm:$0xff]  }
 0x392   : > { %11502 = vmatmul.mubr.bf16.gmra.mrb[8].mxu1 %v22218_v27  ;;  %v15602_v27 = vcombine.low %v15425_v11, %v15429_v52  ;;  %v19498_v25 = vld [vmem:[%s20648_s8 + $0x1e70] ss:$8 sps:$4 sm:$0xff]   ;;  %v19503_v11 = vld [vmem:[%s20648_s8 + $0xc84] ss:$8 sps:$4 sm:$0xff]  }
 0x393   : > { %13536 = vmatmul.mubr.bf16.gmra.mrb[8].mxu0 %v23247_v28  ;;  %11571 = vmatpush1.bf16.msra.mxu1 %v19477_v56  ;;  %v15659_v28 = vld [vmem:[%s20641_s30 + $0x658] sm:$0xff]  ;;  %v19489_v56 = vld [vmem:[%s20648_s8 + $0xc60] ss:$8 sps:$4 sm:$0xff]   ;;  %v19506_v52 = vld [vmem:[%s20648_s8 + $0x1e84] ss:$8 sps:$4 sm:$0xff]  }
 0x394   : > { %13605 = vmatpush1.bf16.msra.mxu0 %v19480_v43  ;;  %11572 = vmatprep.subr.bf16.mxu1 %v19485_v57  ;;  %v19492_v43 = vld [vmem:[%s20648_s8 + $0x1e60] ss:$8 sps:$4 sm:$0xff]   ;;  %v19497_v57 = vld [vmem:[%s20648_s8 + $0xc74] ss:$8 sps:$4 sm:$0xff]   ;;  %v15735_v0 = vcombine.high %v15659_v28, %v20106_v7 }
 0x395   : > { %13606 = vmatprep.subr.bf16.mxu0 %v19488_v41  ;;  %11511 = vmatprep.mubr.bf16.mxu1 %v22228_v54  ;;  %v19500_v41 = vld [vmem:[%s20648_s8 + $0x1e74] ss:$8 sps:$4 sm:$0xff]  }
 0x396   : > { %13545 = vmatprep.mubr.bf16.mxu0 %v15603_v62  ;;  %v23248_v62 = vld [vmem:[#allocation47_spill] sm:$0xff] }
 0x397   : > { %11573 = vmatpush1.bf16.msra.mxu1 %v19483_v46  ;;  %v15734_v46 = vcombine.low %v15659_v28, %v20106_v7  ;;  %v19507_v7 = vld [vmem:[%s20648_s8 + $0xc90] ss:$8 sps:$4 sm:$0xff]  }
 0x398   : > { %13607 = vmatpush1.bf16.msra.mxu0 %v19486_v32  ;;  %11574 = vmatprep.subr.bf16.mxu1 %v19491_v33  ;;  %v19504_v32 = vld [vmem:[%s20648_s8 + $0x1e80] ss:$8 sps:$4 sm:$0xff]   ;;  %v19509_v33 = vld [vmem:[%s20648_s8 + $0xc94] ss:$8 sps:$4 sm:$0xff]   ;;  %v19510_v28 = vld [vmem:[%s20648_s8 + $0x1e90] ss:$8 sps:$4 sm:$0xff]  }
 0x399   : > { %13608 = vmatprep.subr.bf16.mxu0 %v19494_v58  ;;  %v19512_v58 = vld [vmem:[%s20648_s8 + $0x1e94] ss:$8 sps:$4 sm:$0xff]  }
 0x39a   : > { %11512 = vmatmul.mubr.bf16.gmra.mrb[12].mxu1 %v22237_v5 }
 0x39b   : > { %13546 = vmatmul.mubr.bf16.gmra.mrb[12].mxu0 %v15602_v27  ;;  %11575 = vmatpush1.bf16.msra.mxu1 %v19489_v56  ;;  %v19501_v27 = vld [vmem:[%s20648_s8 + $0xc80] ss:$8 sps:$4 sm:$0xff]   ;;  %v20107_v56 = vld [vmem:[%s20641_s30 + $0x698] sm:$0xff] }
 0x39c   : > { %13609 = vmatpush1.bf16.msra.mxu0 %v19492_v43  ;;  %11576 = vmatprep.subr.bf16.mxu1 %v19497_v57  ;;  %v20108_v43 = vld [vmem:[%s20641_s30 + $0x6b8] sm:$0xff] }
 0x39d   : > { %13610 = vmatprep.subr.bf16.mxu0 %v19500_v41  ;;  %11521 = vmatprep.mubr.bf16.mxu1 %v15735_v0  ;;  %v22257_v57 = vcombine.high %v20107_v56, %v20108_v43  ;;  %v23249_v0 = vld [vmem:[#allocation48_spill] sm:$0xff] }
 0x39e   : > { %13555 = vmatprep.mubr.bf16.mxu0 %v23248_v62  ;;  %v19515_v41 = vld [vmem:[%s20648_s8 + $0xca4] ss:$8 sps:$4 sm:$0xff]   ;;  %v19521_v62 = vld [vmem:[%s20648_s8 + $0xcb4] ss:$8 sps:$4 sm:$0xff]  }
 0x39f   : > { %11577 = vmatpush1.bf16.msra.mxu1 %v19495_v20  ;;  %v19518_v20 = vld [vmem:[%s20648_s8 + $0x1ea4] ss:$8 sps:$4 sm:$0xff]  }
 0x3a0   : > { %13611 = vmatpush1.bf16.msra.mxu0 %v19498_v25  ;;  %11578 = vmatprep.subr.bf16.mxu1 %v19503_v11  ;;  %v22266_v25 = vcombine.low %v20107_v56, %v20108_v43  ;;  %v19513_v11 = vld [vmem:[%s20648_s8 + $0xca0] ss:$8 sps:$4 sm:$0xff]   ;;  %v19527_v56 = vld [vmem:[%s20648_s8 + $0xcc4] ss:$8 sps:$4 sm:$0xff]  }
 0x3a1   : > { %13612 = vmatprep.subr.bf16.mxu0 %v19506_v52  ;;  %v19516_v52 = vld [vmem:[%s20648_s8 + $0x1ea0] ss:$8 sps:$4 sm:$0xff]   ;;  %v19530_v43 = vld [vmem:[%s20648_s8 + $0x1ec4] ss:$8 sps:$4 sm:$0xff]  }
 0x3a2   : > { %11522 = vmatmul.mubr.bf16.gmra.mrb[16].mxu1 %v15734_v46  ;;  %v19524_v46 = vld [vmem:[%s20648_s8 + $0x1eb4] ss:$8 sps:$4 sm:$0xff]  }
 0x3a3   : > { %13556 = vmatmul.mubr.bf16.gmra.mrb[16].mxu0 %v23249_v0  ;;  %11579 = vmatpush1.bf16.msra.mxu1 %v19501_v27  ;;  %v20109_v27 = vld [vmem:[%s20641_s30 + $0x6d8] sm:$0xff] }
 0x3a4   : > { %13613 = vmatpush1.bf16.msra.mxu0 %v19504_v32  ;;  %11580 = vmatprep.subr.bf16.mxu1 %v19509_v33  ;;  %v20110_v32 = vld [vmem:[%s20641_s30 + $0x6f8] sm:$0xff] }
 0x3a5   : > { %13614 = vmatprep.subr.bf16.mxu0 %v19512_v58  ;;  %11531 = vmatprep.mubr.bf16.mxu1 %v22257_v57  ;;  %v22274_v33 = vcombine.high %v20109_v27, %v20110_v32  ;;  %v19522_v58 = vld [vmem:[%s20648_s8 + $0x1eb0] ss:$8 sps:$4 sm:$0xff]   ;;  %v22284_v0 = vcombine.low %v20109_v27, %v20110_v32 }
 0x3a6   : > { %13565 = vmatprep.mubr.bf16.mxu0 %v21486_v23  ;;  %v19519_v23 = vld [vmem:[%s20648_s8 + $0xcb0] ss:$8 sps:$4 sm:$0xff]  }
 0x3a7   : > { %11581 = vmatpush1.bf16.msra.mxu1 %v19507_v7  ;;  %23250 = vst [vmem:[#allocation45_spill] sm:$0xff] %v22274_v33  ;;  %23251 = vst [vmem:[#allocation46_spill] sm:$0xff] %v22284_v0  ;;  %v15469_v7 = vld [vmem:[%s20641_s30 + $0x4e8] sm:$0xff]  ;;  %v19531_v27 = vld [vmem:[%s20648_s8 + $0xcd0] ss:$8 sps:$4 sm:$0xff]  }
 0x3a8   : > { %13615 = vmatpush1.bf16.msra.mxu0 %v19510_v28  ;;  %11582 = vmatprep.subr.bf16.mxu1 %v19515_v41  ;;  %v19525_v28 = vld [vmem:[%s20648_s8 + $0xcc0] ss:$8 sps:$4 sm:$0xff]   ;;  %v19534_v32 = vld [vmem:[%s20648_s8 + $0x1ed0] ss:$8 sps:$4 sm:$0xff]  }
 0x3a9   : > { %13616 = vmatprep.subr.bf16.mxu0 %v19518_v20  ;;  %v19528_v41 = vld [vmem:[%s20648_s8 + $0x1ec0] ss:$8 sps:$4 sm:$0xff]   ;;  %v19533_v20 = vld [vmem:[%s20648_s8 + $0xcd4] ss:$8 sps:$4 sm:$0xff]  }
 0x3aa   : > { %11532 = vmatmul.mubr.bf16.gmra.mrb[20].mxu1 %v22266_v25 }
 0x3ab   : > { %13566 = vmatmul.mubr.bf16.gmra.mrb[20].mxu0 %v21496_v13  ;;  %11583 = vmatpush1.bf16.msra.mxu1 %v19513_v11  ;;  %v15465_v13 = vld [vmem:[%s20641_s30 + $0x4c8] sm:$0xff]  ;;  %v19536_v11 = vld [vmem:[%s20648_s8 + $0x1ed4] ss:$8 sps:$4 sm:$0xff]  }
 0x3ac   : > { %13617 = vmatpush1.bf16.msra.mxu0 %v19516_v52  ;;  %11584 = vmatprep.subr.bf16.mxu1 %v19521_v62  ;;  %v20111_v52 = vld [vmem:[%s20641_s30 + $0x718] sm:$0xff] }
 0x3ad   : > { %13618 = vmatprep.subr.bf16.mxu0 %v19524_v46  ;;  %11541 = vmatprep.mubr.bf16.mxu1 %v22274_v33  ;;  %v20112_v62 = vld [vmem:[%s20641_s30 + $0x738] sm:$0xff] }
 0x3ae   : > { %13575 = vmatprep.mubr.bf16.mxu0 %v21503_v47  ;;  %v22294_v46 = vcombine.high %v20111_v52, %v20112_v62  ;;  %v15611_v47 = vcombine.high %v15465_v13, %v15469_v7 }
 0x3af   : > { %11585 = vmatpush1.bf16.msra.mxu1 %v19519_v23  ;;  %v19539_v23 = vld [vmem:[%s20648_s8 + $0xce4] ss:$8 sps:$4 sm:$0xff]  }
 0x3b0   : > { %13619 = vmatpush1.bf16.msra.mxu0 %v19522_v58  ;;  %11586 = vmatprep.subr.bf16.mxu1 %v19527_v56  ;;  %v19542_v58 = vld [vmem:[%s20648_s8 + $0x1ee4] ss:$8 sps:$4 sm:$0xff]   ;;  %v22303_v56 = vcombine.low %v20111_v52, %v20112_v62 }
 0x3b1   : > { %13620 = vmatprep.subr.bf16.mxu0 %v19530_v43  ;;  %v15610_v43 = vcombine.low %v15465_v13, %v15469_v7  ;;  %v19543_v13 = vld [vmem:[%s20648_s8 + $0xcf0] ss:$8 sps:$4 sm:$0xff]   ;;  %v19551_v52 = vld [vmem:[%s20648_s8 + $0xd04] ss:$8 sps:$4 sm:$0xff]  }
 0x3b2   : > { %11542 = vmatmul.mubr.bf16.gmra.mrb[24].mxu1 %v22284_v0  ;;  %v20114_v0 = vld [vmem:[%s20641_s30 + $0x40] sm:$0xff]  ;;  %v19546_v7 = vld [vmem:[%s20648_s8 + $0x1ef0] ss:$8 sps:$4 sm:$0xff]  }
 0x3b3   : > { %13576 = vmatmul.mubr.bf16.gmra.mrb[24].mxu0 %v21511_v24  ;;  %11587 = vmatpush1.bf16.msra.mxu1 %v19525_v28  ;;  %v19537_v24 = vld [vmem:[%s20648_s8 + $0xce0] ss:$8 sps:$4 sm:$0xff]   ;;  %v19554_v62 = vld [vmem:[%s20648_s8 + $0x1f04] ss:$8 sps:$4 sm:$0xff]  }
 0x3b4   : > { %13621 = vmatpush1.bf16.msra.mxu0 %v19528_v41  ;;  %11588 = vmatprep.subr.bf16.mxu1 %v19533_v20  ;;  %v19540_v28 = vld [vmem:[%s20648_s8 + $0x1ee0] ss:$8 sps:$4 sm:$0xff]   ;;  %v19545_v41 = vld [vmem:[%s20648_s8 + $0xcf4] ss:$8 sps:$4 sm:$0xff]  }
 0x3b5   : > { %13622 = vmatprep.subr.bf16.mxu0 %v19536_v11  ;;  %11551 = vmatprep.mubr.bf16.mxu1 %v22294_v46  ;;  %v19548_v20 = vld [vmem:[%s20648_s8 + $0x1ef4] ss:$8 sps:$4 sm:$0xff]   ;;  %v20113_v11 = vld [vmem:[%s20641_s30 + $0x20] sm:$0xff] }
 0x3b6   : > { %13585 = vmatprep.mubr.bf16.mxu0 %v15611_v47  ;;  %v15313_v33 = vcombine.high %v20113_v11, %v20114_v0  ;;  %v15312_v47 = vcombine.low %v20113_v11, %v20114_v0  ;;  %v19563_v0 = vld [vmem:[%s20648_s8 + $0xd24] ss:$8 sps:$4 sm:$0xff]   ;;  %v19564_v11 = vld [vmem:[%s20648_s8 + $0x1f20] ss:$8 sps:$4 sm:$0xff]  }
 0x3b7   : > { %11589 = vmatpush1.bf16.msra.mxu1 %v19531_v27  ;;  %v19549_v27 = vld [vmem:[%s20648_s8 + $0xd00] ss:$8 sps:$4 sm:$0xff]  }
 0x3b8   : > { %13623 = vmatpush1.bf16.msra.mxu0 %v19534_v32  ;;  %11590 = vmatprep.subr.bf16.mxu1 %v19539_v23  ;;  %v19552_v32 = vld [vmem:[%s20648_s8 + $0x1f00] ss:$8 sps:$4 sm:$0xff]   ;;  %v19557_v23 = vld [vmem:[%s20648_s8 + $0xd14] ss:$8 sps:$4 sm:$0xff]  }
 0x3b9   : > { %13624 = vmatprep.subr.bf16.mxu0 %v19542_v58  ;;  %v19560_v58 = vld [vmem:[%s20648_s8 + $0x1f14] ss:$8 sps:$4 sm:$0xff]  }
 0x3ba   : > { %11552 = vmatmul.mubr.bf16.gmra.mrb[28].mxu1 %v22303_v56 }
 0x3bb   : > { %13586 = vmatmul.mubr.bf16.gmra.mrb[28].mxu0 %v15610_v43  ;;  %11591 = vmatpush1.bf16.msra.mxu1 %v19537_v24  ;;  %v20115_v43 = vld [vmem:[%s20641_s30 + $0x60] sm:$0xff] }
 0x3bc   : > { %13625 = vmatpush1.bf16.msra.mxu0 %v19540_v28  ;;  %11592 = vmatprep.subr.bf16.mxu1 %v19545_v41  ;;  %v20116_v24 = vld [vmem:[%s20641_s30 + $0x80] sm:$0xff] }
 0x3bd   : > { %13626 = vmatprep.subr.bf16.mxu0 %v19548_v20  ;;  %11594 = vmatprep.mubr.bf16.mxu1 %v15313_v33  ;;  %v15321_v28 = vcombine.high %v20115_v43, %v20116_v24  ;;  %v19558_v33 = vld [vmem:[%s20648_s8 + $0x1f10] ss:$8 sps:$4 sm:$0xff]   ;;  %v19566_v41 = vld [vmem:[%s20648_s8 + $0x1f24] ss:$8 sps:$4 sm:$0xff]   ;;  %v15320_v20 = vcombine.low %v20115_v43, %v20116_v24  ;;  %v19576_v24 = vld [vmem:[%s20648_s8 + $0x1f40] ss:$8 sps:$4 sm:$0xff]  }
 0x3be   : > { %13628 = vmatprep.mubr.bf16.mxu0 %v21531_v9  ;;  %v19555_v9 = vld [vmem:[%s20648_s8 + $0xd10] ss:$8 sps:$4 sm:$0xff]  }
 0x3bf   : > { %11593 = vmatpush1.bf16.msra.mxu1 %v19543_v13  ;;  %v19569_v13 = vld [vmem:[%s20648_s8 + $0xd34] ss:$8 sps:$4 sm:$0xff]  }
 0x3c0   : > { %13627 = vmatpush1.bf16.msra.mxu0 %v19546_v7  ;;  %11675 = vmatprep.subr.bf16.mxu1 %v19551_v52  ;;  %v19572_v7 = vld [vmem:[%s20648_s8 + $0x1f34] ss:$8 sps:$4 sm:$0xff]   ;;  %v20117_v52 = vld [vmem:[%s20641_s30 + $0xa0] sm:$0xff] }
 0x3c1   : > { %13709 = vmatprep.subr.bf16.mxu0 %v19554_v62  ;;  %v20118_v62 = vld [vmem:[%s20641_s30 + $0xc0] sm:$0xff]  ;;  %v15430_v43 = vld [vmem:[%s20641_s30 + $0x3b0] sm:$0xff] }
 0x3c2   : > { %11595 = vmatmul.mubr.bf16.vlgmr.msra.gmra.mrb[0].mxu1 %v15312_v47  ;;  %v15329_v47 = vcombine.high %v20117_v52, %v20118_v62 }
 0x3c3   : > { %13629 = vmatmul.mubr.bf16.vlgmr.msra.gmra.mrb[0].mxu0 %v21540_v63  ;;  %11676 = vmatpush1.bf16.msra.mxu1 %v19549_v27  ;;  %v19561_v63 = vld [vmem:[%s20648_s8 + $0xd20] ss:$8 sps:$4 sm:$0xff]   ;;  %v19570_v27 = vld [vmem:[%s20648_s8 + $0x1f30] ss:$8 sps:$4 sm:$0xff]  }
 0x3c4   : > { %13710 = vmatpush1.bf16.msra.mxu0 %v19552_v32  ;;  %11677 = vmatprep.subr.bf16.mxu1 %v19557_v23  ;;  %v19575_v32 = vld [vmem:[%s20648_s8 + $0xd44] ss:$8 sps:$4 sm:$0xff]  }
 0x3c5   : > { %13711 = vmatprep.subr.bf16.mxu0 %v19560_v58  ;;  %11604 = vmatprep.mubr.bf16.mxu1 %v15321_v28  ;;  %v19578_v23 = vld [vmem:[%s20648_s8 + $0x1f44] ss:$8 sps:$4 sm:$0xff]   ;;  %v15328_v58 = vcombine.low %v20117_v52, %v20118_v62  ;;  %v19581_v28 = vld [vmem:[%s20648_s8 + $0xd54] ss:$8 sps:$4 sm:$0xff]  }
 0x3c6   : > { %13638 = vmatprep.mubr.bf16.mxu0 %v21548_v2  ;;  %v19567_v2 = vld [vmem:[%s20648_s8 + $0xd30] ss:$8 sps:$4 sm:$0xff]  }
 0x3c7   : > { %11678 = vmatpush1.bf16.msra.mxu1 %v19555_v9  ;;  %v19584_v9 = vld [vmem:[%s20648_s8 + $0x1f54] ss:$8 sps:$4 sm:$0xff]  }
 0x3c8   : > { %13712 = vmatpush1.bf16.msra.mxu0 %v19558_v33  ;;  %11679 = vmatprep.subr.bf16.mxu1 %v19563_v0  ;;  %v20119_v33 = vld [vmem:[%s20641_s30 + $0xe0] sm:$0xff] }
 0x3c9   : > { %13713 = vmatprep.subr.bf16.mxu0 %v19566_v41  ;;  %v20120_v0 = vld [vmem:[%s20641_s30 + $0x100] sm:$0xff] }
 0x3ca   : > { %11605 = vmatmul.mubr.bf16.gmra.mrb[4].mxu1 %v15320_v20  ;;  %v15337_v41 = vcombine.high %v20119_v33, %v20120_v0  ;;  %v20121_v20 = vld [vmem:[%s20641_s30 + $0x390] sm:$0xff]  ;;  %v15336_v52 = vcombine.low %v20119_v33, %v20120_v0  ;;  %v19597_v33 = vld [vmem:[%s20648_s8 + $0xd80] ss:$8 sps:$4 sm:$0xff]  }
 0x3cb   : > { %13639 = vmatmul.mubr.bf16.gmra.mrb[4].mxu0 %v21562_v19  ;;  %11680 = vmatpush1.bf16.msra.mxu1 %v19561_v63  ;;  %v19573_v19 = vld [vmem:[%s20648_s8 + $0xd40] ss:$8 sps:$4 sm:$0xff]   ;;  %v15605_v63 = vcombine.high %v20121_v20, %v15430_v43  ;;  %v15604_v62 = vcombine.low %v20121_v20, %v15430_v43  ;;  %v19591_v43 = vld [vmem:[%s20648_s8 + $0xd70] ss:$8 sps:$4 sm:$0xff]   ;;  %v19608_v20 = vld [vmem:[%s20648_s8 + $0x1f94] ss:$8 sps:$4 sm:$0xff]  }
 0x3cc   : > { %13714 = vmatpush1.bf16.msra.mxu0 %v19564_v11  ;;  %11681 = vmatprep.subr.bf16.mxu1 %v19569_v13  ;;  %v19582_v11 = vld [vmem:[%s20648_s8 + $0x1f50] ss:$8 sps:$4 sm:$0xff]   ;;  %v19587_v13 = vld [vmem:[%s20648_s8 + $0xd64] ss:$8 sps:$4 sm:$0xff]   ;;  %v19600_v0 = vld [vmem:[%s20648_s8 + $0x1f80] ss:$8 sps:$4 sm:$0xff]  }
 0x3cd   : > { %13715 = vmatprep.subr.bf16.mxu0 %v19572_v7  ;;  %11614 = vmatprep.mubr.bf16.mxu1 %v15329_v47  ;;  %v19590_v7 = vld [vmem:[%s20648_s8 + $0x1f64] ss:$8 sps:$4 sm:$0xff]   ;;  %v19588_v47 = vld [vmem:[%s20648_s8 + $0x1f60] ss:$8 sps:$4 sm:$0xff]  }
 0x3ce   : > { %13648 = vmatprep.mubr.bf16.mxu0 %v21568_v51  ;;  %v19579_v51 = vld [vmem:[%s20648_s8 + $0xd50] ss:$8 sps:$4 sm:$0xff]  }
 0x3cf   : > { %11682 = vmatpush1.bf16.msra.mxu1 %v19567_v2  ;;  %v19593_v2 = vld [vmem:[%s20648_s8 + $0xd74] ss:$8 sps:$4 sm:$0xff]  }
 0x3d0   : > { %13716 = vmatpush1.bf16.msra.mxu0 %v19570_v27  ;;  %11683 = vmatprep.subr.bf16.mxu1 %v19575_v32  ;;  %v19596_v27 = vld [vmem:[%s20648_s8 + $0x1f74] ss:$8 sps:$4 sm:$0xff]   ;;  %v20122_v32 = vld [vmem:[%s20641_s30 + $0x160] sm:$0xff] }
 0x3d1   : > { %13717 = vmatprep.subr.bf16.mxu0 %v19578_v23  ;;  %v20123_v23 = vld [vmem:[%s20641_s30 + $0x180] sm:$0xff] }
 0x3d2   : > { %11615 = vmatmul.mubr.bf16.gmra.mrb[8].mxu1 %v15328_v58  ;;  %v15345_v58 = vcombine.high %v20122_v32, %v20123_v23 }
 0x3d3   : > { %13649 = vmatmul.mubr.bf16.gmra.mrb[8].mxu0 %v21578_v34  ;;  %11684 = vmatpush1.bf16.msra.mxu1 %v19573_v19  ;;  %v19585_v34 = vld [vmem:[%s20648_s8 + $0xd60] ss:$8 sps:$4 sm:$0xff]   ;;  %v19594_v19 = vld [vmem:[%s20648_s8 + $0x1f70] ss:$8 sps:$4 sm:$0xff]  }
 0x3d4   : > { %13718 = vmatpush1.bf16.msra.mxu0 %v19576_v24  ;;  %11685 = vmatprep.subr.bf16.mxu1 %v19581_v28  ;;  %v19599_v24 = vld [vmem:[%s20648_s8 + $0xd84] ss:$8 sps:$4 sm:$0xff]  }
 0x3d5   : > { %13719 = vmatprep.subr.bf16.mxu0 %v19584_v9  ;;  %11624 = vmatprep.mubr.bf16.mxu1 %v15337_v41  ;;  %v19602_v28 = vld [vmem:[%s20648_s8 + $0x1f84] ss:$8 sps:$4 sm:$0xff]   ;;  %v15344_v9 = vcombine.low %v20122_v32, %v20123_v23  ;;  %v19605_v41 = vld [vmem:[%s20648_s8 + $0xd94] ss:$8 sps:$4 sm:$0xff]  }
 0x3d6   : > { %13658 = vmatprep.mubr.bf16.mxu0 %v15605_v63  ;;  %v20124_v63 = vld [vmem:[%s20641_s30 + $0x1a0] sm:$0xff] }
 0x3d7   : > { %11686 = vmatpush1.bf16.msra.mxu1 %v19579_v51  ;;  %v20125_v51 = vld [vmem:[%s20641_s30 + $0x1c0] sm:$0xff] }
 0x3d8   : > { %13720 = vmatpush1.bf16.msra.mxu0 %v19582_v11  ;;  %11687 = vmatprep.subr.bf16.mxu1 %v19587_v13  ;;  %v15353_v11 = vcombine.high %v20124_v63, %v20125_v51  ;;  %v19606_v13 = vld [vmem:[%s20648_s8 + $0x1f90] ss:$8 sps:$4 sm:$0xff]   ;;  %v20127_v32 = vld [vmem:[%s20641_s30 + $0x200] sm:$0xff] }
 0x3d9   : > { %13721 = vmatprep.subr.bf16.mxu0 %v19590_v7  ;;  %v19611_v7 = vld [vmem:[%s20648_s8 + $0xda4] ss:$8 sps:$4 sm:$0xff]  }
 0x3da   : > { %11625 = vmatmul.mubr.bf16.gmra.mrb[12].mxu1 %v15336_v52  ;;  %v19614_v52 = vld [vmem:[%s20648_s8 + $0x1fa4] ss:$8 sps:$4 sm:$0xff]  }
 0x3db   : > { %13659 = vmatmul.mubr.bf16.gmra.mrb[12].mxu0 %v15604_v62  ;;  %11688 = vmatpush1.bf16.msra.mxu1 %v19585_v34  ;;  %v15352_v62 = vcombine.low %v20124_v63, %v20125_v51  ;;  %v19612_v34 = vld [vmem:[%s20648_s8 + $0x1fa0] ss:$8 sps:$4 sm:$0xff]   ;;  %v20130_v51 = vld [vmem:[%s20641_s30 + $0x4d0] sm:$0xff] }
 0x3dc   : > { %13722 = vmatpush1.bf16.msra.mxu0 %v19588_v47  ;;  %11689 = vmatprep.subr.bf16.mxu1 %v19593_v2  ;;  %v19617_v47 = vld [vmem:[%s20648_s8 + $0xdb4] ss:$8 sps:$4 sm:$0xff]  }
 0x3dd   : > { %13723 = vmatprep.subr.bf16.mxu0 %v19596_v27  ;;  %11634 = vmatprep.mubr.bf16.mxu1 %v15345_v58  ;;  %v19620_v2 = vld [vmem:[%s20648_s8 + $0x1fb4] ss:$8 sps:$4 sm:$0xff]   ;;  %v20126_v27 = vld [vmem:[%s20641_s30 + $0x1e0] sm:$0xff]  ;;  %v19618_v58 = vld [vmem:[%s20648_s8 + $0x1fb0] ss:$8 sps:$4 sm:$0xff]  }
 0x3de   : > { %13668 = vmatprep.mubr.bf16.mxu0 %v21597_v60  ;;  %v19603_v60 = vld [vmem:[%s20648_s8 + $0xd90] ss:$8 sps:$4 sm:$0xff]   ;;  %v15361_v23 = vcombine.high %v20126_v27, %v20127_v32 }
 0x3df   : > { %11690 = vmatpush1.bf16.msra.mxu1 %v19591_v43  ;;  %v19623_v43 = vld [vmem:[%s20648_s8 + $0xdc4] ss:$8 sps:$4 sm:$0xff]  }
 0x3e0   : > { %13724 = vmatpush1.bf16.msra.mxu0 %v19594_v19  ;;  %11691 = vmatprep.subr.bf16.mxu1 %v19599_v24  ;;  %v19626_v19 = vld [vmem:[%s20648_s8 + $0x1fc4] ss:$8 sps:$4 sm:$0xff]   ;;  %v15360_v24 = vcombine.low %v20126_v27, %v20127_v32 }
 0x3e1   : > { %13725 = vmatprep.subr.bf16.mxu0 %v19602_v28  ;;  %v15470_v28 = vld [vmem:[%s20641_s30 + $0x4f0] sm:$0xff]  ;;  %v20132_v27 = vld [vmem:[%s20641_s30 + $0x48] sm:$0xff] }
 0x3e2   : > { %11635 = vmatmul.mubr.bf16.gmra.mrb[16].mxu1 %v15344_v9  ;;  %v19624_v9 = vld [vmem:[%s20648_s8 + $0x1fc0] ss:$8 sps:$4 sm:$0xff]  }
 0x3e3   : > { %13669 = vmatmul.mubr.bf16.gmra.mrb[16].mxu0 %v21608_v1  ;;  %11692 = vmatpush1.bf16.msra.mxu1 %v19597_v33  ;;  %v19609_v1 = vld [vmem:[%s20648_s8 + $0xda0] ss:$8 sps:$4 sm:$0xff]   ;;  %v19629_v33 = vld [vmem:[%s20648_s8 + $0xdd4] ss:$8 sps:$4 sm:$0xff]  }
 0x3e4   : > { %13726 = vmatpush1.bf16.msra.mxu0 %v19600_v0  ;;  %11693 = vmatprep.subr.bf16.mxu1 %v19605_v41  ;;  %v19632_v0 = vld [vmem:[%s20648_s8 + $0x1fd4] ss:$8 sps:$4 sm:$0xff]   ;;  %v20128_v41 = vld [vmem:[%s20641_s30 + $0x220] sm:$0xff] }
 0x3e5   : > { %13727 = vmatprep.subr.bf16.mxu0 %v19608_v20  ;;  %11644 = vmatprep.mubr.bf16.mxu1 %v15353_v11  ;;  %v20129_v20 = vld [vmem:[%s20641_s30 + $0x240] sm:$0xff]  ;;  %v15613_v11 = vcombine.high %v20130_v51, %v15470_v28 }
 0x3e6   : > { %13678 = vmatprep.mubr.bf16.mxu0 %v21616_v4  ;;  %v19615_v4 = vld [vmem:[%s20648_s8 + $0xdb0] ss:$8 sps:$4 sm:$0xff]   ;;  %v15369_v63 = vcombine.high %v20128_v41, %v20129_v20 }
 0x3e7   : > { %11694 = vmatpush1.bf16.msra.mxu1 %v19603_v60  ;;  %v19630_v60 = vld [vmem:[%s20648_s8 + $0x1fd0] ss:$8 sps:$4 sm:$0xff]  }
 0x3e8   : > { %13728 = vmatpush1.bf16.msra.mxu0 %v19606_v13  ;;  %11695 = vmatprep.subr.bf16.mxu1 %v19611_v7  ;;  %v19635_v13 = vld [vmem:[%s20648_s8 + $0xde4] ss:$8 sps:$4 sm:$0xff]  }
 0x3e9   : > { %13729 = vmatprep.subr.bf16.mxu0 %v19614_v52  ;;  %v19638_v7 = vld [vmem:[%s20648_s8 + $0x1fe4] ss:$8 sps:$4 sm:$0xff]   ;;  %v15368_v52 = vcombine.low %v20128_v41, %v20129_v20  ;;  %v19654_v20 = vld [vmem:[%s20648_s8 + $0x2010] ss:$8 sps:$4 sm:$0xff]  }
 0x3ea   : > { %11645 = vmatmul.mubr.bf16.gmra.mrb[20].mxu1 %v15352_v62  ;;  %v15612_v62 = vcombine.low %v20130_v51, %v15470_v28  ;;  %v19648_v28 = vld [vmem:[%s20648_s8 + $0x2000] ss:$8 sps:$4 sm:$0xff]   ;;  %v19662_v51 = vld [vmem:[%s20648_s8 + $0x2024] ss:$8 sps:$4 sm:$0xff]  }
 0x3eb   : > { %13679 = vmatmul.mubr.bf16.gmra.mrb[20].mxu0 %v21628_v49  ;;  %11696 = vmatpush1.bf16.msra.mxu1 %v19609_v1  ;;  %v19621_v49 = vld [vmem:[%s20648_s8 + $0xdc0] ss:$8 sps:$4 sm:$0xff]  }
 0x3ec   : > { %13730 = vmatpush1.bf16.msra.mxu0 %v19612_v34  ;;  %11697 = vmatprep.subr.bf16.mxu1 %v19617_v47  ;;  %v19636_v1 = vld [vmem:[%s20648_s8 + $0x1fe0] ss:$8 sps:$4 sm:$0xff]   ;;  %v19641_v34 = vld [vmem:[%s20648_s8 + $0xdf4] ss:$8 sps:$4 sm:$0xff]  }
 0x3ed   : > { %13731 = vmatprep.subr.bf16.mxu0 %v19620_v2  ;;  %11654 = vmatprep.mubr.bf16.mxu1 %v15361_v23  ;;  %v19644_v47 = vld [vmem:[%s20648_s8 + $0x1ff4] ss:$8 sps:$4 sm:$0xff]   ;;  %v20131_v2 = vld [vmem:[%s20641_s30 + $0x28] sm:$0xff]  ;;  %v19639_v23 = vld [vmem:[%s20648_s8 + $0xdf0] ss:$8 sps:$4 sm:$0xff]  }
 0x3ee   : > { %13688 = vmatprep.mubr.bf16.mxu0 %v21634_v30  ;;  %v19627_v30 = vld [vmem:[%s20648_s8 + $0xdd0] ss:$8 sps:$4 sm:$0xff]   ;;  %v15315_v32 = vcombine.high %v20131_v2, %v20132_v27 }
 0x3ef   : > { %11698 = vmatpush1.bf16.msra.mxu1 %v19615_v4  ;;  %v19642_v4 = vld [vmem:[%s20648_s8 + $0x1ff0] ss:$8 sps:$4 sm:$0xff]  }
 0x3f0   : > { %13732 = vmatpush1.bf16.msra.mxu0 %v19618_v58  ;;  %11699 = vmatprep.subr.bf16.mxu1 %v19623_v43  ;;  %v19647_v58 = vld [vmem:[%s20648_s8 + $0xe04] ss:$8 sps:$4 sm:$0xff]  }
 0x3f1   : > { %13733 = vmatprep.subr.bf16.mxu0 %v19626_v19  ;;  %v19650_v43 = vld [vmem:[%s20648_s8 + $0x2004] ss:$8 sps:$4 sm:$0xff]   ;;  %v15314_v19 = vcombine.low %v20131_v2, %v20132_v27  ;;  %v15431_v2 = vld [vmem:[%s20641_s30 + $0x3b8] sm:$0xff]  ;;  %v19672_v27 = vld [vmem:[%s20648_s8 + $0x2040] ss:$8 sps:$4 sm:$0xff]  }
 0x3f2   : > { %11655 = vmatmul.mubr.bf16.gmra.mrb[24].mxu1 %v15360_v24  ;;  %v19645_v24 = vld [vmem:[%s20648_s8 + $0xe00] ss:$8 sps:$4 sm:$0xff]  }
 0x3f3   : > { %13689 = vmatmul.mubr.bf16.gmra.mrb[24].mxu0 %v21644_v38  ;;  %11700 = vmatpush1.bf16.msra.mxu1 %v19621_v49  ;;  %v19633_v38 = vld [vmem:[%s20648_s8 + $0xde0] ss:$8 sps:$4 sm:$0xff]   ;;  %v19653_v49 = vld [vmem:[%s20648_s8 + $0xe14] ss:$8 sps:$4 sm:$0xff]  }
 0x3f4   : > { %13734 = vmatpush1.bf16.msra.mxu0 %v19624_v9  ;;  %11701 = vmatprep.subr.bf16.mxu1 %v19629_v33  ;;  %v19656_v9 = vld [vmem:[%s20648_s8 + $0x2014] ss:$8 sps:$4 sm:$0xff]   ;;  %v20133_v33 = vld [vmem:[%s20641_s30 + $0x68] sm:$0xff] }
 0x3f5   : > { %13735 = vmatprep.subr.bf16.mxu0 %v19632_v0  ;;  %11664 = vmatprep.mubr.bf16.mxu1 %v15369_v63  ;;  %v20134_v0 = vld [vmem:[%s20641_s30 + $0x88] sm:$0xff] }
 0x3f6   : > { %13698 = vmatprep.mubr.bf16.mxu0 %v15613_v11  ;;  %v15323_v41 = vcombine.high %v20133_v33, %v20134_v0  ;;  %v19659_v63 = vld [vmem:[%s20648_s8 + $0xe24] ss:$8 sps:$4 sm:$0xff]   ;;  %v15322_v11 = vcombine.low %v20133_v33, %v20134_v0 }
 0x3f7   : > { %11702 = vmatpush1.bf16.msra.mxu1 %v19627_v30  ;;  %v19660_v30 = vld [vmem:[%s20648_s8 + $0x2020] ss:$8 sps:$4 sm:$0xff]  }
 0x3f8   : > { %13736 = vmatpush1.bf16.msra.mxu0 %v19630_v60  ;;  %11703 = vmatprep.subr.bf16.mxu1 %v19635_v13  ;;  %v19665_v60 = vld [vmem:[%s20648_s8 + $0xe34] ss:$8 sps:$4 sm:$0xff]  }
 0x3f9   : > { %13737 = vmatprep.subr.bf16.mxu0 %v19638_v7  ;;  %v19668_v13 = vld [vmem:[%s20648_s8 + $0x2034] ss:$8 sps:$4 sm:$0xff]   ;;  %v20135_v7 = vld [vmem:[%s20641_s30 + $0xa8] sm:$0xff] }
 0x3fa   : > { %11665 = vmatmul.mubr.bf16.gmra.mrb[28].mxu1 %v15368_v52  ;;  %v20136_v52 = vld [vmem:[%s20641_s30 + $0xc8] sm:$0xff] }
 0x3fb   : > { %13699 = vmatmul.mubr.bf16.gmra.mrb[28].mxu0 %v15612_v62  ;;  %11704 = vmatpush1.bf16.msra.mxu1 %v19633_v38  ;;  %v15331_v62 = vcombine.high %v20135_v7, %v20136_v52  ;;  %v19666_v38 = vld [vmem:[%s20648_s8 + $0x2030] ss:$8 sps:$4 sm:$0xff]  }
 0x3fc   : > { %13738 = vmatpush1.bf16.msra.mxu0 %v19636_v1  ;;  %11705 = vmatprep.subr.bf16.mxu1 %v19641_v34  ;;  %v19671_v1 = vld [vmem:[%s20648_s8 + $0xe44] ss:$8 sps:$4 sm:$0xff]  }
 0x3fd   : > { %13739 = vmatprep.subr.bf16.mxu0 %v19644_v47  ;;  %11707 = vmatprep.mubr.bf16.mxu1 %v15315_v32  ;;  %v19674_v34 = vld [vmem:[%s20648_s8 + $0x2044] ss:$8 sps:$4 sm:$0xff]   ;;  %v15330_v47 = vcombine.low %v20135_v7, %v20136_v52  ;;  %v19677_v32 = vld [vmem:[%s20648_s8 + $0xe54] ss:$8 sps:$4 sm:$0xff]   ;;  %v19693_v52 = vld [vmem:[%s20648_s8 + $0xe80] ss:$8 sps:$4 sm:$0xff]  }
 0x3fe   : > { %13741 = vmatprep.mubr.bf16.mxu0 %v21663_v3  ;;  %v19651_v3 = vld [vmem:[%s20648_s8 + $0xe10] ss:$8 sps:$4 sm:$0xff]  }
 0x3ff   : > { %11706 = vmatpush1.bf16.msra.mxu1 %v19639_v23  ;;  %v19680_v23 = vld [vmem:[%s20648_s8 + $0x2054] ss:$8 sps:$4 sm:$0xff]  }
 0x400   : > { %13740 = vmatpush1.bf16.msra.mxu0 %v19642_v4  ;;  %11788 = vmatprep.subr.bf16.mxu1 %v19647_v58  ;;  %v20137_v4 = vld [vmem:[%s20641_s30 + $0xe8] sm:$0xff] }
 0x401   : > { %13822 = vmatprep.subr.bf16.mxu0 %v19650_v43  ;;  %v20138_v58 = vld [vmem:[%s20641_s30 + $0x108] sm:$0xff] }
 0x402   : > { %11708 = vmatmul.mubr.bf16.vlgmr.msra.gmra.mrb[0].mxu1 %v15314_v19  ;;  %v15339_v43 = vcombine.high %v20137_v4, %v20138_v58  ;;  %v20139_v19 = vld [vmem:[%s20641_s30 + $0x398] sm:$0xff]  ;;  %v15338_v33 = vcombine.low %v20137_v4, %v20138_v58 }
 0x403   : > { %13742 = vmatmul.mubr.bf16.vlgmr.msra.gmra.mrb[0].mxu0 %v21674_v50  ;;  %11789 = vmatpush1.bf16.msra.mxu1 %v19645_v24  ;;  %v19657_v50 = vld [vmem:[%s20648_s8 + $0xe20] ss:$8 sps:$4 sm:$0xff]   ;;  %v15607_v24 = vcombine.high %v20139_v19, %v15431_v2  ;;  %v15606_v0 = vcombine.low %v20139_v19, %v15431_v2  ;;  %v19702_v2 = vld [vmem:[%s20648_s8 + $0x2090] ss:$8 sps:$4 sm:$0xff]   ;;  %v19713_v4 = vld [vmem:[%s20648_s8 + $0xeb4] ss:$8 sps:$4 sm:$0xff]  }
 0x404   : > { %13823 = vmatpush1.bf16.msra.mxu0 %v19648_v28  ;;  %11790 = vmatprep.subr.bf16.mxu1 %v19653_v49  ;;  %v19678_v28 = vld [vmem:[%s20648_s8 + $0x2050] ss:$8 sps:$4 sm:$0xff]   ;;  %v19683_v49 = vld [vmem:[%s20648_s8 + $0xe64] ss:$8 sps:$4 sm:$0xff]   ;;  %v19716_v58 = vld [vmem:[%s20648_s8 + $0x20b4] ss:$8 sps:$4 sm:$0xff]  }
 0x405   : > { %13824 = vmatprep.subr.bf16.mxu0 %v19656_v9  ;;  %11717 = vmatprep.mubr.bf16.mxu1 %v15323_v41  ;;  %v19686_v9 = vld [vmem:[%s20648_s8 + $0x2064] ss:$8 sps:$4 sm:$0xff]   ;;  %v19684_v41 = vld [vmem:[%s20648_s8 + $0x2060] ss:$8 sps:$4 sm:$0xff]  }
 0x406   : > { %13751 = vmatprep.mubr.bf16.mxu0 %v21682_v18  ;;  %v19663_v18 = vld [vmem:[%s20648_s8 + $0xe30] ss:$8 sps:$4 sm:$0xff]   ;;  %v20145_v19 = vld [vmem:[%s20641_s30 + $0x208] sm:$0xff] }
 0x407   : > { %11791 = vmatpush1.bf16.msra.mxu1 %v19651_v3  ;;  %v19689_v3 = vld [vmem:[%s20648_s8 + $0xe74] ss:$8 sps:$4 sm:$0xff]  }
 0x408   : > { %13825 = vmatpush1.bf16.msra.mxu0 %v19654_v20  ;;  %11792 = vmatprep.subr.bf16.mxu1 %v19659_v63  ;;  %v19692_v20 = vld [vmem:[%s20648_s8 + $0x2074] ss:$8 sps:$4 sm:$0xff]   ;;  %v20140_v63 = vld [vmem:[%s20641_s30 + $0x168] sm:$0xff] }
 0x409   : > { %13826 = vmatprep.subr.bf16.mxu0 %v19662_v51  ;;  %v20141_v51 = vld [vmem:[%s20641_s30 + $0x188] sm:$0xff] }
 0x40a   : > { %11718 = vmatmul.mubr.bf16.gmra.mrb[4].mxu1 %v15322_v11  ;;  %v15347_v11 = vcombine.high %v20140_v63, %v20141_v51  ;;  %v15346_v7 = vcombine.low %v20140_v63, %v20141_v51  ;;  %v20148_v51 = vld [vmem:[%s20641_s30 + $0x4d8] sm:$0xff] }
 0x40b   : > { %13752 = vmatmul.mubr.bf16.gmra.mrb[4].mxu0 %v21694_v61  ;;  %11793 = vmatpush1.bf16.msra.mxu1 %v19657_v50  ;;  %v19669_v61 = vld [vmem:[%s20648_s8 + $0xe40] ss:$8 sps:$4 sm:$0xff]   ;;  %v19687_v50 = vld [vmem:[%s20648_s8 + $0xe70] ss:$8 sps:$4 sm:$0xff]  }
 0x40c   : > { %13827 = vmatpush1.bf16.msra.mxu0 %v19660_v30  ;;  %11794 = vmatprep.subr.bf16.mxu1 %v19665_v60  ;;  %v19690_v30 = vld [vmem:[%s20648_s8 + $0x2070] ss:$8 sps:$4 sm:$0xff]   ;;  %v19695_v60 = vld [vmem:[%s20648_s8 + $0xe84] ss:$8 sps:$4 sm:$0xff]  }
 0x40d   : > { %13828 = vmatprep.subr.bf16.mxu0 %v19668_v13  ;;  %11727 = vmatprep.mubr.bf16.mxu1 %v15331_v62  ;;  %v19698_v13 = vld [vmem:[%s20648_s8 + $0x2084] ss:$8 sps:$4 sm:$0xff]   ;;  %v19696_v62 = vld [vmem:[%s20648_s8 + $0x2080] ss:$8 sps:$4 sm:$0xff]  }
 0x40e   : > { %13761 = vmatprep.mubr.bf16.mxu0 %v21700_v39  ;;  %v19675_v39 = vld [vmem:[%s20648_s8 + $0xe50] ss:$8 sps:$4 sm:$0xff]  }
 0x40f   : > { %11795 = vmatpush1.bf16.msra.mxu1 %v19663_v18  ;;  %v19701_v18 = vld [vmem:[%s20648_s8 + $0xe94] ss:$8 sps:$4 sm:$0xff]  }
 0x410   : > { %13829 = vmatpush1.bf16.msra.mxu0 %v19666_v38  ;;  %11796 = vmatprep.subr.bf16.mxu1 %v19671_v1  ;;  %v19704_v38 = vld [vmem:[%s20648_s8 + $0x2094] ss:$8 sps:$4 sm:$0xff]   ;;  %v20142_v1 = vld [vmem:[%s20641_s30 + $0x1a8] sm:$0xff] }
 0x411   : > { %13830 = vmatprep.subr.bf16.mxu0 %v19674_v34  ;;  %v20143_v34 = vld [vmem:[%s20641_s30 + $0x1c8] sm:$0xff] }
 0x412   : > { %11728 = vmatmul.mubr.bf16.gmra.mrb[8].mxu1 %v15330_v47  ;;  %v15355_v47 = vcombine.high %v20142_v1, %v20143_v34 }
 0x413   : > { %13762 = vmatmul.mubr.bf16.gmra.mrb[8].mxu0 %v21710_v48  ;;  %11797 = vmatpush1.bf16.msra.mxu1 %v19669_v61  ;;  %v19681_v48 = vld [vmem:[%s20648_s8 + $0xe60] ss:$8 sps:$4 sm:$0xff]   ;;  %v19707_v61 = vld [vmem:[%s20648_s8 + $0xea4] ss:$8 sps:$4 sm:$0xff]  }
 0x414   : > { %13831 = vmatpush1.bf16.msra.mxu0 %v19672_v27  ;;  %11798 = vmatprep.subr.bf16.mxu1 %v19677_v32  ;;  %v19710_v27 = vld [vmem:[%s20648_s8 + $0x20a4] ss:$8 sps:$4 sm:$0xff]   ;;  %v15354_v32 = vcombine.low %v20142_v1, %v20143_v34  ;;  %v20150_v1 = vld [vmem:[%s20641_s30 + $0x50] sm:$0xff] }
 0x415   : > { %13832 = vmatprep.subr.bf16.mxu0 %v19680_v23  ;;  %11737 = vmatprep.mubr.bf16.mxu1 %v15339_v43  ;;  %v19708_v23 = vld [vmem:[%s20648_s8 + $0x20a0] ss:$8 sps:$4 sm:$0xff]  }
 0x416   : > { %13771 = vmatprep.mubr.bf16.mxu0 %v15607_v24  ;;  %v20144_v43 = vld [vmem:[%s20641_s30 + $0x1e8] sm:$0xff] }
 0x417   : > { %11799 = vmatpush1.bf16.msra.mxu1 %v19675_v39  ;;  %v15363_v24 = vcombine.high %v20144_v43, %v20145_v19  ;;  %v19714_v39 = vld [vmem:[%s20648_s8 + $0x20b0] ss:$8 sps:$4 sm:$0xff]  }
 0x418   : > { %13833 = vmatpush1.bf16.msra.mxu0 %v19678_v28  ;;  %11800 = vmatprep.subr.bf16.mxu1 %v19683_v49  ;;  %v19719_v28 = vld [vmem:[%s20648_s8 + $0xec4] ss:$8 sps:$4 sm:$0xff]  }
 0x419   : > { %13834 = vmatprep.subr.bf16.mxu0 %v19686_v9  ;;  %v19722_v49 = vld [vmem:[%s20648_s8 + $0x20c4] ss:$8 sps:$4 sm:$0xff]   ;;  %v15362_v9 = vcombine.low %v20144_v43, %v20145_v19  ;;  %v20152_v43 = vld [vmem:[%s20641_s30 + $0x90] sm:$0xff] }
 0x41a   : > { %11738 = vmatmul.mubr.bf16.gmra.mrb[12].mxu1 %v15338_v33  ;;  %v15471_v33 = vld [vmem:[%s20641_s30 + $0x4f8] sm:$0xff] }
 0x41b   : > { %13772 = vmatmul.mubr.bf16.gmra.mrb[12].mxu0 %v15606_v0  ;;  %11801 = vmatpush1.bf16.msra.mxu1 %v19681_v48  ;;  %v19720_v0 = vld [vmem:[%s20648_s8 + $0x20c0] ss:$8 sps:$4 sm:$0xff]   ;;  %v19725_v48 = vld [vmem:[%s20648_s8 + $0xed4] ss:$8 sps:$4 sm:$0xff]  }
 0x41c   : > { %13835 = vmatpush1.bf16.msra.mxu0 %v19684_v41  ;;  %11802 = vmatprep.subr.bf16.mxu1 %v19689_v3  ;;  %v19728_v41 = vld [vmem:[%s20648_s8 + $0x20d4] ss:$8 sps:$4 sm:$0xff]   ;;  %v20146_v3 = vld [vmem:[%s20641_s30 + $0x228] sm:$0xff] }
 0x41d   : > { %13836 = vmatprep.subr.bf16.mxu0 %v19692_v20  ;;  %11747 = vmatprep.mubr.bf16.mxu1 %v15347_v11  ;;  %v20147_v20 = vld [vmem:[%s20641_s30 + $0x248] sm:$0xff]  ;;  %v15615_v11 = vcombine.high %v20148_v51, %v15471_v33 }
 0x41e   : > { %13781 = vmatprep.mubr.bf16.mxu0 %v21729_v15  ;;  %v19699_v15 = vld [vmem:[%s20648_s8 + $0xe90] ss:$8 sps:$4 sm:$0xff]   ;;  %v15371_v63 = vcombine.high %v20146_v3, %v20147_v20 }
 0x41f   : > { %11803 = vmatpush1.bf16.msra.mxu1 %v19687_v50  ;;  %v19726_v50 = vld [vmem:[%s20648_s8 + $0x20d0] ss:$8 sps:$4 sm:$0xff]  }
 0x420   : > { %13837 = vmatpush1.bf16.msra.mxu0 %v19690_v30  ;;  %11804 = vmatprep.subr.bf16.mxu1 %v19695_v60  ;;  %v19731_v30 = vld [vmem:[%s20648_s8 + $0xee4] ss:$8 sps:$4 sm:$0xff]  }
 0x421   : > { %13838 = vmatprep.subr.bf16.mxu0 %v19698_v13  ;;  %v19734_v60 = vld [vmem:[%s20648_s8 + $0x20e4] ss:$8 sps:$4 sm:$0xff]   ;;  %v15370_v13 = vcombine.low %v20146_v3, %v20147_v20 }
 0x422   : > { %11748 = vmatmul.mubr.bf16.gmra.mrb[16].mxu1 %v15346_v7  ;;  %v15614_v7 = vcombine.low %v20148_v51, %v15471_v33  ;;  %v19764_v33 = vld [vmem:[%s20648_s8 + $0x2134] ss:$8 sps:$4 sm:$0xff]   ;;  %v19767_v3 = vld [vmem:[%s20648_s8 + $0xf44] ss:$8 sps:$4 sm:$0xff]  }
 0x423   : > { %13782 = vmatmul.mubr.bf16.gmra.mrb[16].mxu0 %v21740_v16  ;;  %11805 = vmatpush1.bf16.msra.mxu1 %v19693_v52  ;;  %v19705_v16 = vld [vmem:[%s20648_s8 + $0xea0] ss:$8 sps:$4 sm:$0xff]   ;;  %v19770_v20 = vld [vmem:[%s20648_s8 + $0x2144] ss:$8 sps:$4 sm:$0xff]  }
 0x424   : > { %13839 = vmatpush1.bf16.msra.mxu0 %v19696_v62  ;;  %11806 = vmatprep.subr.bf16.mxu1 %v19701_v18  ;;  %v19732_v52 = vld [vmem:[%s20648_s8 + $0x20e0] ss:$8 sps:$4 sm:$0xff]   ;;  %v19737_v62 = vld [vmem:[%s20648_s8 + $0xef4] ss:$8 sps:$4 sm:$0xff]  }
 0x425   : > { %13840 = vmatprep.subr.bf16.mxu0 %v19704_v38  ;;  %11757 = vmatprep.mubr.bf16.mxu1 %v15355_v47  ;;  %v19740_v18 = vld [vmem:[%s20648_s8 + $0x20f4] ss:$8 sps:$4 sm:$0xff]   ;;  %v19735_v47 = vld [vmem:[%s20648_s8 + $0xef0] ss:$8 sps:$4 sm:$0xff]   ;;  %v15652_v51 = vld [vmem:[%s20641_s30 + $0x620] sm:$0xff] }
 0x426   : > { %13791 = vmatprep.mubr.bf16.mxu0 %v21748_v44  ;;  %v19711_v44 = vld [vmem:[%s20648_s8 + $0xeb0] ss:$8 sps:$4 sm:$0xff]  }
 0x427   : > { %11807 = vmatpush1.bf16.msra.mxu1 %v19699_v15  ;;  %v20149_v38 = vld [vmem:[%s20641_s30 + $0x30] sm:$0xff] }
 0x428   : > { %13841 = vmatpush1.bf16.msra.mxu0 %v19702_v2  ;;  %11808 = vmatprep.subr.bf16.mxu1 %v19707_v61  ;;  %v15317_v34 = vcombine.high %v20149_v38, %v20150_v1  ;;  %v19738_v15 = vld [vmem:[%s20648_s8 + $0x20f0] ss:$8 sps:$4 sm:$0xff]   ;;  %v19743_v2 = vld [vmem:[%s20648_s8 + $0xf04] ss:$8 sps:$4 sm:$0xff]  }
 0x429   : > { %13842 = vmatprep.subr.bf16.mxu0 %v19710_v27  ;;  %v19746_v61 = vld [vmem:[%s20648_s8 + $0x2104] ss:$8 sps:$4 sm:$0xff]   ;;  %v15316_v27 = vcombine.low %v20149_v38, %v20150_v1 }
 0x42a   : > { %11758 = vmatmul.mubr.bf16.gmra.mrb[20].mxu1 %v15354_v32  ;;  %v19741_v32 = vld [vmem:[%s20648_s8 + $0xf00] ss:$8 sps:$4 sm:$0xff]  }
 0x42b   : > { %13792 = vmatmul.mubr.bf16.gmra.mrb[20].mxu0 %v21760_v14  ;;  %11809 = vmatpush1.bf16.msra.mxu1 %v19705_v16  ;;  %v19717_v14 = vld [vmem:[%s20648_s8 + $0xec0] ss:$8 sps:$4 sm:$0xff]  }
 0x42c   : > { %13843 = vmatpush1.bf16.msra.mxu0 %v19708_v23  ;;  %11810 = vmatprep.subr.bf16.mxu1 %v19713_v4  ;;  %v19744_v16 = vld [vmem:[%s20648_s8 + $0x2100] ss:$8 sps:$4 sm:$0xff]   ;;  %v19749_v23 = vld [vmem:[%s20648_s8 + $0xf14] ss:$8 sps:$4 sm:$0xff]  }
 0x42d   : > { %13844 = vmatprep.subr.bf16.mxu0 %v19716_v58  ;;  %11767 = vmatprep.mubr.bf16.mxu1 %v15363_v24  ;;  %v19752_v4 = vld [vmem:[%s20648_s8 + $0x2114] ss:$8 sps:$4 sm:$0xff]   ;;  %v19750_v24 = vld [vmem:[%s20648_s8 + $0x2110] ss:$8 sps:$4 sm:$0xff]  }
 0x42e   : > { %13801 = vmatprep.mubr.bf16.mxu0 %v21766_v59  ;;  %v19723_v59 = vld [vmem:[%s20648_s8 + $0xed0] ss:$8 sps:$4 sm:$0xff]  }
 0x42f   : > { %11811 = vmatpush1.bf16.msra.mxu1 %v19711_v44  ;;  %v20151_v58 = vld [vmem:[%s20641_s30 + $0x70] sm:$0xff]  ;;  %v19755_v44 = vld [vmem:[%s20648_s8 + $0xf24] ss:$8 sps:$4 sm:$0xff]  }
 0x430   : > { %13845 = vmatpush1.bf16.msra.mxu0 %v19714_v39  ;;  %11812 = vmatprep.subr.bf16.mxu1 %v19719_v28  ;;  %v15325_v19 = vcombine.high %v20151_v58, %v20152_v43  ;;  %v19758_v39 = vld [vmem:[%s20648_s8 + $0x2124] ss:$8 sps:$4 sm:$0xff]   ;;  %v15324_v28 = vcombine.low %v20151_v58, %v20152_v43  ;;  %v19789_v43 = vld [vmem:[%s20648_s8 + $0xf80] ss:$8 sps:$4 sm:$0xff]  }
 0x431   : > { %13846 = vmatprep.subr.bf16.mxu0 %v19722_v49  ;;  %v19756_v49 = vld [vmem:[%s20648_s8 + $0x2120] ss:$8 sps:$4 sm:$0xff]  }
 0x432   : > { %11768 = vmatmul.mubr.bf16.gmra.mrb[24].mxu1 %v15362_v9  ;;  %v19761_v9 = vld [vmem:[%s20648_s8 + $0xf34] ss:$8 sps:$4 sm:$0xff]  }
 0x433   : > { %13802 = vmatmul.mubr.bf16.gmra.mrb[24].mxu0 %v21776_v6  ;;  %11813 = vmatpush1.bf16.msra.mxu1 %v19717_v14  ;;  %v19729_v6 = vld [vmem:[%s20648_s8 + $0xee0] ss:$8 sps:$4 sm:$0xff]   ;;  %v20153_v14 = vld [vmem:[%s20641_s30 + $0xb0] sm:$0xff] }
 0x434   : > { %13847 = vmatpush1.bf16.msra.mxu0 %v19720_v0  ;;  %11814 = vmatprep.subr.bf16.mxu1 %v19725_v48  ;;  %v20154_v0 = vld [vmem:[%s20641_s30 + $0xd0] sm:$0xff] }
 0x435   : > { %13848 = vmatprep.subr.bf16.mxu0 %v19728_v41  ;;  %11777 = vmatprep.mubr.bf16.mxu1 %v15371_v63  ;;  %v15333_v48 = vcombine.high %v20153_v14, %v20154_v0  ;;  %v19762_v41 = vld [vmem:[%s20648_s8 + $0x2130] ss:$8 sps:$4 sm:$0xff]   ;;  %v15332_v63 = vcombine.low %v20153_v14, %v20154_v0  ;;  %v19804_v14 = vld [vmem:[%s20648_s8 + $0x21a0] ss:$8 sps:$4 sm:$0xff]   ;;  %v19809_v0 = vld [vmem:[%s20648_s8 + $0xfb4] ss:$8 sps:$4 sm:$0xff]  }
 0x436   : > { %13811 = vmatprep.mubr.bf16.mxu0 %v15615_v11  ;;  %v19768_v11 = vld [vmem:[%s20648_s8 + $0x2140] ss:$8 sps:$4 sm:$0xff]  }
 0x437   : > { %11815 = vmatpush1.bf16.msra.mxu1 %v19723_v59  ;;  %v19773_v59 = vld [vmem:[%s20648_s8 + $0xf54] ss:$8 sps:$4 sm:$0xff]  }
 0x438   : > { %13849 = vmatpush1.bf16.msra.mxu0 %v19726_v50  ;;  %11816 = vmatprep.subr.bf16.mxu1 %v19731_v30  ;;  %v19776_v50 = vld [vmem:[%s20648_s8 + $0x2154] ss:$8 sps:$4 sm:$0xff]  }
 0x439   : > { %13850 = vmatprep.subr.bf16.mxu0 %v19734_v60  ;;  %v20155_v30 = vld [vmem:[%s20641_s30 + $0xf0] sm:$0xff] }
 0x43a   : > { %11778 = vmatmul.mubr.bf16.gmra.mrb[28].mxu1 %v15370_v13  ;;  %v20156_v60 = vld [vmem:[%s20641_s30 + $0x110] sm:$0xff] }
 0x43b   : > { %13812 = vmatmul.mubr.bf16.gmra.mrb[28].mxu0 %v15614_v7  ;;  %11817 = vmatpush1.bf16.msra.mxu1 %v19729_v6  ;;  %v15341_v13 = vcombine.high %v20155_v30, %v20156_v60  ;;  %v20157_v7 = vld [vmem:[%s20641_s30 + $0x600] sm:$0xff]  ;;  %v15340_v38 = vcombine.low %v20155_v30, %v20156_v60  ;;  %v19824_v30 = vld [vmem:[%s20648_s8 + $0x21d4] ss:$8 sps:$4 sm:$0xff]  }
 0x43c   : > { %13851 = vmatpush1.bf16.msra.mxu0 %v19732_v52  ;;  %11818 = vmatprep.subr.bf16.mxu1 %v19737_v62  ;;  %v15825_v6 = vcombine.high %v20157_v7, %v15652_v51  ;;  %v19774_v52 = vld [vmem:[%s20648_s8 + $0x2150] ss:$8 sps:$4 sm:$0xff]   ;;  %v19779_v62 = vld [vmem:[%s20648_s8 + $0xf64] ss:$8 sps:$4 sm:$0xff]   ;;  %v15824_v1 = vcombine.low %v20157_v7, %v15652_v51 }
 0x43d   : > { %13852 = vmatprep.subr.bf16.mxu0 %v19740_v18  ;;  %11820 = vmatprep.mubr.bf16.mxu1 %v15317_v34  ;;  %v19782_v18 = vld [vmem:[%s20648_s8 + $0x2164] ss:$8 sps:$4 sm:$0xff]   ;;  %v19780_v34 = vld [vmem:[%s20648_s8 + $0x2160] ss:$8 sps:$4 sm:$0xff]   ;;  %v20164_v60 = vld [vmem:[%s20641_s30 + $0x230] sm:$0xff] }
 0x43e   : > { %13854 = vmatprep.mubr.bf16.mxu0 %v21795_v40  ;;  %v19747_v40 = vld [vmem:[%s20648_s8 + $0xf10] ss:$8 sps:$4 sm:$0xff]   ;;  %v19818_v51 = vld [vmem:[%s20648_s8 + $0x21c4] ss:$8 sps:$4 sm:$0xff]  }
 0x43f   : > { %11819 = vmatpush1.bf16.msra.mxu1 %v19735_v47  ;;  %v19785_v47 = vld [vmem:[%s20648_s8 + $0xf74] ss:$8 sps:$4 sm:$0xff]  }
 0x440   : > { %13853 = vmatpush1.bf16.msra.mxu0 %v19738_v15  ;;  %11901 = vmatprep.subr.bf16.mxu1 %v19743_v2  ;;  %v19788_v15 = vld [vmem:[%s20648_s8 + $0x2174] ss:$8 sps:$4 sm:$0xff]  }
 0x441   : > { %13935 = vmatprep.subr.bf16.mxu0 %v19746_v61  ;;  %v20158_v2 = vld [vmem:[%s20641_s30 + $0x170] sm:$0xff] }
 0x442   : > { %11821 = vmatmul.mubr.bf16.vlgmr.msra.gmra.mrb[0].mxu1 %v15316_v27  ;;  %v20159_v61 = vld [vmem:[%s20641_s30 + $0x190] sm:$0xff] }
 0x443   : > { %13855 = vmatmul.mubr.bf16.vlgmr.msra.gmra.mrb[0].mxu0 %v21806_v37  ;;  %11902 = vmatpush1.bf16.msra.mxu1 %v19741_v32  ;;  %v19753_v37 = vld [vmem:[%s20648_s8 + $0xf20] ss:$8 sps:$4 sm:$0xff]   ;;  %v15349_v27 = vcombine.high %v20158_v2, %v20159_v61  ;;  %v19783_v32 = vld [vmem:[%s20648_s8 + $0xf70] ss:$8 sps:$4 sm:$0xff]   ;;  %v15348_v58 = vcombine.low %v20158_v2, %v20159_v61 }
 0x444   : > { %13936 = vmatpush1.bf16.msra.mxu0 %v19744_v16  ;;  %11903 = vmatprep.subr.bf16.mxu1 %v19749_v23  ;;  %v19786_v16 = vld [vmem:[%s20648_s8 + $0x2170] ss:$8 sps:$4 sm:$0xff]   ;;  %v19791_v23 = vld [vmem:[%s20648_s8 + $0xf84] ss:$8 sps:$4 sm:$0xff]  }
 0x445   : > { %13937 = vmatprep.subr.bf16.mxu0 %v19752_v4  ;;  %11830 = vmatprep.mubr.bf16.mxu1 %v15325_v19  ;;  %v19794_v4 = vld [vmem:[%s20648_s8 + $0x2184] ss:$8 sps:$4 sm:$0xff]   ;;  %v19792_v19 = vld [vmem:[%s20648_s8 + $0x2180] ss:$8 sps:$4 sm:$0xff]   ;;  %v20168_v2 = vld [vmem:[%s20641_s30 + $0x58] sm:$0xff] }
 0x446   : > { %13864 = vmatprep.mubr.bf16.mxu0 %v21814_v29  ;;  %v19759_v29 = vld [vmem:[%s20648_s8 + $0xf30] ss:$8 sps:$4 sm:$0xff]  }
 0x447   : > { %11904 = vmatpush1.bf16.msra.mxu1 %v19747_v40  ;;  %v19797_v40 = vld [vmem:[%s20648_s8 + $0xf94] ss:$8 sps:$4 sm:$0xff]  }
 0x448   : > { %13938 = vmatpush1.bf16.msra.mxu0 %v19750_v24  ;;  %11905 = vmatprep.subr.bf16.mxu1 %v19755_v44  ;;  %v19800_v24 = vld [vmem:[%s20648_s8 + $0x2194] ss:$8 sps:$4 sm:$0xff]  }
 0x449   : > { %13939 = vmatprep.subr.bf16.mxu0 %v19758_v39  ;;  %v20160_v44 = vld [vmem:[%s20641_s30 + $0x1b0] sm:$0xff] }
 0x44a   : > { %11831 = vmatmul.mubr.bf16.gmra.mrb[4].mxu1 %v15324_v28  ;;  %v20161_v39 = vld [vmem:[%s20641_s30 + $0x1d0] sm:$0xff] }
 0x44b   : > { %13865 = vmatmul.mubr.bf16.gmra.mrb[4].mxu0 %v21826_v53  ;;  %11906 = vmatpush1.bf16.msra.mxu1 %v19753_v37  ;;  %v19765_v53 = vld [vmem:[%s20648_s8 + $0xf40] ss:$8 sps:$4 sm:$0xff]   ;;  %v15357_v28 = vcombine.high %v20160_v44, %v20161_v39  ;;  %v19798_v37 = vld [vmem:[%s20648_s8 + $0x2190] ss:$8 sps:$4 sm:$0xff]  }
 0x44c   : > { %13940 = vmatpush1.bf16.msra.mxu0 %v19756_v49  ;;  %11907 = vmatprep.subr.bf16.mxu1 %v19761_v9  ;;  %v19803_v49 = vld [vmem:[%s20648_s8 + $0xfa4] ss:$8 sps:$4 sm:$0xff]  }
 0x44d   : > { %13941 = vmatprep.subr.bf16.mxu0 %v19764_v33  ;;  %11840 = vmatprep.mubr.bf16.mxu1 %v15333_v48  ;;  %v19806_v9 = vld [vmem:[%s20648_s8 + $0x21a4] ss:$8 sps:$4 sm:$0xff]   ;;  %v15356_v33 = vcombine.low %v20160_v44, %v20161_v39  ;;  %v19812_v48 = vld [vmem:[%s20648_s8 + $0x21b4] ss:$8 sps:$4 sm:$0xff]  }
 0x44e   : > { %13874 = vmatprep.mubr.bf16.mxu0 %v21832_v26  ;;  %v19771_v26 = vld [vmem:[%s20648_s8 + $0xf50] ss:$8 sps:$4 sm:$0xff]  }
 0x44f   : > { %11908 = vmatpush1.bf16.msra.mxu1 %v19759_v29  ;;  %v20162_v29 = vld [vmem:[%s20641_s30 + $0x1f0] sm:$0xff]  ;;  %v20170_v44 = vld [vmem:[%s20641_s30 + $0x98] sm:$0xff] }
 0x450   : > { %13942 = vmatpush1.bf16.msra.mxu0 %v19762_v41  ;;  %11909 = vmatprep.subr.bf16.mxu1 %v19767_v3  ;;  %v20163_v41 = vld [vmem:[%s20641_s30 + $0x210] sm:$0xff] }
 0x451   : > { %13943 = vmatprep.subr.bf16.mxu0 %v19770_v20  ;;  %v15365_v3 = vcombine.high %v20162_v29, %v20163_v41  ;;  %v19810_v20 = vld [vmem:[%s20648_s8 + $0x21b0] ss:$8 sps:$4 sm:$0xff]  }
 0x452   : > { %11841 = vmatmul.mubr.bf16.gmra.mrb[8].mxu1 %v15332_v63  ;;  %v19815_v63 = vld [vmem:[%s20648_s8 + $0xfc4] ss:$8 sps:$4 sm:$0xff]  }
 0x453   : > { %13875 = vmatmul.mubr.bf16.gmra.mrb[8].mxu0 %v21842_v36  ;;  %11910 = vmatpush1.bf16.msra.mxu1 %v19765_v53  ;;  %v19777_v36 = vld [vmem:[%s20648_s8 + $0xf60] ss:$8 sps:$4 sm:$0xff]   ;;  %v15364_v53 = vcombine.low %v20162_v29, %v20163_v41  ;;  %v19858_v29 = vld [vmem:[%s20648_s8 + $0x2230] ss:$8 sps:$4 sm:$0xff]   ;;  %v19863_v41 = vld [vmem:[%s20648_s8 + $0x1044] ss:$8 sps:$4 sm:$0xff]  }
 0x454   : > { %13944 = vmatpush1.bf16.msra.mxu0 %v19768_v11  ;;  %11911 = vmatprep.subr.bf16.mxu1 %v19773_v59  ;;  %v15692_v11 = vld [vmem:[%s20641_s30 + $0x760] sm:$0xff] }
 0x455   : > { %13945 = vmatprep.subr.bf16.mxu0 %v19776_v50  ;;  %11850 = vmatprep.mubr.bf16.mxu1 %v15341_v13  ;;  %v19816_v59 = vld [vmem:[%s20648_s8 + $0x21c0] ss:$8 sps:$4 sm:$0xff]   ;;  %v19821_v50 = vld [vmem:[%s20648_s8 + $0xfd4] ss:$8 sps:$4 sm:$0xff]  }
 0x456   : > { %13884 = vmatprep.mubr.bf16.mxu0 %v15825_v6  ;;  %v20165_v13 = vld [vmem:[%s20641_s30 + $0x250] sm:$0xff]  ;;  %v20166_v6 = vld [vmem:[%s20641_s30 + $0x740] sm:$0xff] }
 0x457   : > { %11912 = vmatpush1.bf16.msra.mxu1 %v19771_v26  ;;  %v15373_v7 = vcombine.high %v20164_v60, %v20165_v13  ;;  %v15833_v26 = vcombine.high %v20166_v6, %v15692_v11 }
 0x458   : > { %13946 = vmatpush1.bf16.msra.mxu0 %v19774_v52  ;;  %11913 = vmatprep.subr.bf16.mxu1 %v19779_v62  ;;  %v19822_v52 = vld [vmem:[%s20648_s8 + $0x21d0] ss:$8 sps:$4 sm:$0xff]   ;;  %v19827_v62 = vld [vmem:[%s20648_s8 + $0xfe4] ss:$8 sps:$4 sm:$0xff]  }
 0x459   : > { %13947 = vmatprep.subr.bf16.mxu0 %v19782_v18  ;;  %v19830_v18 = vld [vmem:[%s20648_s8 + $0x21e4] ss:$8 sps:$4 sm:$0xff]  }
 0x45a   : > { %11851 = vmatmul.mubr.bf16.gmra.mrb[12].mxu1 %v15340_v38  ;;  %v15372_v38 = vcombine.low %v20164_v60, %v20165_v13  ;;  %v19867_v60 = vld [vmem:[%s20648_s8 + $0x1050] ss:$8 sps:$4 sm:$0xff]  }
 0x45b   : > { %13885 = vmatmul.mubr.bf16.gmra.mrb[12].mxu0 %v15824_v1  ;;  %11914 = vmatpush1.bf16.msra.mxu1 %v19777_v36  ;;  %v15832_v1 = vcombine.low %v20166_v6, %v15692_v11  ;;  %v19828_v36 = vld [vmem:[%s20648_s8 + $0x21e0] ss:$8 sps:$4 sm:$0xff]   ;;  %v20173_v11 = vld [vmem:[%s20641_s30 + $0xf8] sm:$0xff]  ;;  %v19878_v6 = vld [vmem:[%s20648_s8 + $0x2264] ss:$8 sps:$4 sm:$0xff]  }
 0x45c   : > { %13948 = vmatpush1.bf16.msra.mxu0 %v19780_v34  ;;  %11915 = vmatprep.subr.bf16.mxu1 %v19785_v47  ;;  %v19833_v34 = vld [vmem:[%s20648_s8 + $0xff4] ss:$8 sps:$4 sm:$0xff]   ;;  %v19870_v13 = vld [vmem:[%s20648_s8 + $0x2250] ss:$8 sps:$4 sm:$0xff]  }
 0x45d   : > { %13949 = vmatprep.subr.bf16.mxu0 %v19788_v15  ;;  %11860 = vmatprep.mubr.bf16.mxu1 %v15349_v27  ;;  %v19836_v47 = vld [vmem:[%s20648_s8 + $0x21f4] ss:$8 sps:$4 sm:$0xff]   ;;  %v19831_v27 = vld [vmem:[%s20648_s8 + $0xff0] ss:$8 sps:$4 sm:$0xff]  }
 0x45e   : > { %13894 = vmatprep.mubr.bf16.mxu0 %v21861_v12  ;;  %v19795_v12 = vld [vmem:[%s20648_s8 + $0xf90] ss:$8 sps:$4 sm:$0xff]  }
 0x45f   : > { %11916 = vmatpush1.bf16.msra.mxu1 %v19783_v32  ;;  %v20167_v15 = vld [vmem:[%s20641_s30 + $0x38] sm:$0xff] }
 0x460   : > { %13950 = vmatpush1.bf16.msra.mxu0 %v19786_v16  ;;  %11917 = vmatprep.subr.bf16.mxu1 %v19791_v23  ;;  %v15319_v61 = vcombine.high %v20167_v15, %v20168_v2  ;;  %v19834_v32 = vld [vmem:[%s20648_s8 + $0x21f0] ss:$8 sps:$4 sm:$0xff]   ;;  %v19839_v16 = vld [vmem:[%s20648_s8 + $0x1004] ss:$8 sps:$4 sm:$0xff]  }
 0x461   : > { %13951 = vmatprep.subr.bf16.mxu0 %v19794_v4  ;;  %v19842_v23 = vld [vmem:[%s20648_s8 + $0x2204] ss:$8 sps:$4 sm:$0xff]   ;;  %v15318_v4 = vcombine.low %v20167_v15, %v20168_v2 }
 0x462   : > { %11861 = vmatmul.mubr.bf16.gmra.mrb[16].mxu1 %v15348_v58  ;;  %v19837_v58 = vld [vmem:[%s20648_s8 + $0x1000] ss:$8 sps:$4 sm:$0xff]   ;;  %v19887_v15 = vld [vmem:[%s20648_s8 + $0x1084] ss:$8 sps:$4 sm:$0xff]  }
 0x463   : > { %13895 = vmatmul.mubr.bf16.gmra.mrb[16].mxu0 %v21872_v45  ;;  %11918 = vmatpush1.bf16.msra.mxu1 %v19789_v43  ;;  %v19801_v45 = vld [vmem:[%s20648_s8 + $0xfa0] ss:$8 sps:$4 sm:$0xff]   ;;  %v19890_v2 = vld [vmem:[%s20648_s8 + $0x2284] ss:$8 sps:$4 sm:$0xff]  }
 0x464   : > { %13952 = vmatpush1.bf16.msra.mxu0 %v19792_v19  ;;  %11919 = vmatprep.subr.bf16.mxu1 %v19797_v40  ;;  %v19840_v43 = vld [vmem:[%s20648_s8 + $0x2200] ss:$8 sps:$4 sm:$0xff]   ;;  %v19845_v19 = vld [vmem:[%s20648_s8 + $0x1014] ss:$8 sps:$4 sm:$0xff]  }
 0x465   : > { %13953 = vmatprep.subr.bf16.mxu0 %v19800_v24  ;;  %11870 = vmatprep.mubr.bf16.mxu1 %v15357_v28  ;;  %v19848_v40 = vld [vmem:[%s20648_s8 + $0x2214] ss:$8 sps:$4 sm:$0xff]   ;;  %v19846_v28 = vld [vmem:[%s20648_s8 + $0x2210] ss:$8 sps:$4 sm:$0xff]  }
 0x466   : > { %13904 = vmatprep.mubr.bf16.mxu0 %v21880_v21  ;;  %v19807_v21 = vld [vmem:[%s20648_s8 + $0xfb0] ss:$8 sps:$4 sm:$0xff]  }
 0x467   : > { %11920 = vmatpush1.bf16.msra.mxu1 %v19795_v12  ;;  %v20169_v24 = vld [vmem:[%s20641_s30 + $0x78] sm:$0xff]  ;;  %v19851_v12 = vld [vmem:[%s20648_s8 + $0x1024] ss:$8 sps:$4 sm:$0xff]  }
 0x468   : > { %13954 = vmatpush1.bf16.msra.mxu0 %v19798_v37  ;;  %11921 = vmatprep.subr.bf16.mxu1 %v19803_v49  ;;  %v15327_v39 = vcombine.high %v20169_v24, %v20170_v44  ;;  %v19854_v37 = vld [vmem:[%s20648_s8 + $0x2224] ss:$8 sps:$4 sm:$0xff]   ;;  %v15326_v49 = vcombine.low %v20169_v24, %v20170_v44  ;;  %v19891_v24 = vld [vmem:[%s20648_s8 + $0x1090] ss:$8 sps:$4 sm:$0xff]  }
 0x469   : > { %13955 = vmatprep.subr.bf16.mxu0 %v19806_v9  ;;  %v19852_v9 = vld [vmem:[%s20648_s8 + $0x2220] ss:$8 sps:$4 sm:$0xff]   ;;  %v19894_v44 = vld [vmem:[%s20648_s8 + $0x2290] ss:$8 sps:$4 sm:$0xff]  }
 0x46a   : > { %11871 = vmatmul.mubr.bf16.gmra.mrb[20].mxu1 %v15356_v33  ;;  %v19857_v33 = vld [vmem:[%s20648_s8 + $0x1034] ss:$8 sps:$4 sm:$0xff]  }
 0x46b   : > { %13905 = vmatmul.mubr.bf16.gmra.mrb[20].mxu0 %v21892_v42  ;;  %11922 = vmatpush1.bf16.msra.mxu1 %v19801_v45  ;;  %v19813_v42 = vld [vmem:[%s20648_s8 + $0xfc0] ss:$8 sps:$4 sm:$0xff]   ;;  %v19860_v45 = vld [vmem:[%s20648_s8 + $0x2234] ss:$8 sps:$4 sm:$0xff]  }
 0x46c   : > { %13956 = vmatpush1.bf16.msra.mxu0 %v19804_v14  ;;  %11923 = vmatprep.subr.bf16.mxu1 %v19809_v0  ;;  %v20171_v14 = vld [vmem:[%s20641_s30 + $0xb8] sm:$0xff] }
 0x46d   : > { %13957 = vmatprep.subr.bf16.mxu0 %v19812_v48  ;;  %11880 = vmatprep.mubr.bf16.mxu1 %v15365_v3  ;;  %v20172_v0 = vld [vmem:[%s20641_s30 + $0xd8] sm:$0xff]  ;;  %v19866_v3 = vld [vmem:[%s20648_s8 + $0x2244] ss:$8 sps:$4 sm:$0xff]  }
 0x46e   : > { %13914 = vmatprep.mubr.bf16.mxu0 %v21898_v10  ;;  %v19819_v10 = vld [vmem:[%s20648_s8 + $0xfd0] ss:$8 sps:$4 sm:$0xff]   ;;  %v15335_v48 = vcombine.high %v20171_v14, %v20172_v0 }
 0x46f   : > { %11924 = vmatpush1.bf16.msra.mxu1 %v19807_v21  ;;  %v15334_v21 = vcombine.low %v20171_v14, %v20172_v0  ;;  %v23256_v0 = vld [vmem:[#allocation26_spill] sm:$0xff] }
 0x470   : > { %13958 = vmatpush1.bf16.msra.mxu0 %v19810_v20  ;;  %11925 = vmatprep.subr.bf16.mxu1 %v19815_v63  ;;  %v15653_v20 = vld [vmem:[%s20641_s30 + $0x628] sm:$0xff] }
 0x471   : > { %13959 = vmatprep.subr.bf16.mxu0 %v19818_v51  ;;  %v19864_v63 = vld [vmem:[%s20648_s8 + $0x2240] ss:$8 sps:$4 sm:$0xff]   ;;  %v19869_v51 = vld [vmem:[%s20648_s8 + $0x1054] ss:$8 sps:$4 sm:$0xff]  }
 0x472   : > { %11881 = vmatmul.mubr.bf16.gmra.mrb[24].mxu1 %v15364_v53  ;;  %v19872_v53 = vld [vmem:[%s20648_s8 + $0x2254] ss:$8 sps:$4 sm:$0xff]  }
 0x473   : > { %13915 = vmatmul.mubr.bf16.gmra.mrb[24].mxu0 %v21908_v22  ;;  %11926 = vmatpush1.bf16.msra.mxu1 %v19813_v42  ;;  %v19825_v22 = vld [vmem:[%s20648_s8 + $0xfe0] ss:$8 sps:$4 sm:$0xff]   ;;  %v20174_v42 = vld [vmem:[%s20641_s30 + $0x118] sm:$0xff] }
 0x474   : > { %13960 = vmatpush1.bf16.msra.mxu0 %v19816_v59  ;;  %11927 = vmatprep.subr.bf16.mxu1 %v19821_v50  ;;  %v15343_v59 = vcombine.high %v20173_v11, %v20174_v42  ;;  %v20175_v50 = vld [vmem:[%s20641_s30 + $0x608] sm:$0xff] }
 0x475   : > { %13961 = vmatprep.subr.bf16.mxu0 %v19824_v30  ;;  %11890 = vmatprep.mubr.bf16.mxu1 %v15373_v7  ;;  %v15827_v30 = vcombine.high %v20175_v50, %v15653_v20  ;;  %v19875_v7 = vld [vmem:[%s20648_s8 + $0x1064] ss:$8 sps:$4 sm:$0xff]  }
 0x476   : > { %13924 = vmatprep.mubr.bf16.mxu0 %v15833_v26  ;;  %v15342_v26 = vcombine.low %v20173_v11, %v20174_v42  ;;  %v20182_v11 = vld [vmem:[%s20641_s30 + $0x238] sm:$0xff] }
 0x477   : > { %11928 = vmatpush1.bf16.msra.mxu1 %v19819_v10  ;;  %v15826_v10 = vcombine.low %v20175_v50, %v15653_v20  ;;  %v15693_v20 = vld [vmem:[%s20641_s30 + $0x768] sm:$0xff]  ;;  %v20183_v42 = vld [vmem:[%s20641_s30 + $0x258] sm:$0xff] }
 0x478   : > { %13962 = vmatpush1.bf16.msra.mxu0 %v19822_v52  ;;  %11929 = vmatprep.subr.bf16.mxu1 %v19827_v62  ;;  %v19873_v52 = vld [vmem:[%s20648_s8 + $0x1060] ss:$8 sps:$4 sm:$0xff]  }
 0x479   : > { %13963 = vmatprep.subr.bf16.mxu0 %v19830_v18  ;;  %v19876_v62 = vld [vmem:[%s20648_s8 + $0x2260] ss:$8 sps:$4 sm:$0xff]   ;;  %v19881_v18 = vld [vmem:[%s20648_s8 + $0x1074] ss:$8 sps:$4 sm:$0xff]  }
 0x47a   : > { %11891 = vmatmul.mubr.bf16.gmra.mrb[28].mxu1 %v15372_v38  ;;  %v19884_v38 = vld [vmem:[%s20648_s8 + $0x2274] ss:$8 sps:$4 sm:$0xff]   ;;  %v20184_v50 = vld [vmem:[%s20641_s30 + $0x748] sm:$0xff] }
 0x47b   : > { %13925 = vmatmul.mubr.bf16.gmra.mrb[28].mxu0 %v15832_v1  ;;  %11930 = vmatpush1.bf16.msra.mxu1 %v19825_v22  ;;  %v20176_v1 = vld [vmem:[%s20641_s30 + $0x178] sm:$0xff] }
 0x47c   : > { %13964 = vmatpush1.bf16.msra.mxu0 %v19828_v36  ;;  %11931 = vmatprep.subr.bf16.mxu1 %v19833_v34  ;;  %v20177_v22 = vld [vmem:[%s20641_s30 + $0x198] sm:$0xff] }
 0x47d   : > { %13965 = vmatprep.subr.bf16.mxu0 %v19836_v47  ;;  %11933 = vmatprep.mubr.bf16.mxu1 %v15319_v61  ;;  %v15351_v36 = vcombine.high %v20176_v1, %v20177_v22  ;;  %v19879_v34 = vld [vmem:[%s20648_s8 + $0x1070] ss:$8 sps:$4 sm:$0xff]  }
 0x47e   : > { %13967 = vmatprep.mubr.bf16.mxu0 %v21927_v8  ;;  %v19843_v8 = vld [vmem:[%s20648_s8 + $0x1010] ss:$8 sps:$4 sm:$0xff]  }
 0x47f   : > { %11932 = vmatpush1.bf16.msra.mxu1 %v19831_v27  ;;  %v19882_v47 = vld [vmem:[%s20648_s8 + $0x2270] ss:$8 sps:$4 sm:$0xff]   ;;  %v15350_v27 = vcombine.low %v20176_v1, %v20177_v22  ;;  %v20185_v1 = vld [vmem:[%s20641_s30 + $0x2a0] sm:$0xff] }
 0x480   : > { %13966 = vmatpush1.bf16.msra.mxu0 %v19834_v32  ;;  %12014 = vmatprep.subr.bf16.mxu1 %v19839_v16  ;;  %v23253_v61 = vld [vmem:[#allocation50_spill] sm:$0xff]  ;;  %v19885_v32 = vld [vmem:[%s20648_s8 + $0x1080] ss:$8 sps:$4 sm:$0xff]  }
 0x481   : > { %14048 = vmatprep.subr.bf16.mxu0 %v19842_v23  ;;  %v19888_v16 = vld [vmem:[%s20648_s8 + $0x2280] ss:$8 sps:$4 sm:$0xff]   ;;  %v19893_v23 = vld [vmem:[%s20648_s8 + $0x1094] ss:$8 sps:$4 sm:$0xff]  }
 0x482   : > { %11934 = vmatmul.mubr.bf16.vlgmr.msra.gmra.mrb[0].mxu1 %v15318_v4  ;;  %v19896_v4 = vld [vmem:[%s20648_s8 + $0x2294] ss:$8 sps:$4 sm:$0xff]   ;;  %v20186_v22 = vld [vmem:[%s20641_s30 + $0x2c0] sm:$0xff] }
 0x483   : > { %13968 = vmatmul.mubr.bf16.vlgmr.msra.gmra.mrb[0].mxu0 %v21938_v35  ;;  %12015 = vmatpush1.bf16.msra.mxu1 %v19837_v58  ;;  %v19849_v35 = vld [vmem:[%s20648_s8 + $0x1020] ss:$8 sps:$4 sm:$0xff]   ;;  %v20178_v58 = vld [vmem:[%s20641_s30 + $0x1b8] sm:$0xff] }
 0x484   : > { %14049 = vmatpush1.bf16.msra.mxu0 %v19840_v43  ;;  %12016 = vmatprep.subr.bf16.mxu1 %v19845_v19  ;;  %v20179_v43 = vld [vmem:[%s20641_s30 + $0x1d8] sm:$0xff] }
 0x485   : > { %14050 = vmatprep.subr.bf16.mxu0 %v19848_v40  ;;  %11943 = vmatprep.mubr.bf16.mxu1 %v15327_v39  ;;  %v15359_v19 = vcombine.high %v20178_v58, %v20179_v43  ;;  %v23254_v40 = vld [vmem:[#allocation24_spill] sm:$0xff] }
 0x486   : > { %13977 = vmatprep.mubr.bf16.mxu0 %v21946_v31  ;;  %v19855_v31 = vld [vmem:[%s20648_s8 + $0x1030] ss:$8 sps:$4 sm:$0xff]   ;;  %v19899_v39 = vld [vmem:[%s20648_s8 + $0x10a4] ss:$8 sps:$4 sm:$0xff]  }
 0x487   : > { %12017 = vmatpush1.bf16.msra.mxu1 %v19843_v8  ;;  %v19902_v8 = vld [vmem:[%s20648_s8 + $0x22a4] ss:$8 sps:$4 sm:$0xff]  }
 0x488   : > { %14051 = vmatpush1.bf16.msra.mxu0 %v19846_v28  ;;  %12018 = vmatprep.subr.bf16.mxu1 %v19851_v12  ;;  %v23255_v28 = vld [vmem:[#allocation25_spill] sm:$0xff]  ;;  %v15358_v12 = vcombine.low %v20178_v58, %v20179_v43  ;;  %v20187_v58 = vld [vmem:[%s20641_s30 + $0x2e0] sm:$0xff] }
 0x489   : > { %14052 = vmatprep.subr.bf16.mxu0 %v19854_v37  ;;  %v19897_v37 = vld [vmem:[%s20648_s8 + $0x10a0] ss:$8 sps:$4 sm:$0xff]  }
 0x48a   : > { %11944 = vmatmul.mubr.bf16.gmra.mrb[4].mxu1 %v15326_v49  ;;  %v19900_v49 = vld [vmem:[%s20648_s8 + $0x22a0] ss:$8 sps:$4 sm:$0xff]  }
 0x48b   : > { %13978 = vmatmul.mubr.bf16.gmra.mrb[4].mxu0 %v21958_v55  ;;  %12019 = vmatpush1.bf16.msra.mxu1 %v19849_v35  ;;  %v19861_v55 = vld [vmem:[%s20648_s8 + $0x1040] ss:$8 sps:$4 sm:$0xff]   ;;  %v19905_v35 = vld [vmem:[%s20648_s8 + $0x10b4] ss:$8 sps:$4 sm:$0xff]  }
 0x48c   : > { %14053 = vmatpush1.bf16.msra.mxu0 %v19852_v9  ;;  %12020 = vmatprep.subr.bf16.mxu1 %v19857_v33  ;;  %v19908_v9 = vld [vmem:[%s20648_s8 + $0x22b4] ss:$8 sps:$4 sm:$0xff]   ;;  %v20188_v43 = vld [vmem:[%s20641_s30 + $0x300] sm:$0xff] }
 0x48d   : > { %14054 = vmatprep.subr.bf16.mxu0 %v19860_v45  ;;  %11953 = vmatprep.mubr.bf16.mxu1 %v15335_v48  ;;  %v20180_v33 = vld [vmem:[%s20641_s30 + $0x1f8] sm:$0xff] }
 0x48e   : > { %13987 = vmatprep.mubr.bf16.mxu0 %v21964_v17  ;;  %v23252_v17 = vld [vmem:[#allocation49_spill] sm:$0xff]  ;;  %v20181_v45 = vld [vmem:[%s20641_s30 + $0x218] sm:$0xff] }
 0x48f   : > { %12021 = vmatpush1.bf16.msra.mxu1 %v19855_v31  ;;  %v15367_v14 = vcombine.high %v20180_v33, %v20181_v45  ;;  %v19903_v48 = vld [vmem:[%s20648_s8 + $0x10b0] ss:$8 sps:$4 sm:$0xff]  }
 0x490   : > { %14055 = vmatpush1.bf16.msra.mxu0 %v19858_v29  ;;  %12022 = vmatprep.subr.bf16.mxu1 %v19863_v41  ;;  %v19906_v31 = vld [vmem:[%s20648_s8 + $0x22b0] ss:$8 sps:$4 sm:$0xff]   ;;  %v19911_v29 = vld [vmem:[%s20648_s8 + $0x10c4] ss:$8 sps:$4 sm:$0xff]  }
 0x491   : > { %14056 = vmatprep.subr.bf16.mxu0 %v19866_v3  ;;  %v19914_v41 = vld [vmem:[%s20648_s8 + $0x22c4] ss:$8 sps:$4 sm:$0xff]   ;;  %v23257_v3 = vld [vmem:[#allocation27_spill] sm:$0xff] }
 0x492   : > { %11954 = vmatmul.mubr.bf16.gmra.mrb[8].mxu1 %v15334_v21  ;;  %v15366_v21 = vcombine.low %v20180_v33, %v20181_v45  ;;  %v20189_v33 = vld [vmem:[%s20641_s30 + $0x320] sm:$0xff] }
 0x493   : > { %13988 = vmatmul.mubr.bf16.gmra.mrb[8].mxu0 %v23252_v17  ;;  %12023 = vmatpush1.bf16.msra.mxu1 %v19861_v55  ;;  %v19909_v55 = vld [vmem:[%s20648_s8 + $0x10c0] ss:$8 sps:$4 sm:$0xff]  }
 0x494   : > { %14057 = vmatpush1.bf16.msra.mxu0 %v19864_v63  ;;  %12024 = vmatprep.subr.bf16.mxu1 %v19869_v51  ;;  %v19912_v63 = vld [vmem:[%s20648_s8 + $0x22c0] ss:$8 sps:$4 sm:$0xff]   ;;  %v19917_v51 = vld [vmem:[%s20648_s8 + $0x10d4] ss:$8 sps:$4 sm:$0xff]  }
 0x495   : > { %14058 = vmatprep.subr.bf16.mxu0 %v19872_v53  ;;  %11963 = vmatprep.mubr.bf16.mxu1 %v15343_v59  ;;  %v19920_v53 = vld [vmem:[%s20648_s8 + $0x22d4] ss:$8 sps:$4 sm:$0xff]   ;;  %v15375_v59 = vcombine.high %v20182_v11, %v20183_v42  ;;  %v23258_v17 = vld [vmem:[#allocation28_spill] sm:$0xff] }
 0x496   : > { %13997 = vmatprep.mubr.bf16.mxu0 %v15827_v30  ;;  %v15835_v30 = vcombine.high %v20184_v50, %v15693_v20  ;;  %v20190_v45 = vld [vmem:[%s20641_s30 + $0x340] sm:$0xff] }
 0x497   : > { %12025 = vmatpush1.bf16.msra.mxu1 %v19867_v60  ;;  %v19915_v60 = vld [vmem:[%s20648_s8 + $0x10d0] ss:$8 sps:$4 sm:$0xff]  }
 0x498   : > { %14059 = vmatpush1.bf16.msra.mxu0 %v19870_v13  ;;  %12026 = vmatprep.subr.bf16.mxu1 %v19875_v7  ;;  %v19918_v13 = vld [vmem:[%s20648_s8 + $0x22d0] ss:$8 sps:$4 sm:$0xff]   ;;  %v19923_v7 = vld [vmem:[%s20648_s8 + $0x10e4] ss:$8 sps:$4 sm:$0xff]  }
 0x499   : > { %14060 = vmatprep.subr.bf16.mxu0 %v19878_v6  ;;  %v19926_v6 = vld [vmem:[%s20648_s8 + $0x22e4] ss:$8 sps:$4 sm:$0xff]  }
 0x49a   : > { %11964 = vmatmul.mubr.bf16.gmra.mrb[12].mxu1 %v15342_v26  ;;  %v15374_v26 = vcombine.low %v20182_v11, %v20183_v42  ;;  %v20191_v11 = vld [vmem:[%s20641_s30 + $0x360] sm:$0xff] }
 0x49b   : > { %13998 = vmatmul.mubr.bf16.gmra.mrb[12].mxu0 %v15826_v10  ;;  %12027 = vmatpush1.bf16.msra.mxu1 %v19873_v52  ;;  %v15834_v10 = vcombine.low %v20184_v50, %v15693_v20  ;;  %v19921_v52 = vld [vmem:[%s20648_s8 + $0x10e0] ss:$8 sps:$4 sm:$0xff]   ;;  %v15654_v20 = vld [vmem:[%s20641_s30 + $0x630] sm:$0xff] }
 0x49c   : > { %14061 = vmatpush1.bf16.msra.mxu0 %v19876_v62  ;;  %12028 = vmatprep.subr.bf16.mxu1 %v19881_v18  ;;  %v19924_v62 = vld [vmem:[%s20648_s8 + $0x22e0] ss:$8 sps:$4 sm:$0xff]   ;;  %v19929_v18 = vld [vmem:[%s20648_s8 + $0x10f4] ss:$8 sps:$4 sm:$0xff]  }
 0x49d   : > { %14062 = vmatprep.subr.bf16.mxu0 %v19884_v38  ;;  %11973 = vmatprep.mubr.bf16.mxu1 %v15351_v36  ;;  %v19932_v38 = vld [vmem:[%s20648_s8 + $0x22f4] ss:$8 sps:$4 sm:$0xff]   ;;  %v15537_v36 = vcombine.high %v20185_v1, %v20186_v22  ;;  %v20192_v42 = vld [vmem:[%s20641_s30 + $0x380] sm:$0xff] }
 0x49e   : > { %14007 = vmatprep.mubr.bf16.mxu0 %v23253_v61  ;;  %v23259_v61 = vld [vmem:[#allocation29_spill] sm:$0xff]  ;;  %v20193_v50 = vld [vmem:[%s20641_s30 + $0x610] sm:$0xff] }
 0x49f   : > { %12029 = vmatpush1.bf16.msra.mxu1 %v19879_v34  ;;  %v19927_v34 = vld [vmem:[%s20648_s8 + $0x10f0] ss:$8 sps:$4 sm:$0xff]  }
 0x4a0   : > { %14063 = vmatpush1.bf16.msra.mxu0 %v19882_v47  ;;  %12030 = vmatprep.subr.bf16.mxu1 %v19887_v15  ;;  %v19930_v47 = vld [vmem:[%s20648_s8 + $0x22f0] ss:$8 sps:$4 sm:$0xff]   ;;  %v19935_v15 = vld [vmem:[%s20648_s8 + $0x1104] ss:$8 sps:$4 sm:$0xff]  }
 0x4a1   : > { %14064 = vmatprep.subr.bf16.mxu0 %v19890_v2  ;;  %v19938_v2 = vld [vmem:[%s20648_s8 + $0x2304] ss:$8 sps:$4 sm:$0xff]  }
 0x4a2   : > { %11974 = vmatmul.mubr.bf16.gmra.mrb[16].mxu1 %v15350_v27  ;;  %v15536_v27 = vcombine.low %v20185_v1, %v20186_v22  ;;  %v20194_v1 = vld [vmem:[%s20641_s30 + $0x3e0] sm:$0xff] }
 0x4a3   : > { %14008 = vmatmul.mubr.bf16.gmra.mrb[16].mxu0 %v23254_v40  ;;  %12031 = vmatpush1.bf16.msra.mxu1 %v19885_v32  ;;  %v19933_v32 = vld [vmem:[%s20648_s8 + $0x1100] ss:$8 sps:$4 sm:$0xff]   ;;  %v23260_v40 = vld [vmem:[#allocation30_spill] sm:$0xff] }
 0x4a4   : > { %14065 = vmatpush1.bf16.msra.mxu0 %v19888_v16  ;;  %12032 = vmatprep.subr.bf16.mxu1 %v19893_v23  ;;  %v19936_v16 = vld [vmem:[%s20648_s8 + $0x2300] ss:$8 sps:$4 sm:$0xff]   ;;  %v19941_v23 = vld [vmem:[%s20648_s8 + $0x1114] ss:$8 sps:$4 sm:$0xff]  }
 0x4a5   : > { %14066 = vmatprep.subr.bf16.mxu0 %v19896_v4  ;;  %11983 = vmatprep.mubr.bf16.mxu1 %v15359_v19  ;;  %v19944_v4 = vld [vmem:[%s20648_s8 + $0x2314] ss:$8 sps:$4 sm:$0xff]   ;;  %v15545_v19 = vcombine.high %v20187_v58, %v20188_v43  ;;  %v20195_v22 = vld [vmem:[%s20641_s30 + $0x400] sm:$0xff] }
 0x4a6   : > { %14017 = vmatprep.mubr.bf16.mxu0 %v23255_v28  ;;  %v23261_v28 = vld [vmem:[#allocation31_spill] sm:$0xff] }
 0x4a7   : > { %12033 = vmatpush1.bf16.msra.mxu1 %v19891_v24  ;;  %v19939_v24 = vld [vmem:[%s20648_s8 + $0x1110] ss:$8 sps:$4 sm:$0xff]  }
 0x4a8   : > { %14067 = vmatpush1.bf16.msra.mxu0 %v19894_v44  ;;  %12034 = vmatprep.subr.bf16.mxu1 %v19899_v39  ;;  %v19942_v44 = vld [vmem:[%s20648_s8 + $0x2310] ss:$8 sps:$4 sm:$0xff]   ;;  %v19947_v39 = vld [vmem:[%s20648_s8 + $0x1124] ss:$8 sps:$4 sm:$0xff]  }
 0x4a9   : > { %14068 = vmatprep.subr.bf16.mxu0 %v19902_v8  ;;  %v19950_v8 = vld [vmem:[%s20648_s8 + $0x2324] ss:$8 sps:$4 sm:$0xff]  }
 0x4aa   : > { %11984 = vmatmul.mubr.bf16.gmra.mrb[20].mxu1 %v15358_v12  ;;  %v15544_v12 = vcombine.low %v20187_v58, %v20188_v43  ;;  %v20196_v58 = vld [vmem:[%s20641_s30 + $0x420] sm:$0xff] }
 0x4ab   : > { %14018 = vmatmul.mubr.bf16.gmra.mrb[20].mxu0 %v23256_v0  ;;  %12035 = vmatpush1.bf16.msra.mxu1 %v19897_v37  ;;  %v19945_v37 = vld [vmem:[%s20648_s8 + $0x1120] ss:$8 sps:$4 sm:$0xff]  }
 0x4ac   : > { %14069 = vmatpush1.bf16.msra.mxu0 %v19900_v49  ;;  %12036 = vmatprep.subr.bf16.mxu1 %v19905_v35  ;;  %v19948_v49 = vld [vmem:[%s20648_s8 + $0x2320] ss:$8 sps:$4 sm:$0xff]   ;;  %v19953_v35 = vld [vmem:[%s20648_s8 + $0x1134] ss:$8 sps:$4 sm:$0xff]  }
 0x4ad   : > { %14070 = vmatprep.subr.bf16.mxu0 %v19908_v9  ;;  %11993 = vmatprep.mubr.bf16.mxu1 %v15367_v14  ;;  %v19956_v9 = vld [vmem:[%s20648_s8 + $0x2334] ss:$8 sps:$4 sm:$0xff]   ;;  %v15553_v14 = vcombine.high %v20189_v33, %v20190_v45  ;;  %v23262_v0 = vld [vmem:[#allocation32_spill] sm:$0xff] }
 0x4ae   : > { %14027 = vmatprep.mubr.bf16.mxu0 %v23257_v3  ;;  %v23263_v3 = vld [vmem:[#allocation33_spill] sm:$0xff]  ;;  %v20197_v43 = vld [vmem:[%s20641_s30 + $0x440] sm:$0xff] }
 0x4af   : > { %12037 = vmatpush1.bf16.msra.mxu1 %v19903_v48  ;;  %v19951_v48 = vld [vmem:[%s20648_s8 + $0x1130] ss:$8 sps:$4 sm:$0xff]  }
 0x4b0   : > { %14071 = vmatpush1.bf16.msra.mxu0 %v19906_v31  ;;  %12038 = vmatprep.subr.bf16.mxu1 %v19911_v29  ;;  %v19954_v31 = vld [vmem:[%s20648_s8 + $0x2330] ss:$8 sps:$4 sm:$0xff]   ;;  %v19959_v29 = vld [vmem:[%s20648_s8 + $0x1144] ss:$8 sps:$4 sm:$0xff]  }
 0x4b1   : > { %14072 = vmatprep.subr.bf16.mxu0 %v19914_v41  ;;  %v19962_v41 = vld [vmem:[%s20648_s8 + $0x2344] ss:$8 sps:$4 sm:$0xff]  }
 0x4b2   : > { %11994 = vmatmul.mubr.bf16.gmra.mrb[24].mxu1 %v15366_v21  ;;  %v15552_v21 = vcombine.low %v20189_v33, %v20190_v45  ;;  %v20198_v33 = vld [vmem:[%s20641_s30 + $0x460] sm:$0xff] }
 0x4b3   : > { %14028 = vmatmul.mubr.bf16.gmra.mrb[24].mxu0 %v23258_v17  ;;  %12039 = vmatpush1.bf16.msra.mxu1 %v19909_v55  ;;  %v19957_v55 = vld [vmem:[%s20648_s8 + $0x1140] ss:$8 sps:$4 sm:$0xff]   ;;  %v23264_v17 = vld [vmem:[#allocation34_spill] sm:$0xff] }
 0x4b4   : > { %14073 = vmatpush1.bf16.msra.mxu0 %v19912_v63  ;;  %12040 = vmatprep.subr.bf16.mxu1 %v19917_v51  ;;  %v19960_v63 = vld [vmem:[%s20648_s8 + $0x2340] ss:$8 sps:$4 sm:$0xff]   ;;  %v19965_v51 = vld [vmem:[%s20648_s8 + $0x1154] ss:$8 sps:$4 sm:$0xff]  }
 0x4b5   : > { %14074 = vmatprep.subr.bf16.mxu0 %v19920_v53  ;;  %12003 = vmatprep.mubr.bf16.mxu1 %v15375_v59  ;;  %v19968_v53 = vld [vmem:[%s20648_s8 + $0x2354] ss:$8 sps:$4 sm:$0xff]   ;;  %v15561_v59 = vcombine.high %v20191_v11, %v20192_v42  ;;  %v20199_v45 = vld [vmem:[%s20641_s30 + $0x480] sm:$0xff] }
 0x4b6   : > { %14037 = vmatprep.mubr.bf16.mxu0 %v15835_v30  ;;  %v15829_v30 = vcombine.high %v20193_v50, %v15654_v20 }
 0x4b7   : > { %12041 = vmatpush1.bf16.msra.mxu1 %v19915_v60  ;;  %v19963_v60 = vld [vmem:[%s20648_s8 + $0x1150] ss:$8 sps:$4 sm:$0xff]  }
 0x4b8   : > { %14075 = vmatpush1.bf16.msra.mxu0 %v19918_v13  ;;  %12042 = vmatprep.subr.bf16.mxu1 %v19923_v7  ;;  %v19966_v13 = vld [vmem:[%s20648_s8 + $0x2350] ss:$8 sps:$4 sm:$0xff]   ;;  %v19971_v7 = vld [vmem:[%s20648_s8 + $0x1164] ss:$8 sps:$4 sm:$0xff]  }
 0x4b9   : > { %14076 = vmatprep.subr.bf16.mxu0 %v19926_v6  ;;  %v19974_v6 = vld [vmem:[%s20648_s8 + $0x2364] ss:$8 sps:$4 sm:$0xff]  }
 0x4ba   : > { %12004 = vmatmul.mubr.bf16.gmra.mrb[28].mxu1 %v15374_v26  ;;  %v15560_v26 = vcombine.low %v20191_v11, %v20192_v42  ;;  %v20200_v11 = vld [vmem:[%s20641_s30 + $0x4a0] sm:$0xff] }
 0x4bb   : > { %14038 = vmatmul.mubr.bf16.gmra.mrb[28].mxu0 %v15834_v10  ;;  %12043 = vmatpush1.bf16.msra.mxu1 %v19921_v52  ;;  %v15828_v10 = vcombine.low %v20193_v50, %v15654_v20  ;;  %v19969_v52 = vld [vmem:[%s20648_s8 + $0x1160] ss:$8 sps:$4 sm:$0xff]   ;;  %v15694_v20 = vld [vmem:[%s20641_s30 + $0x770] sm:$0xff] }
 0x4bc   : > { %14077 = vmatpush1.bf16.msra.mxu0 %v19924_v62  ;;  %12044 = vmatprep.subr.bf16.mxu1 %v19929_v18  ;;  %v19972_v62 = vld [vmem:[%s20648_s8 + $0x2360] ss:$8 sps:$4 sm:$0xff]   ;;  %v19977_v18 = vld [vmem:[%s20648_s8 + $0x1174] ss:$8 sps:$4 sm:$0xff]  }
 0x4bd   : > { %14078 = vmatprep.subr.bf16.mxu0 %v19932_v38  ;;  %12046 = vmatprep.mubr.bf16.mxu1 %v15537_v36  ;;  %v19980_v38 = vld [vmem:[%s20648_s8 + $0x2374] ss:$8 sps:$4 sm:$0xff]   ;;  %v15569_v36 = vcombine.high %v20194_v1, %v20195_v22  ;;  %v20201_v42 = vld [vmem:[%s20641_s30 + $0x4c0] sm:$0xff] }
 0x4be   : > { %14080 = vmatprep.mubr.bf16.mxu0 %v23259_v61  ;;  %v23265_v61 = vld [vmem:[#allocation35_spill] sm:$0xff]  ;;  %v20202_v50 = vld [vmem:[%s20641_s30 + $0x750] sm:$0xff] }
 0x4bf   : > { %12045 = vmatpush1.bf16.msra.mxu1 %v19927_v34  ;;  %v19975_v34 = vld [vmem:[%s20648_s8 + $0x1170] ss:$8 sps:$4 sm:$0xff]  }
 0x4c0   : > { %14079 = vmatpush1.bf16.msra.mxu0 %v19930_v47  ;;  %12127 = vmatprep.subr.bf16.mxu1 %v19935_v15  ;;  %v19978_v47 = vld [vmem:[%s20648_s8 + $0x2370] ss:$8 sps:$4 sm:$0xff]   ;;  %v19983_v15 = vld [vmem:[%s20648_s8 + $0x1184] ss:$8 sps:$4 sm:$0xff]  }
 0x4c1   : > { %14161 = vmatprep.subr.bf16.mxu0 %v19938_v2  ;;  %v19986_v2 = vld [vmem:[%s20648_s8 + $0x2384] ss:$8 sps:$4 sm:$0xff]  }
 0x4c2   : > { %12047 = vmatmul.mubr.bf16.vlgmr.msra.gmra.mrb[0].mxu1 %v15536_v27  ;;  %v15568_v27 = vcombine.low %v20194_v1, %v20195_v22  ;;  %v20203_v1 = vld [vmem:[%s20641_s30 + $0x2a8] sm:$0xff] }
 0x4c3   : > { %14081 = vmatmul.mubr.bf16.vlgmr.msra.gmra.mrb[0].mxu0 %v23260_v40  ;;  %12128 = vmatpush1.bf16.msra.mxu1 %v19933_v32  ;;  %v19981_v32 = vld [vmem:[%s20648_s8 + $0x1180] ss:$8 sps:$4 sm:$0xff]  }
 0x4c4   : > { %14162 = vmatpush1.bf16.msra.mxu0 %v19936_v16  ;;  %12129 = vmatprep.subr.bf16.mxu1 %v19941_v23  ;;  %v19984_v16 = vld [vmem:[%s20648_s8 + $0x2380] ss:$8 sps:$4 sm:$0xff]   ;;  %v19989_v23 = vld [vmem:[%s20648_s8 + $0x1194] ss:$8 sps:$4 sm:$0xff]  }
 0x4c5   : > { %14163 = vmatprep.subr.bf16.mxu0 %v19944_v4  ;;  %12056 = vmatprep.mubr.bf16.mxu1 %v15545_v19  ;;  %v19992_v4 = vld [vmem:[%s20648_s8 + $0x2394] ss:$8 sps:$4 sm:$0xff]   ;;  %v15577_v19 = vcombine.high %v20196_v58, %v20197_v43  ;;  %v23266_v40 = vld [vmem:[#allocation36_spill] sm:$0xff]  ;;  %v20204_v22 = vld [vmem:[%s20641_s30 + $0x2c8] sm:$0xff] }
 0x4c6   : > { %14090 = vmatprep.mubr.bf16.mxu0 %v23261_v28  ;;  %v23267_v28 = vld [vmem:[#allocation37_spill] sm:$0xff] }
 0x4c7   : > { %12130 = vmatpush1.bf16.msra.mxu1 %v19939_v24  ;;  %v19987_v24 = vld [vmem:[%s20648_s8 + $0x1190] ss:$8 sps:$4 sm:$0xff]  }
 0x4c8   : > { %14164 = vmatpush1.bf16.msra.mxu0 %v19942_v44  ;;  %12131 = vmatprep.subr.bf16.mxu1 %v19947_v39  ;;  %v19990_v44 = vld [vmem:[%s20648_s8 + $0x2390] ss:$8 sps:$4 sm:$0xff]   ;;  %v19995_v39 = vld [vmem:[%s20648_s8 + $0x11a4] ss:$8 sps:$4 sm:$0xff]  }
 0x4c9   : > { %14165 = vmatprep.subr.bf16.mxu0 %v19950_v8  ;;  %v19998_v8 = vld [vmem:[%s20648_s8 + $0x23a4] ss:$8 sps:$4 sm:$0xff]  }
 0x4ca   : > { %12057 = vmatmul.mubr.bf16.gmra.mrb[4].mxu1 %v15544_v12  ;;  %v15576_v12 = vcombine.low %v20196_v58, %v20197_v43  ;;  %v20207_v58 = vld [vmem:[%s20641_s30 + $0x328] sm:$0xff] }
 0x4cb   : > { %14091 = vmatmul.mubr.bf16.gmra.mrb[4].mxu0 %v23262_v0  ;;  %12132 = vmatpush1.bf16.msra.mxu1 %v19945_v37  ;;  %v19993_v37 = vld [vmem:[%s20648_s8 + $0x11a0] ss:$8 sps:$4 sm:$0xff]   ;;  %v23268_v0 = vld [vmem:[#allocation38_spill] sm:$0xff] }
 0x4cc   : > { %14166 = vmatpush1.bf16.msra.mxu0 %v19948_v49  ;;  %12133 = vmatprep.subr.bf16.mxu1 %v19953_v35  ;;  %v19996_v49 = vld [vmem:[%s20648_s8 + $0x23a0] ss:$8 sps:$4 sm:$0xff]   ;;  %v20001_v35 = vld [vmem:[%s20648_s8 + $0x11b4] ss:$8 sps:$4 sm:$0xff]  }
 0x4cd   : > { %14167 = vmatprep.subr.bf16.mxu0 %v19956_v9  ;;  %12066 = vmatprep.mubr.bf16.mxu1 %v15553_v14  ;;  %v20004_v9 = vld [vmem:[%s20648_s8 + $0x23b4] ss:$8 sps:$4 sm:$0xff]   ;;  %v15585_v14 = vcombine.high %v20198_v33, %v20199_v45  ;;  %v20208_v43 = vld [vmem:[%s20641_s30 + $0x348] sm:$0xff] }
 0x4ce   : > { %14100 = vmatprep.mubr.bf16.mxu0 %v23263_v3  ;;  %v23269_v3 = vld [vmem:[#allocation39_spill] sm:$0xff] }
 0x4cf   : > { %12134 = vmatpush1.bf16.msra.mxu1 %v19951_v48  ;;  %v19999_v48 = vld [vmem:[%s20648_s8 + $0x11b0] ss:$8 sps:$4 sm:$0xff]  }
 0x4d0   : > { %14168 = vmatpush1.bf16.msra.mxu0 %v19954_v31  ;;  %12135 = vmatprep.subr.bf16.mxu1 %v19959_v29  ;;  %v20002_v31 = vld [vmem:[%s20648_s8 + $0x23b0] ss:$8 sps:$4 sm:$0xff]   ;;  %v20007_v29 = vld [vmem:[%s20648_s8 + $0x11c4] ss:$8 sps:$4 sm:$0xff]  }
 0x4d1   : > { %14169 = vmatprep.subr.bf16.mxu0 %v19962_v41  ;;  %v20010_v41 = vld [vmem:[%s20648_s8 + $0x23c4] ss:$8 sps:$4 sm:$0xff]  }
 0x4d2   : > { %12067 = vmatmul.mubr.bf16.gmra.mrb[8].mxu1 %v15552_v21  ;;  %v15584_v21 = vcombine.low %v20198_v33, %v20199_v45  ;;  %v20213_v33 = vld [vmem:[%s20641_s30 + $0x408] sm:$0xff] }
 0x4d3   : > { %14101 = vmatmul.mubr.bf16.gmra.mrb[8].mxu0 %v23264_v17  ;;  %12136 = vmatpush1.bf16.msra.mxu1 %v19957_v55  ;;  %v20005_v55 = vld [vmem:[%s20648_s8 + $0x11c0] ss:$8 sps:$4 sm:$0xff]  }
 0x4d4   : > { %14170 = vmatpush1.bf16.msra.mxu0 %v19960_v63  ;;  %12137 = vmatprep.subr.bf16.mxu1 %v19965_v51  ;;  %v20008_v63 = vld [vmem:[%s20648_s8 + $0x23c0] ss:$8 sps:$4 sm:$0xff]   ;;  %v20013_v51 = vld [vmem:[%s20648_s8 + $0x11d4] ss:$8 sps:$4 sm:$0xff]  }
 0x4d5   : > { %14171 = vmatprep.subr.bf16.mxu0 %v19968_v53  ;;  %12076 = vmatprep.mubr.bf16.mxu1 %v15561_v59  ;;  %v20016_v53 = vld [vmem:[%s20648_s8 + $0x23d4] ss:$8 sps:$4 sm:$0xff]   ;;  %v15593_v59 = vcombine.high %v20200_v11, %v20201_v42  ;;  %v23270_v17 = vld [vmem:[#allocation40_spill] sm:$0xff] }
 0x4d6   : > { %14110 = vmatprep.mubr.bf16.mxu0 %v15829_v30  ;;  %v15837_v30 = vcombine.high %v20202_v50, %v15694_v20 }
 0x4d7   : > { %12138 = vmatpush1.bf16.msra.mxu1 %v19963_v60  ;;  %v20011_v60 = vld [vmem:[%s20648_s8 + $0x11d0] ss:$8 sps:$4 sm:$0xff]  }
 0x4d8   : > { %14172 = vmatpush1.bf16.msra.mxu0 %v19966_v13  ;;  %12139 = vmatprep.subr.bf16.mxu1 %v19971_v7  ;;  %v20014_v13 = vld [vmem:[%s20648_s8 + $0x23d0] ss:$8 sps:$4 sm:$0xff]   ;;  %v20019_v7 = vld [vmem:[%s20648_s8 + $0x11e4] ss:$8 sps:$4 sm:$0xff]  }
 0x4d9   : > { %14173 = vmatprep.subr.bf16.mxu0 %v19974_v6  ;;  %v20022_v6 = vld [vmem:[%s20648_s8 + $0x23e4] ss:$8 sps:$4 sm:$0xff]  }
 0x4da   : > { %12077 = vmatmul.mubr.bf16.gmra.mrb[12].mxu1 %v15560_v26  ;;  %v15592_v26 = vcombine.low %v20200_v11, %v20201_v42 }
 0x4db   : > { %14111 = vmatmul.mubr.bf16.gmra.mrb[12].mxu0 %v15828_v10  ;;  %12140 = vmatpush1.bf16.msra.mxu1 %v19969_v52  ;;  %v15836_v10 = vcombine.low %v20202_v50, %v15694_v20  ;;  %v20017_v52 = vld [vmem:[%s20648_s8 + $0x11e0] ss:$8 sps:$4 sm:$0xff]  }
 0x4dc   : > { %14174 = vmatpush1.bf16.msra.mxu0 %v19972_v62  ;;  %12141 = vmatprep.subr.bf16.mxu1 %v19977_v18  ;;  %v20020_v62 = vld [vmem:[%s20648_s8 + $0x23e0] ss:$8 sps:$4 sm:$0xff]   ;;  %v20025_v18 = vld [vmem:[%s20648_s8 + $0x11f4] ss:$8 sps:$4 sm:$0xff]  }
 0x4dd   : > { %14175 = vmatprep.subr.bf16.mxu0 %v19980_v38  ;;  %12086 = vmatprep.mubr.bf16.mxu1 %v15569_v36  ;;  %v20028_v38 = vld [vmem:[%s20648_s8 + $0x23f4] ss:$8 sps:$4 sm:$0xff]   ;;  %v15539_v36 = vcombine.high %v20203_v1, %v20204_v22  ;;  %v3838_v50 = vld [vmem:[#allocation2] sm:$0xff] }
 0x4de   : > { %14120 = vmatprep.mubr.bf16.mxu0 %v23265_v61  ;;  %v20205_v61 = vld [vmem:[%s20641_s30 + $0x2e8] sm:$0xff] }
 0x4df   : > { %12142 = vmatpush1.bf16.msra.mxu1 %v19975_v34  ;;  %v20023_v34 = vld [vmem:[%s20648_s8 + $0x11f0] ss:$8 sps:$4 sm:$0xff]  }
 0x4e0   : > { %14176 = vmatpush1.bf16.msra.mxu0 %v19978_v47  ;;  %12143 = vmatprep.subr.bf16.mxu1 %v19983_v15  ;;  %v20026_v47 = vld [vmem:[%s20648_s8 + $0x23f0] ss:$8 sps:$4 sm:$0xff]   ;;  %v23271_v15 = vld [vmem:[#allocation41_spill] sm:$0xff] }
 0x4e1   : > { %14177 = vmatprep.subr.bf16.mxu0 %v19986_v2  ;;  %v15538_v2 = vcombine.low %v20203_v1, %v20204_v22 }
 0x4e2   : > { %12087 = vmatmul.mubr.bf16.gmra.mrb[16].mxu1 %v15568_v27  ;;  %v20206_v27 = vld [vmem:[%s20641_s30 + $0x308] sm:$0xff] }
 0x4e3   : > { %14121 = vmatmul.mubr.bf16.gmra.mrb[16].mxu0 %v23266_v40  ;;  %12144 = vmatpush1.bf16.msra.mxu1 %v19981_v32  ;;  %v15547_v32 = vcombine.high %v20205_v61, %v20206_v27  ;;  %v23274_v40 = vld [vmem:[#allocation44_spill] sm:$0xff] }
 0x4e4   : > { %14178 = vmatpush1.bf16.msra.mxu0 %v19984_v16  ;;  %12145 = vmatprep.subr.bf16.mxu1 %v19989_v23  ;;  %v23272_v16 = vld [vmem:[#allocation42_spill] sm:$0xff]  ;;  %v23273_v23 = vld [vmem:[#allocation43_spill] sm:$0xff] }
 0x4e5   : > { %14179 = vmatprep.subr.bf16.mxu0 %v19992_v4  ;;  %12096 = vmatprep.mubr.bf16.mxu1 %v15577_v19  ;;  %v15546_v4 = vcombine.low %v20205_v61, %v20206_v27  ;;  %v15555_v19 = vcombine.high %v20207_v58, %v20208_v43 }
 0x4e6   : > { %14130 = vmatprep.mubr.bf16.mxu0 %v23267_v28 }
 0x4e7   : > { %12146 = vmatpush1.bf16.msra.mxu1 %v19987_v24  ;;  %v15655_v24 = vld [vmem:[%s20641_s30 + $0x638] sm:$0xff] }
 0x4e8   : > { %14180 = vmatpush1.bf16.msra.mxu0 %v19990_v44  ;;  %12147 = vmatprep.subr.bf16.mxu1 %v19995_v39  ;;  %v15554_v44 = vcombine.low %v20207_v58, %v20208_v43  ;;  %v20209_v39 = vld [vmem:[%s20641_s30 + $0x368] sm:$0xff]  ;;  %v3844_v58 = vld [vmem:[#allocation2 + $0x30] sm:$0xff] }
 0x4e9   : > { %14181 = vmatprep.subr.bf16.mxu0 %v19998_v8  ;;  %v20210_v8 = vld [vmem:[%s20641_s30 + $0x388] sm:$0xff] }
 0x4ea   : > { %12097 = vmatmul.mubr.bf16.gmra.mrb[20].mxu1 %v15576_v12  ;;  %v15563_v28 = vcombine.high %v20209_v39, %v20210_v8  ;;  %v20211_v12 = vld [vmem:[%s20641_s30 + $0x618] sm:$0xff] }
 0x4eb   : > { %14131 = vmatmul.mubr.bf16.gmra.mrb[20].mxu0 %v23268_v0  ;;  %12148 = vmatpush1.bf16.msra.mxu1 %v19993_v37  ;;  %v15831_v37 = vcombine.high %v20211_v12, %v15655_v24  ;;  %v20215_v0 = vld [vmem:[%s20641_s30 + $0x448] sm:$0xff] }
 0x4ec   : > { %14182 = vmatpush1.bf16.msra.mxu0 %v19996_v49  ;;  %12149 = vmatprep.subr.bf16.mxu1 %v20001_v35  ;;  %v15562_v49 = vcombine.low %v20209_v39, %v20210_v8  ;;  %v15830_v35 = vcombine.low %v20211_v12, %v15655_v24 }
 0x4ed   : > { %14183 = vmatprep.subr.bf16.mxu0 %v20004_v9  ;;  %12106 = vmatprep.mubr.bf16.mxu1 %v15585_v14  ;;  %v20212_v9 = vld [vmem:[%s20641_s30 + $0x3e8] sm:$0xff] }
 0x4ee   : > { %14140 = vmatprep.mubr.bf16.mxu0 %v23269_v3  ;;  %v15570_v45 = vcombine.low %v20212_v9, %v20213_v33  ;;  %v20214_v14 = vld [vmem:[%s20641_s30 + $0x428] sm:$0xff] }
 0x4ef   : > { %12150 = vmatpush1.bf16.msra.mxu1 %v19999_v48  ;;  %v23275_v48 = vld [vmem:[#allocation45_spill] sm:$0xff] }
 0x4f0   : > { %14184 = vmatpush1.bf16.msra.mxu0 %v20002_v31  ;;  %12151 = vmatprep.subr.bf16.mxu1 %v20007_v29  ;;  %v15578_v31 = vcombine.low %v20214_v14, %v20215_v0  ;;  %v20216_v29 = vld [vmem:[%s20641_s30 + $0x468] sm:$0xff] }
 0x4f1   : > { %14185 = vmatprep.subr.bf16.mxu0 %v20010_v41  ;;  %v20217_v41 = vld [vmem:[%s20641_s30 + $0x488] sm:$0xff] }
 0x4f2   : > { %12107 = vmatmul.mubr.bf16.gmra.mrb[24].mxu1 %v15584_v21  ;;  %v15587_v3 = vcombine.high %v20216_v29, %v20217_v41  ;;  %v15695_v21 = vld [vmem:[%s20641_s30 + $0x778] sm:$0xff]  ;;  %v15586_v20 = vcombine.low %v20216_v29, %v20217_v41 }
 0x4f3   : > { %14141 = vmatmul.mubr.bf16.gmra.mrb[24].mxu0 %v23270_v17  ;;  %12152 = vmatpush1.bf16.msra.mxu1 %v20005_v55  ;;  %v20218_v55 = vld [vmem:[%s20641_s30 + $0x4a8] sm:$0xff] }
 0x4f4   : > { %14186 = vmatpush1.bf16.msra.mxu0 %v20008_v63  ;;  %12153 = vmatprep.subr.bf16.mxu1 %v20013_v51  ;;  %v20219_v63 = vld [vmem:[%s20641_s30 + $0x4c8] sm:$0xff] }
 0x4f5   : > { %14187 = vmatprep.subr.bf16.mxu0 %v20016_v53  ;;  %12116 = vmatprep.mubr.bf16.mxu1 %v15593_v59  ;;  %v15595_v51 = vcombine.high %v20218_v55, %v20219_v63  ;;  %v15594_v11 = vcombine.low %v20218_v55, %v20219_v63 }
 0x4f6   : > { %14150 = vmatprep.mubr.bf16.mxu0 %v15837_v30 }
 0x4f7   : > { %12154 = vmatpush1.bf16.msra.mxu1 %v20011_v60  ;;  %v3839_v60 = vld [vmem:[#allocation2 + $0x8] sm:$0xff] }
 0x4f8   : > { %14188 = vmatpush1.bf16.msra.mxu0 %v20014_v13  ;;  %12155 = vmatprep.subr.bf16.mxu1 %v20019_v7 }
 0x4f9   : > { %14189 = vmatprep.subr.bf16.mxu0 %v20022_v6 }
 0x4fa   : > { %12117 = vmatmul.mubr.bf16.gmra.mrb[28].mxu1 %v15592_v26  ;;  %v3840_v26 = vld [vmem:[#allocation2 + $0x10] sm:$0xff] }
 0x4fb   : > { %14151 = vmatmul.mubr.bf16.gmra.mrb[28].mxu0 %v15836_v10  ;;  %12156 = vmatpush1.bf16.msra.mxu1 %v20017_v52 }
 0x4fc   : > { %14190 = vmatpush1.bf16.msra.mxu0 %v20020_v62  ;;  %12157 = vmatprep.subr.bf16.mxu1 %v20025_v18  ;;  %v3841_v18 = vld [vmem:[#allocation2 + $0x18] sm:$0xff] }
 0x4fd   : > { %14191 = vmatprep.subr.bf16.mxu0 %v20028_v38  ;;  %12159 = vmatprep.mubr.bf16.mxu1 %v15539_v36 }
 0x4fe   : > { %14193 = vmatprep.mubr.bf16.mxu0 %v23271_v15  ;;  %v3842_v15 = vld [vmem:[#allocation2 + $0x20] sm:$0xff] }
 0x4ff   : > { %12158 = vmatpush1.bf16.msra.mxu1 %v20023_v34 }
 0x500   : > { %14192 = vmatpush1.bf16.msra.mxu0 %v20026_v47 }
 0x502   : > { %12160 = vmatmul.mubr.bf16.vlgmr.msra.gmra.mrb[0].mxu1 %v15538_v2 }
 0x503   : > { %14194 = vmatmul.mubr.bf16.vlgmr.msra.gmra.mrb[0].mxu0 %v23272_v16  ;;  %12169 = vmatprep.mubr.bf16.mxu1 %v15547_v32  ;;  %v3843_v32 = vld [vmem:[#allocation2 + $0x28] sm:$0xff] }
 0x504   : > { %14203 = vmatprep.mubr.bf16.mxu0 %v23273_v23 }
 0x50a   : > { %12170 = vmatmul.mubr.bf16.gmra.mrb[4].mxu1 %v15546_v4 }
 0x50b   : > { %14204 = vmatmul.mubr.bf16.gmra.mrb[4].mxu0 %v23274_v40  ;;  %12179 = vmatprep.mubr.bf16.mxu1 %v15555_v19 }
 0x50c   : > { %14213 = vmatprep.mubr.bf16.mxu0 %v22228_v54  ;;  %v15571_v54 = vcombine.high %v20212_v9, %v20213_v33 }
 0x512   : > { %12180 = vmatmul.mubr.bf16.gmra.mrb[8].mxu1 %v15554_v44  ;;  %v3845_v44 = vld [vmem:[#allocation2 + $0x38] sm:$0xff] }
 0x513   : > { %14214 = vmatmul.mubr.bf16.gmra.mrb[8].mxu0 %v22237_v5  ;;  %12189 = vmatprep.mubr.bf16.mxu1 %v15563_v28  ;;  %v15579_v5 = vcombine.high %v20214_v14, %v20215_v0 }
 0x514   : > { %14223 = vmatprep.mubr.bf16.mxu0 %v15831_v37 }
 0x51a   : > { %12190 = vmatmul.mubr.bf16.gmra.mrb[12].mxu1 %v15562_v49 }
 0x51b   : > { %14224 = vmatmul.mubr.bf16.gmra.mrb[12].mxu0 %v15830_v35  ;;  %12199 = vmatprep.mubr.bf16.mxu1 %v15571_v54  ;;  %v3846_v35 = vld [vmem:[#allocation2 + $0x40] sm:$0xff] }
 0x51c   : > { %14233 = vmatprep.mubr.bf16.mxu0 %v22257_v57  ;;  %v23276_v57 = vld [vmem:[#allocation46_spill] sm:$0xff] }
 0x522   : > { %12200 = vmatmul.mubr.bf16.gmra.mrb[16].mxu1 %v15570_v45  ;;  %v3847_v45 = vld [vmem:[#allocation2 + $0x48] sm:$0xff] }
 0x523   : > { %14234 = vmatmul.mubr.bf16.gmra.mrb[16].mxu0 %v22266_v25  ;;  %12209 = vmatprep.mubr.bf16.mxu1 %v15579_v5  ;;  %v20220_v25 = vld [vmem:[%s20641_s30 + $0x758] sm:$0xff] }
 0x524   : > { %14243 = vmatprep.mubr.bf16.mxu0 %v23275_v48  ;;  %v15839_v53 = vcombine.high %v20220_v25, %v15695_v21  ;;  %v15838_v42 = vcombine.low %v20220_v25, %v15695_v21  ;;  %v3848_v48 = vld [vmem:[#allocation2 + $0x50] sm:$0xff] }
 0x52a   : > { %12210 = vmatmul.mubr.bf16.gmra.mrb[20].mxu1 %v15578_v31 }
 0x52b   : > { %14244 = vmatmul.mubr.bf16.gmra.mrb[20].mxu0 %v23276_v57  ;;  %12219 = vmatprep.mubr.bf16.mxu1 %v15587_v3  ;;  %v3849_v57 = vld [vmem:[#allocation2 + $0x58] sm:$0xff] }
 0x52c   : > { %14253 = vmatprep.mubr.bf16.mxu0 %v22294_v46 }
 0x532   : > { %12220 = vmatmul.mubr.bf16.gmra.mrb[24].mxu1 %v15586_v20 }
 0x533   : > { %14254 = vmatmul.mubr.bf16.gmra.mrb[24].mxu0 %v22303_v56  ;;  %12229 = vmatprep.mubr.bf16.mxu1 %v15595_v51 }
 0x534   : > { %14263 = vmatprep.mubr.bf16.mxu0 %v15839_v53  ;;  %v3850_v53 = vld [vmem:[#allocation2 + $0x60] sm:$0xff] }
 0x53a   : > { %12230 = vmatmul.mubr.bf16.gmra.mrb[28].mxu1 %v15594_v11 }
 0x53b   : > { %14264 = vmatmul.mubr.bf16.gmra.mrb[28].mxu0 %v15838_v42 }
 0x5d5   : > { %v12161_v59 = vpop.f32.mrb[0].mxu1 }
 0x5d6   : > { %v14195_v30 = vpop.f32.mrb[0].mxu0  ;;  %v12163_v17 = vpop.f32.mrb[1].mxu1 }
 0x5d7   : > { %v17033_v46 = vadd.f32 %v14195_v30, %v12161_v59  ;;  %v14197_v13 = vpop.f32.mrb[1].mxu0  ;;  %v12165_v6 = vpop.f32.mrb[2].mxu1 }
 0x5d8   : > { %v17034_v7 = vadd.f32 %v14197_v13, %v12163_v17  ;;  %v14199_v10 = vpop.f32.mrb[2].mxu0  ;;  %v12167_v56 = vpop.f32.mrb[3].mxu1 }
 0x5d9   : > { %v14274_v52 = vadd.f32 %v17033_v46, %v3838_v50  ;;  %v17035_v62 = vadd.f32 %v14199_v10, %v12165_v6  ;;  %v14201_v38 = vpop.f32.mrb[3].mxu0  ;;  %v3851_v50 = vld [vmem:[#allocation2 + $0x68] sm:$0xff]  ;;  %v3853_v10 = vld [vmem:[#allocation2 + $0x78] sm:$0xff] }
 0x5da   : > { %v14275_v1 = vadd.f32 %v17034_v7, %v3839_v60  ;;  %v17036_v22 = vadd.f32 %v14201_v38, %v12167_v56  ;;  %v3852_v60 = vld [vmem:[#allocation2 + $0x70] sm:$0xff] }
 0x5db   : > { %14306 = vst [vmem:[#allocation2] sm:$0xff] %v14274_v52  ;;  %v14276_v36 = vadd.f32 %v17035_v62, %v3840_v26 }
 0x5dc   : > { %14307 = vst [vmem:[#allocation2 + $0x8] sm:$0xff] %v14275_v1  ;;  %v14277_v34 = vadd.f32 %v17036_v22, %v3841_v18  ;;  %v3854_v22 = vld [vmem:[#allocation2 + $0x80] sm:$0xff] }
 0x5dd   : > { %14308 = vst [vmem:[#allocation2 + $0x10] sm:$0xff] %v14276_v36  ;;  %v12171_v47 = vpop.f32.mrb[4].mxu1 }
 0x5de   : > { %14309 = vst [vmem:[#allocation2 + $0x18] sm:$0xff] %v14277_v34  ;;  %v14205_v2 = vpop.f32.mrb[4].mxu0  ;;  %v12173_v27 = vpop.f32.mrb[5].mxu1 }
 0x5df   : > { %v17037_v61 = vadd.f32 %v14205_v2, %v12171_v47  ;;  %v14207_v16 = vpop.f32.mrb[5].mxu0  ;;  %v12175_v4 = vpop.f32.mrb[6].mxu1 }
 0x5e0   : > { %v17038_v23 = vadd.f32 %v14207_v16, %v12173_v27  ;;  %v14209_v43 = vpop.f32.mrb[6].mxu0  ;;  %v12177_v24 = vpop.f32.mrb[7].mxu1 }
 0x5e1   : > { %v14278_v19 = vadd.f32 %v17037_v61, %v3842_v15  ;;  %v17039_v40 = vadd.f32 %v14209_v43, %v12175_v4  ;;  %v14211_v39 = vpop.f32.mrb[7].mxu0  ;;  %v3855_v15 = vld [vmem:[#allocation2 + $0x88] sm:$0xff]  ;;  %v3857_v43 = vld [vmem:[#allocation2 + $0x98] sm:$0xff] }
 0x5e2   : > { %v14279_v8 = vadd.f32 %v17038_v23, %v3843_v32  ;;  %v17040_v28 = vadd.f32 %v14211_v39, %v12177_v24  ;;  %v3856_v32 = vld [vmem:[#allocation2 + $0x90] sm:$0xff] }
 0x5e3   : > { %14310 = vst [vmem:[#allocation2 + $0x20] sm:$0xff] %v14278_v19  ;;  %v14280_v12 = vadd.f32 %v17039_v40, %v3844_v58 }
 0x5e4   : > { %14311 = vst [vmem:[#allocation2 + $0x28] sm:$0xff] %v14279_v8  ;;  %v14281_v37 = vadd.f32 %v17040_v28, %v3845_v44  ;;  %v3858_v28 = vld [vmem:[#allocation2 + $0xa0] sm:$0xff] }
 0x5e5   : > { %14312 = vst [vmem:[#allocation2 + $0x30] sm:$0xff] %v14280_v12  ;;  %v12181_v49 = vpop.f32.mrb[8].mxu1 }
 0x5e6   : > { %14313 = vst [vmem:[#allocation2 + $0x38] sm:$0xff] %v14281_v37  ;;  %v14215_v9 = vpop.f32.mrb[8].mxu0  ;;  %v12183_v54 = vpop.f32.mrb[9].mxu1 }
 0x5e7   : > { %v17041_v33 = vadd.f32 %v14215_v9, %v12181_v49  ;;  %v14217_v14 = vpop.f32.mrb[9].mxu0  ;;  %v12185_v5 = vpop.f32.mrb[10].mxu1 }
 0x5e8   : > { %v17042_v0 = vadd.f32 %v14217_v14, %v12183_v54  ;;  %v14219_v31 = vpop.f32.mrb[10].mxu0  ;;  %v12187_v3 = vpop.f32.mrb[11].mxu1 }
 0x5e9   : > { %v14282_v29 = vadd.f32 %v17041_v33, %v3846_v35  ;;  %v17043_v41 = vadd.f32 %v14219_v31, %v12185_v5  ;;  %v14221_v21 = vpop.f32.mrb[11].mxu0  ;;  %v3859_v35 = vld [vmem:[#allocation2 + $0xa8] sm:$0xff]  ;;  %v3861_v31 = vld [vmem:[#allocation2 + $0xb8] sm:$0xff] }
 0x5ea   : > { %v14283_v20 = vadd.f32 %v17042_v0, %v3847_v45  ;;  %v17044_v55 = vadd.f32 %v14221_v21, %v12187_v3  ;;  %v3860_v45 = vld [vmem:[#allocation2 + $0xb0] sm:$0xff] }
 0x5eb   : > { %14314 = vst [vmem:[#allocation2 + $0x40] sm:$0xff] %v14282_v29  ;;  %v14284_v63 = vadd.f32 %v17043_v41, %v3848_v48 }
 0x5ec   : > { %14315 = vst [vmem:[#allocation2 + $0x48] sm:$0xff] %v14283_v20  ;;  %v14285_v51 = vadd.f32 %v17044_v55, %v3849_v57  ;;  %v3862_v55 = vld [vmem:[#allocation2 + $0xc0] sm:$0xff] }
 0x5ed   : > { %14316 = vst [vmem:[#allocation2 + $0x50] sm:$0xff] %v14284_v63  ;;  %v12191_v25 = vpop.f32.mrb[12].mxu1 }
 0x5ee   : > { %14317 = vst [vmem:[#allocation2 + $0x58] sm:$0xff] %v14285_v51  ;;  %v14225_v11 = vpop.f32.mrb[12].mxu0  ;;  %v12193_v59 = vpop.f32.mrb[13].mxu1 }
 0x5ef   : > { %v17045_v42 = vadd.f32 %v14225_v11, %v12191_v25  ;;  %v14227_v30 = vpop.f32.mrb[13].mxu0  ;;  %v12195_v17 = vpop.f32.mrb[14].mxu1 }
 0x5f0   : > { %v17046_v46 = vadd.f32 %v14227_v30, %v12193_v59  ;;  %v14229_v13 = vpop.f32.mrb[14].mxu0  ;;  %v12197_v26 = vpop.f32.mrb[15].mxu1 }
 0x5f1   : > { %v14286_v7 = vadd.f32 %v17045_v42, %v3850_v53  ;;  %v17047_v6 = vadd.f32 %v14229_v13, %v12195_v17  ;;  %v14231_v52 = vpop.f32.mrb[15].mxu0  ;;  %v3863_v53 = vld [vmem:[#allocation2 + $0xc8] sm:$0xff]  ;;  %v3865_v13 = vld [vmem:[#allocation2 + $0xd8] sm:$0xff] }
 0x5f2   : > { %v14287_v62 = vadd.f32 %v17046_v46, %v3851_v50  ;;  %v17048_v56 = vadd.f32 %v14231_v52, %v12197_v26  ;;  %v3864_v50 = vld [vmem:[#allocation2 + $0xd0] sm:$0xff] }
 0x5f3   : > { %14318 = vst [vmem:[#allocation2 + $0x60] sm:$0xff] %v14286_v7  ;;  %v14288_v18 = vadd.f32 %v17047_v6, %v3852_v60 }
 0x5f4   : > { %14319 = vst [vmem:[#allocation2 + $0x68] sm:$0xff] %v14287_v62  ;;  %v14289_v38 = vadd.f32 %v17048_v56, %v3853_v10  ;;  %v3866_v56 = vld [vmem:[#allocation2 + $0xe0] sm:$0xff] }
 0x5f5   : > { %14320 = vst [vmem:[#allocation2 + $0x70] sm:$0xff] %v14288_v18  ;;  %v12201_v1 = vpop.f32.mrb[16].mxu1 }
 0x5f6   : > { %14321 = vst [vmem:[#allocation2 + $0x78] sm:$0xff] %v14289_v38  ;;  %v14235_v36 = vpop.f32.mrb[16].mxu0  ;;  %v12203_v47 = vpop.f32.mrb[17].mxu1 }
 0x5f7   : > { %v17049_v34 = vadd.f32 %v14235_v36, %v12201_v1  ;;  %v14237_v2 = vpop.f32.mrb[17].mxu0  ;;  %v12205_v27 = vpop.f32.mrb[18].mxu1 }
 0x5f8   : > { %v17050_v61 = vadd.f32 %v14237_v2, %v12203_v47  ;;  %v14239_v16 = vpop.f32.mrb[18].mxu0  ;;  %v12207_v58 = vpop.f32.mrb[19].mxu1 }
 0x5f9   : > { %v14290_v23 = vadd.f32 %v17049_v34, %v3854_v22  ;;  %v17051_v4 = vadd.f32 %v14239_v16, %v12205_v27  ;;  %v14241_v19 = vpop.f32.mrb[19].mxu0  ;;  %v3867_v22 = vld [vmem:[#allocation2 + $0xe8] sm:$0xff]  ;;  %v3869_v16 = vld [vmem:[#allocation2 + $0xf8] sm:$0xff] }
 0x5fa   : > { %v14291_v40 = vadd.f32 %v17050_v61, %v3855_v15  ;;  %v17052_v24 = vadd.f32 %v14241_v19, %v12207_v58  ;;  %v3868_v15 = vld [vmem:[#allocation2 + $0xf0] sm:$0xff] }
 0x5fb   : > { %14322 = vst [vmem:[#allocation2 + $0x80] sm:$0xff] %v14290_v23  ;;  %v14292_v44 = vadd.f32 %v17051_v4, %v3856_v32 }
 0x5fc   : > { %14323 = vst [vmem:[#allocation2 + $0x88] sm:$0xff] %v14291_v40  ;;  %v14293_v39 = vadd.f32 %v17052_v24, %v3857_v43  ;;  %v14342_v40 = vld [vmem:[#allocation2] sm:$0xff] (!%p16992_p12)  ;;  %v14343_v24 = vld [vmem:[#allocation2 + $0x8] sm:$0xff] (!%p16992_p12) }
 0x5fd   : > { %14324 = vst [vmem:[#allocation2 + $0x90] sm:$0xff] %v14292_v44  ;;  %v12211_v8 = vpop.f32.mrb[20].mxu1  ;;  %v14344_v44 = vld [vmem:[#allocation2 + $0x10] sm:$0xff] (!%p16992_p12) }
 0x5fe   : > { %14325 = vst [vmem:[#allocation2 + $0x98] sm:$0xff] %v14293_v39  ;;  %v14245_v12 = vpop.f32.mrb[20].mxu0  ;;  %v12213_v49 = vpop.f32.mrb[21].mxu1  ;;  %v14411_v39 = vlaneseq (!%p16992_p12) }
 0x5ff   : > { %v17053_v37 = vadd.f32 %v14245_v12, %v12211_v8  ;;  %v14247_v9 = vpop.f32.mrb[21].mxu0  ;;  %v12215_v54 = vpop.f32.mrb[22].mxu1  ;;  %v14345_v8 = vld [vmem:[#allocation2 + $0x18] sm:$0xff] (!%p16992_p12)  ;;  %v14347_v12 = vld [vmem:[#allocation2 + $0x28] sm:$0xff] (!%p16992_p12) }
 0x600   : > { %v17054_v33 = vadd.f32 %v14247_v9, %v12213_v49  ;;  %v14249_v14 = vpop.f32.mrb[22].mxu0  ;;  %v12217_v48 = vpop.f32.mrb[23].mxu1  ;;  %v20412_v49 = vmov (!%p16992_p12), 1983009808   ;;  %v14348_v9 = vld [vmem:[#allocation2 + $0x30] sm:$0xff] (!%p16992_p12) }
 0x601   : > { %v14294_v0 = vadd.f32 %v17053_v37, %v3858_v28  ;;  %v17055_v5 = vadd.f32 %v14249_v14, %v12215_v54  ;;  %v14251_v29 = vpop.f32.mrb[23].mxu0  ;;  %v14346_v28 = vld [vmem:[#allocation2 + $0x20] sm:$0xff] (!%p16992_p12)  ;;  %v14374_v37 = vadd.f32 (!%p16992_p12), %v14344_v44, %v14342_v40  ;;  %v14375_v54 = vadd.f32 (!%p16992_p12), %v14345_v8, %v14343_v24 }
 0x602   : > { %v14295_v41 = vadd.f32 %v17054_v33, %v3859_v35  ;;  %v17056_v3 = vadd.f32 %v14251_v29, %v12217_v48  ;;  %v14409_v35 = vunpack.c.l.s4 (!%p16992_p12), %v20412_v49  ;;  %v14349_v33 = vld [vmem:[#allocation2 + $0x38] sm:$0xff] (!%p16992_p12)  ;;  %v14350_v14 = vld [vmem:[#allocation2 + $0x40] sm:$0xff] (!%p16992_p12)  ;;  %v14352_v29 = vld [vmem:[#allocation2 + $0x50] sm:$0xff] (!%p16992_p12) }
 0x603   : > { %14326 = vst [vmem:[#allocation2 + $0xa0] sm:$0xff] %v14294_v0  ;;  %v14296_v57 = vadd.f32 %v17055_v5, %v3860_v45  ;;  %v14412_v45 = vshrl.u32 (!%p16992_p12), %v14411_v39, 7  ;;  %v14376_v0 = vadd.f32 (!%p16992_p12), %v14348_v9, %v14346_v28  ;;  %v14377_v5 = vadd.f32 (!%p16992_p12), %v14349_v33, %v14347_v12 }
 0x604   : > { %14327 = vst [vmem:[#allocation2 + $0xa8] sm:$0xff] %v14295_v41  ;;  %v14297_v21 = vadd.f32 %v17056_v3, %v3861_v31  ;;  %v14410_v48 = vunpack.c.0.s8 (!%p16992_p12), %v14409_v35  ;;  %v14351_v31 = vld [vmem:[#allocation2 + $0x48] sm:$0xff] (!%p16992_p12)  ;;  %v14353_v41 = vld [vmem:[#allocation2 + $0x58] sm:$0xff] (!%p16992_p12)  ;;  %v14406_v3 = vcombine.low (!%p16992_p12), %v14374_v37, %v14375_v54 }
 0x605   : > { %14328 = vst [vmem:[#allocation2 + $0xb0] sm:$0xff] %v14296_v57  ;;  %v12221_v20 = vpop.f32.mrb[24].mxu1  ;;  %v14407_v57 = vcombine.high (!%p16992_p12), %v14374_v37, %v14375_v54 }
 0x606   : > { %14329 = vst [vmem:[#allocation2 + $0xb8] sm:$0xff] %v14297_v21  ;;  %v14255_v63 = vpop.f32.mrb[24].mxu0  ;;  %v12223_v25 = vpop.f32.mrb[25].mxu1  ;;  %v22825_v21 = vsub.s32 (!%p16992_p12), 0, %v14412_v45 }
 0x607   : > { %v17057_v51 = vadd.f32 %v14255_v63, %v12221_v20  ;;  %v14257_v11 = vpop.f32.mrb[25].mxu0  ;;  %v12225_v59 = vpop.f32.mrb[26].mxu1  ;;  %v14354_v20 = vld [vmem:[#allocation2 + $0x60] sm:$0xff] (!%p16992_p12)  ;;  %v14356_v63 = vld [vmem:[#allocation2 + $0x70] sm:$0xff] (!%p16992_p12) }
 0x608   : > { %v17058_v42 = vadd.f32 %v14257_v11, %v12223_v25  ;;  %v14259_v30 = vpop.f32.mrb[26].mxu0  ;;  %v12227_v60 = vpop.f32.mrb[27].mxu1  ;;  %v14424_v25 = vcombine.low (!%p16992_p12), %v14376_v0, %v14377_v5  ;;  %v22829_v11 = vsub.s32 (!%p16992_p12), 2, %v14412_v45 }
 0x609   : > { %v14298_v46 = vadd.f32 %v17057_v51, %v3862_v55  ;;  %v17059_v17 = vadd.f32 %v14259_v30, %v12225_v59  ;;  %v14261_v7 = vpop.f32.mrb[27].mxu0  ;;  %v14355_v55 = vld [vmem:[#allocation2 + $0x68] sm:$0xff] (!%p16992_p12)  ;;  %v22827_v51 = vsub.s32 (!%p16992_p12), %v14410_v48, %v14412_v45  ;;  %v22831_v59 = vadd.f32 (!%p16992_p12), %v14352_v29, %v14350_v14 }
 0x60a   : > { %v14299_v6 = vadd.f32 %v17058_v42, %v3863_v53  ;;  %v17060_v26 = vadd.f32 %v14261_v7, %v12227_v60  ;;  %v14425_v53 = vcombine.high (!%p16992_p12), %v14376_v0, %v14377_v5  ;;  %v14357_v42 = vld [vmem:[#allocation2 + $0x78] sm:$0xff] (!%p16992_p12)  ;;  %v22835_v30 = vadd.f32 (!%p16992_p12), %v14356_v63, %v14354_v20 }
 0x60b   : > { %14330 = vst [vmem:[#allocation2 + $0xc0] sm:$0xff] %v14298_v46  ;;  %v14300_v10 = vadd.f32 %v17059_v17, %v3864_v50  ;;  %v22833_v50 = vadd.f32 (!%p16992_p12), %v14353_v41, %v14351_v31  ;;  %v22837_v46 = vadd.f32 (!%p16992_p12), %v14357_v42, %v14355_v55  ;;  %v14414_v17 = vrot.slane (!%p16992_p12), %v14406_v3, %v22827_v51 }
 0x60c   : > { %14331 = vst [vmem:[#allocation2 + $0xc8] sm:$0xff] %v14299_v6  ;;  %v14301_v52 = vadd.f32 %v17060_v26, %v3865_v13  ;;  %v14421_v60 = vrot.slane (!%p16992_p12), %v14407_v57, %v22827_v51  ;;  %v14432_v13 = vrot.slane (!%p16992_p12), %v14424_v25, %v22827_v51  ;;  %v14439_v7 = vrot.slane (!%p16992_p12), %v14425_v53, %v22827_v51 }
 0x60d   : > { %14332 = vst [vmem:[#allocation2 + $0xd0] sm:$0xff] %v14300_v10  ;;  %v12231_v62 = vpop.f32.mrb[28].mxu1  ;;  %v14442_v6 = vcombine.low (!%p16992_p12), %v22831_v59, %v22833_v50  ;;  %v14443_v26 = vcombine.high (!%p16992_p12), %v22831_v59, %v22833_v50  ;;  %v14460_v10 = vcombine.low (!%p16992_p12), %v22835_v30, %v22837_v46 }
 0x60e   : > { %14333 = vst [vmem:[#allocation2 + $0xd8] sm:$0xff] %v14301_v52  ;;  %v14265_v18 = vpop.f32.mrb[28].mxu0  ;;  %v12233_v1 = vpop.f32.mrb[29].mxu1  ;;  %v14461_v52 = vcombine.high (!%p16992_p12), %v22835_v30, %v22837_v46 }
 0x60f   : > { %v17061_v38 = vadd.f32 %v14265_v18, %v12231_v62  ;;  %v14267_v36 = vpop.f32.mrb[29].mxu0  ;;  %v12235_v47 = vpop.f32.mrb[30].mxu1  ;;  %v14422_v62 = vcombine.high (!%p16992_p12), %v14414_v17, %v14414_v17  ;;  %v14440_v18 = vcombine.high (!%p16992_p12), %v14432_v13, %v14432_v13  ;;  %v14450_v53 = vrot.slane (!%p16992_p12), %v14442_v6, %v22827_v51 }
 0x610   : > { %v17062_v34 = vadd.f32 %v14267_v36, %v12233_v1  ;;  %v14269_v2 = vpop.f32.mrb[30].mxu0  ;;  %v12237_v32 = vpop.f32.mrb[31].mxu1  ;;  %14341 = sbr.rel (%p16992_p12) target bundleno = 1622 (0x656), region = 44  ;;  %v16993_v1 = vrot.slane (!%p16992_p12), %v14414_v17, 9  ;;  %v16997_v36 = vrot.slane (!%p16992_p12), %v14432_v13, 9  ;;  %v14457_v50 = vrot.slane (!%p16992_p12), %v14443_v26, %v22827_v51 }
 0x611   : > { %v14302_v61 = vadd.f32 %v17061_v38, %v3866_v56  ;;  %v17063_v27 = vadd.f32 %v14269_v2, %v12235_v47  ;;  %v14271_v23 = vpop.f32.mrb[31].mxu0  ;;  %v14423_v56 = vcombine.high (!%p16992_p12), %v14421_v60, %v14421_v60  ;;  %v14441_v38 = vcombine.high (!%p16992_p12), %v14439_v7, %v14439_v7 }
 0x612   : > { %v14303_v4 = vadd.f32 %v17062_v34, %v3867_v22  ;;  %v17064_v58 = vadd.f32 %v14271_v23, %v12237_v32  ;;  %v16995_v22 = vrot.slane (!%p16992_p12), %v14421_v60, 9  ;;  %v16999_v34 = vrot.slane (!%p16992_p12), %v14439_v7, 9 }
 0x613   : > { %14334 = vst [vmem:[#allocation2 + $0xe0] sm:$0xff] %v14302_v61  ;;  %v14304_v43 = vadd.f32 %v17063_v27, %v3868_v15  ;;  %v16994_v47 = vrot.slane (!%p16992_p12), %v14422_v62, 9  ;;  %v16996_v15 = vrot.slane (!%p16992_p12), %v14423_v56, 9  ;;  %v16998_v2 = vrot.slane (!%p16992_p12), %v14440_v18, 9 }
 0x614   : > { %14335 = vst [vmem:[#allocation2 + $0xe8] sm:$0xff] %v14303_v4  ;;  %v14305_v19 = vadd.f32 %v17064_v58, %v3869_v16  ;;  %v17000_v61 = vrot.slane (!%p16992_p12), %v14441_v38, 9  ;;  %v14678_v27 = vadd.f32 (!%p16992_p12), %v16993_v1, %v14414_v17  ;;  %v14680_v32 = vadd.f32 (!%p16992_p12), %v16995_v22, %v14421_v60 }
 0x615   : > { %14336 = vst [vmem:[#allocation2 + $0xf0] sm:$0xff] %v14304_v43  ;;  %v14682_v16 = vadd.f32 (!%p16992_p12), %v16997_v36, %v14432_v13  ;;  %v14684_v23 = vadd.f32 (!%p16992_p12), %v16999_v34, %v14439_v7  ;;  %v14679_v4 = vadd.f32 (!%p16992_p12), %v16994_v47, %v14422_v62  ;;  %v14681_v58 = vadd.f32 (!%p16992_p12), %v16996_v15, %v14423_v56 }
 0x616   : > { %14337 = vst [vmem:[#allocation2 + $0xf8] sm:$0xff] %v14305_v19  ;;  %v14683_v43 = vadd.f32 (!%p16992_p12), %v16998_v2, %v14440_v18  ;;  %v14685_v19 = vadd.f32 (!%p16992_p12), %v17000_v61, %v14441_v38  ;;  %v14710_v40 = vmul.f32 (!%p16992_p12), 0.25, %v14678_v27  ;;  %v14712_v24 = vmul.f32 (!%p16992_p12), 0.25, %v14680_v32 }
 0x617   : > { %v14714_v44 = vmul.f32 0.25, %v14682_v16  ;;  %v14716_v39 = vmul.f32 0.25, %v14684_v23  ;;  %v14711_v8 = vmul.f32 0.25, %v14679_v4  ;;  %v14713_v28 = vmul.f32 0.25, %v14681_v58 }
 0x618   : > { %v14715_v12 = vmul.f32 0.25, %v14683_v43  ;;  %v14717_v37 = vmul.f32 0.25, %v14685_v19  ;;  %v14777_v49 = vrot.slane %v14710_v40, %v22825_v21  ;;  %v14793_v35 = vrot.slane %v14712_v24, %v22825_v21 }
 0x619   : > { %v14809_v9 = vrot.slane %v14714_v44, %v22825_v21  ;;  %v14825_v33 = vrot.slane %v14716_v39, %v22825_v21  ;;  %v14785_v54 = vrot.slane %v14711_v8, %v22825_v21  ;;  %v14801_v45 = vrot.slane %v14713_v28, %v22825_v21 }
 0x61a   : > { %v14817_v14 = vrot.slane %v14715_v12, %v22825_v21  ;;  %v14833_v0 = vrot.slane %v14717_v37, %v22825_v21  ;;  %v14781_v5 = vrot.slane %v14710_v40, %v22829_v11  ;;  %v14789_v48 = vrot.slane %v14711_v8, %v22829_v11 }
 0x61b   : > { %v14797_v31 = vrot.slane %v14712_v24, %v22829_v11  ;;  %v14805_v29 = vrot.slane %v14713_v28, %v22829_v11  ;;  %v15031_v41 = vsel %vm15030_vm0, %v14785_v54, %v14777_v49  ;;  %v14813_v3 = vrot.slane %v14714_v44, %v22829_v11 }
 0x61c   : > { %v14821_v57 = vrot.slane %v14715_v12, %v22829_v11  ;;  %v14829_v20 = vrot.slane %v14716_v39, %v22829_v11  ;;  %v15033_v55 = vsel %vm15032_vm1, %v14793_v35, %v15031_v41  ;;  %v14837_v63 = vrot.slane %v14717_v37, %v22829_v11  ;;  %v14359_v41 = vld [vmem:[#allocation2 + $0x88] sm:$0xff] }
 0x61d   : > { %v15044_v25 = vsel %vm15030_vm0, %v14789_v48, %v14781_v5  ;;  %v15035_v42 = vsel %vm15034_vm2, %v14801_v45, %v15033_v55  ;;  %v14468_v30 = vrot.slane %v14460_v10, %v22827_v51  ;;  %v14458_v60 = vcombine.high %v14450_v53, %v14450_v53 }
 0x61e   : > { %v15045_v59 = vsel %vm15032_vm1, %v14797_v31, %v15044_v25  ;;  %v15037_v46 = vsel %vm15036_vm3, %v14809_v9, %v15035_v42  ;;  %v14475_v13 = vrot.slane %v14461_v52, %v22827_v51  ;;  %v14459_v62 = vcombine.high %v14457_v50, %v14457_v50  ;;  %v14363_v42 = vld [vmem:[#allocation2 + $0xa8] sm:$0xff] }
 0x61f   : > { %v15046_v17 = vsel %vm15034_vm2, %v14805_v29, %v15045_v59  ;;  %v15039_v7 = vsel %vm15038_vm4, %v14817_v14, %v15037_v46  ;;  %v14476_v56 = vcombine.high %v14468_v30, %v14468_v30  ;;  %v17001_v38 = vrot.slane %v14450_v53, 9  ;;  %v14364_v59 = vld [vmem:[#allocation2 + $0xb0] sm:$0xff] }
 0x620   : > { %v15047_v6 = vsel %vm15036_vm3, %v14813_v3, %v15046_v17  ;;  %v15041_v18 = vsel %vm15040_vm5, %v14825_v33, %v15039_v7  ;;  %v14477_v10 = vcombine.high %v14475_v13, %v14475_v13  ;;  %v17002_v36 = vrot.slane %v14458_v60, 9  ;;  %v14360_v3 = vld [vmem:[#allocation2 + $0x90] sm:$0xff] }
 0x621   : > { %v15048_v26 = vsel %vm15038_vm4, %v14821_v57, %v15047_v6  ;;  %v15043_v1 = vsel %vm15042_vm6, %v14833_v0, %v15041_v18  ;;  %v17003_v34 = vrot.slane %v14457_v50, 9  ;;  %v17004_v47 = vrot.slane %v14459_v62, 9  ;;  %v14358_v0 = vld [vmem:[#allocation2 + $0x80] sm:$0xff]  ;;  %v14361_v57 = vld [vmem:[#allocation2 + $0x98] sm:$0xff]  ;;  %v14368_v7 = vld [vmem:[#allocation2 + $0xd0] sm:$0xff] }
 0x622   : > { %v15049_v22 = vsel %vm15040_vm5, %v14829_v20, %v15048_v26  ;;  %15101 = vst [vmem:[%s20657_s11] sm:$0xff] %v15043_v1  ;;  %v17005_v15 = vrot.slane %v14468_v30, 9  ;;  %v17006_v2 = vrot.slane %v14476_v56, 9  ;;  %v17007_v61 = vrot.slane %v14475_v13, 9 }
 0x623   : > { %v15050_v52 = vsel %vm15042_vm6, %v14837_v63, %v15049_v22  ;;  %v17008_v27 = vrot.slane %v14477_v10, 9  ;;  %v14686_v32 = vadd.f32 %v17001_v38, %v14450_v53  ;;  %v14687_v16 = vadd.f32 %v17002_v36, %v14458_v60  ;;  %v14362_v53 = vld [vmem:[#allocation2 + $0xa0] sm:$0xff]  ;;  %v14365_v60 = vld [vmem:[#allocation2 + $0xb8] sm:$0xff]  ;;  %v14367_v22 = vld [vmem:[#allocation2 + $0xc8] sm:$0xff] }
 0x624   : > { %15102 = vst [vmem:[%s20657_s11 + $0x8] sm:$0xff] %v15050_v52  ;;  %v14688_v23 = vadd.f32 %v17003_v34, %v14457_v50  ;;  %v14689_v4 = vadd.f32 %v17004_v47, %v14459_v62  ;;  %v14690_v58 = vadd.f32 %v17005_v15, %v14468_v30  ;;  %v14691_v43 = vadd.f32 %v17006_v2, %v14476_v56  ;;  %v14369_v36 = vld [vmem:[#allocation2 + $0xd8] sm:$0xff]  ;;  %v14370_v15 = vld [vmem:[#allocation2 + $0xe0] sm:$0xff]  ;;  %v14372_v2 = vld [vmem:[#allocation2 + $0xf0] sm:$0xff] }
 0x625   : > { %v14692_v19 = vadd.f32 %v17007_v61, %v14475_v13  ;;  %v14693_v40 = vadd.f32 %v17008_v27, %v14477_v10  ;;  %v14718_v24 = vmul.f32 0.25, %v14686_v32  ;;  %v14719_v44 = vmul.f32 0.25, %v14687_v16  ;;  %v14366_v13 = vld [vmem:[#allocation2 + $0xc0] sm:$0xff] }
 0x626   : > { %v14720_v39 = vmul.f32 0.25, %v14688_v23  ;;  %v14721_v8 = vmul.f32 0.25, %v14689_v4  ;;  %v14722_v28 = vmul.f32 0.25, %v14690_v58  ;;  %v14723_v12 = vmul.f32 0.25, %v14691_v43  ;;  %v14371_v4 = vld [vmem:[#allocation2 + $0xe8] sm:$0xff]  ;;  %v14373_v58 = vld [vmem:[#allocation2 + $0xf8] sm:$0xff] }
 0x627   : > { %v14724_v37 = vmul.f32 0.25, %v14692_v19  ;;  %v14725_v49 = vmul.f32 0.25, %v14693_v40  ;;  %v14841_v35 = vrot.slane %v14718_v24, %v22825_v21  ;;  %v14849_v9 = vrot.slane %v14719_v44, %v22825_v21 }
 0x628   : > { %v14857_v33 = vrot.slane %v14720_v39, %v22825_v21  ;;  %v14865_v54 = vrot.slane %v14721_v8, %v22825_v21  ;;  %v14873_v45 = vrot.slane %v14722_v28, %v22825_v21  ;;  %v14881_v14 = vrot.slane %v14723_v12, %v22825_v21 }
 0x629   : > { %v14889_v5 = vrot.slane %v14724_v37, %v22825_v21  ;;  %v14897_v48 = vrot.slane %v14725_v49, %v22825_v21  ;;  %v15051_v31 = vsel %vm15030_vm0, %v14849_v9, %v14841_v35  ;;  %v14845_v29 = vrot.slane %v14718_v24, %v22829_v11 }
 0x62a   : > { %v15052_v20 = vsel %vm15032_vm1, %v14857_v33, %v15051_v31  ;;  %v14853_v55 = vrot.slane %v14719_v44, %v22829_v11  ;;  %v14861_v63 = vrot.slane %v14720_v39, %v22829_v11  ;;  %v14869_v25 = vrot.slane %v14721_v8, %v22829_v11 }
 0x62b   : > { %v15053_v50 = vsel %vm15034_vm2, %v14865_v54, %v15052_v20  ;;  %v14877_v30 = vrot.slane %v14722_v28, %v22829_v11  ;;  %v14885_v46 = vrot.slane %v14723_v12, %v22829_v11  ;;  %v14893_v17 = vrot.slane %v14724_v37, %v22829_v11 }
 0x62c   : > { %v15054_v6 = vsel %vm15036_vm3, %v14873_v45, %v15053_v50  ;;  %v14901_v62 = vrot.slane %v14725_v49, %v22829_v11  ;;  %v15058_v56 = vsel %vm15030_vm0, %v14853_v55, %v14845_v29  ;;  %v14382_v18 = vadd.f32 %v14360_v3, %v14358_v0 }
 0x62d   : > { %v15055_v26 = vsel %vm15038_vm4, %v14881_v14, %v15054_v6  ;;  %v15059_v10 = vsel %vm15032_vm1, %v14861_v63, %v15058_v56  ;;  %v14383_v38 = vadd.f32 %v14361_v57, %v14359_v41  ;;  %v14384_v1 = vadd.f32 %v14364_v59, %v14362_v53 }
 0x62e   : > { %v15056_v34 = vsel %vm15040_vm5, %v14889_v5, %v15055_v26  ;;  %v15060_v52 = vsel %vm15034_vm2, %v14869_v25, %v15059_v10  ;;  %v14385_v47 = vadd.f32 %v14365_v60, %v14363_v42  ;;  %v22912_v61 = vadd.f32 %v14368_v7, %v14366_v13 }
 0x62f   : > { %v15057_v27 = vsel %vm15042_vm6, %v14897_v48, %v15056_v34  ;;  %v15061_v32 = vsel %vm15036_vm3, %v14877_v30, %v15060_v52  ;;  %v14478_v16 = vcombine.low %v14382_v18, %v14383_v38  ;;  %v14479_v23 = vcombine.high %v14382_v18, %v14383_v38 }
 0x630   : > { %15103 = vst [vmem:[%s20657_s11 + $0x10] sm:$0xff] %v15057_v27  ;;  %v15062_v43 = vsel %vm15038_vm4, %v14885_v46, %v15061_v32  ;;  %v14496_v19 = vcombine.low %v14384_v1, %v14385_v47  ;;  %v14497_v40 = vcombine.high %v14384_v1, %v14385_v47  ;;  %v22918_v24 = vadd.f32 %v14369_v36, %v14367_v22 }
 0x631   : > { %v15063_v44 = vsel %vm15040_vm5, %v14893_v17, %v15062_v43  ;;  %v14486_v39 = vrot.slane %v14478_v16, %v22827_v51  ;;  %v14493_v8 = vrot.slane %v14479_v23, %v22827_v51  ;;  %v22923_v28 = vadd.f32 %v14372_v2, %v14370_v15 }
 0x632   : > { %v15064_v12 = vsel %vm15042_vm6, %v14901_v62, %v15063_v44  ;;  %v14504_v37 = vrot.slane %v14496_v19, %v22827_v51  ;;  %v14511_v49 = vrot.slane %v14497_v40, %v22827_v51  ;;  %v22928_v35 = vadd.f32 %v14373_v58, %v14371_v4 }
 0x633   : > { %15104 = vst [vmem:[%s20657_s11 + $0x18] sm:$0xff] %v15064_v12  ;;  %v14494_v9 = vcombine.high %v14486_v39, %v14486_v39  ;;  %v14495_v33 = vcombine.high %v14493_v8, %v14493_v8  ;;  %v17009_v54 = vrot.slane %v14486_v39, 9  ;;  %v17011_v45 = vrot.slane %v14493_v8, 9 }
 0x634   : > { %v14512_v14 = vcombine.high %v14504_v37, %v14504_v37  ;;  %v14513_v0 = vcombine.high %v14511_v49, %v14511_v49  ;;  %v17013_v5 = vrot.slane %v14504_v37, 9  ;;  %v17015_v48 = vrot.slane %v14511_v49, 9 }
 0x635   : > { %v17010_v31 = vrot.slane %v14494_v9, 9  ;;  %v17012_v29 = vrot.slane %v14495_v33, 9  ;;  %v14694_v41 = vadd.f32 %v17009_v54, %v14486_v39  ;;  %v14696_v3 = vadd.f32 %v17011_v45, %v14493_v8 }
 0x636   : > { %v17014_v57 = vrot.slane %v14512_v14, 9  ;;  %v17016_v20 = vrot.slane %v14513_v0, 9  ;;  %v14698_v55 = vadd.f32 %v17013_v5, %v14504_v37  ;;  %v14700_v63 = vadd.f32 %v17015_v48, %v14511_v49 }
 0x637   : > { %v14695_v25 = vadd.f32 %v17010_v31, %v14494_v9  ;;  %v14697_v53 = vadd.f32 %v17012_v29, %v14495_v33  ;;  %v14726_v42 = vmul.f32 0.25, %v14694_v41  ;;  %v14728_v59 = vmul.f32 0.25, %v14696_v3 }
 0x638   : > { %v14699_v50 = vadd.f32 %v17014_v57, %v14512_v14  ;;  %v14701_v30 = vadd.f32 %v17016_v20, %v14513_v0  ;;  %v14730_v46 = vmul.f32 0.25, %v14698_v55  ;;  %v14732_v17 = vmul.f32 0.25, %v14700_v63 }
 0x639   : > { %v14727_v60 = vmul.f32 0.25, %v14695_v25  ;;  %v14729_v13 = vmul.f32 0.25, %v14697_v53  ;;  %v14905_v7 = vrot.slane %v14726_v42, %v22825_v21  ;;  %v14921_v6 = vrot.slane %v14728_v59, %v22825_v21 }
 0x63a   : > { %v14731_v62 = vmul.f32 0.25, %v14699_v50  ;;  %v14733_v56 = vmul.f32 0.25, %v14701_v30  ;;  %v14937_v18 = vrot.slane %v14730_v46, %v22825_v21  ;;  %v14953_v26 = vrot.slane %v14732_v17, %v22825_v21 }
 0x63b   : > { %v14913_v10 = vrot.slane %v14727_v60, %v22825_v21  ;;  %v14929_v38 = vrot.slane %v14729_v13, %v22825_v21  ;;  %v14909_v1 = vrot.slane %v14726_v42, %v22829_v11  ;;  %v14917_v22 = vrot.slane %v14727_v60, %v22829_v11 }
 0x63c   : > { %v14945_v36 = vrot.slane %v14731_v62, %v22825_v21  ;;  %v14961_v34 = vrot.slane %v14733_v56, %v22825_v21  ;;  %v14925_v52 = vrot.slane %v14728_v59, %v22829_v11  ;;  %v14933_v47 = vrot.slane %v14729_v13, %v22829_v11 }
 0x63d   : > { %v15065_v15 = vsel %vm15030_vm0, %v14913_v10, %v14905_v7  ;;  %v14941_v2 = vrot.slane %v14730_v46, %v22829_v11  ;;  %v14949_v27 = vrot.slane %v14731_v62, %v22829_v11  ;;  %v14957_v32 = vrot.slane %v14732_v17, %v22829_v11 }
 0x63e   : > { %v15066_v16 = vsel %vm15032_vm1, %v14921_v6, %v15065_v15  ;;  %v14965_v23 = vrot.slane %v14733_v56, %v22829_v11  ;;  %v15072_v4 = vsel %vm15030_vm0, %v14917_v22, %v14909_v1  ;;  %v14514_v58 = vcombine.low %v22912_v61, %v22918_v24 }
 0x63f   : > { %v15067_v43 = vsel %vm15034_vm2, %v14929_v38, %v15066_v16  ;;  %v15073_v19 = vsel %vm15032_vm1, %v14925_v52, %v15072_v4  ;;  %v14515_v40 = vcombine.high %v22912_v61, %v22918_v24  ;;  %v14532_v44 = vcombine.low %v22923_v28, %v22928_v35 }
 0x640   : > { %v15068_v39 = vsel %vm15036_vm3, %v14937_v18, %v15067_v43  ;;  %v15074_v8 = vsel %vm15034_vm2, %v14933_v47, %v15073_v19  ;;  %v14522_v12 = vrot.slane %v14514_v58, %v22827_v51  ;;  %v14533_v37 = vcombine.high %v22923_v28, %v22928_v35 }
 0x641   : > { %v15069_v49 = vsel %vm15038_vm4, %v14945_v36, %v15068_v39  ;;  %v15075_v9 = vsel %vm15036_vm3, %v14941_v2, %v15074_v8  ;;  %v14529_v61 = vrot.slane %v14515_v40, %v22827_v51  ;;  %v14540_v24 = vrot.slane %v14532_v44, %v22827_v51 }
 0x642   : > { %v15070_v33 = vsel %vm15040_vm5, %v14953_v26, %v15069_v49  ;;  %v15076_v54 = vsel %vm15038_vm4, %v14949_v27, %v15075_v9  ;;  %v14530_v45 = vcombine.high %v14522_v12, %v14522_v12  ;;  %v14547_v14 = vrot.slane %v14533_v37, %v22827_v51 }
 0x643   : > { %v15071_v0 = vsel %vm15042_vm6, %v14961_v34, %v15070_v33  ;;  %v15077_v28 = vsel %vm15040_vm5, %v14957_v32, %v15076_v54  ;;  %v14531_v35 = vcombine.high %v14529_v61, %v14529_v61  ;;  %v14548_v5 = vcombine.high %v14540_v24, %v14540_v24 }
 0x644   : > { %15105 = vst [vmem:[%s20657_s11 + $0x20] sm:$0xff] %v15071_v0  ;;  %v15078_v48 = vsel %vm15042_vm6, %v14965_v23, %v15077_v28  ;;  %v14549_v31 = vcombine.high %v14547_v14, %v14547_v14  ;;  %v17017_v29 = vrot.slane %v14522_v12, 9  ;;  %v17018_v41 = vrot.slane %v14530_v45, 9 }
 0x645   : > { %15106 = vst [vmem:[%s20657_s11 + $0x28] sm:$0xff] %v15078_v48  ;;  %v17019_v3 = vrot.slane %v14529_v61, 9  ;;  %v17020_v57 = vrot.slane %v14531_v35, 9  ;;  %v17021_v20 = vrot.slane %v14540_v24, 9  ;;  %v17022_v55 = vrot.slane %v14548_v5, 9 }
 0x646   : > { %v17023_v63 = vrot.slane %v14547_v14, 9  ;;  %v17024_v25 = vrot.slane %v14549_v31, 9  ;;  %v14702_v51 = vadd.f32 %v17017_v29, %v14522_v12  ;;  %v14703_v53 = vadd.f32 %v17018_v41, %v14530_v45 }
 0x647   : > { %v14704_v42 = vadd.f32 %v17019_v3, %v14529_v61  ;;  %v14705_v59 = vadd.f32 %v17020_v57, %v14531_v35  ;;  %v14706_v50 = vadd.f32 %v17021_v20, %v14540_v24  ;;  %v14707_v30 = vadd.f32 %v17022_v55, %v14548_v5 }
 0x648   : > { %v14708_v46 = vadd.f32 %v17023_v63, %v14547_v14  ;;  %v14709_v17 = vadd.f32 %v17024_v25, %v14549_v31  ;;  %v14734_v60 = vmul.f32 0.25, %v14702_v51  ;;  %v14735_v13 = vmul.f32 0.25, %v14703_v53 }
 0x649   : > { %v14736_v7 = vmul.f32 0.25, %v14704_v42  ;;  %v14737_v6 = vmul.f32 0.25, %v14705_v59  ;;  %v14738_v62 = vmul.f32 0.25, %v14706_v50  ;;  %v14739_v56 = vmul.f32 0.25, %v14707_v30 }
 0x64a   : > { %v14740_v18 = vmul.f32 0.25, %v14708_v46  ;;  %v14741_v26 = vmul.f32 0.25, %v14709_v17  ;;  %v14969_v10 = vrot.slane %v14734_v60, %v22825_v21  ;;  %v14977_v38 = vrot.slane %v14735_v13, %v22825_v21 }
 0x64b   : > { %v14985_v1 = vrot.slane %v14736_v7, %v22825_v21  ;;  %v14993_v22 = vrot.slane %v14737_v6, %v22825_v21  ;;  %v15001_v36 = vrot.slane %v14738_v62, %v22825_v21  ;;  %v15009_v34 = vrot.slane %v14739_v56, %v22825_v21 }
 0x64c   : > { %v15017_v52 = vrot.slane %v14740_v18, %v22825_v21  ;;  %v15079_v47 = vsel %vm15030_vm0, %v14977_v38, %v14969_v10  ;;  %v14973_v15 = vrot.slane %v14734_v60, %v22829_v11  ;;  %v14981_v27 = vrot.slane %v14735_v13, %v22829_v11 }
 0x64d   : > { %v15080_v2 = vsel %vm15032_vm1, %v14985_v1, %v15079_v47  ;;  %v14989_v32 = vrot.slane %v14736_v7, %v22829_v11  ;;  %v14997_v16 = vrot.slane %v14737_v6, %v22829_v11  ;;  %v15025_v23 = vrot.slane %v14741_v26, %v22825_v21 }
 0x64e   : > { %v15081_v4 = vsel %vm15034_vm2, %v14993_v22, %v15080_v2  ;;  %v15005_v58 = vrot.slane %v14738_v62, %v22829_v11  ;;  %v15013_v19 = vrot.slane %v14739_v56, %v22829_v11  ;;  %v15086_v40 = vsel %vm15030_vm0, %v14981_v27, %v14973_v15 }
 0x64f   : > { %v15082_v43 = vsel %vm15036_vm3, %v15001_v36, %v15081_v4  ;;  %v15021_v39 = vrot.slane %v14740_v18, %v22829_v11  ;;  %v15087_v8 = vsel %vm15032_vm1, %v14989_v32, %v15086_v40  ;;  %v15029_v21 = vrot.slane %v14741_v26, %v22829_v11 }
 0x650   : > { %v15083_v44 = vsel %vm15038_vm4, %v15009_v34, %v15082_v43  ;;  %v15088_v37 = vsel %vm15034_vm2, %v14997_v16, %v15087_v8 }
 0x651   : > { %v15084_v12 = vsel %vm15040_vm5, %v15017_v52, %v15083_v44  ;;  %v15089_v9 = vsel %vm15036_vm3, %v15005_v58, %v15088_v37 }
 0x652   : > { %v15085_v49 = vsel %vm15042_vm6, %v15025_v23, %v15084_v12  ;;  %v15090_v61 = vsel %vm15038_vm4, %v15013_v19, %v15089_v9 }
 0x653   : > { %15107 = vst [vmem:[%s20657_s11 + $0x30] sm:$0xff] %v15085_v49  ;;  %v15091_v24 = vsel %vm15040_vm5, %v15021_v39, %v15090_v61 }
 0x654   : > { %v15092_v33 = vsel %vm15042_vm6, %v15029_v21, %v15091_v24 }
 0x655   : > { %15108 = vst [vmem:[%s20657_s11 + $0x38] sm:$0xff] %v15092_v33 }
 0x656 PF: > { %s17032_s18 = sshll.u32 %s20387_s19, 8  ;;  %s15123_s6 = sshll.u32 %s20657_s11, 4  ;;  %s23014_s6 = int_to_ptr.vmem [resolvable:$true] %s15123_s6 }
 0x657   : > { %s23011_s0 = scalar_lea.hbm %s23096_s2, %s17032_s18  ;;  %s23018_s25 = scalar_lea.sflag [#allocation6], %s241_s23 }
 0x658   : > { %s20249_s17 = scalar_lea.vmem %s23014_s6, 1024  ;;  %p23277_p6 = scmp.ne.s32.totalorder %s23170_s5, 0 }
 0x659   : > { %p20250_p5 = scmp.ne.s32.totalorder %s23014_s6, %s20249_s17  ;;  %s20413_s19 = smov [#allocation9]  }
 0x65a   : > { %s20253_s24 = sshll.u32 %s20413_s19, 4  ;;  %s20254_s24 = int_to_ptr.vmem [resolvable:$false] %s20253_s24 }
 0x65b   : > { %p20251_p7 = pnand %p20250_p5, %p23277_p6  ;;  %s20255_s26 = scalar_lea.vmem %s20254_s24, 2048 }
 0x65c   : > { %p20256_p11 = scmp.lt.s32.totalorder %s23014_s6, %s20254_s24  ;;  %p20257_p1 = scmp.lt.s32.totalorder %s20255_s26, %s20249_s17 }
 0x65d   : > { %p20252_p10 = pneg %p20251_p7 }
 0x65e   : > { %p20258_p4 = por %p20257_p1, %p20256_p11 }
 0x660   : > { %p20259_p3 = pnand %p20258_p4, %p20252_p10 }
 0x662   : > { %20262 = shalt.err (!%p20259_p3)
}
 0x663   : > { %s20263_s3 = scalar_lea.hbm %s23011_s0, 1024  ;;  %s20267_s15 = scalar_lea.hbm %s23096_s2, 2048 }
 0x664   : > { %p20264_p8 = scmp.ne.s32.totalorder %s23011_s0, %s20263_s3  ;;  %p20268_p13 = scmp.lt.u32.totalorder %s23011_s0, %s23096_s2 }
 0x665   : > { %p20269_p2 = scmp.lt.u32.totalorder %s20267_s15, %s20263_s3  ;;  %p20271_p5 = scmp.lt.u32.totalorder %s20263_s3, %s23011_s0 }
 0x666   : > { %p20265_p0 = pnand %p20264_p8, %p23277_p6 }
 0x667   : > { %p20270_p12 = por %p20269_p2, %p20268_p13 }
 0x668   : > { %p20266_p9 = pneg %p20265_p0 }
 0x669   : > { %p20272_p7 = por %p20271_p5, %p20270_p12 }
 0x66b   : > { %p20273_p10 = pnand %p20272_p7, %p20266_p9 }
 0x66d   : > { %20276 = shalt.err (!%p20273_p10)
}
 0x66e   : > { %s20414_s8 = smov 256   ;;  %s20415_s23 = smov 512  }
 0x66f   : > { %s20416_s12 = smov 16  }
 0x670   : > { %18168 = dma.vmem_to_hbm [thread:$0]  (%p23277_p6), %s23014_s6, 1024, %s23011_s0, %s23018_s25, %s20414_s8, %s20415_s23, %s20416_s12  }
 0x671 PF: > { %s23278_s11 = sld [smem:[#allocation23_spill]]  ;;  %p18174_p11 = scmp.ge.s32.totalorder %s20399_s22, 2 }
 0x672   : > { %s15138_s18 = sand.u32 1, %s20347_s9  }
 0x673   : > { %s15139_s4 = scalar_lea.sflag [#allocation6], %s15138_s18 }
 0x677   : > { %p23279_p1 = scmp.ne.s32.totalorder %s23278_s11, 0 }
 0x679   : > { %p18171_p4 = pnand %p18174_p11, %p23279_p1 }
 0x67b   : > { %20342 = dma.done.wait (!%p18171_p4), %s15139_s4, 1024  }
 0x67c   : > { %20344 = vsyncadd (!%p18171_p4), %s15139_s4, 4294966272  ;;  %s21_s22 = sadd.s32 1, %s20399_s22   ;;  %s23281_s5 = sld [smem:[#allocation16_spill]] }
 0x67d   : > { %p23047_p3 = scmp.ge.s32.totalorder %s21_s22, 6   ;;  %s23282_s11 = sld [smem:[#allocation22_spill]] }
 0x67e   : > { %s23283_s0 = sld [smem:[#allocation21_spill]]  ;;  %s23284_s6 = sld [smem:[#allocation17_spill]] }
 0x67f   : > { %s23285_s17 = sld [smem:[#allocation20_spill]]  ;;  %s23286_s25 = sld [smem:[#allocation18_spill]] }
 0x680   : > { %s23287_s24 = sld [smem:[#allocation19_spill]]  ;;  %s23288_s9 = smov %s20351_s10 }
 0x681   : > { %s23290_s12 = smov %s20363_s13  ;;  %s23291_s13 = smov %s20367_s14 }
 0x682   : > { %s23289_s10 = smov %s23281_s5  ;;  %s23293_s15 = smov %s20375_s16 }
 0x683   : > { %s23295_s18 = smov %s20391_s20  ;;  %s23296_s19 = smov %s20395_s21 }
 0x684   : > { %s23292_s14 = smov %s23283_s0  ;;  %s23294_s16 = smov %s23284_s6 }
 0x685   : > { %s23297_s20 = smov %s23286_s25  ;;  %20 = sbr.rel (!%p23047_p3) target bundleno = 14 (0xe), region = 101 }
 0x686   : > { %s23298_s21 = smov %s23287_s24 }
 0x68c   :  { %15144 = vsyncpa [#allocation5], 1 }
 0x68d   :  { %15146 = vsyncpa [#allocation5 + $0x1], 1 }
 0x68e   :  { %15147 = vsyncpa [#allocation8], 1 }
 0x68f   :  { %15149 = vsyncpa [#allocation8 + $0x1], 1 }
 0x690   :  { %15150 = vsyncpa [#allocation6], 1 }
 0x691   :  { %15152 = vsyncpa [#allocation6 + $0x1], 1 }

</bundles_post_ra>
